<compile_context>
chip_gen: v6e
topology: v6e:2x2x1
jax: 0.10.0
libtpu: 0.0.40
codegen_flags: <defaults>
</compile_context>

<pallas_src>
import jax
import jax.numpy as jnp
from jax.experimental import pallas as pl
from jax.experimental.pallas import tpu as pltpu

H = 20     # lstm_size == embedding_dim
L = 3      # num_layers
V = 50     # n_vocab (synthetic)
T = 8      # sequence length
B = 2      # batch
TB = T * B
VP = 128   # vocab padded to one full lane tile (one-hot width + lane-dense logits)


def lstm_lm_kernel(tok_ref, emb_ref, h0_ref, c0_ref,
                   w_ref, b_ref, w_fc_ref, b_fc_ref,
                   logits_ref, h_out_ref, c_out_ref):
    # ---- Embedding gather for ALL timesteps via one one-hot matmul ----------
    tok = tok_ref[...]                                              # (TB, 1) int32
    lane_iota = jax.lax.broadcasted_iota(jnp.int32, (TB, VP), 1)
    onehot = (lane_iota == tok).astype(jnp.float32)                 # (TB, VP)
    embed = jnp.dot(onehot, emb_ref[...],
                    preferred_element_type=jnp.float32)             # (TB, H)

    # ---- LSTM recurrence, fully unrolled (single kernel invocation) ---------
    h = [h0_ref[l] for l in range(L)]                               # each (B, H)
    c = [c0_ref[l] for l in range(L)]
    tops = []
    for t in range(T):
        x = embed[t * B:(t + 1) * B, :]                             # (B, H)
        for l in range(L):
            xh = jnp.concatenate([x, h[l]], axis=1)                 # (B, 2H)
            # One small dot per gate against pre-split (2H, H) weights:
            # avoids non-128-aligned lane slices of a fused (B, 4H) gate vector.
            pre = [jnp.dot(xh, w_ref[l, k],
                           preferred_element_type=jnp.float32) + b_ref[l, k]
                   for k in range(4)]                               # each (B, H)
            i_g = jax.nn.sigmoid(pre[0])
            f_g = jax.nn.sigmoid(pre[1])
            g_g = jnp.tanh(pre[2])
            o_g = jax.nn.sigmoid(pre[3])
            c_new = f_g * c[l] + i_g * g_g
            h_new = o_g * jnp.tanh(c_new)
            c[l] = c_new
            h[l] = h_new
            x = h_new
            # TODO(synk): nn.LSTM inter-layer dropout(p=0.2) only applies in
            # training mode; this kernel implements eval-mode semantics.
        tops.append(x)

    # ---- One batched, lane-dense vocab projection for all timesteps ---------
    h_top = jnp.concatenate(tops, axis=0)                           # (TB, H)
    logits_ref[...] = (jnp.dot(h_top, w_fc_ref[...],
                               preferred_element_type=jnp.float32)
                       + b_fc_ref[...])                             # (TB, VP)

    # ---- Final state (aliased with h0/c0 buffers) ----------------------------
    for l in range(L):
        h_out_ref[l] = h[l]
        c_out_ref[l] = c[l]


def lstm_lm_forward(x_tokens, prev_state, params):
    h0, c0 = prev_state

    # Token ids as a (T*B, 1) column (time-major flattening, matches logits slab).
    tok2d = x_tokens.reshape(TB, 1).astype(jnp.int32)

    # Embedding table padded on the vocab axis to VP rows (one-hot matmul width).
    emb_pad = jnp.zeros((VP, H), jnp.float32).at[:V, :].set(params["emb"])

    # Per-gate weights (gate order i,f,g,o) with x / h weights stacked along the
    # input axis so the kernel does concat([x, h]) @ W[l, gate] per gate.
    w_ih = jnp.transpose(params["w_ih"].reshape(L, 4, H, H), (0, 1, 3, 2))  # (L,4,H,H)
    w_hh = jnp.transpose(params["w_hh"].reshape(L, 4, H, H), (0, 1, 3, 2))  # (L,4,H,H)
    w_gate = jnp.concatenate([w_ih, w_hh], axis=2)                          # (L,4,2H,H)
    b_gate = (params["b_ih"] + params["b_hh"]).reshape(L, 4, 1, H)          # pre-added

    # FC weights padded to a lane-dense VP-wide output slab.
    w_fc_pad = jnp.zeros((H, VP), jnp.float32).at[:, :V].set(params["w_fc"].T)
    b_fc_pad = jnp.zeros((1, VP), jnp.float32).at[0, :V].set(params["b_fc"])

    vmem = pl.BlockSpec(memory_space=pltpu.MemorySpace.VMEM)   # whole-array VMEM block

    logits_slab, h_out, c_out = pl.pallas_call(
        lstm_lm_kernel,
        out_shape=(
            jax.ShapeDtypeStruct((TB, VP), jnp.float32),   # lane-dense logits slab
            jax.ShapeDtypeStruct((L, B, H), jnp.float32),  # h_out
            jax.ShapeDtypeStruct((L, B, H), jnp.float32),  # c_out
        ),
        # No grid: single invocation; every operand is a whole-array VMEM block.
        in_specs=[vmem] * 8,
        out_specs=(vmem, vmem, vmem),
        # h0 -> h_out, c0 -> c_out (input operand indices 2 and 3).
        input_output_aliases={2: 1, 3: 2},
    )(tok2d, emb_pad, h0, c0, w_gate, b_gate, w_fc_pad, b_fc_pad)

    logits = logits_slab.reshape(T, B, VP)[:, :, :V]
    return logits, (h_out, c_out)


def ref_forward(x_tokens, prev_state, params):
    """Pure-JAX reference (eval-mode PyTorch LSTM semantics)."""
    h0, c0 = prev_state
    emb = params["emb"][x_tokens]
    h = [h0[l] for l in range(L)]
    c = [c0[l] for l in range(L)]
    outs = []
    for t in range(T):
        xt = emb[t]
        for l in range(L):
            gates = (xt @ params["w_ih"][l].T + params["b_ih"][l]
                     + h[l] @ params["w_hh"][l].T + params["b_hh"][l])
            i_g = jax.nn.sigmoid(gates[:, 0 * H:1 * H])
            f_g = jax.nn.sigmoid(gates[:, 1 * H:2 * H])
            g_g = jnp.tanh(gates[:, 2 * H:3 * H])
            o_g = jax.nn.sigmoid(gates[:, 3 * H:4 * H])
            c[l] = f_g * c[l] + i_g * g_g
            h[l] = o_g * jnp.tanh(c[l])
            xt = h[l]
        outs.append(xt)
    out = jnp.stack(outs)
    logits = out @ params["w_fc"].T + params["b_fc"]
    return logits, (jnp.stack(h), jnp.stack(c))


def init_params(key):
    ks = jax.random.split(key, 7)
    scale = 1.0 / jnp.sqrt(H)
    u = lambda k, shape: jax.random.uniform(k, shape, jnp.float32, -scale, scale)
    return {
        "emb":  jax.random.normal(ks[0], (V, H), jnp.float32) * 0.1,
        "w_ih": u(ks[1], (L, 4 * H, H)),
        "w_hh": u(ks[2], (L, 4 * H, H)),
        "b_ih": u(ks[3], (L, 4 * H)),
        "b_hh": u(ks[4], (L, 4 * H)),
        "w_fc": u(ks[5], (V, H)),
        "b_fc": u(ks[6], (V,)),
    }


if __name__ == "__main__":
    key = jax.random.PRNGKey(0)
    k_p, k_x = jax.random.split(key)
    params = init_params(k_p)

    x = jax.random.randint(k_x, (T, B), 0, V, dtype=jnp.int32)
    prev_state = (jnp.zeros((L, B, H), jnp.float32),
                  jnp.zeros((L, B, H), jnp.float32))

    # Reference first (h0/c0 are aliased/donated into the kernel outputs).
    ref_logits, (ref_h, ref_c) = ref_forward(x, prev_state, params)
    jax.block_until_ready((ref_logits, ref_h, ref_c))

    logits, (h_out, c_out) = lstm_lm_forward(x, prev_state, params)
    jax.block_until_ready((logits, h_out, c_out))

    assert jnp.allclose(logits, ref_logits, rtol=1e-5, atol=5e-5)
    assert jnp.allclose(h_out, ref_h, rtol=1e-5, atol=5e-5)
    assert jnp.allclose(c_out, ref_c, rtol=1e-5, atol=5e-5)

    print("KERNEL_OK")
</pallas_src>

<mosaic_0001>
module attributes {stable_mosaic.version = 11 : i64} {
  func.func @lstm_lm_kernel(%arg0: memref<16x1xi32, #tpu.memory_space<vmem>>, %arg1: memref<128x20xf32, #tpu.memory_space<vmem>>, %arg2: memref<3x2x20xf32, #tpu.memory_space<vmem>>, %arg3: memref<3x2x20xf32, #tpu.memory_space<vmem>>, %arg4: memref<3x4x40x20xf32, #tpu.memory_space<vmem>>, %arg5: memref<3x4x1x20xf32, #tpu.memory_space<vmem>>, %arg6: memref<20x128xf32, #tpu.memory_space<vmem>>, %arg7: memref<1x128xf32, #tpu.memory_space<vmem>>, %arg8: memref<16x128xf32, #tpu.memory_space<vmem>>, %arg9: memref<3x2x20xf32, #tpu.memory_space<vmem>>, %arg10: memref<3x2x20xf32, #tpu.memory_space<vmem>>) attributes {dimension_semantics = [], scalar_prefetch = 0 : i64, scratch_operands = 0 : i64, tpu.core_type = #tpu.core_type<tc>} {
    %c0 = arith.constant 0 : index
    %c0_0 = arith.constant 0 : index
    %0 = vector.load %arg0[%c0, %c0_0] : memref<16x1xi32, #tpu.memory_space<vmem>>, vector<16x1xi32>
    %1 = tpu.iota {dimensions = array<i32: 1>} : vector<16x128xi32>
    %2 = vector.broadcast %0 : vector<16x1xi32> to vector<16x128xi32>
    %3 = arith.cmpi eq, %1, %2 : vector<16x128xi32>
    %4 = arith.extui %3 : vector<16x128xi1> to vector<16x128xi32>
    %5 = arith.sitofp %4 : vector<16x128xi32> to vector<16x128xf32>
    %c0_1 = arith.constant 0 : index
    %c0_2 = arith.constant 0 : index
    %6 = vector.load %arg1[%c0_1, %c0_2] : memref<128x20xf32, #tpu.memory_space<vmem>>, vector<128x20xf32>
    %cst = arith.constant dense<0.000000e+00> : vector<16x20xf32>
    %7 = tpu.matmul %5, %6, %cst {dimension_numbers = #tpu.dot_dimension_numbers<[1], [0], [0], [1], [0, 0, 1, 1], [], []>} : vector<16x128xf32>, vector<128x20xf32>, vector<16x20xf32> -> vector<16x20xf32>
    %c0_3 = arith.constant 0 : index
    %c0_4 = arith.constant 0 : index
    %c0_5 = arith.constant 0 : index
    %8 = vector.load %arg2[%c0_3, %c0_4, %c0_5] : memref<3x2x20xf32, #tpu.memory_space<vmem>>, vector<1x2x20xf32>
    %9 = vector.shape_cast %8 : vector<1x2x20xf32> to vector<2x20xf32>
    %c1 = arith.constant 1 : index
    %c0_6 = arith.constant 0 : index
    %c0_7 = arith.constant 0 : index
    %10 = vector.load %arg2[%c1, %c0_6, %c0_7] : memref<3x2x20xf32, #tpu.memory_space<vmem>>, vector<1x2x20xf32>
    %11 = vector.shape_cast %10 : vector<1x2x20xf32> to vector<2x20xf32>
    %c2 = arith.constant 2 : index
    %c0_8 = arith.constant 0 : index
    %c0_9 = arith.constant 0 : index
    %12 = vector.load %arg2[%c2, %c0_8, %c0_9] : memref<3x2x20xf32, #tpu.memory_space<vmem>>, vector<1x2x20xf32>
    %13 = vector.shape_cast %12 : vector<1x2x20xf32> to vector<2x20xf32>
    %c0_10 = arith.constant 0 : index
    %c0_11 = arith.constant 0 : index
    %c0_12 = arith.constant 0 : index
    %14 = vector.load %arg3[%c0_10, %c0_11, %c0_12] : memref<3x2x20xf32, #tpu.memory_space<vmem>>, vector<1x2x20xf32>
    %15 = vector.shape_cast %14 : vector<1x2x20xf32> to vector<2x20xf32>
    %c1_13 = arith.constant 1 : index
    %c0_14 = arith.constant 0 : index
    %c0_15 = arith.constant 0 : index
    %16 = vector.load %arg3[%c1_13, %c0_14, %c0_15] : memref<3x2x20xf32, #tpu.memory_space<vmem>>, vector<1x2x20xf32>
    %17 = vector.shape_cast %16 : vector<1x2x20xf32> to vector<2x20xf32>
    %c2_16 = arith.constant 2 : index
    %c0_17 = arith.constant 0 : index
    %c0_18 = arith.constant 0 : index
    %18 = vector.load %arg3[%c2_16, %c0_17, %c0_18] : memref<3x2x20xf32, #tpu.memory_space<vmem>>, vector<1x2x20xf32>
    %19 = vector.shape_cast %18 : vector<1x2x20xf32> to vector<2x20xf32>
    %20 = vector.extract_strided_slice %7 {offsets = [0, 0], sizes = [2, 20], strides = [1, 1]} : vector<16x20xf32> to vector<2x20xf32>
    %21 = tpu.concatenate %20, %9 in 1 : vector<2x20xf32>, vector<2x20xf32> -> vector<2x40xf32>
    %c0_19 = arith.constant 0 : index
    %c0_20 = arith.constant 0 : index
    %c0_21 = arith.constant 0 : index
    %c0_22 = arith.constant 0 : index
    %22 = vector.load %arg4[%c0_19, %c0_20, %c0_21, %c0_22] : memref<3x4x40x20xf32, #tpu.memory_space<vmem>>, vector<1x1x40x20xf32>
    %23 = vector.shape_cast %22 : vector<1x1x40x20xf32> to vector<40x20xf32>
    %cst_23 = arith.constant dense<0.000000e+00> : vector<2x20xf32>
    %24 = tpu.matmul %21, %23, %cst_23 {dimension_numbers = #tpu.dot_dimension_numbers<[1], [0], [0], [1], [0, 0, 1, 1], [], []>} : vector<2x40xf32>, vector<40x20xf32>, vector<2x20xf32> -> vector<2x20xf32>
    %c0_24 = arith.constant 0 : index
    %c0_25 = arith.constant 0 : index
    %c0_26 = arith.constant 0 : index
    %c0_27 = arith.constant 0 : index
    %25 = vector.load %arg5[%c0_24, %c0_25, %c0_26, %c0_27] : memref<3x4x1x20xf32, #tpu.memory_space<vmem>>, vector<1x1x1x20xf32>
    %26 = vector.shape_cast %25 : vector<1x1x1x20xf32> to vector<1x20xf32>
    %27 = vector.broadcast %26 : vector<1x20xf32> to vector<2x20xf32>
    %28 = arith.addf %24, %27 : vector<2x20xf32>
    %c0_28 = arith.constant 0 : index
    %c1_29 = arith.constant 1 : index
    %c0_30 = arith.constant 0 : index
    %c0_31 = arith.constant 0 : index
    %29 = vector.load %arg4[%c0_28, %c1_29, %c0_30, %c0_31] : memref<3x4x40x20xf32, #tpu.memory_space<vmem>>, vector<1x1x40x20xf32>
    %30 = vector.shape_cast %29 : vector<1x1x40x20xf32> to vector<40x20xf32>
    %cst_32 = arith.constant dense<0.000000e+00> : vector<2x20xf32>
    %31 = tpu.matmul %21, %30, %cst_32 {dimension_numbers = #tpu.dot_dimension_numbers<[1], [0], [0], [1], [0, 0, 1, 1], [], []>} : vector<2x40xf32>, vector<40x20xf32>, vector<2x20xf32> -> vector<2x20xf32>
    %c0_33 = arith.constant 0 : index
    %c1_34 = arith.constant 1 : index
    %c0_35 = arith.constant 0 : index
    %c0_36 = arith.constant 0 : index
    %32 = vector.load %arg5[%c0_33, %c1_34, %c0_35, %c0_36] : memref<3x4x1x20xf32, #tpu.memory_space<vmem>>, vector<1x1x1x20xf32>
    %33 = vector.shape_cast %32 : vector<1x1x1x20xf32> to vector<1x20xf32>
    %34 = vector.broadcast %33 : vector<1x20xf32> to vector<2x20xf32>
    %35 = arith.addf %31, %34 : vector<2x20xf32>
    %c0_37 = arith.constant 0 : index
    %c2_38 = arith.constant 2 : index
    %c0_39 = arith.constant 0 : index
    %c0_40 = arith.constant 0 : index
    %36 = vector.load %arg4[%c0_37, %c2_38, %c0_39, %c0_40] : memref<3x4x40x20xf32, #tpu.memory_space<vmem>>, vector<1x1x40x20xf32>
    %37 = vector.shape_cast %36 : vector<1x1x40x20xf32> to vector<40x20xf32>
    %cst_41 = arith.constant dense<0.000000e+00> : vector<2x20xf32>
    %38 = tpu.matmul %21, %37, %cst_41 {dimension_numbers = #tpu.dot_dimension_numbers<[1], [0], [0], [1], [0, 0, 1, 1], [], []>} : vector<2x40xf32>, vector<40x20xf32>, vector<2x20xf32> -> vector<2x20xf32>
    %c0_42 = arith.constant 0 : index
    %c2_43 = arith.constant 2 : index
    %c0_44 = arith.constant 0 : index
    %c0_45 = arith.constant 0 : index
    %39 = vector.load %arg5[%c0_42, %c2_43, %c0_44, %c0_45] : memref<3x4x1x20xf32, #tpu.memory_space<vmem>>, vector<1x1x1x20xf32>
    %40 = vector.shape_cast %39 : vector<1x1x1x20xf32> to vector<1x20xf32>
    %41 = vector.broadcast %40 : vector<1x20xf32> to vector<2x20xf32>
    %42 = arith.addf %38, %41 : vector<2x20xf32>
    %c0_46 = arith.constant 0 : index
    %c3 = arith.constant 3 : index
    %c0_47 = arith.constant 0 : index
    %c0_48 = arith.constant 0 : index
    %43 = vector.load %arg4[%c0_46, %c3, %c0_47, %c0_48] : memref<3x4x40x20xf32, #tpu.memory_space<vmem>>, vector<1x1x40x20xf32>
    %44 = vector.shape_cast %43 : vector<1x1x40x20xf32> to vector<40x20xf32>
    %cst_49 = arith.constant dense<0.000000e+00> : vector<2x20xf32>
    %45 = tpu.matmul %21, %44, %cst_49 {dimension_numbers = #tpu.dot_dimension_numbers<[1], [0], [0], [1], [0, 0, 1, 1], [], []>} : vector<2x40xf32>, vector<40x20xf32>, vector<2x20xf32> -> vector<2x20xf32>
    %c0_50 = arith.constant 0 : index
    %c3_51 = arith.constant 3 : index
    %c0_52 = arith.constant 0 : index
    %c0_53 = arith.constant 0 : index
    %46 = vector.load %arg5[%c0_50, %c3_51, %c0_52, %c0_53] : memref<3x4x1x20xf32, #tpu.memory_space<vmem>>, vector<1x1x1x20xf32>
    %47 = vector.shape_cast %46 : vector<1x1x1x20xf32> to vector<1x20xf32>
    %48 = vector.broadcast %47 : vector<1x20xf32> to vector<2x20xf32>
    %49 = arith.addf %45, %48 : vector<2x20xf32>
    %50 = arith.negf %28 : vector<2x20xf32>
    %51 = math.exp %50 : vector<2x20xf32>
    %cst_54 = arith.constant 1.000000e+00 : f32
    %52 = vector.broadcast %cst_54 : f32 to vector<2x20xf32>
    %53 = arith.addf %52, %51 : vector<2x20xf32>
    %54 = arith.divf %52, %53 : vector<2x20xf32>
    %55 = arith.negf %35 : vector<2x20xf32>
    %56 = math.exp %55 : vector<2x20xf32>
    %cst_55 = arith.constant 1.000000e+00 : f32
    %57 = vector.broadcast %cst_55 : f32 to vector<2x20xf32>
    %58 = arith.addf %57, %56 : vector<2x20xf32>
    %59 = arith.divf %57, %58 : vector<2x20xf32>
    %60 = math.tanh %42 : vector<2x20xf32>
    %61 = arith.negf %49 : vector<2x20xf32>
    %62 = math.exp %61 : vector<2x20xf32>
    %cst_56 = arith.constant 1.000000e+00 : f32
    %63 = vector.broadcast %cst_56 : f32 to vector<2x20xf32>
    %64 = arith.addf %63, %62 : vector<2x20xf32>
    %65 = arith.divf %63, %64 : vector<2x20xf32>
    %66 = arith.mulf %59, %15 : vector<2x20xf32>
    %67 = arith.mulf %54, %60 : vector<2x20xf32>
    %68 = arith.addf %66, %67 : vector<2x20xf32>
    %69 = math.tanh %68 : vector<2x20xf32>
    %70 = arith.mulf %65, %69 : vector<2x20xf32>
    %71 = tpu.concatenate %70, %11 in 1 : vector<2x20xf32>, vector<2x20xf32> -> vector<2x40xf32>
    %c1_57 = arith.constant 1 : index
    %c0_58 = arith.constant 0 : index
    %c0_59 = arith.constant 0 : index
    %c0_60 = arith.constant 0 : index
    %72 = vector.load %arg4[%c1_57, %c0_58, %c0_59, %c0_60] : memref<3x4x40x20xf32, #tpu.memory_space<vmem>>, vector<1x1x40x20xf32>
    %73 = vector.shape_cast %72 : vector<1x1x40x20xf32> to vector<40x20xf32>
    %cst_61 = arith.constant dense<0.000000e+00> : vector<2x20xf32>
    %74 = tpu.matmul %71, %73, %cst_61 {dimension_numbers = #tpu.dot_dimension_numbers<[1], [0], [0], [1], [0, 0, 1, 1], [], []>} : vector<2x40xf32>, vector<40x20xf32>, vector<2x20xf32> -> vector<2x20xf32>
    %c1_62 = arith.constant 1 : index
    %c0_63 = arith.constant 0 : index
    %c0_64 = arith.constant 0 : index
    %c0_65 = arith.constant 0 : index
    %75 = vector.load %arg5[%c1_62, %c0_63, %c0_64, %c0_65] : memref<3x4x1x20xf32, #tpu.memory_space<vmem>>, vector<1x1x1x20xf32>
    %76 = vector.shape_cast %75 : vector<1x1x1x20xf32> to vector<1x20xf32>
    %77 = vector.broadcast %76 : vector<1x20xf32> to vector<2x20xf32>
    %78 = arith.addf %74, %77 : vector<2x20xf32>
    %c1_66 = arith.constant 1 : index
    %c1_67 = arith.constant 1 : index
    %c0_68 = arith.constant 0 : index
    %c0_69 = arith.constant 0 : index
    %79 = vector.load %arg4[%c1_66, %c1_67, %c0_68, %c0_69] : memref<3x4x40x20xf32, #tpu.memory_space<vmem>>, vector<1x1x40x20xf32>
    %80 = vector.shape_cast %79 : vector<1x1x40x20xf32> to vector<40x20xf32>
    %cst_70 = arith.constant dense<0.000000e+00> : vector<2x20xf32>
    %81 = tpu.matmul %71, %80, %cst_70 {dimension_numbers = #tpu.dot_dimension_numbers<[1], [0], [0], [1], [0, 0, 1, 1], [], []>} : vector<2x40xf32>, vector<40x20xf32>, vector<2x20xf32> -> vector<2x20xf32>
    %c1_71 = arith.constant 1 : index
    %c1_72 = arith.constant 1 : index
    %c0_73 = arith.constant 0 : index
    %c0_74 = arith.constant 0 : index
    %82 = vector.load %arg5[%c1_71, %c1_72, %c0_73, %c0_74] : memref<3x4x1x20xf32, #tpu.memory_space<vmem>>, vector<1x1x1x20xf32>
    %83 = vector.shape_cast %82 : vector<1x1x1x20xf32> to vector<1x20xf32>
    %84 = vector.broadcast %83 : vector<1x20xf32> to vector<2x20xf32>
    %85 = arith.addf %81, %84 : vector<2x20xf32>
    %c1_75 = arith.constant 1 : index
    %c2_76 = arith.constant 2 : index
    %c0_77 = arith.constant 0 : index
    %c0_78 = arith.constant 0 : index
    %86 = vector.load %arg4[%c1_75, %c2_76, %c0_77, %c0_78] : memref<3x4x40x20xf32, #tpu.memory_space<vmem>>, vector<1x1x40x20xf32>
    %87 = vector.shape_cast %86 : vector<1x1x40x20xf32> to vector<40x20xf32>
    %cst_79 = arith.constant dense<0.000000e+00> : vector<2x20xf32>
    %88 = tpu.matmul %71, %87, %cst_79 {dimension_numbers = #tpu.dot_dimension_numbers<[1], [0], [0], [1], [0, 0, 1, 1], [], []>} : vector<2x40xf32>, vector<40x20xf32>, vector<2x20xf32> -> vector<2x20xf32>
    %c1_80 = arith.constant 1 : index
    %c2_81 = arith.constant 2 : index
    %c0_82 = arith.constant 0 : index
    %c0_83 = arith.constant 0 : index
    %89 = vector.load %arg5[%c1_80, %c2_81, %c0_82, %c0_83] : memref<3x4x1x20xf32, #tpu.memory_space<vmem>>, vector<1x1x1x20xf32>
    %90 = vector.shape_cast %89 : vector<1x1x1x20xf32> to vector<1x20xf32>
    %91 = vector.broadcast %90 : vector<1x20xf32> to vector<2x20xf32>
    %92 = arith.addf %88, %91 : vector<2x20xf32>
    %c1_84 = arith.constant 1 : index
    %c3_85 = arith.constant 3 : index
    %c0_86 = arith.constant 0 : index
    %c0_87 = arith.constant 0 : index
    %93 = vector.load %arg4[%c1_84, %c3_85, %c0_86, %c0_87] : memref<3x4x40x20xf32, #tpu.memory_space<vmem>>, vector<1x1x40x20xf32>
    %94 = vector.shape_cast %93 : vector<1x1x40x20xf32> to vector<40x20xf32>
    %cst_88 = arith.constant dense<0.000000e+00> : vector<2x20xf32>
    %95 = tpu.matmul %71, %94, %cst_88 {dimension_numbers = #tpu.dot_dimension_numbers<[1], [0], [0], [1], [0, 0, 1, 1], [], []>} : vector<2x40xf32>, vector<40x20xf32>, vector<2x20xf32> -> vector<2x20xf32>
    %c1_89 = arith.constant 1 : index
    %c3_90 = arith.constant 3 : index
    %c0_91 = arith.constant 0 : index
    %c0_92 = arith.constant 0 : index
    %96 = vector.load %arg5[%c1_89, %c3_90, %c0_91, %c0_92] : memref<3x4x1x20xf32, #tpu.memory_space<vmem>>, vector<1x1x1x20xf32>
    %97 = vector.shape_cast %96 : vector<1x1x1x20xf32> to vector<1x20xf32>
    %98 = vector.broadcast %97 : vector<1x20xf32> to vector<2x20xf32>
    %99 = arith.addf %95, %98 : vector<2x20xf32>
    %100 = arith.negf %78 : vector<2x20xf32>
    %101 = math.exp %100 : vector<2x20xf32>
    %cst_93 = arith.constant 1.000000e+00 : f32
    %102 = vector.broadcast %cst_93 : f32 to vector<2x20xf32>
    %103 = arith.addf %102, %101 : vector<2x20xf32>
    %104 = arith.divf %102, %103 : vector<2x20xf32>
    %105 = arith.negf %85 : vector<2x20xf32>
    %106 = math.exp %105 : vector<2x20xf32>
    %cst_94 = arith.constant 1.000000e+00 : f32
    %107 = vector.broadcast %cst_94 : f32 to vector<2x20xf32>
    %108 = arith.addf %107, %106 : vector<2x20xf32>
    %109 = arith.divf %107, %108 : vector<2x20xf32>
    %110 = math.tanh %92 : vector<2x20xf32>
    %111 = arith.negf %99 : vector<2x20xf32>
    %112 = math.exp %111 : vector<2x20xf32>
    %cst_95 = arith.constant 1.000000e+00 : f32
    %113 = vector.broadcast %cst_95 : f32 to vector<2x20xf32>
    %114 = arith.addf %113, %112 : vector<2x20xf32>
    %115 = arith.divf %113, %114 : vector<2x20xf32>
    %116 = arith.mulf %109, %17 : vector<2x20xf32>
    %117 = arith.mulf %104, %110 : vector<2x20xf32>
    %118 = arith.addf %116, %117 : vector<2x20xf32>
    %119 = math.tanh %118 : vector<2x20xf32>
    %120 = arith.mulf %115, %119 : vector<2x20xf32>
    %121 = tpu.concatenate %120, %13 in 1 : vector<2x20xf32>, vector<2x20xf32> -> vector<2x40xf32>
    %c2_96 = arith.constant 2 : index
    %c0_97 = arith.constant 0 : index
    %c0_98 = arith.constant 0 : index
    %c0_99 = arith.constant 0 : index
    %122 = vector.load %arg4[%c2_96, %c0_97, %c0_98, %c0_99] : memref<3x4x40x20xf32, #tpu.memory_space<vmem>>, vector<1x1x40x20xf32>
    %123 = vector.shape_cast %122 : vector<1x1x40x20xf32> to vector<40x20xf32>
    %cst_100 = arith.constant dense<0.000000e+00> : vector<2x20xf32>
    %124 = tpu.matmul %121, %123, %cst_100 {dimension_numbers = #tpu.dot_dimension_numbers<[1], [0], [0], [1], [0, 0, 1, 1], [], []>} : vector<2x40xf32>, vector<40x20xf32>, vector<2x20xf32> -> vector<2x20xf32>
    %c2_101 = arith.constant 2 : index
    %c0_102 = arith.constant 0 : index
    %c0_103 = arith.constant 0 : index
    %c0_104 = arith.constant 0 : index
    %125 = vector.load %arg5[%c2_101, %c0_102, %c0_103, %c0_104] : memref<3x4x1x20xf32, #tpu.memory_space<vmem>>, vector<1x1x1x20xf32>
    %126 = vector.shape_cast %125 : vector<1x1x1x20xf32> to vector<1x20xf32>
    %127 = vector.broadcast %126 : vector<1x20xf32> to vector<2x20xf32>
    %128 = arith.addf %124, %127 : vector<2x20xf32>
    %c2_105 = arith.constant 2 : index
    %c1_106 = arith.constant 1 : index
    %c0_107 = arith.constant 0 : index
    %c0_108 = arith.constant 0 : index
    %129 = vector.load %arg4[%c2_105, %c1_106, %c0_107, %c0_108] : memref<3x4x40x20xf32, #tpu.memory_space<vmem>>, vector<1x1x40x20xf32>
    %130 = vector.shape_cast %129 : vector<1x1x40x20xf32> to vector<40x20xf32>
    %cst_109 = arith.constant dense<0.000000e+00> : vector<2x20xf32>
    %131 = tpu.matmul %121, %130, %cst_109 {dimension_numbers = #tpu.dot_dimension_numbers<[1], [0], [0], [1], [0, 0, 1, 1], [], []>} : vector<2x40xf32>, vector<40x20xf32>, vector<2x20xf32> -> vector<2x20xf32>
    %c2_110 = arith.constant 2 : index
    %c1_111 = arith.constant 1 : index
    %c0_112 = arith.constant 0 : index
    %c0_113 = arith.constant 0 : index
    %132 = vector.load %arg5[%c2_110, %c1_111, %c0_112, %c0_113] : memref<3x4x1x20xf32, #tpu.memory_space<vmem>>, vector<1x1x1x20xf32>
    %133 = vector.shape_cast %132 : vector<1x1x1x20xf32> to vector<1x20xf32>
    %134 = vector.broadcast %133 : vector<1x20xf32> to vector<2x20xf32>
    %135 = arith.addf %131, %134 : vector<2x20xf32>
    %c2_114 = arith.constant 2 : index
    %c2_115 = arith.constant 2 : index
    %c0_116 = arith.constant 0 : index
    %c0_117 = arith.constant 0 : index
    %136 = vector.load %arg4[%c2_114, %c2_115, %c0_116, %c0_117] : memref<3x4x40x20xf32, #tpu.memory_space<vmem>>, vector<1x1x40x20xf32>
    %137 = vector.shape_cast %136 : vector<1x1x40x20xf32> to vector<40x20xf32>
    %cst_118 = arith.constant dense<0.000000e+00> : vector<2x20xf32>
    %138 = tpu.matmul %121, %137, %cst_118 {dimension_numbers = #tpu.dot_dimension_numbers<[1], [0], [0], [1], [0, 0, 1, 1], [], []>} : vector<2x40xf32>, vector<40x20xf32>, vector<2x20xf32> -> vector<2x20xf32>
    %c2_119 = arith.constant 2 : index
    %c2_120 = arith.constant 2 : index
    %c0_121 = arith.constant 0 : index
    %c0_122 = arith.constant 0 : index
    %139 = vector.load %arg5[%c2_119, %c2_120, %c0_121, %c0_122] : memref<3x4x1x20xf32, #tpu.memory_space<vmem>>, vector<1x1x1x20xf32>
    %140 = vector.shape_cast %139 : vector<1x1x1x20xf32> to vector<1x20xf32>
    %141 = vector.broadcast %140 : vector<1x20xf32> to vector<2x20xf32>
    %142 = arith.addf %138, %141 : vector<2x20xf32>
    %c2_123 = arith.constant 2 : index
    %c3_124 = arith.constant 3 : index
    %c0_125 = arith.constant 0 : index
    %c0_126 = arith.constant 0 : index
    %143 = vector.load %arg4[%c2_123, %c3_124, %c0_125, %c0_126] : memref<3x4x40x20xf32, #tpu.memory_space<vmem>>, vector<1x1x40x20xf32>
    %144 = vector.shape_cast %143 : vector<1x1x40x20xf32> to vector<40x20xf32>
    %cst_127 = arith.constant dense<0.000000e+00> : vector<2x20xf32>
    %145 = tpu.matmul %121, %144, %cst_127 {dimension_numbers = #tpu.dot_dimension_numbers<[1], [0], [0], [1], [0, 0, 1, 1], [], []>} : vector<2x40xf32>, vector<40x20xf32>, vector<2x20xf32> -> vector<2x20xf32>
    %c2_128 = arith.constant 2 : index
    %c3_129 = arith.constant 3 : index
    %c0_130 = arith.constant 0 : index
    %c0_131 = arith.constant 0 : index
    %146 = vector.load %arg5[%c2_128, %c3_129, %c0_130, %c0_131] : memref<3x4x1x20xf32, #tpu.memory_space<vmem>>, vector<1x1x1x20xf32>
    %147 = vector.shape_cast %146 : vector<1x1x1x20xf32> to vector<1x20xf32>
    %148 = vector.broadcast %147 : vector<1x20xf32> to vector<2x20xf32>
    %149 = arith.addf %145, %148 : vector<2x20xf32>
    %150 = arith.negf %128 : vector<2x20xf32>
    %151 = math.exp %150 : vector<2x20xf32>
    %cst_132 = arith.constant 1.000000e+00 : f32
    %152 = vector.broadcast %cst_132 : f32 to vector<2x20xf32>
    %153 = arith.addf %152, %151 : vector<2x20xf32>
    %154 = arith.divf %152, %153 : vector<2x20xf32>
    %155 = arith.negf %135 : vector<2x20xf32>
    %156 = math.exp %155 : vector<2x20xf32>
    %cst_133 = arith.constant 1.000000e+00 : f32
    %157 = vector.broadcast %cst_133 : f32 to vector<2x20xf32>
    %158 = arith.addf %157, %156 : vector<2x20xf32>
    %159 = arith.divf %157, %158 : vector<2x20xf32>
    %160 = math.tanh %142 : vector<2x20xf32>
    %161 = arith.negf %149 : vector<2x20xf32>
    %162 = math.exp %161 : vector<2x20xf32>
    %cst_134 = arith.constant 1.000000e+00 : f32
    %163 = vector.broadcast %cst_134 : f32 to vector<2x20xf32>
    %164 = arith.addf %163, %162 : vector<2x20xf32>
    %165 = arith.divf %163, %164 : vector<2x20xf32>
    %166 = arith.mulf %159, %19 : vector<2x20xf32>
    %167 = arith.mulf %154, %160 : vector<2x20xf32>
    %168 = arith.addf %166, %167 : vector<2x20xf32>
    %169 = math.tanh %168 : vector<2x20xf32>
    %170 = arith.mulf %165, %169 : vector<2x20xf32>
    %171 = vector.extract_strided_slice %7 {offsets = [2, 0], sizes = [2, 20], strides = [1, 1]} : vector<16x20xf32> to vector<2x20xf32>
    %172 = tpu.concatenate %171, %70 in 1 : vector<2x20xf32>, vector<2x20xf32> -> vector<2x40xf32>
    %c0_135 = arith.constant 0 : index
    %c0_136 = arith.constant 0 : index
    %c0_137 = arith.constant 0 : index
    %c0_138 = arith.constant 0 : index
    %173 = vector.load %arg4[%c0_135, %c0_136, %c0_137, %c0_138] : memref<3x4x40x20xf32, #tpu.memory_space<vmem>>, vector<1x1x40x20xf32>
    %174 = vector.shape_cast %173 : vector<1x1x40x20xf32> to vector<40x20xf32>
    %cst_139 = arith.constant dense<0.000000e+00> : vector<2x20xf32>
    %175 = tpu.matmul %172, %174, %cst_139 {dimension_numbers = #tpu.dot_dimension_numbers<[1], [0], [0], [1], [0, 0, 1, 1], [], []>} : vector<2x40xf32>, vector<40x20xf32>, vector<2x20xf32> -> vector<2x20xf32>
    %c0_140 = arith.constant 0 : index
    %c0_141 = arith.constant 0 : index
    %c0_142 = arith.constant 0 : index
    %c0_143 = arith.constant 0 : index
    %176 = vector.load %arg5[%c0_140, %c0_141, %c0_142, %c0_143] : memref<3x4x1x20xf32, #tpu.memory_space<vmem>>, vector<1x1x1x20xf32>
    %177 = vector.shape_cast %176 : vector<1x1x1x20xf32> to vector<1x20xf32>
    %178 = vector.broadcast %177 : vector<1x20xf32> to vector<2x20xf32>
    %179 = arith.addf %175, %178 : vector<2x20xf32>
    %c0_144 = arith.constant 0 : index
    %c1_145 = arith.constant 1 : index
    %c0_146 = arith.constant 0 : index
    %c0_147 = arith.constant 0 : index
    %180 = vector.load %arg4[%c0_144, %c1_145, %c0_146, %c0_147] : memref<3x4x40x20xf32, #tpu.memory_space<vmem>>, vector<1x1x40x20xf32>
    %181 = vector.shape_cast %180 : vector<1x1x40x20xf32> to vector<40x20xf32>
    %cst_148 = arith.constant dense<0.000000e+00> : vector<2x20xf32>
    %182 = tpu.matmul %172, %181, %cst_148 {dimension_numbers = #tpu.dot_dimension_numbers<[1], [0], [0], [1], [0, 0, 1, 1], [], []>} : vector<2x40xf32>, vector<40x20xf32>, vector<2x20xf32> -> vector<2x20xf32>
    %c0_149 = arith.constant 0 : index
    %c1_150 = arith.constant 1 : index
    %c0_151 = arith.constant 0 : index
    %c0_152 = arith.constant 0 : index
    %183 = vector.load %arg5[%c0_149, %c1_150, %c0_151, %c0_152] : memref<3x4x1x20xf32, #tpu.memory_space<vmem>>, vector<1x1x1x20xf32>
    %184 = vector.shape_cast %183 : vector<1x1x1x20xf32> to vector<1x20xf32>
    %185 = vector.broadcast %184 : vector<1x20xf32> to vector<2x20xf32>
    %186 = arith.addf %182, %185 : vector<2x20xf32>
    %c0_153 = arith.constant 0 : index
    %c2_154 = arith.constant 2 : index
    %c0_155 = arith.constant 0 : index
    %c0_156 = arith.constant 0 : index
    %187 = vector.load %arg4[%c0_153, %c2_154, %c0_155, %c0_156] : memref<3x4x40x20xf32, #tpu.memory_space<vmem>>, vector<1x1x40x20xf32>
    %188 = vector.shape_cast %187 : vector<1x1x40x20xf32> to vector<40x20xf32>
    %cst_157 = arith.constant dense<0.000000e+00> : vector<2x20xf32>
    %189 = tpu.matmul %172, %188, %cst_157 {dimension_numbers = #tpu.dot_dimension_numbers<[1], [0], [0], [1], [0, 0, 1, 1], [], []>} : vector<2x40xf32>, vector<40x20xf32>, vector<2x20xf32> -> vector<2x20xf32>
    %c0_158 = arith.constant 0 : index
    %c2_159 = arith.constant 2 : index
    %c0_160 = arith.constant 0 : index
    %c0_161 = arith.constant 0 : index
    %190 = vector.load %arg5[%c0_158, %c2_159, %c0_160, %c0_161] : memref<3x4x1x20xf32, #tpu.memory_space<vmem>>, vector<1x1x1x20xf32>
    %191 = vector.shape_cast %190 : vector<1x1x1x20xf32> to vector<1x20xf32>
    %192 = vector.broadcast %191 : vector<1x20xf32> to vector<2x20xf32>
    %193 = arith.addf %189, %192 : vector<2x20xf32>
    %c0_162 = arith.constant 0 : index
    %c3_163 = arith.constant 3 : index
    %c0_164 = arith.constant 0 : index
    %c0_165 = arith.constant 0 : index
    %194 = vector.load %arg4[%c0_162, %c3_163, %c0_164, %c0_165] : memref<3x4x40x20xf32, #tpu.memory_space<vmem>>, vector<1x1x40x20xf32>
    %195 = vector.shape_cast %194 : vector<1x1x40x20xf32> to vector<40x20xf32>
    %cst_166 = arith.constant dense<0.000000e+00> : vector<2x20xf32>
    %196 = tpu.matmul %172, %195, %cst_166 {dimension_numbers = #tpu.dot_dimension_numbers<[1], [0], [0], [1], [0, 0, 1, 1], [], []>} : vector<2x40xf32>, vector<40x20xf32>, vector<2x20xf32> -> vector<2x20xf32>
    %c0_167 = arith.constant 0 : index
    %c3_168 = arith.constant 3 : index
    %c0_169 = arith.constant 0 : index
    %c0_170 = arith.constant 0 : index
    %197 = vector.load %arg5[%c0_167, %c3_168, %c0_169, %c0_170] : memref<3x4x1x20xf32, #tpu.memory_space<vmem>>, vector<1x1x1x20xf32>
    %198 = vector.shape_cast %197 : vector<1x1x1x20xf32> to vector<1x20xf32>
    %199 = vector.broadcast %198 : vector<1x20xf32> to vector<2x20xf32>
    %200 = arith.addf %196, %199 : vector<2x20xf32>
    %201 = arith.negf %179 : vector<2x20xf32>
    %202 = math.exp %201 : vector<2x20xf32>
    %cst_171 = arith.constant 1.000000e+00 : f32
    %203 = vector.broadcast %cst_171 : f32 to vector<2x20xf32>
    %204 = arith.addf %203, %202 : vector<2x20xf32>
    %205 = arith.divf %203, %204 : vector<2x20xf32>
    %206 = arith.negf %186 : vector<2x20xf32>
    %207 = math.exp %206 : vector<2x20xf32>
    %cst_172 = arith.constant 1.000000e+00 : f32
    %208 = vector.broadcast %cst_172 : f32 to vector<2x20xf32>
    %209 = arith.addf %208, %207 : vector<2x20xf32>
    %210 = arith.divf %208, %209 : vector<2x20xf32>
    %211 = math.tanh %193 : vector<2x20xf32>
    %212 = arith.negf %200 : vector<2x20xf32>
    %213 = math.exp %212 : vector<2x20xf32>
    %cst_173 = arith.constant 1.000000e+00 : f32
    %214 = vector.broadcast %cst_173 : f32 to vector<2x20xf32>
    %215 = arith.addf %214, %213 : vector<2x20xf32>
    %216 = arith.divf %214, %215 : vector<2x20xf32>
    %217 = arith.mulf %210, %68 : vector<2x20xf32>
    %218 = arith.mulf %205, %211 : vector<2x20xf32>
    %219 = arith.addf %217, %218 : vector<2x20xf32>
    %220 = math.tanh %219 : vector<2x20xf32>
    %221 = arith.mulf %216, %220 : vector<2x20xf32>
    %222 = tpu.concatenate %221, %120 in 1 : vector<2x20xf32>, vector<2x20xf32> -> vector<2x40xf32>
    %c1_174 = arith.constant 1 : index
    %c0_175 = arith.constant 0 : index
    %c0_176 = arith.constant 0 : index
    %c0_177 = arith.constant 0 : index
    %223 = vector.load %arg4[%c1_174, %c0_175, %c0_176, %c0_177] : memref<3x4x40x20xf32, #tpu.memory_space<vmem>>, vector<1x1x40x20xf32>
    %224 = vector.shape_cast %223 : vector<1x1x40x20xf32> to vector<40x20xf32>
    %cst_178 = arith.constant dense<0.000000e+00> : vector<2x20xf32>
    %225 = tpu.matmul %222, %224, %cst_178 {dimension_numbers = #tpu.dot_dimension_numbers<[1], [0], [0], [1], [0, 0, 1, 1], [], []>} : vector<2x40xf32>, vector<40x20xf32>, vector<2x20xf32> -> vector<2x20xf32>
    %c1_179 = arith.constant 1 : index
    %c0_180 = arith.constant 0 : index
    %c0_181 = arith.constant 0 : index
    %c0_182 = arith.constant 0 : index
    %226 = vector.load %arg5[%c1_179, %c0_180, %c0_181, %c0_182] : memref<3x4x1x20xf32, #tpu.memory_space<vmem>>, vector<1x1x1x20xf32>
    %227 = vector.shape_cast %226 : vector<1x1x1x20xf32> to vector<1x20xf32>
    %228 = vector.broadcast %227 : vector<1x20xf32> to vector<2x20xf32>
    %229 = arith.addf %225, %228 : vector<2x20xf32>
    %c1_183 = arith.constant 1 : index
    %c1_184 = arith.constant 1 : index
    %c0_185 = arith.constant 0 : index
    %c0_186 = arith.constant 0 : index
    %230 = vector.load %arg4[%c1_183, %c1_184, %c0_185, %c0_186] : memref<3x4x40x20xf32, #tpu.memory_space<vmem>>, vector<1x1x40x20xf32>
    %231 = vector.shape_cast %230 : vector<1x1x40x20xf32> to vector<40x20xf32>
    %cst_187 = arith.constant dense<0.000000e+00> : vector<2x20xf32>
    %232 = tpu.matmul %222, %231, %cst_187 {dimension_numbers = #tpu.dot_dimension_numbers<[1], [0], [0], [1], [0, 0, 1, 1], [], []>} : vector<2x40xf32>, vector<40x20xf32>, vector<2x20xf32> -> vector<2x20xf32>
    %c1_188 = arith.constant 1 : index
    %c1_189 = arith.constant 1 : index
    %c0_190 = arith.constant 0 : index
    %c0_191 = arith.constant 0 : index
    %233 = vector.load %arg5[%c1_188, %c1_189, %c0_190, %c0_191] : memref<3x4x1x20xf32, #tpu.memory_space<vmem>>, vector<1x1x1x20xf32>
    %234 = vector.shape_cast %233 : vector<1x1x1x20xf32> to vector<1x20xf32>
    %235 = vector.broadcast %234 : vector<1x20xf32> to vector<2x20xf32>
    %236 = arith.addf %232, %235 : vector<2x20xf32>
    %c1_192 = arith.constant 1 : index
    %c2_193 = arith.constant 2 : index
    %c0_194 = arith.constant 0 : index
    %c0_195 = arith.constant 0 : index
    %237 = vector.load %arg4[%c1_192, %c2_193, %c0_194, %c0_195] : memref<3x4x40x20xf32, #tpu.memory_space<vmem>>, vector<1x1x40x20xf32>
    %238 = vector.shape_cast %237 : vector<1x1x40x20xf32> to vector<40x20xf32>
    %cst_196 = arith.constant dense<0.000000e+00> : vector<2x20xf32>
    %239 = tpu.matmul %222, %238, %cst_196 {dimension_numbers = #tpu.dot_dimension_numbers<[1], [0], [0], [1], [0, 0, 1, 1], [], []>} : vector<2x40xf32>, vector<40x20xf32>, vector<2x20xf32> -> vector<2x20xf32>
    %c1_197 = arith.constant 1 : index
    %c2_198 = arith.constant 2 : index
    %c0_199 = arith.constant 0 : index
    %c0_200 = arith.constant 0 : index
    %240 = vector.load %arg5[%c1_197, %c2_198, %c0_199, %c0_200] : memref<3x4x1x20xf32, #tpu.memory_space<vmem>>, vector<1x1x1x20xf32>
    %241 = vector.shape_cast %240 : vector<1x1x1x20xf32> to vector<1x20xf32>
    %242 = vector.broadcast %241 : vector<1x20xf32> to vector<2x20xf32>
    %243 = arith.addf %239, %242 : vector<2x20xf32>
    %c1_201 = arith.constant 1 : index
    %c3_202 = arith.constant 3 : index
    %c0_203 = arith.constant 0 : index
    %c0_204 = arith.constant 0 : index
    %244 = vector.load %arg4[%c1_201, %c3_202, %c0_203, %c0_204] : memref<3x4x40x20xf32, #tpu.memory_space<vmem>>, vector<1x1x40x20xf32>
    %245 = vector.shape_cast %244 : vector<1x1x40x20xf32> to vector<40x20xf32>
    %cst_205 = arith.constant dense<0.000000e+00> : vector<2x20xf32>
    %246 = tpu.matmul %222, %245, %cst_205 {dimension_numbers = #tpu.dot_dimension_numbers<[1], [0], [0], [1], [0, 0, 1, 1], [], []>} : vector<2x40xf32>, vector<40x20xf32>, vector<2x20xf32> -> vector<2x20xf32>
    %c1_206 = arith.constant 1 : index
    %c3_207 = arith.constant 3 : index
    %c0_208 = arith.constant 0 : index
    %c0_209 = arith.constant 0 : index
    %247 = vector.load %arg5[%c1_206, %c3_207, %c0_208, %c0_209] : memref<3x4x1x20xf32, #tpu.memory_space<vmem>>, vector<1x1x1x20xf32>
    %248 = vector.shape_cast %247 : vector<1x1x1x20xf32> to vector<1x20xf32>
    %249 = vector.broadcast %248 : vector<1x20xf32> to vector<2x20xf32>
    %250 = arith.addf %246, %249 : vector<2x20xf32>
    %251 = arith.negf %229 : vector<2x20xf32>
    %252 = math.exp %251 : vector<2x20xf32>
    %cst_210 = arith.constant 1.000000e+00 : f32
    %253 = vector.broadcast %cst_210 : f32 to vector<2x20xf32>
    %254 = arith.addf %253, %252 : vector<2x20xf32>
    %255 = arith.divf %253, %254 : vector<2x20xf32>
    %256 = arith.negf %236 : vector<2x20xf32>
    %257 = math.exp %256 : vector<2x20xf32>
    %cst_211 = arith.constant 1.000000e+00 : f32
    %258 = vector.broadcast %cst_211 : f32 to vector<2x20xf32>
    %259 = arith.addf %258, %257 : vector<2x20xf32>
    %260 = arith.divf %258, %259 : vector<2x20xf32>
    %261 = math.tanh %243 : vector<2x20xf32>
    %262 = arith.negf %250 : vector<2x20xf32>
    %263 = math.exp %262 : vector<2x20xf32>
    %cst_212 = arith.constant 1.000000e+00 : f32
    %264 = vector.broadcast %cst_212 : f32 to vector<2x20xf32>
    %265 = arith.addf %264, %263 : vector<2x20xf32>
    %266 = arith.divf %264, %265 : vector<2x20xf32>
    %267 = arith.mulf %260, %118 : vector<2x20xf32>
    %268 = arith.mulf %255, %261 : vector<2x20xf32>
    %269 = arith.addf %267, %268 : vector<2x20xf32>
    %270 = math.tanh %269 : vector<2x20xf32>
    %271 = arith.mulf %266, %270 : vector<2x20xf32>
    %272 = tpu.concatenate %271, %170 in 1 : vector<2x20xf32>, vector<2x20xf32> -> vector<2x40xf32>
    %c2_213 = arith.constant 2 : index
    %c0_214 = arith.constant 0 : index
    %c0_215 = arith.constant 0 : index
    %c0_216 = arith.constant 0 : index
    %273 = vector.load %arg4[%c2_213, %c0_214, %c0_215, %c0_216] : memref<3x4x40x20xf32, #tpu.memory_space<vmem>>, vector<1x1x40x20xf32>
    %274 = vector.shape_cast %273 : vector<1x1x40x20xf32> to vector<40x20xf32>
    %cst_217 = arith.constant dense<0.000000e+00> : vector<2x20xf32>
    %275 = tpu.matmul %272, %274, %cst_217 {dimension_numbers = #tpu.dot_dimension_numbers<[1], [0], [0], [1], [0, 0, 1, 1], [], []>} : vector<2x40xf32>, vector<40x20xf32>, vector<2x20xf32> -> vector<2x20xf32>
    %c2_218 = arith.constant 2 : index
    %c0_219 = arith.constant 0 : index
    %c0_220 = arith.constant 0 : index
    %c0_221 = arith.constant 0 : index
    %276 = vector.load %arg5[%c2_218, %c0_219, %c0_220, %c0_221] : memref<3x4x1x20xf32, #tpu.memory_space<vmem>>, vector<1x1x1x20xf32>
    %277 = vector.shape_cast %276 : vector<1x1x1x20xf32> to vector<1x20xf32>
    %278 = vector.broadcast %277 : vector<1x20xf32> to vector<2x20xf32>
    %279 = arith.addf %275, %278 : vector<2x20xf32>
    %c2_222 = arith.constant 2 : index
    %c1_223 = arith.constant 1 : index
    %c0_224 = arith.constant 0 : index
    %c0_225 = arith.constant 0 : index
    %280 = vector.load %arg4[%c2_222, %c1_223, %c0_224, %c0_225] : memref<3x4x40x20xf32, #tpu.memory_space<vmem>>, vector<1x1x40x20xf32>
    %281 = vector.shape_cast %280 : vector<1x1x40x20xf32> to vector<40x20xf32>
    %cst_226 = arith.constant dense<0.000000e+00> : vector<2x20xf32>
    %282 = tpu.matmul %272, %281, %cst_226 {dimension_numbers = #tpu.dot_dimension_numbers<[1], [0], [0], [1], [0, 0, 1, 1], [], []>} : vector<2x40xf32>, vector<40x20xf32>, vector<2x20xf32> -> vector<2x20xf32>
    %c2_227 = arith.constant 2 : index
    %c1_228 = arith.constant 1 : index
    %c0_229 = arith.constant 0 : index
    %c0_230 = arith.constant 0 : index
    %283 = vector.load %arg5[%c2_227, %c1_228, %c0_229, %c0_230] : memref<3x4x1x20xf32, #tpu.memory_space<vmem>>, vector<1x1x1x20xf32>
    %284 = vector.shape_cast %283 : vector<1x1x1x20xf32> to vector<1x20xf32>
    %285 = vector.broadcast %284 : vector<1x20xf32> to vector<2x20xf32>
    %286 = arith.addf %282, %285 : vector<2x20xf32>
    %c2_231 = arith.constant 2 : index
    %c2_232 = arith.constant 2 : index
    %c0_233 = arith.constant 0 : index
    %c0_234 = arith.constant 0 : index
    %287 = vector.load %arg4[%c2_231, %c2_232, %c0_233, %c0_234] : memref<3x4x40x20xf32, #tpu.memory_space<vmem>>, vector<1x1x40x20xf32>
    %288 = vector.shape_cast %287 : vector<1x1x40x20xf32> to vector<40x20xf32>
    %cst_235 = arith.constant dense<0.000000e+00> : vector<2x20xf32>
    %289 = tpu.matmul %272, %288, %cst_235 {dimension_numbers = #tpu.dot_dimension_numbers<[1], [0], [0], [1], [0, 0, 1, 1], [], []>} : vector<2x40xf32>, vector<40x20xf32>, vector<2x20xf32> -> vector<2x20xf32>
    %c2_236 = arith.constant 2 : index
    %c2_237 = arith.constant 2 : index
    %c0_238 = arith.constant 0 : index
    %c0_239 = arith.constant 0 : index
    %290 = vector.load %arg5[%c2_236, %c2_237, %c0_238, %c0_239] : memref<3x4x1x20xf32, #tpu.memory_space<vmem>>, vector<1x1x1x20xf32>
    %291 = vector.shape_cast %290 : vector<1x1x1x20xf32> to vector<1x20xf32>
    %292 = vector.broadcast %291 : vector<1x20xf32> to vector<2x20xf32>
    %293 = arith.addf %289, %292 : vector<2x20xf32>
    %c2_240 = arith.constant 2 : index
    %c3_241 = arith.constant 3 : index
    %c0_242 = arith.constant 0 : index
    %c0_243 = arith.constant 0 : index
    %294 = vector.load %arg4[%c2_240, %c3_241, %c0_242, %c0_243] : memref<3x4x40x20xf32, #tpu.memory_space<vmem>>, vector<1x1x40x20xf32>
    %295 = vector.shape_cast %294 : vector<1x1x40x20xf32> to vector<40x20xf32>
    %cst_244 = arith.constant dense<0.000000e+00> : vector<2x20xf32>
    %296 = tpu.matmul %272, %295, %cst_244 {dimension_numbers = #tpu.dot_dimension_numbers<[1], [0], [0], [1], [0, 0, 1, 1], [], []>} : vector<2x40xf32>, vector<40x20xf32>, vector<2x20xf32> -> vector<2x20xf32>
    %c2_245 = arith.constant 2 : index
    %c3_246 = arith.constant 3 : index
    %c0_247 = arith.constant 0 : index
    %c0_248 = arith.constant 0 : index
    %297 = vector.load %arg5[%c2_245, %c3_246, %c0_247, %c0_248] : memref<3x4x1x20xf32, #tpu.memory_space<vmem>>, vector<1x1x1x20xf32>
    %298 = vector.shape_cast %297 : vector<1x1x1x20xf32> to vector<1x20xf32>
    %299 = vector.broadcast %298 : vector<1x20xf32> to vector<2x20xf32>
    %300 = arith.addf %296, %299 : vector<2x20xf32>
    %301 = arith.negf %279 : vector<2x20xf32>
    %302 = math.exp %301 : vector<2x20xf32>
    %cst_249 = arith.constant 1.000000e+00 : f32
    %303 = vector.broadcast %cst_249 : f32 to vector<2x20xf32>
    %304 = arith.addf %303, %302 : vector<2x20xf32>
    %305 = arith.divf %303, %304 : vector<2x20xf32>
    %306 = arith.negf %286 : vector<2x20xf32>
    %307 = math.exp %306 : vector<2x20xf32>
    %cst_250 = arith.constant 1.000000e+00 : f32
    %308 = vector.broadcast %cst_250 : f32 to vector<2x20xf32>
    %309 = arith.addf %308, %307 : vector<2x20xf32>
    %310 = arith.divf %308, %309 : vector<2x20xf32>
    %311 = math.tanh %293 : vector<2x20xf32>
    %312 = arith.negf %300 : vector<2x20xf32>
    %313 = math.exp %312 : vector<2x20xf32>
    %cst_251 = arith.constant 1.000000e+00 : f32
    %314 = vector.broadcast %cst_251 : f32 to vector<2x20xf32>
    %315 = arith.addf %314, %313 : vector<2x20xf32>
    %316 = arith.divf %314, %315 : vector<2x20xf32>
    %317 = arith.mulf %310, %168 : vector<2x20xf32>
    %318 = arith.mulf %305, %311 : vector<2x20xf32>
    %319 = arith.addf %317, %318 : vector<2x20xf32>
    %320 = math.tanh %319 : vector<2x20xf32>
    %321 = arith.mulf %316, %320 : vector<2x20xf32>
    %322 = vector.extract_strided_slice %7 {offsets = [4, 0], sizes = [2, 20], strides = [1, 1]} : vector<16x20xf32> to vector<2x20xf32>
    %323 = tpu.concatenate %322, %221 in 1 : vector<2x20xf32>, vector<2x20xf32> -> vector<2x40xf32>
    %c0_252 = arith.constant 0 : index
    %c0_253 = arith.constant 0 : index
    %c0_254 = arith.constant 0 : index
    %c0_255 = arith.constant 0 : index
    %324 = vector.load %arg4[%c0_252, %c0_253, %c0_254, %c0_255] : memref<3x4x40x20xf32, #tpu.memory_space<vmem>>, vector<1x1x40x20xf32>
    %325 = vector.shape_cast %324 : vector<1x1x40x20xf32> to vector<40x20xf32>
    %cst_256 = arith.constant dense<0.000000e+00> : vector<2x20xf32>
    %326 = tpu.matmul %323, %325, %cst_256 {dimension_numbers = #tpu.dot_dimension_numbers<[1], [0], [0], [1], [0, 0, 1, 1], [], []>} : vector<2x40xf32>, vector<40x20xf32>, vector<2x20xf32> -> vector<2x20xf32>
    %c0_257 = arith.constant 0 : index
    %c0_258 = arith.constant 0 : index
    %c0_259 = arith.constant 0 : index
    %c0_260 = arith.constant 0 : index
    %327 = vector.load %arg5[%c0_257, %c0_258, %c0_259, %c0_260] : memref<3x4x1x20xf32, #tpu.memory_space<vmem>>, vector<1x1x1x20xf32>
    %328 = vector.shape_cast %327 : vector<1x1x1x20xf32> to vector<1x20xf32>
    %329 = vector.broadcast %328 : vector<1x20xf32> to vector<2x20xf32>
    %330 = arith.addf %326, %329 : vector<2x20xf32>
    %c0_261 = arith.constant 0 : index
    %c1_262 = arith.constant 1 : index
    %c0_263 = arith.constant 0 : index
    %c0_264 = arith.constant 0 : index
    %331 = vector.load %arg4[%c0_261, %c1_262, %c0_263, %c0_264] : memref<3x4x40x20xf32, #tpu.memory_space<vmem>>, vector<1x1x40x20xf32>
    %332 = vector.shape_cast %331 : vector<1x1x40x20xf32> to vector<40x20xf32>
    %cst_265 = arith.constant dense<0.000000e+00> : vector<2x20xf32>
    %333 = tpu.matmul %323, %332, %cst_265 {dimension_numbers = #tpu.dot_dimension_numbers<[1], [0], [0], [1], [0, 0, 1, 1], [], []>} : vector<2x40xf32>, vector<40x20xf32>, vector<2x20xf32> -> vector<2x20xf32>
    %c0_266 = arith.constant 0 : index
    %c1_267 = arith.constant 1 : index
    %c0_268 = arith.constant 0 : index
    %c0_269 = arith.constant 0 : index
    %334 = vector.load %arg5[%c0_266, %c1_267, %c0_268, %c0_269] : memref<3x4x1x20xf32, #tpu.memory_space<vmem>>, vector<1x1x1x20xf32>
    %335 = vector.shape_cast %334 : vector<1x1x1x20xf32> to vector<1x20xf32>
    %336 = vector.broadcast %335 : vector<1x20xf32> to vector<2x20xf32>
    %337 = arith.addf %333, %336 : vector<2x20xf32>
    %c0_270 = arith.constant 0 : index
    %c2_271 = arith.constant 2 : index
    %c0_272 = arith.constant 0 : index
    %c0_273 = arith.constant 0 : index
    %338 = vector.load %arg4[%c0_270, %c2_271, %c0_272, %c0_273] : memref<3x4x40x20xf32, #tpu.memory_space<vmem>>, vector<1x1x40x20xf32>
    %339 = vector.shape_cast %338 : vector<1x1x40x20xf32> to vector<40x20xf32>
    %cst_274 = arith.constant dense<0.000000e+00> : vector<2x20xf32>
    %340 = tpu.matmul %323, %339, %cst_274 {dimension_numbers = #tpu.dot_dimension_numbers<[1], [0], [0], [1], [0, 0, 1, 1], [], []>} : vector<2x40xf32>, vector<40x20xf32>, vector<2x20xf32> -> vector<2x20xf32>
    %c0_275 = arith.constant 0 : index
    %c2_276 = arith.constant 2 : index
    %c0_277 = arith.constant 0 : index
    %c0_278 = arith.constant 0 : index
    %341 = vector.load %arg5[%c0_275, %c2_276, %c0_277, %c0_278] : memref<3x4x1x20xf32, #tpu.memory_space<vmem>>, vector<1x1x1x20xf32>
    %342 = vector.shape_cast %341 : vector<1x1x1x20xf32> to vector<1x20xf32>
    %343 = vector.broadcast %342 : vector<1x20xf32> to vector<2x20xf32>
    %344 = arith.addf %340, %343 : vector<2x20xf32>
    %c0_279 = arith.constant 0 : index
    %c3_280 = arith.constant 3 : index
    %c0_281 = arith.constant 0 : index
    %c0_282 = arith.constant 0 : index
    %345 = vector.load %arg4[%c0_279, %c3_280, %c0_281, %c0_282] : memref<3x4x40x20xf32, #tpu.memory_space<vmem>>, vector<1x1x40x20xf32>
    %346 = vector.shape_cast %345 : vector<1x1x40x20xf32> to vector<40x20xf32>
    %cst_283 = arith.constant dense<0.000000e+00> : vector<2x20xf32>
    %347 = tpu.matmul %323, %346, %cst_283 {dimension_numbers = #tpu.dot_dimension_numbers<[1], [0], [0], [1], [0, 0, 1, 1], [], []>} : vector<2x40xf32>, vector<40x20xf32>, vector<2x20xf32> -> vector<2x20xf32>
    %c0_284 = arith.constant 0 : index
    %c3_285 = arith.constant 3 : index
    %c0_286 = arith.constant 0 : index
    %c0_287 = arith.constant 0 : index
    %348 = vector.load %arg5[%c0_284, %c3_285, %c0_286, %c0_287] : memref<3x4x1x20xf32, #tpu.memory_space<vmem>>, vector<1x1x1x20xf32>
    %349 = vector.shape_cast %348 : vector<1x1x1x20xf32> to vector<1x20xf32>
    %350 = vector.broadcast %349 : vector<1x20xf32> to vector<2x20xf32>
    %351 = arith.addf %347, %350 : vector<2x20xf32>
    %352 = arith.negf %330 : vector<2x20xf32>
    %353 = math.exp %352 : vector<2x20xf32>
    %cst_288 = arith.constant 1.000000e+00 : f32
    %354 = vector.broadcast %cst_288 : f32 to vector<2x20xf32>
    %355 = arith.addf %354, %353 : vector<2x20xf32>
    %356 = arith.divf %354, %355 : vector<2x20xf32>
    %357 = arith.negf %337 : vector<2x20xf32>
    %358 = math.exp %357 : vector<2x20xf32>
    %cst_289 = arith.constant 1.000000e+00 : f32
    %359 = vector.broadcast %cst_289 : f32 to vector<2x20xf32>
    %360 = arith.addf %359, %358 : vector<2x20xf32>
    %361 = arith.divf %359, %360 : vector<2x20xf32>
    %362 = math.tanh %344 : vector<2x20xf32>
    %363 = arith.negf %351 : vector<2x20xf32>
    %364 = math.exp %363 : vector<2x20xf32>
    %cst_290 = arith.constant 1.000000e+00 : f32
    %365 = vector.broadcast %cst_290 : f32 to vector<2x20xf32>
    %366 = arith.addf %365, %364 : vector<2x20xf32>
    %367 = arith.divf %365, %366 : vector<2x20xf32>
    %368 = arith.mulf %361, %219 : vector<2x20xf32>
    %369 = arith.mulf %356, %362 : vector<2x20xf32>
    %370 = arith.addf %368, %369 : vector<2x20xf32>
    %371 = math.tanh %370 : vector<2x20xf32>
    %372 = arith.mulf %367, %371 : vector<2x20xf32>
    %373 = tpu.concatenate %372, %271 in 1 : vector<2x20xf32>, vector<2x20xf32> -> vector<2x40xf32>
    %c1_291 = arith.constant 1 : index
    %c0_292 = arith.constant 0 : index
    %c0_293 = arith.constant 0 : index
    %c0_294 = arith.constant 0 : index
    %374 = vector.load %arg4[%c1_291, %c0_292, %c0_293, %c0_294] : memref<3x4x40x20xf32, #tpu.memory_space<vmem>>, vector<1x1x40x20xf32>
    %375 = vector.shape_cast %374 : vector<1x1x40x20xf32> to vector<40x20xf32>
    %cst_295 = arith.constant dense<0.000000e+00> : vector<2x20xf32>
    %376 = tpu.matmul %373, %375, %cst_295 {dimension_numbers = #tpu.dot_dimension_numbers<[1], [0], [0], [1], [0, 0, 1, 1], [], []>} : vector<2x40xf32>, vector<40x20xf32>, vector<2x20xf32> -> vector<2x20xf32>
    %c1_296 = arith.constant 1 : index
    %c0_297 = arith.constant 0 : index
    %c0_298 = arith.constant 0 : index
    %c0_299 = arith.constant 0 : index
    %377 = vector.load %arg5[%c1_296, %c0_297, %c0_298, %c0_299] : memref<3x4x1x20xf32, #tpu.memory_space<vmem>>, vector<1x1x1x20xf32>
    %378 = vector.shape_cast %377 : vector<1x1x1x20xf32> to vector<1x20xf32>
    %379 = vector.broadcast %378 : vector<1x20xf32> to vector<2x20xf32>
    %380 = arith.addf %376, %379 : vector<2x20xf32>
    %c1_300 = arith.constant 1 : index
    %c1_301 = arith.constant 1 : index
    %c0_302 = arith.constant 0 : index
    %c0_303 = arith.constant 0 : index
    %381 = vector.load %arg4[%c1_300, %c1_301, %c0_302, %c0_303] : memref<3x4x40x20xf32, #tpu.memory_space<vmem>>, vector<1x1x40x20xf32>
    %382 = vector.shape_cast %381 : vector<1x1x40x20xf32> to vector<40x20xf32>
    %cst_304 = arith.constant dense<0.000000e+00> : vector<2x20xf32>
    %383 = tpu.matmul %373, %382, %cst_304 {dimension_numbers = #tpu.dot_dimension_numbers<[1], [0], [0], [1], [0, 0, 1, 1], [], []>} : vector<2x40xf32>, vector<40x20xf32>, vector<2x20xf32> -> vector<2x20xf32>
    %c1_305 = arith.constant 1 : index
    %c1_306 = arith.constant 1 : index
    %c0_307 = arith.constant 0 : index
    %c0_308 = arith.constant 0 : index
    %384 = vector.load %arg5[%c1_305, %c1_306, %c0_307, %c0_308] : memref<3x4x1x20xf32, #tpu.memory_space<vmem>>, vector<1x1x1x20xf32>
    %385 = vector.shape_cast %384 : vector<1x1x1x20xf32> to vector<1x20xf32>
    %386 = vector.broadcast %385 : vector<1x20xf32> to vector<2x20xf32>
    %387 = arith.addf %383, %386 : vector<2x20xf32>
    %c1_309 = arith.constant 1 : index
    %c2_310 = arith.constant 2 : index
    %c0_311 = arith.constant 0 : index
    %c0_312 = arith.constant 0 : index
    %388 = vector.load %arg4[%c1_309, %c2_310, %c0_311, %c0_312] : memref<3x4x40x20xf32, #tpu.memory_space<vmem>>, vector<1x1x40x20xf32>
    %389 = vector.shape_cast %388 : vector<1x1x40x20xf32> to vector<40x20xf32>
    %cst_313 = arith.constant dense<0.000000e+00> : vector<2x20xf32>
    %390 = tpu.matmul %373, %389, %cst_313 {dimension_numbers = #tpu.dot_dimension_numbers<[1], [0], [0], [1], [0, 0, 1, 1], [], []>} : vector<2x40xf32>, vector<40x20xf32>, vector<2x20xf32> -> vector<2x20xf32>
    %c1_314 = arith.constant 1 : index
    %c2_315 = arith.constant 2 : index
    %c0_316 = arith.constant 0 : index
    %c0_317 = arith.constant 0 : index
    %391 = vector.load %arg5[%c1_314, %c2_315, %c0_316, %c0_317] : memref<3x4x1x20xf32, #tpu.memory_space<vmem>>, vector<1x1x1x20xf32>
    %392 = vector.shape_cast %391 : vector<1x1x1x20xf32> to vector<1x20xf32>
    %393 = vector.broadcast %392 : vector<1x20xf32> to vector<2x20xf32>
    %394 = arith.addf %390, %393 : vector<2x20xf32>
    %c1_318 = arith.constant 1 : index
    %c3_319 = arith.constant 3 : index
    %c0_320 = arith.constant 0 : index
    %c0_321 = arith.constant 0 : index
    %395 = vector.load %arg4[%c1_318, %c3_319, %c0_320, %c0_321] : memref<3x4x40x20xf32, #tpu.memory_space<vmem>>, vector<1x1x40x20xf32>
    %396 = vector.shape_cast %395 : vector<1x1x40x20xf32> to vector<40x20xf32>
    %cst_322 = arith.constant dense<0.000000e+00> : vector<2x20xf32>
    %397 = tpu.matmul %373, %396, %cst_322 {dimension_numbers = #tpu.dot_dimension_numbers<[1], [0], [0], [1], [0, 0, 1, 1], [], []>} : vector<2x40xf32>, vector<40x20xf32>, vector<2x20xf32> -> vector<2x20xf32>
    %c1_323 = arith.constant 1 : index
    %c3_324 = arith.constant 3 : index
    %c0_325 = arith.constant 0 : index
    %c0_326 = arith.constant 0 : index
    %398 = vector.load %arg5[%c1_323, %c3_324, %c0_325, %c0_326] : memref<3x4x1x20xf32, #tpu.memory_space<vmem>>, vector<1x1x1x20xf32>
    %399 = vector.shape_cast %398 : vector<1x1x1x20xf32> to vector<1x20xf32>
    %400 = vector.broadcast %399 : vector<1x20xf32> to vector<2x20xf32>
    %401 = arith.addf %397, %400 : vector<2x20xf32>
    %402 = arith.negf %380 : vector<2x20xf32>
    %403 = math.exp %402 : vector<2x20xf32>
    %cst_327 = arith.constant 1.000000e+00 : f32
    %404 = vector.broadcast %cst_327 : f32 to vector<2x20xf32>
    %405 = arith.addf %404, %403 : vector<2x20xf32>
    %406 = arith.divf %404, %405 : vector<2x20xf32>
    %407 = arith.negf %387 : vector<2x20xf32>
    %408 = math.exp %407 : vector<2x20xf32>
    %cst_328 = arith.constant 1.000000e+00 : f32
    %409 = vector.broadcast %cst_328 : f32 to vector<2x20xf32>
    %410 = arith.addf %409, %408 : vector<2x20xf32>
    %411 = arith.divf %409, %410 : vector<2x20xf32>
    %412 = math.tanh %394 : vector<2x20xf32>
    %413 = arith.negf %401 : vector<2x20xf32>
    %414 = math.exp %413 : vector<2x20xf32>
    %cst_329 = arith.constant 1.000000e+00 : f32
    %415 = vector.broadcast %cst_329 : f32 to vector<2x20xf32>
    %416 = arith.addf %415, %414 : vector<2x20xf32>
    %417 = arith.divf %415, %416 : vector<2x20xf32>
    %418 = arith.mulf %411, %269 : vector<2x20xf32>
    %419 = arith.mulf %406, %412 : vector<2x20xf32>
    %420 = arith.addf %418, %419 : vector<2x20xf32>
    %421 = math.tanh %420 : vector<2x20xf32>
    %422 = arith.mulf %417, %421 : vector<2x20xf32>
    %423 = tpu.concatenate %422, %321 in 1 : vector<2x20xf32>, vector<2x20xf32> -> vector<2x40xf32>
    %c2_330 = arith.constant 2 : index
    %c0_331 = arith.constant 0 : index
    %c0_332 = arith.constant 0 : index
    %c0_333 = arith.constant 0 : index
    %424 = vector.load %arg4[%c2_330, %c0_331, %c0_332, %c0_333] : memref<3x4x40x20xf32, #tpu.memory_space<vmem>>, vector<1x1x40x20xf32>
    %425 = vector.shape_cast %424 : vector<1x1x40x20xf32> to vector<40x20xf32>
    %cst_334 = arith.constant dense<0.000000e+00> : vector<2x20xf32>
    %426 = tpu.matmul %423, %425, %cst_334 {dimension_numbers = #tpu.dot_dimension_numbers<[1], [0], [0], [1], [0, 0, 1, 1], [], []>} : vector<2x40xf32>, vector<40x20xf32>, vector<2x20xf32> -> vector<2x20xf32>
    %c2_335 = arith.constant 2 : index
    %c0_336 = arith.constant 0 : index
    %c0_337 = arith.constant 0 : index
    %c0_338 = arith.constant 0 : index
    %427 = vector.load %arg5[%c2_335, %c0_336, %c0_337, %c0_338] : memref<3x4x1x20xf32, #tpu.memory_space<vmem>>, vector<1x1x1x20xf32>
    %428 = vector.shape_cast %427 : vector<1x1x1x20xf32> to vector<1x20xf32>
    %429 = vector.broadcast %428 : vector<1x20xf32> to vector<2x20xf32>
    %430 = arith.addf %426, %429 : vector<2x20xf32>
    %c2_339 = arith.constant 2 : index
    %c1_340 = arith.constant 1 : index
    %c0_341 = arith.constant 0 : index
    %c0_342 = arith.constant 0 : index
    %431 = vector.load %arg4[%c2_339, %c1_340, %c0_341, %c0_342] : memref<3x4x40x20xf32, #tpu.memory_space<vmem>>, vector<1x1x40x20xf32>
    %432 = vector.shape_cast %431 : vector<1x1x40x20xf32> to vector<40x20xf32>
    %cst_343 = arith.constant dense<0.000000e+00> : vector<2x20xf32>
    %433 = tpu.matmul %423, %432, %cst_343 {dimension_numbers = #tpu.dot_dimension_numbers<[1], [0], [0], [1], [0, 0, 1, 1], [], []>} : vector<2x40xf32>, vector<40x20xf32>, vector<2x20xf32> -> vector<2x20xf32>
    %c2_344 = arith.constant 2 : index
    %c1_345 = arith.constant 1 : index
    %c0_346 = arith.constant 0 : index
    %c0_347 = arith.constant 0 : index
    %434 = vector.load %arg5[%c2_344, %c1_345, %c0_346, %c0_347] : memref<3x4x1x20xf32, #tpu.memory_space<vmem>>, vector<1x1x1x20xf32>
    %435 = vector.shape_cast %434 : vector<1x1x1x20xf32> to vector<1x20xf32>
    %436 = vector.broadcast %435 : vector<1x20xf32> to vector<2x20xf32>
    %437 = arith.addf %433, %436 : vector<2x20xf32>
    %c2_348 = arith.constant 2 : index
    %c2_349 = arith.constant 2 : index
    %c0_350 = arith.constant 0 : index
    %c0_351 = arith.constant 0 : index
    %438 = vector.load %arg4[%c2_348, %c2_349, %c0_350, %c0_351] : memref<3x4x40x20xf32, #tpu.memory_space<vmem>>, vector<1x1x40x20xf32>
    %439 = vector.shape_cast %438 : vector<1x1x40x20xf32> to vector<40x20xf32>
    %cst_352 = arith.constant dense<0.000000e+00> : vector<2x20xf32>
    %440 = tpu.matmul %423, %439, %cst_352 {dimension_numbers = #tpu.dot_dimension_numbers<[1], [0], [0], [1], [0, 0, 1, 1], [], []>} : vector<2x40xf32>, vector<40x20xf32>, vector<2x20xf32> -> vector<2x20xf32>
    %c2_353 = arith.constant 2 : index
    %c2_354 = arith.constant 2 : index
    %c0_355 = arith.constant 0 : index
    %c0_356 = arith.constant 0 : index
    %441 = vector.load %arg5[%c2_353, %c2_354, %c0_355, %c0_356] : memref<3x4x1x20xf32, #tpu.memory_space<vmem>>, vector<1x1x1x20xf32>
    %442 = vector.shape_cast %441 : vector<1x1x1x20xf32> to vector<1x20xf32>
    %443 = vector.broadcast %442 : vector<1x20xf32> to vector<2x20xf32>
    %444 = arith.addf %440, %443 : vector<2x20xf32>
    %c2_357 = arith.constant 2 : index
    %c3_358 = arith.constant 3 : index
    %c0_359 = arith.constant 0 : index
    %c0_360 = arith.constant 0 : index
    %445 = vector.load %arg4[%c2_357, %c3_358, %c0_359, %c0_360] : memref<3x4x40x20xf32, #tpu.memory_space<vmem>>, vector<1x1x40x20xf32>
    %446 = vector.shape_cast %445 : vector<1x1x40x20xf32> to vector<40x20xf32>
    %cst_361 = arith.constant dense<0.000000e+00> : vector<2x20xf32>
    %447 = tpu.matmul %423, %446, %cst_361 {dimension_numbers = #tpu.dot_dimension_numbers<[1], [0], [0], [1], [0, 0, 1, 1], [], []>} : vector<2x40xf32>, vector<40x20xf32>, vector<2x20xf32> -> vector<2x20xf32>
    %c2_362 = arith.constant 2 : index
    %c3_363 = arith.constant 3 : index
    %c0_364 = arith.constant 0 : index
    %c0_365 = arith.constant 0 : index
    %448 = vector.load %arg5[%c2_362, %c3_363, %c0_364, %c0_365] : memref<3x4x1x20xf32, #tpu.memory_space<vmem>>, vector<1x1x1x20xf32>
    %449 = vector.shape_cast %448 : vector<1x1x1x20xf32> to vector<1x20xf32>
    %450 = vector.broadcast %449 : vector<1x20xf32> to vector<2x20xf32>
    %451 = arith.addf %447, %450 : vector<2x20xf32>
    %452 = arith.negf %430 : vector<2x20xf32>
    %453 = math.exp %452 : vector<2x20xf32>
    %cst_366 = arith.constant 1.000000e+00 : f32
    %454 = vector.broadcast %cst_366 : f32 to vector<2x20xf32>
    %455 = arith.addf %454, %453 : vector<2x20xf32>
    %456 = arith.divf %454, %455 : vector<2x20xf32>
    %457 = arith.negf %437 : vector<2x20xf32>
    %458 = math.exp %457 : vector<2x20xf32>
    %cst_367 = arith.constant 1.000000e+00 : f32
    %459 = vector.broadcast %cst_367 : f32 to vector<2x20xf32>
    %460 = arith.addf %459, %458 : vector<2x20xf32>
    %461 = arith.divf %459, %460 : vector<2x20xf32>
    %462 = math.tanh %444 : vector<2x20xf32>
    %463 = arith.negf %451 : vector<2x20xf32>
    %464 = math.exp %463 : vector<2x20xf32>
    %cst_368 = arith.constant 1.000000e+00 : f32
    %465 = vector.broadcast %cst_368 : f32 to vector<2x20xf32>
    %466 = arith.addf %465, %464 : vector<2x20xf32>
    %467 = arith.divf %465, %466 : vector<2x20xf32>
    %468 = arith.mulf %461, %319 : vector<2x20xf32>
    %469 = arith.mulf %456, %462 : vector<2x20xf32>
    %470 = arith.addf %468, %469 : vector<2x20xf32>
    %471 = math.tanh %470 : vector<2x20xf32>
    %472 = arith.mulf %467, %471 : vector<2x20xf32>
    %473 = vector.extract_strided_slice %7 {offsets = [6, 0], sizes = [2, 20], strides = [1, 1]} : vector<16x20xf32> to vector<2x20xf32>
    %474 = tpu.concatenate %473, %372 in 1 : vector<2x20xf32>, vector<2x20xf32> -> vector<2x40xf32>
    %c0_369 = arith.constant 0 : index
    %c0_370 = arith.constant 0 : index
    %c0_371 = arith.constant 0 : index
    %c0_372 = arith.constant 0 : index
    %475 = vector.load %arg4[%c0_369, %c0_370, %c0_371, %c0_372] : memref<3x4x40x20xf32, #tpu.memory_space<vmem>>, vector<1x1x40x20xf32>
    %476 = vector.shape_cast %475 : vector<1x1x40x20xf32> to vector<40x20xf32>
    %cst_373 = arith.constant dense<0.000000e+00> : vector<2x20xf32>
    %477 = tpu.matmul %474, %476, %cst_373 {dimension_numbers = #tpu.dot_dimension_numbers<[1], [0], [0], [1], [0, 0, 1, 1], [], []>} : vector<2x40xf32>, vector<40x20xf32>, vector<2x20xf32> -> vector<2x20xf32>
    %c0_374 = arith.constant 0 : index
    %c0_375 = arith.constant 0 : index
    %c0_376 = arith.constant 0 : index
    %c0_377 = arith.constant 0 : index
    %478 = vector.load %arg5[%c0_374, %c0_375, %c0_376, %c0_377] : memref<3x4x1x20xf32, #tpu.memory_space<vmem>>, vector<1x1x1x20xf32>
    %479 = vector.shape_cast %478 : vector<1x1x1x20xf32> to vector<1x20xf32>
    %480 = vector.broadcast %479 : vector<1x20xf32> to vector<2x20xf32>
    %481 = arith.addf %477, %480 : vector<2x20xf32>
    %c0_378 = arith.constant 0 : index
    %c1_379 = arith.constant 1 : index
    %c0_380 = arith.constant 0 : index
    %c0_381 = arith.constant 0 : index
    %482 = vector.load %arg4[%c0_378, %c1_379, %c0_380, %c0_381] : memref<3x4x40x20xf32, #tpu.memory_space<vmem>>, vector<1x1x40x20xf32>
    %483 = vector.shape_cast %482 : vector<1x1x40x20xf32> to vector<40x20xf32>
    %cst_382 = arith.constant dense<0.000000e+00> : vector<2x20xf32>
    %484 = tpu.matmul %474, %483, %cst_382 {dimension_numbers = #tpu.dot_dimension_numbers<[1], [0], [0], [1], [0, 0, 1, 1], [], []>} : vector<2x40xf32>, vector<40x20xf32>, vector<2x20xf32> -> vector<2x20xf32>
    %c0_383 = arith.constant 0 : index
    %c1_384 = arith.constant 1 : index
    %c0_385 = arith.constant 0 : index
    %c0_386 = arith.constant 0 : index
    %485 = vector.load %arg5[%c0_383, %c1_384, %c0_385, %c0_386] : memref<3x4x1x20xf32, #tpu.memory_space<vmem>>, vector<1x1x1x20xf32>
    %486 = vector.shape_cast %485 : vector<1x1x1x20xf32> to vector<1x20xf32>
    %487 = vector.broadcast %486 : vector<1x20xf32> to vector<2x20xf32>
    %488 = arith.addf %484, %487 : vector<2x20xf32>
    %c0_387 = arith.constant 0 : index
    %c2_388 = arith.constant 2 : index
    %c0_389 = arith.constant 0 : index
    %c0_390 = arith.constant 0 : index
    %489 = vector.load %arg4[%c0_387, %c2_388, %c0_389, %c0_390] : memref<3x4x40x20xf32, #tpu.memory_space<vmem>>, vector<1x1x40x20xf32>
    %490 = vector.shape_cast %489 : vector<1x1x40x20xf32> to vector<40x20xf32>
    %cst_391 = arith.constant dense<0.000000e+00> : vector<2x20xf32>
    %491 = tpu.matmul %474, %490, %cst_391 {dimension_numbers = #tpu.dot_dimension_numbers<[1], [0], [0], [1], [0, 0, 1, 1], [], []>} : vector<2x40xf32>, vector<40x20xf32>, vector<2x20xf32> -> vector<2x20xf32>
    %c0_392 = arith.constant 0 : index
    %c2_393 = arith.constant 2 : index
    %c0_394 = arith.constant 0 : index
    %c0_395 = arith.constant 0 : index
    %492 = vector.load %arg5[%c0_392, %c2_393, %c0_394, %c0_395] : memref<3x4x1x20xf32, #tpu.memory_space<vmem>>, vector<1x1x1x20xf32>
    %493 = vector.shape_cast %492 : vector<1x1x1x20xf32> to vector<1x20xf32>
    %494 = vector.broadcast %493 : vector<1x20xf32> to vector<2x20xf32>
    %495 = arith.addf %491, %494 : vector<2x20xf32>
    %c0_396 = arith.constant 0 : index
    %c3_397 = arith.constant 3 : index
    %c0_398 = arith.constant 0 : index
    %c0_399 = arith.constant 0 : index
    %496 = vector.load %arg4[%c0_396, %c3_397, %c0_398, %c0_399] : memref<3x4x40x20xf32, #tpu.memory_space<vmem>>, vector<1x1x40x20xf32>
    %497 = vector.shape_cast %496 : vector<1x1x40x20xf32> to vector<40x20xf32>
    %cst_400 = arith.constant dense<0.000000e+00> : vector<2x20xf32>
    %498 = tpu.matmul %474, %497, %cst_400 {dimension_numbers = #tpu.dot_dimension_numbers<[1], [0], [0], [1], [0, 0, 1, 1], [], []>} : vector<2x40xf32>, vector<40x20xf32>, vector<2x20xf32> -> vector<2x20xf32>
    %c0_401 = arith.constant 0 : index
    %c3_402 = arith.constant 3 : index
    %c0_403 = arith.constant 0 : index
    %c0_404 = arith.constant 0 : index
    %499 = vector.load %arg5[%c0_401, %c3_402, %c0_403, %c0_404] : memref<3x4x1x20xf32, #tpu.memory_space<vmem>>, vector<1x1x1x20xf32>
    %500 = vector.shape_cast %499 : vector<1x1x1x20xf32> to vector<1x20xf32>
    %501 = vector.broadcast %500 : vector<1x20xf32> to vector<2x20xf32>
    %502 = arith.addf %498, %501 : vector<2x20xf32>
    %503 = arith.negf %481 : vector<2x20xf32>
    %504 = math.exp %503 : vector<2x20xf32>
    %cst_405 = arith.constant 1.000000e+00 : f32
    %505 = vector.broadcast %cst_405 : f32 to vector<2x20xf32>
    %506 = arith.addf %505, %504 : vector<2x20xf32>
    %507 = arith.divf %505, %506 : vector<2x20xf32>
    %508 = arith.negf %488 : vector<2x20xf32>
    %509 = math.exp %508 : vector<2x20xf32>
    %cst_406 = arith.constant 1.000000e+00 : f32
    %510 = vector.broadcast %cst_406 : f32 to vector<2x20xf32>
    %511 = arith.addf %510, %509 : vector<2x20xf32>
    %512 = arith.divf %510, %511 : vector<2x20xf32>
    %513 = math.tanh %495 : vector<2x20xf32>
    %514 = arith.negf %502 : vector<2x20xf32>
    %515 = math.exp %514 : vector<2x20xf32>
    %cst_407 = arith.constant 1.000000e+00 : f32
    %516 = vector.broadcast %cst_407 : f32 to vector<2x20xf32>
    %517 = arith.addf %516, %515 : vector<2x20xf32>
    %518 = arith.divf %516, %517 : vector<2x20xf32>
    %519 = arith.mulf %512, %370 : vector<2x20xf32>
    %520 = arith.mulf %507, %513 : vector<2x20xf32>
    %521 = arith.addf %519, %520 : vector<2x20xf32>
    %522 = math.tanh %521 : vector<2x20xf32>
    %523 = arith.mulf %518, %522 : vector<2x20xf32>
    %524 = tpu.concatenate %523, %422 in 1 : vector<2x20xf32>, vector<2x20xf32> -> vector<2x40xf32>
    %c1_408 = arith.constant 1 : index
    %c0_409 = arith.constant 0 : index
    %c0_410 = arith.constant 0 : index
    %c0_411 = arith.constant 0 : index
    %525 = vector.load %arg4[%c1_408, %c0_409, %c0_410, %c0_411] : memref<3x4x40x20xf32, #tpu.memory_space<vmem>>, vector<1x1x40x20xf32>
    %526 = vector.shape_cast %525 : vector<1x1x40x20xf32> to vector<40x20xf32>
    %cst_412 = arith.constant dense<0.000000e+00> : vector<2x20xf32>
    %527 = tpu.matmul %524, %526, %cst_412 {dimension_numbers = #tpu.dot_dimension_numbers<[1], [0], [0], [1], [0, 0, 1, 1], [], []>} : vector<2x40xf32>, vector<40x20xf32>, vector<2x20xf32> -> vector<2x20xf32>
    %c1_413 = arith.constant 1 : index
    %c0_414 = arith.constant 0 : index
    %c0_415 = arith.constant 0 : index
    %c0_416 = arith.constant 0 : index
    %528 = vector.load %arg5[%c1_413, %c0_414, %c0_415, %c0_416] : memref<3x4x1x20xf32, #tpu.memory_space<vmem>>, vector<1x1x1x20xf32>
    %529 = vector.shape_cast %528 : vector<1x1x1x20xf32> to vector<1x20xf32>
    %530 = vector.broadcast %529 : vector<1x20xf32> to vector<2x20xf32>
    %531 = arith.addf %527, %530 : vector<2x20xf32>
    %c1_417 = arith.constant 1 : index
    %c1_418 = arith.constant 1 : index
    %c0_419 = arith.constant 0 : index
    %c0_420 = arith.constant 0 : index
    %532 = vector.load %arg4[%c1_417, %c1_418, %c0_419, %c0_420] : memref<3x4x40x20xf32, #tpu.memory_space<vmem>>, vector<1x1x40x20xf32>
    %533 = vector.shape_cast %532 : vector<1x1x40x20xf32> to vector<40x20xf32>
    %cst_421 = arith.constant dense<0.000000e+00> : vector<2x20xf32>
    %534 = tpu.matmul %524, %533, %cst_421 {dimension_numbers = #tpu.dot_dimension_numbers<[1], [0], [0], [1], [0, 0, 1, 1], [], []>} : vector<2x40xf32>, vector<40x20xf32>, vector<2x20xf32> -> vector<2x20xf32>
    %c1_422 = arith.constant 1 : index
    %c1_423 = arith.constant 1 : index
    %c0_424 = arith.constant 0 : index
    %c0_425 = arith.constant 0 : index
    %535 = vector.load %arg5[%c1_422, %c1_423, %c0_424, %c0_425] : memref<3x4x1x20xf32, #tpu.memory_space<vmem>>, vector<1x1x1x20xf32>
    %536 = vector.shape_cast %535 : vector<1x1x1x20xf32> to vector<1x20xf32>
    %537 = vector.broadcast %536 : vector<1x20xf32> to vector<2x20xf32>
    %538 = arith.addf %534, %537 : vector<2x20xf32>
    %c1_426 = arith.constant 1 : index
    %c2_427 = arith.constant 2 : index
    %c0_428 = arith.constant 0 : index
    %c0_429 = arith.constant 0 : index
    %539 = vector.load %arg4[%c1_426, %c2_427, %c0_428, %c0_429] : memref<3x4x40x20xf32, #tpu.memory_space<vmem>>, vector<1x1x40x20xf32>
    %540 = vector.shape_cast %539 : vector<1x1x40x20xf32> to vector<40x20xf32>
    %cst_430 = arith.constant dense<0.000000e+00> : vector<2x20xf32>
    %541 = tpu.matmul %524, %540, %cst_430 {dimension_numbers = #tpu.dot_dimension_numbers<[1], [0], [0], [1], [0, 0, 1, 1], [], []>} : vector<2x40xf32>, vector<40x20xf32>, vector<2x20xf32> -> vector<2x20xf32>
    %c1_431 = arith.constant 1 : index
    %c2_432 = arith.constant 2 : index
    %c0_433 = arith.constant 0 : index
    %c0_434 = arith.constant 0 : index
    %542 = vector.load %arg5[%c1_431, %c2_432, %c0_433, %c0_434] : memref<3x4x1x20xf32, #tpu.memory_space<vmem>>, vector<1x1x1x20xf32>
    %543 = vector.shape_cast %542 : vector<1x1x1x20xf32> to vector<1x20xf32>
    %544 = vector.broadcast %543 : vector<1x20xf32> to vector<2x20xf32>
    %545 = arith.addf %541, %544 : vector<2x20xf32>
    %c1_435 = arith.constant 1 : index
    %c3_436 = arith.constant 3 : index
    %c0_437 = arith.constant 0 : index
    %c0_438 = arith.constant 0 : index
    %546 = vector.load %arg4[%c1_435, %c3_436, %c0_437, %c0_438] : memref<3x4x40x20xf32, #tpu.memory_space<vmem>>, vector<1x1x40x20xf32>
    %547 = vector.shape_cast %546 : vector<1x1x40x20xf32> to vector<40x20xf32>
    %cst_439 = arith.constant dense<0.000000e+00> : vector<2x20xf32>
    %548 = tpu.matmul %524, %547, %cst_439 {dimension_numbers = #tpu.dot_dimension_numbers<[1], [0], [0], [1], [0, 0, 1, 1], [], []>} : vector<2x40xf32>, vector<40x20xf32>, vector<2x20xf32> -> vector<2x20xf32>
    %c1_440 = arith.constant 1 : index
    %c3_441 = arith.constant 3 : index
    %c0_442 = arith.constant 0 : index
    %c0_443 = arith.constant 0 : index
    %549 = vector.load %arg5[%c1_440, %c3_441, %c0_442, %c0_443] : memref<3x4x1x20xf32, #tpu.memory_space<vmem>>, vector<1x1x1x20xf32>
    %550 = vector.shape_cast %549 : vector<1x1x1x20xf32> to vector<1x20xf32>
    %551 = vector.broadcast %550 : vector<1x20xf32> to vector<2x20xf32>
    %552 = arith.addf %548, %551 : vector<2x20xf32>
    %553 = arith.negf %531 : vector<2x20xf32>
    %554 = math.exp %553 : vector<2x20xf32>
    %cst_444 = arith.constant 1.000000e+00 : f32
    %555 = vector.broadcast %cst_444 : f32 to vector<2x20xf32>
    %556 = arith.addf %555, %554 : vector<2x20xf32>
    %557 = arith.divf %555, %556 : vector<2x20xf32>
    %558 = arith.negf %538 : vector<2x20xf32>
    %559 = math.exp %558 : vector<2x20xf32>
    %cst_445 = arith.constant 1.000000e+00 : f32
    %560 = vector.broadcast %cst_445 : f32 to vector<2x20xf32>
    %561 = arith.addf %560, %559 : vector<2x20xf32>
    %562 = arith.divf %560, %561 : vector<2x20xf32>
    %563 = math.tanh %545 : vector<2x20xf32>
    %564 = arith.negf %552 : vector<2x20xf32>
    %565 = math.exp %564 : vector<2x20xf32>
    %cst_446 = arith.constant 1.000000e+00 : f32
    %566 = vector.broadcast %cst_446 : f32 to vector<2x20xf32>
    %567 = arith.addf %566, %565 : vector<2x20xf32>
    %568 = arith.divf %566, %567 : vector<2x20xf32>
    %569 = arith.mulf %562, %420 : vector<2x20xf32>
    %570 = arith.mulf %557, %563 : vector<2x20xf32>
    %571 = arith.addf %569, %570 : vector<2x20xf32>
    %572 = math.tanh %571 : vector<2x20xf32>
    %573 = arith.mulf %568, %572 : vector<2x20xf32>
    %574 = tpu.concatenate %573, %472 in 1 : vector<2x20xf32>, vector<2x20xf32> -> vector<2x40xf32>
    %c2_447 = arith.constant 2 : index
    %c0_448 = arith.constant 0 : index
    %c0_449 = arith.constant 0 : index
    %c0_450 = arith.constant 0 : index
    %575 = vector.load %arg4[%c2_447, %c0_448, %c0_449, %c0_450] : memref<3x4x40x20xf32, #tpu.memory_space<vmem>>, vector<1x1x40x20xf32>
    %576 = vector.shape_cast %575 : vector<1x1x40x20xf32> to vector<40x20xf32>
    %cst_451 = arith.constant dense<0.000000e+00> : vector<2x20xf32>
    %577 = tpu.matmul %574, %576, %cst_451 {dimension_numbers = #tpu.dot_dimension_numbers<[1], [0], [0], [1], [0, 0, 1, 1], [], []>} : vector<2x40xf32>, vector<40x20xf32>, vector<2x20xf32> -> vector<2x20xf32>
    %c2_452 = arith.constant 2 : index
    %c0_453 = arith.constant 0 : index
    %c0_454 = arith.constant 0 : index
    %c0_455 = arith.constant 0 : index
    %578 = vector.load %arg5[%c2_452, %c0_453, %c0_454, %c0_455] : memref<3x4x1x20xf32, #tpu.memory_space<vmem>>, vector<1x1x1x20xf32>
    %579 = vector.shape_cast %578 : vector<1x1x1x20xf32> to vector<1x20xf32>
    %580 = vector.broadcast %579 : vector<1x20xf32> to vector<2x20xf32>
    %581 = arith.addf %577, %580 : vector<2x20xf32>
    %c2_456 = arith.constant 2 : index
    %c1_457 = arith.constant 1 : index
    %c0_458 = arith.constant 0 : index
    %c0_459 = arith.constant 0 : index
    %582 = vector.load %arg4[%c2_456, %c1_457, %c0_458, %c0_459] : memref<3x4x40x20xf32, #tpu.memory_space<vmem>>, vector<1x1x40x20xf32>
    %583 = vector.shape_cast %582 : vector<1x1x40x20xf32> to vector<40x20xf32>
    %cst_460 = arith.constant dense<0.000000e+00> : vector<2x20xf32>
    %584 = tpu.matmul %574, %583, %cst_460 {dimension_numbers = #tpu.dot_dimension_numbers<[1], [0], [0], [1], [0, 0, 1, 1], [], []>} : vector<2x40xf32>, vector<40x20xf32>, vector<2x20xf32> -> vector<2x20xf32>
    %c2_461 = arith.constant 2 : index
    %c1_462 = arith.constant 1 : index
    %c0_463 = arith.constant 0 : index
    %c0_464 = arith.constant 0 : index
    %585 = vector.load %arg5[%c2_461, %c1_462, %c0_463, %c0_464] : memref<3x4x1x20xf32, #tpu.memory_space<vmem>>, vector<1x1x1x20xf32>
    %586 = vector.shape_cast %585 : vector<1x1x1x20xf32> to vector<1x20xf32>
    %587 = vector.broadcast %586 : vector<1x20xf32> to vector<2x20xf32>
    %588 = arith.addf %584, %587 : vector<2x20xf32>
    %c2_465 = arith.constant 2 : index
    %c2_466 = arith.constant 2 : index
    %c0_467 = arith.constant 0 : index
    %c0_468 = arith.constant 0 : index
    %589 = vector.load %arg4[%c2_465, %c2_466, %c0_467, %c0_468] : memref<3x4x40x20xf32, #tpu.memory_space<vmem>>, vector<1x1x40x20xf32>
    %590 = vector.shape_cast %589 : vector<1x1x40x20xf32> to vector<40x20xf32>
    %cst_469 = arith.constant dense<0.000000e+00> : vector<2x20xf32>
    %591 = tpu.matmul %574, %590, %cst_469 {dimension_numbers = #tpu.dot_dimension_numbers<[1], [0], [0], [1], [0, 0, 1, 1], [], []>} : vector<2x40xf32>, vector<40x20xf32>, vector<2x20xf32> -> vector<2x20xf32>
    %c2_470 = arith.constant 2 : index
    %c2_471 = arith.constant 2 : index
    %c0_472 = arith.constant 0 : index
    %c0_473 = arith.constant 0 : index
    %592 = vector.load %arg5[%c2_470, %c2_471, %c0_472, %c0_473] : memref<3x4x1x20xf32, #tpu.memory_space<vmem>>, vector<1x1x1x20xf32>
    %593 = vector.shape_cast %592 : vector<1x1x1x20xf32> to vector<1x20xf32>
    %594 = vector.broadcast %593 : vector<1x20xf32> to vector<2x20xf32>
    %595 = arith.addf %591, %594 : vector<2x20xf32>
    %c2_474 = arith.constant 2 : index
    %c3_475 = arith.constant 3 : index
    %c0_476 = arith.constant 0 : index
    %c0_477 = arith.constant 0 : index
    %596 = vector.load %arg4[%c2_474, %c3_475, %c0_476, %c0_477] : memref<3x4x40x20xf32, #tpu.memory_space<vmem>>, vector<1x1x40x20xf32>
    %597 = vector.shape_cast %596 : vector<1x1x40x20xf32> to vector<40x20xf32>
    %cst_478 = arith.constant dense<0.000000e+00> : vector<2x20xf32>
    %598 = tpu.matmul %574, %597, %cst_478 {dimension_numbers = #tpu.dot_dimension_numbers<[1], [0], [0], [1], [0, 0, 1, 1], [], []>} : vector<2x40xf32>, vector<40x20xf32>, vector<2x20xf32> -> vector<2x20xf32>
    %c2_479 = arith.constant 2 : index
    %c3_480 = arith.constant 3 : index
    %c0_481 = arith.constant 0 : index
    %c0_482 = arith.constant 0 : index
    %599 = vector.load %arg5[%c2_479, %c3_480, %c0_481, %c0_482] : memref<3x4x1x20xf32, #tpu.memory_space<vmem>>, vector<1x1x1x20xf32>
    %600 = vector.shape_cast %599 : vector<1x1x1x20xf32> to vector<1x20xf32>
    %601 = vector.broadcast %600 : vector<1x20xf32> to vector<2x20xf32>
    %602 = arith.addf %598, %601 : vector<2x20xf32>
    %603 = arith.negf %581 : vector<2x20xf32>
    %604 = math.exp %603 : vector<2x20xf32>
    %cst_483 = arith.constant 1.000000e+00 : f32
    %605 = vector.broadcast %cst_483 : f32 to vector<2x20xf32>
    %606 = arith.addf %605, %604 : vector<2x20xf32>
    %607 = arith.divf %605, %606 : vector<2x20xf32>
    %608 = arith.negf %588 : vector<2x20xf32>
    %609 = math.exp %608 : vector<2x20xf32>
    %cst_484 = arith.constant 1.000000e+00 : f32
    %610 = vector.broadcast %cst_484 : f32 to vector<2x20xf32>
    %611 = arith.addf %610, %609 : vector<2x20xf32>
    %612 = arith.divf %610, %611 : vector<2x20xf32>
    %613 = math.tanh %595 : vector<2x20xf32>
    %614 = arith.negf %602 : vector<2x20xf32>
    %615 = math.exp %614 : vector<2x20xf32>
    %cst_485 = arith.constant 1.000000e+00 : f32
    %616 = vector.broadcast %cst_485 : f32 to vector<2x20xf32>
    %617 = arith.addf %616, %615 : vector<2x20xf32>
    %618 = arith.divf %616, %617 : vector<2x20xf32>
    %619 = arith.mulf %612, %470 : vector<2x20xf32>
    %620 = arith.mulf %607, %613 : vector<2x20xf32>
    %621 = arith.addf %619, %620 : vector<2x20xf32>
    %622 = math.tanh %621 : vector<2x20xf32>
    %623 = arith.mulf %618, %622 : vector<2x20xf32>
    %624 = vector.extract_strided_slice %7 {offsets = [8, 0], sizes = [2, 20], strides = [1, 1]} : vector<16x20xf32> to vector<2x20xf32>
    %625 = tpu.concatenate %624, %523 in 1 : vector<2x20xf32>, vector<2x20xf32> -> vector<2x40xf32>
    %c0_486 = arith.constant 0 : index
    %c0_487 = arith.constant 0 : index
    %c0_488 = arith.constant 0 : index
    %c0_489 = arith.constant 0 : index
    %626 = vector.load %arg4[%c0_486, %c0_487, %c0_488, %c0_489] : memref<3x4x40x20xf32, #tpu.memory_space<vmem>>, vector<1x1x40x20xf32>
    %627 = vector.shape_cast %626 : vector<1x1x40x20xf32> to vector<40x20xf32>
    %cst_490 = arith.constant dense<0.000000e+00> : vector<2x20xf32>
    %628 = tpu.matmul %625, %627, %cst_490 {dimension_numbers = #tpu.dot_dimension_numbers<[1], [0], [0], [1], [0, 0, 1, 1], [], []>} : vector<2x40xf32>, vector<40x20xf32>, vector<2x20xf32> -> vector<2x20xf32>
    %c0_491 = arith.constant 0 : index
    %c0_492 = arith.constant 0 : index
    %c0_493 = arith.constant 0 : index
    %c0_494 = arith.constant 0 : index
    %629 = vector.load %arg5[%c0_491, %c0_492, %c0_493, %c0_494] : memref<3x4x1x20xf32, #tpu.memory_space<vmem>>, vector<1x1x1x20xf32>
    %630 = vector.shape_cast %629 : vector<1x1x1x20xf32> to vector<1x20xf32>
    %631 = vector.broadcast %630 : vector<1x20xf32> to vector<2x20xf32>
    %632 = arith.addf %628, %631 : vector<2x20xf32>
    %c0_495 = arith.constant 0 : index
    %c1_496 = arith.constant 1 : index
    %c0_497 = arith.constant 0 : index
    %c0_498 = arith.constant 0 : index
    %633 = vector.load %arg4[%c0_495, %c1_496, %c0_497, %c0_498] : memref<3x4x40x20xf32, #tpu.memory_space<vmem>>, vector<1x1x40x20xf32>
    %634 = vector.shape_cast %633 : vector<1x1x40x20xf32> to vector<40x20xf32>
    %cst_499 = arith.constant dense<0.000000e+00> : vector<2x20xf32>
    %635 = tpu.matmul %625, %634, %cst_499 {dimension_numbers = #tpu.dot_dimension_numbers<[1], [0], [0], [1], [0, 0, 1, 1], [], []>} : vector<2x40xf32>, vector<40x20xf32>, vector<2x20xf32> -> vector<2x20xf32>
    %c0_500 = arith.constant 0 : index
    %c1_501 = arith.constant 1 : index
    %c0_502 = arith.constant 0 : index
    %c0_503 = arith.constant 0 : index
    %636 = vector.load %arg5[%c0_500, %c1_501, %c0_502, %c0_503] : memref<3x4x1x20xf32, #tpu.memory_space<vmem>>, vector<1x1x1x20xf32>
    %637 = vector.shape_cast %636 : vector<1x1x1x20xf32> to vector<1x20xf32>
    %638 = vector.broadcast %637 : vector<1x20xf32> to vector<2x20xf32>
    %639 = arith.addf %635, %638 : vector<2x20xf32>
    %c0_504 = arith.constant 0 : index
    %c2_505 = arith.constant 2 : index
    %c0_506 = arith.constant 0 : index
    %c0_507 = arith.constant 0 : index
    %640 = vector.load %arg4[%c0_504, %c2_505, %c0_506, %c0_507] : memref<3x4x40x20xf32, #tpu.memory_space<vmem>>, vector<1x1x40x20xf32>
    %641 = vector.shape_cast %640 : vector<1x1x40x20xf32> to vector<40x20xf32>
    %cst_508 = arith.constant dense<0.000000e+00> : vector<2x20xf32>
    %642 = tpu.matmul %625, %641, %cst_508 {dimension_numbers = #tpu.dot_dimension_numbers<[1], [0], [0], [1], [0, 0, 1, 1], [], []>} : vector<2x40xf32>, vector<40x20xf32>, vector<2x20xf32> -> vector<2x20xf32>
    %c0_509 = arith.constant 0 : index
    %c2_510 = arith.constant 2 : index
    %c0_511 = arith.constant 0 : index
    %c0_512 = arith.constant 0 : index
    %643 = vector.load %arg5[%c0_509, %c2_510, %c0_511, %c0_512] : memref<3x4x1x20xf32, #tpu.memory_space<vmem>>, vector<1x1x1x20xf32>
    %644 = vector.shape_cast %643 : vector<1x1x1x20xf32> to vector<1x20xf32>
    %645 = vector.broadcast %644 : vector<1x20xf32> to vector<2x20xf32>
    %646 = arith.addf %642, %645 : vector<2x20xf32>
    %c0_513 = arith.constant 0 : index
    %c3_514 = arith.constant 3 : index
    %c0_515 = arith.constant 0 : index
    %c0_516 = arith.constant 0 : index
    %647 = vector.load %arg4[%c0_513, %c3_514, %c0_515, %c0_516] : memref<3x4x40x20xf32, #tpu.memory_space<vmem>>, vector<1x1x40x20xf32>
    %648 = vector.shape_cast %647 : vector<1x1x40x20xf32> to vector<40x20xf32>
    %cst_517 = arith.constant dense<0.000000e+00> : vector<2x20xf32>
    %649 = tpu.matmul %625, %648, %cst_517 {dimension_numbers = #tpu.dot_dimension_numbers<[1], [0], [0], [1], [0, 0, 1, 1], [], []>} : vector<2x40xf32>, vector<40x20xf32>, vector<2x20xf32> -> vector<2x20xf32>
    %c0_518 = arith.constant 0 : index
    %c3_519 = arith.constant 3 : index
    %c0_520 = arith.constant 0 : index
    %c0_521 = arith.constant 0 : index
    %650 = vector.load %arg5[%c0_518, %c3_519, %c0_520, %c0_521] : memref<3x4x1x20xf32, #tpu.memory_space<vmem>>, vector<1x1x1x20xf32>
    %651 = vector.shape_cast %650 : vector<1x1x1x20xf32> to vector<1x20xf32>
    %652 = vector.broadcast %651 : vector<1x20xf32> to vector<2x20xf32>
    %653 = arith.addf %649, %652 : vector<2x20xf32>
    %654 = arith.negf %632 : vector<2x20xf32>
    %655 = math.exp %654 : vector<2x20xf32>
    %cst_522 = arith.constant 1.000000e+00 : f32
    %656 = vector.broadcast %cst_522 : f32 to vector<2x20xf32>
    %657 = arith.addf %656, %655 : vector<2x20xf32>
    %658 = arith.divf %656, %657 : vector<2x20xf32>
    %659 = arith.negf %639 : vector<2x20xf32>
    %660 = math.exp %659 : vector<2x20xf32>
    %cst_523 = arith.constant 1.000000e+00 : f32
    %661 = vector.broadcast %cst_523 : f32 to vector<2x20xf32>
    %662 = arith.addf %661, %660 : vector<2x20xf32>
    %663 = arith.divf %661, %662 : vector<2x20xf32>
    %664 = math.tanh %646 : vector<2x20xf32>
    %665 = arith.negf %653 : vector<2x20xf32>
    %666 = math.exp %665 : vector<2x20xf32>
    %cst_524 = arith.constant 1.000000e+00 : f32
    %667 = vector.broadcast %cst_524 : f32 to vector<2x20xf32>
    %668 = arith.addf %667, %666 : vector<2x20xf32>
    %669 = arith.divf %667, %668 : vector<2x20xf32>
    %670 = arith.mulf %663, %521 : vector<2x20xf32>
    %671 = arith.mulf %658, %664 : vector<2x20xf32>
    %672 = arith.addf %670, %671 : vector<2x20xf32>
    %673 = math.tanh %672 : vector<2x20xf32>
    %674 = arith.mulf %669, %673 : vector<2x20xf32>
    %675 = tpu.concatenate %674, %573 in 1 : vector<2x20xf32>, vector<2x20xf32> -> vector<2x40xf32>
    %c1_525 = arith.constant 1 : index
    %c0_526 = arith.constant 0 : index
    %c0_527 = arith.constant 0 : index
    %c0_528 = arith.constant 0 : index
    %676 = vector.load %arg4[%c1_525, %c0_526, %c0_527, %c0_528] : memref<3x4x40x20xf32, #tpu.memory_space<vmem>>, vector<1x1x40x20xf32>
    %677 = vector.shape_cast %676 : vector<1x1x40x20xf32> to vector<40x20xf32>
    %cst_529 = arith.constant dense<0.000000e+00> : vector<2x20xf32>
    %678 = tpu.matmul %675, %677, %cst_529 {dimension_numbers = #tpu.dot_dimension_numbers<[1], [0], [0], [1], [0, 0, 1, 1], [], []>} : vector<2x40xf32>, vector<40x20xf32>, vector<2x20xf32> -> vector<2x20xf32>
    %c1_530 = arith.constant 1 : index
    %c0_531 = arith.constant 0 : index
    %c0_532 = arith.constant 0 : index
    %c0_533 = arith.constant 0 : index
    %679 = vector.load %arg5[%c1_530, %c0_531, %c0_532, %c0_533] : memref<3x4x1x20xf32, #tpu.memory_space<vmem>>, vector<1x1x1x20xf32>
    %680 = vector.shape_cast %679 : vector<1x1x1x20xf32> to vector<1x20xf32>
    %681 = vector.broadcast %680 : vector<1x20xf32> to vector<2x20xf32>
    %682 = arith.addf %678, %681 : vector<2x20xf32>
    %c1_534 = arith.constant 1 : index
    %c1_535 = arith.constant 1 : index
    %c0_536 = arith.constant 0 : index
    %c0_537 = arith.constant 0 : index
    %683 = vector.load %arg4[%c1_534, %c1_535, %c0_536, %c0_537] : memref<3x4x40x20xf32, #tpu.memory_space<vmem>>, vector<1x1x40x20xf32>
    %684 = vector.shape_cast %683 : vector<1x1x40x20xf32> to vector<40x20xf32>
    %cst_538 = arith.constant dense<0.000000e+00> : vector<2x20xf32>
    %685 = tpu.matmul %675, %684, %cst_538 {dimension_numbers = #tpu.dot_dimension_numbers<[1], [0], [0], [1], [0, 0, 1, 1], [], []>} : vector<2x40xf32>, vector<40x20xf32>, vector<2x20xf32> -> vector<2x20xf32>
    %c1_539 = arith.constant 1 : index
    %c1_540 = arith.constant 1 : index
    %c0_541 = arith.constant 0 : index
    %c0_542 = arith.constant 0 : index
    %686 = vector.load %arg5[%c1_539, %c1_540, %c0_541, %c0_542] : memref<3x4x1x20xf32, #tpu.memory_space<vmem>>, vector<1x1x1x20xf32>
    %687 = vector.shape_cast %686 : vector<1x1x1x20xf32> to vector<1x20xf32>
    %688 = vector.broadcast %687 : vector<1x20xf32> to vector<2x20xf32>
    %689 = arith.addf %685, %688 : vector<2x20xf32>
    %c1_543 = arith.constant 1 : index
    %c2_544 = arith.constant 2 : index
    %c0_545 = arith.constant 0 : index
    %c0_546 = arith.constant 0 : index
    %690 = vector.load %arg4[%c1_543, %c2_544, %c0_545, %c0_546] : memref<3x4x40x20xf32, #tpu.memory_space<vmem>>, vector<1x1x40x20xf32>
    %691 = vector.shape_cast %690 : vector<1x1x40x20xf32> to vector<40x20xf32>
    %cst_547 = arith.constant dense<0.000000e+00> : vector<2x20xf32>
    %692 = tpu.matmul %675, %691, %cst_547 {dimension_numbers = #tpu.dot_dimension_numbers<[1], [0], [0], [1], [0, 0, 1, 1], [], []>} : vector<2x40xf32>, vector<40x20xf32>, vector<2x20xf32> -> vector<2x20xf32>
    %c1_548 = arith.constant 1 : index
    %c2_549 = arith.constant 2 : index
    %c0_550 = arith.constant 0 : index
    %c0_551 = arith.constant 0 : index
    %693 = vector.load %arg5[%c1_548, %c2_549, %c0_550, %c0_551] : memref<3x4x1x20xf32, #tpu.memory_space<vmem>>, vector<1x1x1x20xf32>
    %694 = vector.shape_cast %693 : vector<1x1x1x20xf32> to vector<1x20xf32>
    %695 = vector.broadcast %694 : vector<1x20xf32> to vector<2x20xf32>
    %696 = arith.addf %692, %695 : vector<2x20xf32>
    %c1_552 = arith.constant 1 : index
    %c3_553 = arith.constant 3 : index
    %c0_554 = arith.constant 0 : index
    %c0_555 = arith.constant 0 : index
    %697 = vector.load %arg4[%c1_552, %c3_553, %c0_554, %c0_555] : memref<3x4x40x20xf32, #tpu.memory_space<vmem>>, vector<1x1x40x20xf32>
    %698 = vector.shape_cast %697 : vector<1x1x40x20xf32> to vector<40x20xf32>
    %cst_556 = arith.constant dense<0.000000e+00> : vector<2x20xf32>
    %699 = tpu.matmul %675, %698, %cst_556 {dimension_numbers = #tpu.dot_dimension_numbers<[1], [0], [0], [1], [0, 0, 1, 1], [], []>} : vector<2x40xf32>, vector<40x20xf32>, vector<2x20xf32> -> vector<2x20xf32>
    %c1_557 = arith.constant 1 : index
    %c3_558 = arith.constant 3 : index
    %c0_559 = arith.constant 0 : index
    %c0_560 = arith.constant 0 : index
    %700 = vector.load %arg5[%c1_557, %c3_558, %c0_559, %c0_560] : memref<3x4x1x20xf32, #tpu.memory_space<vmem>>, vector<1x1x1x20xf32>
    %701 = vector.shape_cast %700 : vector<1x1x1x20xf32> to vector<1x20xf32>
    %702 = vector.broadcast %701 : vector<1x20xf32> to vector<2x20xf32>
    %703 = arith.addf %699, %702 : vector<2x20xf32>
    %704 = arith.negf %682 : vector<2x20xf32>
    %705 = math.exp %704 : vector<2x20xf32>
    %cst_561 = arith.constant 1.000000e+00 : f32
    %706 = vector.broadcast %cst_561 : f32 to vector<2x20xf32>
    %707 = arith.addf %706, %705 : vector<2x20xf32>
    %708 = arith.divf %706, %707 : vector<2x20xf32>
    %709 = arith.negf %689 : vector<2x20xf32>
    %710 = math.exp %709 : vector<2x20xf32>
    %cst_562 = arith.constant 1.000000e+00 : f32
    %711 = vector.broadcast %cst_562 : f32 to vector<2x20xf32>
    %712 = arith.addf %711, %710 : vector<2x20xf32>
    %713 = arith.divf %711, %712 : vector<2x20xf32>
    %714 = math.tanh %696 : vector<2x20xf32>
    %715 = arith.negf %703 : vector<2x20xf32>
    %716 = math.exp %715 : vector<2x20xf32>
    %cst_563 = arith.constant 1.000000e+00 : f32
    %717 = vector.broadcast %cst_563 : f32 to vector<2x20xf32>
    %718 = arith.addf %717, %716 : vector<2x20xf32>
    %719 = arith.divf %717, %718 : vector<2x20xf32>
    %720 = arith.mulf %713, %571 : vector<2x20xf32>
    %721 = arith.mulf %708, %714 : vector<2x20xf32>
    %722 = arith.addf %720, %721 : vector<2x20xf32>
    %723 = math.tanh %722 : vector<2x20xf32>
    %724 = arith.mulf %719, %723 : vector<2x20xf32>
    %725 = tpu.concatenate %724, %623 in 1 : vector<2x20xf32>, vector<2x20xf32> -> vector<2x40xf32>
    %c2_564 = arith.constant 2 : index
    %c0_565 = arith.constant 0 : index
    %c0_566 = arith.constant 0 : index
    %c0_567 = arith.constant 0 : index
    %726 = vector.load %arg4[%c2_564, %c0_565, %c0_566, %c0_567] : memref<3x4x40x20xf32, #tpu.memory_space<vmem>>, vector<1x1x40x20xf32>
    %727 = vector.shape_cast %726 : vector<1x1x40x20xf32> to vector<40x20xf32>
    %cst_568 = arith.constant dense<0.000000e+00> : vector<2x20xf32>
    %728 = tpu.matmul %725, %727, %cst_568 {dimension_numbers = #tpu.dot_dimension_numbers<[1], [0], [0], [1], [0, 0, 1, 1], [], []>} : vector<2x40xf32>, vector<40x20xf32>, vector<2x20xf32> -> vector<2x20xf32>
    %c2_569 = arith.constant 2 : index
    %c0_570 = arith.constant 0 : index
    %c0_571 = arith.constant 0 : index
    %c0_572 = arith.constant 0 : index
    %729 = vector.load %arg5[%c2_569, %c0_570, %c0_571, %c0_572] : memref<3x4x1x20xf32, #tpu.memory_space<vmem>>, vector<1x1x1x20xf32>
    %730 = vector.shape_cast %729 : vector<1x1x1x20xf32> to vector<1x20xf32>
    %731 = vector.broadcast %730 : vector<1x20xf32> to vector<2x20xf32>
    %732 = arith.addf %728, %731 : vector<2x20xf32>
    %c2_573 = arith.constant 2 : index
    %c1_574 = arith.constant 1 : index
    %c0_575 = arith.constant 0 : index
    %c0_576 = arith.constant 0 : index
    %733 = vector.load %arg4[%c2_573, %c1_574, %c0_575, %c0_576] : memref<3x4x40x20xf32, #tpu.memory_space<vmem>>, vector<1x1x40x20xf32>
    %734 = vector.shape_cast %733 : vector<1x1x40x20xf32> to vector<40x20xf32>
    %cst_577 = arith.constant dense<0.000000e+00> : vector<2x20xf32>
    %735 = tpu.matmul %725, %734, %cst_577 {dimension_numbers = #tpu.dot_dimension_numbers<[1], [0], [0], [1], [0, 0, 1, 1], [], []>} : vector<2x40xf32>, vector<40x20xf32>, vector<2x20xf32> -> vector<2x20xf32>
    %c2_578 = arith.constant 2 : index
    %c1_579 = arith.constant 1 : index
    %c0_580 = arith.constant 0 : index
    %c0_581 = arith.constant 0 : index
    %736 = vector.load %arg5[%c2_578, %c1_579, %c0_580, %c0_581] : memref<3x4x1x20xf32, #tpu.memory_space<vmem>>, vector<1x1x1x20xf32>
    %737 = vector.shape_cast %736 : vector<1x1x1x20xf32> to vector<1x20xf32>
    %738 = vector.broadcast %737 : vector<1x20xf32> to vector<2x20xf32>
    %739 = arith.addf %735, %738 : vector<2x20xf32>
    %c2_582 = arith.constant 2 : index
    %c2_583 = arith.constant 2 : index
    %c0_584 = arith.constant 0 : index
    %c0_585 = arith.constant 0 : index
    %740 = vector.load %arg4[%c2_582, %c2_583, %c0_584, %c0_585] : memref<3x4x40x20xf32, #tpu.memory_space<vmem>>, vector<1x1x40x20xf32>
    %741 = vector.shape_cast %740 : vector<1x1x40x20xf32> to vector<40x20xf32>
    %cst_586 = arith.constant dense<0.000000e+00> : vector<2x20xf32>
    %742 = tpu.matmul %725, %741, %cst_586 {dimension_numbers = #tpu.dot_dimension_numbers<[1], [0], [0], [1], [0, 0, 1, 1], [], []>} : vector<2x40xf32>, vector<40x20xf32>, vector<2x20xf32> -> vector<2x20xf32>
    %c2_587 = arith.constant 2 : index
    %c2_588 = arith.constant 2 : index
    %c0_589 = arith.constant 0 : index
    %c0_590 = arith.constant 0 : index
    %743 = vector.load %arg5[%c2_587, %c2_588, %c0_589, %c0_590] : memref<3x4x1x20xf32, #tpu.memory_space<vmem>>, vector<1x1x1x20xf32>
    %744 = vector.shape_cast %743 : vector<1x1x1x20xf32> to vector<1x20xf32>
    %745 = vector.broadcast %744 : vector<1x20xf32> to vector<2x20xf32>
    %746 = arith.addf %742, %745 : vector<2x20xf32>
    %c2_591 = arith.constant 2 : index
    %c3_592 = arith.constant 3 : index
    %c0_593 = arith.constant 0 : index
    %c0_594 = arith.constant 0 : index
    %747 = vector.load %arg4[%c2_591, %c3_592, %c0_593, %c0_594] : memref<3x4x40x20xf32, #tpu.memory_space<vmem>>, vector<1x1x40x20xf32>
    %748 = vector.shape_cast %747 : vector<1x1x40x20xf32> to vector<40x20xf32>
    %cst_595 = arith.constant dense<0.000000e+00> : vector<2x20xf32>
    %749 = tpu.matmul %725, %748, %cst_595 {dimension_numbers = #tpu.dot_dimension_numbers<[1], [0], [0], [1], [0, 0, 1, 1], [], []>} : vector<2x40xf32>, vector<40x20xf32>, vector<2x20xf32> -> vector<2x20xf32>
    %c2_596 = arith.constant 2 : index
    %c3_597 = arith.constant 3 : index
    %c0_598 = arith.constant 0 : index
    %c0_599 = arith.constant 0 : index
    %750 = vector.load %arg5[%c2_596, %c3_597, %c0_598, %c0_599] : memref<3x4x1x20xf32, #tpu.memory_space<vmem>>, vector<1x1x1x20xf32>
    %751 = vector.shape_cast %750 : vector<1x1x1x20xf32> to vector<1x20xf32>
    %752 = vector.broadcast %751 : vector<1x20xf32> to vector<2x20xf32>
    %753 = arith.addf %749, %752 : vector<2x20xf32>
    %754 = arith.negf %732 : vector<2x20xf32>
    %755 = math.exp %754 : vector<2x20xf32>
    %cst_600 = arith.constant 1.000000e+00 : f32
    %756 = vector.broadcast %cst_600 : f32 to vector<2x20xf32>
    %757 = arith.addf %756, %755 : vector<2x20xf32>
    %758 = arith.divf %756, %757 : vector<2x20xf32>
    %759 = arith.negf %739 : vector<2x20xf32>
    %760 = math.exp %759 : vector<2x20xf32>
    %cst_601 = arith.constant 1.000000e+00 : f32
    %761 = vector.broadcast %cst_601 : f32 to vector<2x20xf32>
    %762 = arith.addf %761, %760 : vector<2x20xf32>
    %763 = arith.divf %761, %762 : vector<2x20xf32>
    %764 = math.tanh %746 : vector<2x20xf32>
    %765 = arith.negf %753 : vector<2x20xf32>
    %766 = math.exp %765 : vector<2x20xf32>
    %cst_602 = arith.constant 1.000000e+00 : f32
    %767 = vector.broadcast %cst_602 : f32 to vector<2x20xf32>
    %768 = arith.addf %767, %766 : vector<2x20xf32>
    %769 = arith.divf %767, %768 : vector<2x20xf32>
    %770 = arith.mulf %763, %621 : vector<2x20xf32>
    %771 = arith.mulf %758, %764 : vector<2x20xf32>
    %772 = arith.addf %770, %771 : vector<2x20xf32>
    %773 = math.tanh %772 : vector<2x20xf32>
    %774 = arith.mulf %769, %773 : vector<2x20xf32>
    %775 = vector.extract_strided_slice %7 {offsets = [10, 0], sizes = [2, 20], strides = [1, 1]} : vector<16x20xf32> to vector<2x20xf32>
    %776 = tpu.concatenate %775, %674 in 1 : vector<2x20xf32>, vector<2x20xf32> -> vector<2x40xf32>
    %c0_603 = arith.constant 0 : index
    %c0_604 = arith.constant 0 : index
    %c0_605 = arith.constant 0 : index
    %c0_606 = arith.constant 0 : index
    %777 = vector.load %arg4[%c0_603, %c0_604, %c0_605, %c0_606] : memref<3x4x40x20xf32, #tpu.memory_space<vmem>>, vector<1x1x40x20xf32>
    %778 = vector.shape_cast %777 : vector<1x1x40x20xf32> to vector<40x20xf32>
    %cst_607 = arith.constant dense<0.000000e+00> : vector<2x20xf32>
    %779 = tpu.matmul %776, %778, %cst_607 {dimension_numbers = #tpu.dot_dimension_numbers<[1], [0], [0], [1], [0, 0, 1, 1], [], []>} : vector<2x40xf32>, vector<40x20xf32>, vector<2x20xf32> -> vector<2x20xf32>
    %c0_608 = arith.constant 0 : index
    %c0_609 = arith.constant 0 : index
    %c0_610 = arith.constant 0 : index
    %c0_611 = arith.constant 0 : index
    %780 = vector.load %arg5[%c0_608, %c0_609, %c0_610, %c0_611] : memref<3x4x1x20xf32, #tpu.memory_space<vmem>>, vector<1x1x1x20xf32>
    %781 = vector.shape_cast %780 : vector<1x1x1x20xf32> to vector<1x20xf32>
    %782 = vector.broadcast %781 : vector<1x20xf32> to vector<2x20xf32>
    %783 = arith.addf %779, %782 : vector<2x20xf32>
    %c0_612 = arith.constant 0 : index
    %c1_613 = arith.constant 1 : index
    %c0_614 = arith.constant 0 : index
    %c0_615 = arith.constant 0 : index
    %784 = vector.load %arg4[%c0_612, %c1_613, %c0_614, %c0_615] : memref<3x4x40x20xf32, #tpu.memory_space<vmem>>, vector<1x1x40x20xf32>
    %785 = vector.shape_cast %784 : vector<1x1x40x20xf32> to vector<40x20xf32>
    %cst_616 = arith.constant dense<0.000000e+00> : vector<2x20xf32>
    %786 = tpu.matmul %776, %785, %cst_616 {dimension_numbers = #tpu.dot_dimension_numbers<[1], [0], [0], [1], [0, 0, 1, 1], [], []>} : vector<2x40xf32>, vector<40x20xf32>, vector<2x20xf32> -> vector<2x20xf32>
    %c0_617 = arith.constant 0 : index
    %c1_618 = arith.constant 1 : index
    %c0_619 = arith.constant 0 : index
    %c0_620 = arith.constant 0 : index
    %787 = vector.load %arg5[%c0_617, %c1_618, %c0_619, %c0_620] : memref<3x4x1x20xf32, #tpu.memory_space<vmem>>, vector<1x1x1x20xf32>
    %788 = vector.shape_cast %787 : vector<1x1x1x20xf32> to vector<1x20xf32>
    %789 = vector.broadcast %788 : vector<1x20xf32> to vector<2x20xf32>
    %790 = arith.addf %786, %789 : vector<2x20xf32>
    %c0_621 = arith.constant 0 : index
    %c2_622 = arith.constant 2 : index
    %c0_623 = arith.constant 0 : index
    %c0_624 = arith.constant 0 : index
    %791 = vector.load %arg4[%c0_621, %c2_622, %c0_623, %c0_624] : memref<3x4x40x20xf32, #tpu.memory_space<vmem>>, vector<1x1x40x20xf32>
    %792 = vector.shape_cast %791 : vector<1x1x40x20xf32> to vector<40x20xf32>
    %cst_625 = arith.constant dense<0.000000e+00> : vector<2x20xf32>
    %793 = tpu.matmul %776, %792, %cst_625 {dimension_numbers = #tpu.dot_dimension_numbers<[1], [0], [0], [1], [0, 0, 1, 1], [], []>} : vector<2x40xf32>, vector<40x20xf32>, vector<2x20xf32> -> vector<2x20xf32>
    %c0_626 = arith.constant 0 : index
    %c2_627 = arith.constant 2 : index
    %c0_628 = arith.constant 0 : index
    %c0_629 = arith.constant 0 : index
    %794 = vector.load %arg5[%c0_626, %c2_627, %c0_628, %c0_629] : memref<3x4x1x20xf32, #tpu.memory_space<vmem>>, vector<1x1x1x20xf32>
    %795 = vector.shape_cast %794 : vector<1x1x1x20xf32> to vector<1x20xf32>
    %796 = vector.broadcast %795 : vector<1x20xf32> to vector<2x20xf32>
    %797 = arith.addf %793, %796 : vector<2x20xf32>
    %c0_630 = arith.constant 0 : index
    %c3_631 = arith.constant 3 : index
    %c0_632 = arith.constant 0 : index
    %c0_633 = arith.constant 0 : index
    %798 = vector.load %arg4[%c0_630, %c3_631, %c0_632, %c0_633] : memref<3x4x40x20xf32, #tpu.memory_space<vmem>>, vector<1x1x40x20xf32>
    %799 = vector.shape_cast %798 : vector<1x1x40x20xf32> to vector<40x20xf32>
    %cst_634 = arith.constant dense<0.000000e+00> : vector<2x20xf32>
    %800 = tpu.matmul %776, %799, %cst_634 {dimension_numbers = #tpu.dot_dimension_numbers<[1], [0], [0], [1], [0, 0, 1, 1], [], []>} : vector<2x40xf32>, vector<40x20xf32>, vector<2x20xf32> -> vector<2x20xf32>
    %c0_635 = arith.constant 0 : index
    %c3_636 = arith.constant 3 : index
    %c0_637 = arith.constant 0 : index
    %c0_638 = arith.constant 0 : index
    %801 = vector.load %arg5[%c0_635, %c3_636, %c0_637, %c0_638] : memref<3x4x1x20xf32, #tpu.memory_space<vmem>>, vector<1x1x1x20xf32>
    %802 = vector.shape_cast %801 : vector<1x1x1x20xf32> to vector<1x20xf32>
    %803 = vector.broadcast %802 : vector<1x20xf32> to vector<2x20xf32>
    %804 = arith.addf %800, %803 : vector<2x20xf32>
    %805 = arith.negf %783 : vector<2x20xf32>
    %806 = math.exp %805 : vector<2x20xf32>
    %cst_639 = arith.constant 1.000000e+00 : f32
    %807 = vector.broadcast %cst_639 : f32 to vector<2x20xf32>
    %808 = arith.addf %807, %806 : vector<2x20xf32>
    %809 = arith.divf %807, %808 : vector<2x20xf32>
    %810 = arith.negf %790 : vector<2x20xf32>
    %811 = math.exp %810 : vector<2x20xf32>
    %cst_640 = arith.constant 1.000000e+00 : f32
    %812 = vector.broadcast %cst_640 : f32 to vector<2x20xf32>
    %813 = arith.addf %812, %811 : vector<2x20xf32>
    %814 = arith.divf %812, %813 : vector<2x20xf32>
    %815 = math.tanh %797 : vector<2x20xf32>
    %816 = arith.negf %804 : vector<2x20xf32>
    %817 = math.exp %816 : vector<2x20xf32>
    %cst_641 = arith.constant 1.000000e+00 : f32
    %818 = vector.broadcast %cst_641 : f32 to vector<2x20xf32>
    %819 = arith.addf %818, %817 : vector<2x20xf32>
    %820 = arith.divf %818, %819 : vector<2x20xf32>
    %821 = arith.mulf %814, %672 : vector<2x20xf32>
    %822 = arith.mulf %809, %815 : vector<2x20xf32>
    %823 = arith.addf %821, %822 : vector<2x20xf32>
    %824 = math.tanh %823 : vector<2x20xf32>
    %825 = arith.mulf %820, %824 : vector<2x20xf32>
    %826 = tpu.concatenate %825, %724 in 1 : vector<2x20xf32>, vector<2x20xf32> -> vector<2x40xf32>
    %c1_642 = arith.constant 1 : index
    %c0_643 = arith.constant 0 : index
    %c0_644 = arith.constant 0 : index
    %c0_645 = arith.constant 0 : index
    %827 = vector.load %arg4[%c1_642, %c0_643, %c0_644, %c0_645] : memref<3x4x40x20xf32, #tpu.memory_space<vmem>>, vector<1x1x40x20xf32>
    %828 = vector.shape_cast %827 : vector<1x1x40x20xf32> to vector<40x20xf32>
    %cst_646 = arith.constant dense<0.000000e+00> : vector<2x20xf32>
    %829 = tpu.matmul %826, %828, %cst_646 {dimension_numbers = #tpu.dot_dimension_numbers<[1], [0], [0], [1], [0, 0, 1, 1], [], []>} : vector<2x40xf32>, vector<40x20xf32>, vector<2x20xf32> -> vector<2x20xf32>
    %c1_647 = arith.constant 1 : index
    %c0_648 = arith.constant 0 : index
    %c0_649 = arith.constant 0 : index
    %c0_650 = arith.constant 0 : index
    %830 = vector.load %arg5[%c1_647, %c0_648, %c0_649, %c0_650] : memref<3x4x1x20xf32, #tpu.memory_space<vmem>>, vector<1x1x1x20xf32>
    %831 = vector.shape_cast %830 : vector<1x1x1x20xf32> to vector<1x20xf32>
    %832 = vector.broadcast %831 : vector<1x20xf32> to vector<2x20xf32>
    %833 = arith.addf %829, %832 : vector<2x20xf32>
    %c1_651 = arith.constant 1 : index
    %c1_652 = arith.constant 1 : index
    %c0_653 = arith.constant 0 : index
    %c0_654 = arith.constant 0 : index
    %834 = vector.load %arg4[%c1_651, %c1_652, %c0_653, %c0_654] : memref<3x4x40x20xf32, #tpu.memory_space<vmem>>, vector<1x1x40x20xf32>
    %835 = vector.shape_cast %834 : vector<1x1x40x20xf32> to vector<40x20xf32>
    %cst_655 = arith.constant dense<0.000000e+00> : vector<2x20xf32>
    %836 = tpu.matmul %826, %835, %cst_655 {dimension_numbers = #tpu.dot_dimension_numbers<[1], [0], [0], [1], [0, 0, 1, 1], [], []>} : vector<2x40xf32>, vector<40x20xf32>, vector<2x20xf32> -> vector<2x20xf32>
    %c1_656 = arith.constant 1 : index
    %c1_657 = arith.constant 1 : index
    %c0_658 = arith.constant 0 : index
    %c0_659 = arith.constant 0 : index
    %837 = vector.load %arg5[%c1_656, %c1_657, %c0_658, %c0_659] : memref<3x4x1x20xf32, #tpu.memory_space<vmem>>, vector<1x1x1x20xf32>
    %838 = vector.shape_cast %837 : vector<1x1x1x20xf32> to vector<1x20xf32>
    %839 = vector.broadcast %838 : vector<1x20xf32> to vector<2x20xf32>
    %840 = arith.addf %836, %839 : vector<2x20xf32>
    %c1_660 = arith.constant 1 : index
    %c2_661 = arith.constant 2 : index
    %c0_662 = arith.constant 0 : index
    %c0_663 = arith.constant 0 : index
    %841 = vector.load %arg4[%c1_660, %c2_661, %c0_662, %c0_663] : memref<3x4x40x20xf32, #tpu.memory_space<vmem>>, vector<1x1x40x20xf32>
    %842 = vector.shape_cast %841 : vector<1x1x40x20xf32> to vector<40x20xf32>
    %cst_664 = arith.constant dense<0.000000e+00> : vector<2x20xf32>
    %843 = tpu.matmul %826, %842, %cst_664 {dimension_numbers = #tpu.dot_dimension_numbers<[1], [0], [0], [1], [0, 0, 1, 1], [], []>} : vector<2x40xf32>, vector<40x20xf32>, vector<2x20xf32> -> vector<2x20xf32>
    %c1_665 = arith.constant 1 : index
    %c2_666 = arith.constant 2 : index
    %c0_667 = arith.constant 0 : index
    %c0_668 = arith.constant 0 : index
    %844 = vector.load %arg5[%c1_665, %c2_666, %c0_667, %c0_668] : memref<3x4x1x20xf32, #tpu.memory_space<vmem>>, vector<1x1x1x20xf32>
    %845 = vector.shape_cast %844 : vector<1x1x1x20xf32> to vector<1x20xf32>
    %846 = vector.broadcast %845 : vector<1x20xf32> to vector<2x20xf32>
    %847 = arith.addf %843, %846 : vector<2x20xf32>
    %c1_669 = arith.constant 1 : index
    %c3_670 = arith.constant 3 : index
    %c0_671 = arith.constant 0 : index
    %c0_672 = arith.constant 0 : index
    %848 = vector.load %arg4[%c1_669, %c3_670, %c0_671, %c0_672] : memref<3x4x40x20xf32, #tpu.memory_space<vmem>>, vector<1x1x40x20xf32>
    %849 = vector.shape_cast %848 : vector<1x1x40x20xf32> to vector<40x20xf32>
    %cst_673 = arith.constant dense<0.000000e+00> : vector<2x20xf32>
    %850 = tpu.matmul %826, %849, %cst_673 {dimension_numbers = #tpu.dot_dimension_numbers<[1], [0], [0], [1], [0, 0, 1, 1], [], []>} : vector<2x40xf32>, vector<40x20xf32>, vector<2x20xf32> -> vector<2x20xf32>
    %c1_674 = arith.constant 1 : index
    %c3_675 = arith.constant 3 : index
    %c0_676 = arith.constant 0 : index
    %c0_677 = arith.constant 0 : index
    %851 = vector.load %arg5[%c1_674, %c3_675, %c0_676, %c0_677] : memref<3x4x1x20xf32, #tpu.memory_space<vmem>>, vector<1x1x1x20xf32>
    %852 = vector.shape_cast %851 : vector<1x1x1x20xf32> to vector<1x20xf32>
    %853 = vector.broadcast %852 : vector<1x20xf32> to vector<2x20xf32>
    %854 = arith.addf %850, %853 : vector<2x20xf32>
    %855 = arith.negf %833 : vector<2x20xf32>
    %856 = math.exp %855 : vector<2x20xf32>
    %cst_678 = arith.constant 1.000000e+00 : f32
    %857 = vector.broadcast %cst_678 : f32 to vector<2x20xf32>
    %858 = arith.addf %857, %856 : vector<2x20xf32>
    %859 = arith.divf %857, %858 : vector<2x20xf32>
    %860 = arith.negf %840 : vector<2x20xf32>
    %861 = math.exp %860 : vector<2x20xf32>
    %cst_679 = arith.constant 1.000000e+00 : f32
    %862 = vector.broadcast %cst_679 : f32 to vector<2x20xf32>
    %863 = arith.addf %862, %861 : vector<2x20xf32>
    %864 = arith.divf %862, %863 : vector<2x20xf32>
    %865 = math.tanh %847 : vector<2x20xf32>
    %866 = arith.negf %854 : vector<2x20xf32>
    %867 = math.exp %866 : vector<2x20xf32>
    %cst_680 = arith.constant 1.000000e+00 : f32
    %868 = vector.broadcast %cst_680 : f32 to vector<2x20xf32>
    %869 = arith.addf %868, %867 : vector<2x20xf32>
    %870 = arith.divf %868, %869 : vector<2x20xf32>
    %871 = arith.mulf %864, %722 : vector<2x20xf32>
    %872 = arith.mulf %859, %865 : vector<2x20xf32>
    %873 = arith.addf %871, %872 : vector<2x20xf32>
    %874 = math.tanh %873 : vector<2x20xf32>
    %875 = arith.mulf %870, %874 : vector<2x20xf32>
    %876 = tpu.concatenate %875, %774 in 1 : vector<2x20xf32>, vector<2x20xf32> -> vector<2x40xf32>
    %c2_681 = arith.constant 2 : index
    %c0_682 = arith.constant 0 : index
    %c0_683 = arith.constant 0 : index
    %c0_684 = arith.constant 0 : index
    %877 = vector.load %arg4[%c2_681, %c0_682, %c0_683, %c0_684] : memref<3x4x40x20xf32, #tpu.memory_space<vmem>>, vector<1x1x40x20xf32>
    %878 = vector.shape_cast %877 : vector<1x1x40x20xf32> to vector<40x20xf32>
    %cst_685 = arith.constant dense<0.000000e+00> : vector<2x20xf32>
    %879 = tpu.matmul %876, %878, %cst_685 {dimension_numbers = #tpu.dot_dimension_numbers<[1], [0], [0], [1], [0, 0, 1, 1], [], []>} : vector<2x40xf32>, vector<40x20xf32>, vector<2x20xf32> -> vector<2x20xf32>
    %c2_686 = arith.constant 2 : index
    %c0_687 = arith.constant 0 : index
    %c0_688 = arith.constant 0 : index
    %c0_689 = arith.constant 0 : index
    %880 = vector.load %arg5[%c2_686, %c0_687, %c0_688, %c0_689] : memref<3x4x1x20xf32, #tpu.memory_space<vmem>>, vector<1x1x1x20xf32>
    %881 = vector.shape_cast %880 : vector<1x1x1x20xf32> to vector<1x20xf32>
    %882 = vector.broadcast %881 : vector<1x20xf32> to vector<2x20xf32>
    %883 = arith.addf %879, %882 : vector<2x20xf32>
    %c2_690 = arith.constant 2 : index
    %c1_691 = arith.constant 1 : index
    %c0_692 = arith.constant 0 : index
    %c0_693 = arith.constant 0 : index
    %884 = vector.load %arg4[%c2_690, %c1_691, %c0_692, %c0_693] : memref<3x4x40x20xf32, #tpu.memory_space<vmem>>, vector<1x1x40x20xf32>
    %885 = vector.shape_cast %884 : vector<1x1x40x20xf32> to vector<40x20xf32>
    %cst_694 = arith.constant dense<0.000000e+00> : vector<2x20xf32>
    %886 = tpu.matmul %876, %885, %cst_694 {dimension_numbers = #tpu.dot_dimension_numbers<[1], [0], [0], [1], [0, 0, 1, 1], [], []>} : vector<2x40xf32>, vector<40x20xf32>, vector<2x20xf32> -> vector<2x20xf32>
    %c2_695 = arith.constant 2 : index
    %c1_696 = arith.constant 1 : index
    %c0_697 = arith.constant 0 : index
    %c0_698 = arith.constant 0 : index
    %887 = vector.load %arg5[%c2_695, %c1_696, %c0_697, %c0_698] : memref<3x4x1x20xf32, #tpu.memory_space<vmem>>, vector<1x1x1x20xf32>
    %888 = vector.shape_cast %887 : vector<1x1x1x20xf32> to vector<1x20xf32>
    %889 = vector.broadcast %888 : vector<1x20xf32> to vector<2x20xf32>
    %890 = arith.addf %886, %889 : vector<2x20xf32>
    %c2_699 = arith.constant 2 : index
    %c2_700 = arith.constant 2 : index
    %c0_701 = arith.constant 0 : index
    %c0_702 = arith.constant 0 : index
    %891 = vector.load %arg4[%c2_699, %c2_700, %c0_701, %c0_702] : memref<3x4x40x20xf32, #tpu.memory_space<vmem>>, vector<1x1x40x20xf32>
    %892 = vector.shape_cast %891 : vector<1x1x40x20xf32> to vector<40x20xf32>
    %cst_703 = arith.constant dense<0.000000e+00> : vector<2x20xf32>
    %893 = tpu.matmul %876, %892, %cst_703 {dimension_numbers = #tpu.dot_dimension_numbers<[1], [0], [0], [1], [0, 0, 1, 1], [], []>} : vector<2x40xf32>, vector<40x20xf32>, vector<2x20xf32> -> vector<2x20xf32>
    %c2_704 = arith.constant 2 : index
    %c2_705 = arith.constant 2 : index
    %c0_706 = arith.constant 0 : index
    %c0_707 = arith.constant 0 : index
    %894 = vector.load %arg5[%c2_704, %c2_705, %c0_706, %c0_707] : memref<3x4x1x20xf32, #tpu.memory_space<vmem>>, vector<1x1x1x20xf32>
    %895 = vector.shape_cast %894 : vector<1x1x1x20xf32> to vector<1x20xf32>
    %896 = vector.broadcast %895 : vector<1x20xf32> to vector<2x20xf32>
    %897 = arith.addf %893, %896 : vector<2x20xf32>
    %c2_708 = arith.constant 2 : index
    %c3_709 = arith.constant 3 : index
    %c0_710 = arith.constant 0 : index
    %c0_711 = arith.constant 0 : index
    %898 = vector.load %arg4[%c2_708, %c3_709, %c0_710, %c0_711] : memref<3x4x40x20xf32, #tpu.memory_space<vmem>>, vector<1x1x40x20xf32>
    %899 = vector.shape_cast %898 : vector<1x1x40x20xf32> to vector<40x20xf32>
    %cst_712 = arith.constant dense<0.000000e+00> : vector<2x20xf32>
    %900 = tpu.matmul %876, %899, %cst_712 {dimension_numbers = #tpu.dot_dimension_numbers<[1], [0], [0], [1], [0, 0, 1, 1], [], []>} : vector<2x40xf32>, vector<40x20xf32>, vector<2x20xf32> -> vector<2x20xf32>
    %c2_713 = arith.constant 2 : index
    %c3_714 = arith.constant 3 : index
    %c0_715 = arith.constant 0 : index
    %c0_716 = arith.constant 0 : index
    %901 = vector.load %arg5[%c2_713, %c3_714, %c0_715, %c0_716] : memref<3x4x1x20xf32, #tpu.memory_space<vmem>>, vector<1x1x1x20xf32>
    %902 = vector.shape_cast %901 : vector<1x1x1x20xf32> to vector<1x20xf32>
    %903 = vector.broadcast %902 : vector<1x20xf32> to vector<2x20xf32>
    %904 = arith.addf %900, %903 : vector<2x20xf32>
    %905 = arith.negf %883 : vector<2x20xf32>
    %906 = math.exp %905 : vector<2x20xf32>
    %cst_717 = arith.constant 1.000000e+00 : f32
    %907 = vector.broadcast %cst_717 : f32 to vector<2x20xf32>
    %908 = arith.addf %907, %906 : vector<2x20xf32>
    %909 = arith.divf %907, %908 : vector<2x20xf32>
    %910 = arith.negf %890 : vector<2x20xf32>
    %911 = math.exp %910 : vector<2x20xf32>
    %cst_718 = arith.constant 1.000000e+00 : f32
    %912 = vector.broadcast %cst_718 : f32 to vector<2x20xf32>
    %913 = arith.addf %912, %911 : vector<2x20xf32>
    %914 = arith.divf %912, %913 : vector<2x20xf32>
    %915 = math.tanh %897 : vector<2x20xf32>
    %916 = arith.negf %904 : vector<2x20xf32>
    %917 = math.exp %916 : vector<2x20xf32>
    %cst_719 = arith.constant 1.000000e+00 : f32
    %918 = vector.broadcast %cst_719 : f32 to vector<2x20xf32>
    %919 = arith.addf %918, %917 : vector<2x20xf32>
    %920 = arith.divf %918, %919 : vector<2x20xf32>
    %921 = arith.mulf %914, %772 : vector<2x20xf32>
    %922 = arith.mulf %909, %915 : vector<2x20xf32>
    %923 = arith.addf %921, %922 : vector<2x20xf32>
    %924 = math.tanh %923 : vector<2x20xf32>
    %925 = arith.mulf %920, %924 : vector<2x20xf32>
    %926 = vector.extract_strided_slice %7 {offsets = [12, 0], sizes = [2, 20], strides = [1, 1]} : vector<16x20xf32> to vector<2x20xf32>
    %927 = tpu.concatenate %926, %825 in 1 : vector<2x20xf32>, vector<2x20xf32> -> vector<2x40xf32>
    %c0_720 = arith.constant 0 : index
    %c0_721 = arith.constant 0 : index
    %c0_722 = arith.constant 0 : index
    %c0_723 = arith.constant 0 : index
    %928 = vector.load %arg4[%c0_720, %c0_721, %c0_722, %c0_723] : memref<3x4x40x20xf32, #tpu.memory_space<vmem>>, vector<1x1x40x20xf32>
    %929 = vector.shape_cast %928 : vector<1x1x40x20xf32> to vector<40x20xf32>
    %cst_724 = arith.constant dense<0.000000e+00> : vector<2x20xf32>
    %930 = tpu.matmul %927, %929, %cst_724 {dimension_numbers = #tpu.dot_dimension_numbers<[1], [0], [0], [1], [0, 0, 1, 1], [], []>} : vector<2x40xf32>, vector<40x20xf32>, vector<2x20xf32> -> vector<2x20xf32>
    %c0_725 = arith.constant 0 : index
    %c0_726 = arith.constant 0 : index
    %c0_727 = arith.constant 0 : index
    %c0_728 = arith.constant 0 : index
    %931 = vector.load %arg5[%c0_725, %c0_726, %c0_727, %c0_728] : memref<3x4x1x20xf32, #tpu.memory_space<vmem>>, vector<1x1x1x20xf32>
    %932 = vector.shape_cast %931 : vector<1x1x1x20xf32> to vector<1x20xf32>
    %933 = vector.broadcast %932 : vector<1x20xf32> to vector<2x20xf32>
    %934 = arith.addf %930, %933 : vector<2x20xf32>
    %c0_729 = arith.constant 0 : index
    %c1_730 = arith.constant 1 : index
    %c0_731 = arith.constant 0 : index
    %c0_732 = arith.constant 0 : index
    %935 = vector.load %arg4[%c0_729, %c1_730, %c0_731, %c0_732] : memref<3x4x40x20xf32, #tpu.memory_space<vmem>>, vector<1x1x40x20xf32>
    %936 = vector.shape_cast %935 : vector<1x1x40x20xf32> to vector<40x20xf32>
    %cst_733 = arith.constant dense<0.000000e+00> : vector<2x20xf32>
    %937 = tpu.matmul %927, %936, %cst_733 {dimension_numbers = #tpu.dot_dimension_numbers<[1], [0], [0], [1], [0, 0, 1, 1], [], []>} : vector<2x40xf32>, vector<40x20xf32>, vector<2x20xf32> -> vector<2x20xf32>
    %c0_734 = arith.constant 0 : index
    %c1_735 = arith.constant 1 : index
    %c0_736 = arith.constant 0 : index
    %c0_737 = arith.constant 0 : index
    %938 = vector.load %arg5[%c0_734, %c1_735, %c0_736, %c0_737] : memref<3x4x1x20xf32, #tpu.memory_space<vmem>>, vector<1x1x1x20xf32>
    %939 = vector.shape_cast %938 : vector<1x1x1x20xf32> to vector<1x20xf32>
    %940 = vector.broadcast %939 : vector<1x20xf32> to vector<2x20xf32>
    %941 = arith.addf %937, %940 : vector<2x20xf32>
    %c0_738 = arith.constant 0 : index
    %c2_739 = arith.constant 2 : index
    %c0_740 = arith.constant 0 : index
    %c0_741 = arith.constant 0 : index
    %942 = vector.load %arg4[%c0_738, %c2_739, %c0_740, %c0_741] : memref<3x4x40x20xf32, #tpu.memory_space<vmem>>, vector<1x1x40x20xf32>
    %943 = vector.shape_cast %942 : vector<1x1x40x20xf32> to vector<40x20xf32>
    %cst_742 = arith.constant dense<0.000000e+00> : vector<2x20xf32>
    %944 = tpu.matmul %927, %943, %cst_742 {dimension_numbers = #tpu.dot_dimension_numbers<[1], [0], [0], [1], [0, 0, 1, 1], [], []>} : vector<2x40xf32>, vector<40x20xf32>, vector<2x20xf32> -> vector<2x20xf32>
    %c0_743 = arith.constant 0 : index
    %c2_744 = arith.constant 2 : index
    %c0_745 = arith.constant 0 : index
    %c0_746 = arith.constant 0 : index
    %945 = vector.load %arg5[%c0_743, %c2_744, %c0_745, %c0_746] : memref<3x4x1x20xf32, #tpu.memory_space<vmem>>, vector<1x1x1x20xf32>
    %946 = vector.shape_cast %945 : vector<1x1x1x20xf32> to vector<1x20xf32>
    %947 = vector.broadcast %946 : vector<1x20xf32> to vector<2x20xf32>
    %948 = arith.addf %944, %947 : vector<2x20xf32>
    %c0_747 = arith.constant 0 : index
    %c3_748 = arith.constant 3 : index
    %c0_749 = arith.constant 0 : index
    %c0_750 = arith.constant 0 : index
    %949 = vector.load %arg4[%c0_747, %c3_748, %c0_749, %c0_750] : memref<3x4x40x20xf32, #tpu.memory_space<vmem>>, vector<1x1x40x20xf32>
    %950 = vector.shape_cast %949 : vector<1x1x40x20xf32> to vector<40x20xf32>
    %cst_751 = arith.constant dense<0.000000e+00> : vector<2x20xf32>
    %951 = tpu.matmul %927, %950, %cst_751 {dimension_numbers = #tpu.dot_dimension_numbers<[1], [0], [0], [1], [0, 0, 1, 1], [], []>} : vector<2x40xf32>, vector<40x20xf32>, vector<2x20xf32> -> vector<2x20xf32>
    %c0_752 = arith.constant 0 : index
    %c3_753 = arith.constant 3 : index
    %c0_754 = arith.constant 0 : index
    %c0_755 = arith.constant 0 : index
    %952 = vector.load %arg5[%c0_752, %c3_753, %c0_754, %c0_755] : memref<3x4x1x20xf32, #tpu.memory_space<vmem>>, vector<1x1x1x20xf32>
    %953 = vector.shape_cast %952 : vector<1x1x1x20xf32> to vector<1x20xf32>
    %954 = vector.broadcast %953 : vector<1x20xf32> to vector<2x20xf32>
    %955 = arith.addf %951, %954 : vector<2x20xf32>
    %956 = arith.negf %934 : vector<2x20xf32>
    %957 = math.exp %956 : vector<2x20xf32>
    %cst_756 = arith.constant 1.000000e+00 : f32
    %958 = vector.broadcast %cst_756 : f32 to vector<2x20xf32>
    %959 = arith.addf %958, %957 : vector<2x20xf32>
    %960 = arith.divf %958, %959 : vector<2x20xf32>
    %961 = arith.negf %941 : vector<2x20xf32>
    %962 = math.exp %961 : vector<2x20xf32>
    %cst_757 = arith.constant 1.000000e+00 : f32
    %963 = vector.broadcast %cst_757 : f32 to vector<2x20xf32>
    %964 = arith.addf %963, %962 : vector<2x20xf32>
    %965 = arith.divf %963, %964 : vector<2x20xf32>
    %966 = math.tanh %948 : vector<2x20xf32>
    %967 = arith.negf %955 : vector<2x20xf32>
    %968 = math.exp %967 : vector<2x20xf32>
    %cst_758 = arith.constant 1.000000e+00 : f32
    %969 = vector.broadcast %cst_758 : f32 to vector<2x20xf32>
    %970 = arith.addf %969, %968 : vector<2x20xf32>
    %971 = arith.divf %969, %970 : vector<2x20xf32>
    %972 = arith.mulf %965, %823 : vector<2x20xf32>
    %973 = arith.mulf %960, %966 : vector<2x20xf32>
    %974 = arith.addf %972, %973 : vector<2x20xf32>
    %975 = math.tanh %974 : vector<2x20xf32>
    %976 = arith.mulf %971, %975 : vector<2x20xf32>
    %977 = tpu.concatenate %976, %875 in 1 : vector<2x20xf32>, vector<2x20xf32> -> vector<2x40xf32>
    %c1_759 = arith.constant 1 : index
    %c0_760 = arith.constant 0 : index
    %c0_761 = arith.constant 0 : index
    %c0_762 = arith.constant 0 : index
    %978 = vector.load %arg4[%c1_759, %c0_760, %c0_761, %c0_762] : memref<3x4x40x20xf32, #tpu.memory_space<vmem>>, vector<1x1x40x20xf32>
    %979 = vector.shape_cast %978 : vector<1x1x40x20xf32> to vector<40x20xf32>
    %cst_763 = arith.constant dense<0.000000e+00> : vector<2x20xf32>
    %980 = tpu.matmul %977, %979, %cst_763 {dimension_numbers = #tpu.dot_dimension_numbers<[1], [0], [0], [1], [0, 0, 1, 1], [], []>} : vector<2x40xf32>, vector<40x20xf32>, vector<2x20xf32> -> vector<2x20xf32>
    %c1_764 = arith.constant 1 : index
    %c0_765 = arith.constant 0 : index
    %c0_766 = arith.constant 0 : index
    %c0_767 = arith.constant 0 : index
    %981 = vector.load %arg5[%c1_764, %c0_765, %c0_766, %c0_767] : memref<3x4x1x20xf32, #tpu.memory_space<vmem>>, vector<1x1x1x20xf32>
    %982 = vector.shape_cast %981 : vector<1x1x1x20xf32> to vector<1x20xf32>
    %983 = vector.broadcast %982 : vector<1x20xf32> to vector<2x20xf32>
    %984 = arith.addf %980, %983 : vector<2x20xf32>
    %c1_768 = arith.constant 1 : index
    %c1_769 = arith.constant 1 : index
    %c0_770 = arith.constant 0 : index
    %c0_771 = arith.constant 0 : index
    %985 = vector.load %arg4[%c1_768, %c1_769, %c0_770, %c0_771] : memref<3x4x40x20xf32, #tpu.memory_space<vmem>>, vector<1x1x40x20xf32>
    %986 = vector.shape_cast %985 : vector<1x1x40x20xf32> to vector<40x20xf32>
    %cst_772 = arith.constant dense<0.000000e+00> : vector<2x20xf32>
    %987 = tpu.matmul %977, %986, %cst_772 {dimension_numbers = #tpu.dot_dimension_numbers<[1], [0], [0], [1], [0, 0, 1, 1], [], []>} : vector<2x40xf32>, vector<40x20xf32>, vector<2x20xf32> -> vector<2x20xf32>
    %c1_773 = arith.constant 1 : index
    %c1_774 = arith.constant 1 : index
    %c0_775 = arith.constant 0 : index
    %c0_776 = arith.constant 0 : index
    %988 = vector.load %arg5[%c1_773, %c1_774, %c0_775, %c0_776] : memref<3x4x1x20xf32, #tpu.memory_space<vmem>>, vector<1x1x1x20xf32>
    %989 = vector.shape_cast %988 : vector<1x1x1x20xf32> to vector<1x20xf32>
    %990 = vector.broadcast %989 : vector<1x20xf32> to vector<2x20xf32>
    %991 = arith.addf %987, %990 : vector<2x20xf32>
    %c1_777 = arith.constant 1 : index
    %c2_778 = arith.constant 2 : index
    %c0_779 = arith.constant 0 : index
    %c0_780 = arith.constant 0 : index
    %992 = vector.load %arg4[%c1_777, %c2_778, %c0_779, %c0_780] : memref<3x4x40x20xf32, #tpu.memory_space<vmem>>, vector<1x1x40x20xf32>
    %993 = vector.shape_cast %992 : vector<1x1x40x20xf32> to vector<40x20xf32>
    %cst_781 = arith.constant dense<0.000000e+00> : vector<2x20xf32>
    %994 = tpu.matmul %977, %993, %cst_781 {dimension_numbers = #tpu.dot_dimension_numbers<[1], [0], [0], [1], [0, 0, 1, 1], [], []>} : vector<2x40xf32>, vector<40x20xf32>, vector<2x20xf32> -> vector<2x20xf32>
    %c1_782 = arith.constant 1 : index
    %c2_783 = arith.constant 2 : index
    %c0_784 = arith.constant 0 : index
    %c0_785 = arith.constant 0 : index
    %995 = vector.load %arg5[%c1_782, %c2_783, %c0_784, %c0_785] : memref<3x4x1x20xf32, #tpu.memory_space<vmem>>, vector<1x1x1x20xf32>
    %996 = vector.shape_cast %995 : vector<1x1x1x20xf32> to vector<1x20xf32>
    %997 = vector.broadcast %996 : vector<1x20xf32> to vector<2x20xf32>
    %998 = arith.addf %994, %997 : vector<2x20xf32>
    %c1_786 = arith.constant 1 : index
    %c3_787 = arith.constant 3 : index
    %c0_788 = arith.constant 0 : index
    %c0_789 = arith.constant 0 : index
    %999 = vector.load %arg4[%c1_786, %c3_787, %c0_788, %c0_789] : memref<3x4x40x20xf32, #tpu.memory_space<vmem>>, vector<1x1x40x20xf32>
    %1000 = vector.shape_cast %999 : vector<1x1x40x20xf32> to vector<40x20xf32>
    %cst_790 = arith.constant dense<0.000000e+00> : vector<2x20xf32>
    %1001 = tpu.matmul %977, %1000, %cst_790 {dimension_numbers = #tpu.dot_dimension_numbers<[1], [0], [0], [1], [0, 0, 1, 1], [], []>} : vector<2x40xf32>, vector<40x20xf32>, vector<2x20xf32> -> vector<2x20xf32>
    %c1_791 = arith.constant 1 : index
    %c3_792 = arith.constant 3 : index
    %c0_793 = arith.constant 0 : index
    %c0_794 = arith.constant 0 : index
    %1002 = vector.load %arg5[%c1_791, %c3_792, %c0_793, %c0_794] : memref<3x4x1x20xf32, #tpu.memory_space<vmem>>, vector<1x1x1x20xf32>
    %1003 = vector.shape_cast %1002 : vector<1x1x1x20xf32> to vector<1x20xf32>
    %1004 = vector.broadcast %1003 : vector<1x20xf32> to vector<2x20xf32>
    %1005 = arith.addf %1001, %1004 : vector<2x20xf32>
    %1006 = arith.negf %984 : vector<2x20xf32>
    %1007 = math.exp %1006 : vector<2x20xf32>
    %cst_795 = arith.constant 1.000000e+00 : f32
    %1008 = vector.broadcast %cst_795 : f32 to vector<2x20xf32>
    %1009 = arith.addf %1008, %1007 : vector<2x20xf32>
    %1010 = arith.divf %1008, %1009 : vector<2x20xf32>
    %1011 = arith.negf %991 : vector<2x20xf32>
    %1012 = math.exp %1011 : vector<2x20xf32>
    %cst_796 = arith.constant 1.000000e+00 : f32
    %1013 = vector.broadcast %cst_796 : f32 to vector<2x20xf32>
    %1014 = arith.addf %1013, %1012 : vector<2x20xf32>
    %1015 = arith.divf %1013, %1014 : vector<2x20xf32>
    %1016 = math.tanh %998 : vector<2x20xf32>
    %1017 = arith.negf %1005 : vector<2x20xf32>
    %1018 = math.exp %1017 : vector<2x20xf32>
    %cst_797 = arith.constant 1.000000e+00 : f32
    %1019 = vector.broadcast %cst_797 : f32 to vector<2x20xf32>
    %1020 = arith.addf %1019, %1018 : vector<2x20xf32>
    %1021 = arith.divf %1019, %1020 : vector<2x20xf32>
    %1022 = arith.mulf %1015, %873 : vector<2x20xf32>
    %1023 = arith.mulf %1010, %1016 : vector<2x20xf32>
    %1024 = arith.addf %1022, %1023 : vector<2x20xf32>
    %1025 = math.tanh %1024 : vector<2x20xf32>
    %1026 = arith.mulf %1021, %1025 : vector<2x20xf32>
    %1027 = tpu.concatenate %1026, %925 in 1 : vector<2x20xf32>, vector<2x20xf32> -> vector<2x40xf32>
    %c2_798 = arith.constant 2 : index
    %c0_799 = arith.constant 0 : index
    %c0_800 = arith.constant 0 : index
    %c0_801 = arith.constant 0 : index
    %1028 = vector.load %arg4[%c2_798, %c0_799, %c0_800, %c0_801] : memref<3x4x40x20xf32, #tpu.memory_space<vmem>>, vector<1x1x40x20xf32>
    %1029 = vector.shape_cast %1028 : vector<1x1x40x20xf32> to vector<40x20xf32>
    %cst_802 = arith.constant dense<0.000000e+00> : vector<2x20xf32>
    %1030 = tpu.matmul %1027, %1029, %cst_802 {dimension_numbers = #tpu.dot_dimension_numbers<[1], [0], [0], [1], [0, 0, 1, 1], [], []>} : vector<2x40xf32>, vector<40x20xf32>, vector<2x20xf32> -> vector<2x20xf32>
    %c2_803 = arith.constant 2 : index
    %c0_804 = arith.constant 0 : index
    %c0_805 = arith.constant 0 : index
    %c0_806 = arith.constant 0 : index
    %1031 = vector.load %arg5[%c2_803, %c0_804, %c0_805, %c0_806] : memref<3x4x1x20xf32, #tpu.memory_space<vmem>>, vector<1x1x1x20xf32>
    %1032 = vector.shape_cast %1031 : vector<1x1x1x20xf32> to vector<1x20xf32>
    %1033 = vector.broadcast %1032 : vector<1x20xf32> to vector<2x20xf32>
    %1034 = arith.addf %1030, %1033 : vector<2x20xf32>
    %c2_807 = arith.constant 2 : index
    %c1_808 = arith.constant 1 : index
    %c0_809 = arith.constant 0 : index
    %c0_810 = arith.constant 0 : index
    %1035 = vector.load %arg4[%c2_807, %c1_808, %c0_809, %c0_810] : memref<3x4x40x20xf32, #tpu.memory_space<vmem>>, vector<1x1x40x20xf32>
    %1036 = vector.shape_cast %1035 : vector<1x1x40x20xf32> to vector<40x20xf32>
    %cst_811 = arith.constant dense<0.000000e+00> : vector<2x20xf32>
    %1037 = tpu.matmul %1027, %1036, %cst_811 {dimension_numbers = #tpu.dot_dimension_numbers<[1], [0], [0], [1], [0, 0, 1, 1], [], []>} : vector<2x40xf32>, vector<40x20xf32>, vector<2x20xf32> -> vector<2x20xf32>
    %c2_812 = arith.constant 2 : index
    %c1_813 = arith.constant 1 : index
    %c0_814 = arith.constant 0 : index
    %c0_815 = arith.constant 0 : index
    %1038 = vector.load %arg5[%c2_812, %c1_813, %c0_814, %c0_815] : memref<3x4x1x20xf32, #tpu.memory_space<vmem>>, vector<1x1x1x20xf32>
    %1039 = vector.shape_cast %1038 : vector<1x1x1x20xf32> to vector<1x20xf32>
    %1040 = vector.broadcast %1039 : vector<1x20xf32> to vector<2x20xf32>
    %1041 = arith.addf %1037, %1040 : vector<2x20xf32>
    %c2_816 = arith.constant 2 : index
    %c2_817 = arith.constant 2 : index
    %c0_818 = arith.constant 0 : index
    %c0_819 = arith.constant 0 : index
    %1042 = vector.load %arg4[%c2_816, %c2_817, %c0_818, %c0_819] : memref<3x4x40x20xf32, #tpu.memory_space<vmem>>, vector<1x1x40x20xf32>
    %1043 = vector.shape_cast %1042 : vector<1x1x40x20xf32> to vector<40x20xf32>
    %cst_820 = arith.constant dense<0.000000e+00> : vector<2x20xf32>
    %1044 = tpu.matmul %1027, %1043, %cst_820 {dimension_numbers = #tpu.dot_dimension_numbers<[1], [0], [0], [1], [0, 0, 1, 1], [], []>} : vector<2x40xf32>, vector<40x20xf32>, vector<2x20xf32> -> vector<2x20xf32>
    %c2_821 = arith.constant 2 : index
    %c2_822 = arith.constant 2 : index
    %c0_823 = arith.constant 0 : index
    %c0_824 = arith.constant 0 : index
    %1045 = vector.load %arg5[%c2_821, %c2_822, %c0_823, %c0_824] : memref<3x4x1x20xf32, #tpu.memory_space<vmem>>, vector<1x1x1x20xf32>
    %1046 = vector.shape_cast %1045 : vector<1x1x1x20xf32> to vector<1x20xf32>
    %1047 = vector.broadcast %1046 : vector<1x20xf32> to vector<2x20xf32>
    %1048 = arith.addf %1044, %1047 : vector<2x20xf32>
    %c2_825 = arith.constant 2 : index
    %c3_826 = arith.constant 3 : index
    %c0_827 = arith.constant 0 : index
    %c0_828 = arith.constant 0 : index
    %1049 = vector.load %arg4[%c2_825, %c3_826, %c0_827, %c0_828] : memref<3x4x40x20xf32, #tpu.memory_space<vmem>>, vector<1x1x40x20xf32>
    %1050 = vector.shape_cast %1049 : vector<1x1x40x20xf32> to vector<40x20xf32>
    %cst_829 = arith.constant dense<0.000000e+00> : vector<2x20xf32>
    %1051 = tpu.matmul %1027, %1050, %cst_829 {dimension_numbers = #tpu.dot_dimension_numbers<[1], [0], [0], [1], [0, 0, 1, 1], [], []>} : vector<2x40xf32>, vector<40x20xf32>, vector<2x20xf32> -> vector<2x20xf32>
    %c2_830 = arith.constant 2 : index
    %c3_831 = arith.constant 3 : index
    %c0_832 = arith.constant 0 : index
    %c0_833 = arith.constant 0 : index
    %1052 = vector.load %arg5[%c2_830, %c3_831, %c0_832, %c0_833] : memref<3x4x1x20xf32, #tpu.memory_space<vmem>>, vector<1x1x1x20xf32>
    %1053 = vector.shape_cast %1052 : vector<1x1x1x20xf32> to vector<1x20xf32>
    %1054 = vector.broadcast %1053 : vector<1x20xf32> to vector<2x20xf32>
    %1055 = arith.addf %1051, %1054 : vector<2x20xf32>
    %1056 = arith.negf %1034 : vector<2x20xf32>
    %1057 = math.exp %1056 : vector<2x20xf32>
    %cst_834 = arith.constant 1.000000e+00 : f32
    %1058 = vector.broadcast %cst_834 : f32 to vector<2x20xf32>
    %1059 = arith.addf %1058, %1057 : vector<2x20xf32>
    %1060 = arith.divf %1058, %1059 : vector<2x20xf32>
    %1061 = arith.negf %1041 : vector<2x20xf32>
    %1062 = math.exp %1061 : vector<2x20xf32>
    %cst_835 = arith.constant 1.000000e+00 : f32
    %1063 = vector.broadcast %cst_835 : f32 to vector<2x20xf32>
    %1064 = arith.addf %1063, %1062 : vector<2x20xf32>
    %1065 = arith.divf %1063, %1064 : vector<2x20xf32>
    %1066 = math.tanh %1048 : vector<2x20xf32>
    %1067 = arith.negf %1055 : vector<2x20xf32>
    %1068 = math.exp %1067 : vector<2x20xf32>
    %cst_836 = arith.constant 1.000000e+00 : f32
    %1069 = vector.broadcast %cst_836 : f32 to vector<2x20xf32>
    %1070 = arith.addf %1069, %1068 : vector<2x20xf32>
    %1071 = arith.divf %1069, %1070 : vector<2x20xf32>
    %1072 = arith.mulf %1065, %923 : vector<2x20xf32>
    %1073 = arith.mulf %1060, %1066 : vector<2x20xf32>
    %1074 = arith.addf %1072, %1073 : vector<2x20xf32>
    %1075 = math.tanh %1074 : vector<2x20xf32>
    %1076 = arith.mulf %1071, %1075 : vector<2x20xf32>
    %1077 = vector.extract_strided_slice %7 {offsets = [14, 0], sizes = [2, 20], strides = [1, 1]} : vector<16x20xf32> to vector<2x20xf32>
    %1078 = tpu.concatenate %1077, %976 in 1 : vector<2x20xf32>, vector<2x20xf32> -> vector<2x40xf32>
    %c0_837 = arith.constant 0 : index
    %c0_838 = arith.constant 0 : index
    %c0_839 = arith.constant 0 : index
    %c0_840 = arith.constant 0 : index
    %1079 = vector.load %arg4[%c0_837, %c0_838, %c0_839, %c0_840] : memref<3x4x40x20xf32, #tpu.memory_space<vmem>>, vector<1x1x40x20xf32>
    %1080 = vector.shape_cast %1079 : vector<1x1x40x20xf32> to vector<40x20xf32>
    %cst_841 = arith.constant dense<0.000000e+00> : vector<2x20xf32>
    %1081 = tpu.matmul %1078, %1080, %cst_841 {dimension_numbers = #tpu.dot_dimension_numbers<[1], [0], [0], [1], [0, 0, 1, 1], [], []>} : vector<2x40xf32>, vector<40x20xf32>, vector<2x20xf32> -> vector<2x20xf32>
    %c0_842 = arith.constant 0 : index
    %c0_843 = arith.constant 0 : index
    %c0_844 = arith.constant 0 : index
    %c0_845 = arith.constant 0 : index
    %1082 = vector.load %arg5[%c0_842, %c0_843, %c0_844, %c0_845] : memref<3x4x1x20xf32, #tpu.memory_space<vmem>>, vector<1x1x1x20xf32>
    %1083 = vector.shape_cast %1082 : vector<1x1x1x20xf32> to vector<1x20xf32>
    %1084 = vector.broadcast %1083 : vector<1x20xf32> to vector<2x20xf32>
    %1085 = arith.addf %1081, %1084 : vector<2x20xf32>
    %c0_846 = arith.constant 0 : index
    %c1_847 = arith.constant 1 : index
    %c0_848 = arith.constant 0 : index
    %c0_849 = arith.constant 0 : index
    %1086 = vector.load %arg4[%c0_846, %c1_847, %c0_848, %c0_849] : memref<3x4x40x20xf32, #tpu.memory_space<vmem>>, vector<1x1x40x20xf32>
    %1087 = vector.shape_cast %1086 : vector<1x1x40x20xf32> to vector<40x20xf32>
    %cst_850 = arith.constant dense<0.000000e+00> : vector<2x20xf32>
    %1088 = tpu.matmul %1078, %1087, %cst_850 {dimension_numbers = #tpu.dot_dimension_numbers<[1], [0], [0], [1], [0, 0, 1, 1], [], []>} : vector<2x40xf32>, vector<40x20xf32>, vector<2x20xf32> -> vector<2x20xf32>
    %c0_851 = arith.constant 0 : index
    %c1_852 = arith.constant 1 : index
    %c0_853 = arith.constant 0 : index
    %c0_854 = arith.constant 0 : index
    %1089 = vector.load %arg5[%c0_851, %c1_852, %c0_853, %c0_854] : memref<3x4x1x20xf32, #tpu.memory_space<vmem>>, vector<1x1x1x20xf32>
    %1090 = vector.shape_cast %1089 : vector<1x1x1x20xf32> to vector<1x20xf32>
    %1091 = vector.broadcast %1090 : vector<1x20xf32> to vector<2x20xf32>
    %1092 = arith.addf %1088, %1091 : vector<2x20xf32>
    %c0_855 = arith.constant 0 : index
    %c2_856 = arith.constant 2 : index
    %c0_857 = arith.constant 0 : index
    %c0_858 = arith.constant 0 : index
    %1093 = vector.load %arg4[%c0_855, %c2_856, %c0_857, %c0_858] : memref<3x4x40x20xf32, #tpu.memory_space<vmem>>, vector<1x1x40x20xf32>
    %1094 = vector.shape_cast %1093 : vector<1x1x40x20xf32> to vector<40x20xf32>
    %cst_859 = arith.constant dense<0.000000e+00> : vector<2x20xf32>
    %1095 = tpu.matmul %1078, %1094, %cst_859 {dimension_numbers = #tpu.dot_dimension_numbers<[1], [0], [0], [1], [0, 0, 1, 1], [], []>} : vector<2x40xf32>, vector<40x20xf32>, vector<2x20xf32> -> vector<2x20xf32>
    %c0_860 = arith.constant 0 : index
    %c2_861 = arith.constant 2 : index
    %c0_862 = arith.constant 0 : index
    %c0_863 = arith.constant 0 : index
    %1096 = vector.load %arg5[%c0_860, %c2_861, %c0_862, %c0_863] : memref<3x4x1x20xf32, #tpu.memory_space<vmem>>, vector<1x1x1x20xf32>
    %1097 = vector.shape_cast %1096 : vector<1x1x1x20xf32> to vector<1x20xf32>
    %1098 = vector.broadcast %1097 : vector<1x20xf32> to vector<2x20xf32>
    %1099 = arith.addf %1095, %1098 : vector<2x20xf32>
    %c0_864 = arith.constant 0 : index
    %c3_865 = arith.constant 3 : index
    %c0_866 = arith.constant 0 : index
    %c0_867 = arith.constant 0 : index
    %1100 = vector.load %arg4[%c0_864, %c3_865, %c0_866, %c0_867] : memref<3x4x40x20xf32, #tpu.memory_space<vmem>>, vector<1x1x40x20xf32>
    %1101 = vector.shape_cast %1100 : vector<1x1x40x20xf32> to vector<40x20xf32>
    %cst_868 = arith.constant dense<0.000000e+00> : vector<2x20xf32>
    %1102 = tpu.matmul %1078, %1101, %cst_868 {dimension_numbers = #tpu.dot_dimension_numbers<[1], [0], [0], [1], [0, 0, 1, 1], [], []>} : vector<2x40xf32>, vector<40x20xf32>, vector<2x20xf32> -> vector<2x20xf32>
    %c0_869 = arith.constant 0 : index
    %c3_870 = arith.constant 3 : index
    %c0_871 = arith.constant 0 : index
    %c0_872 = arith.constant 0 : index
    %1103 = vector.load %arg5[%c0_869, %c3_870, %c0_871, %c0_872] : memref<3x4x1x20xf32, #tpu.memory_space<vmem>>, vector<1x1x1x20xf32>
    %1104 = vector.shape_cast %1103 : vector<1x1x1x20xf32> to vector<1x20xf32>
    %1105 = vector.broadcast %1104 : vector<1x20xf32> to vector<2x20xf32>
    %1106 = arith.addf %1102, %1105 : vector<2x20xf32>
    %1107 = arith.negf %1085 : vector<2x20xf32>
    %1108 = math.exp %1107 : vector<2x20xf32>
    %cst_873 = arith.constant 1.000000e+00 : f32
    %1109 = vector.broadcast %cst_873 : f32 to vector<2x20xf32>
    %1110 = arith.addf %1109, %1108 : vector<2x20xf32>
    %1111 = arith.divf %1109, %1110 : vector<2x20xf32>
    %1112 = arith.negf %1092 : vector<2x20xf32>
    %1113 = math.exp %1112 : vector<2x20xf32>
    %cst_874 = arith.constant 1.000000e+00 : f32
    %1114 = vector.broadcast %cst_874 : f32 to vector<2x20xf32>
    %1115 = arith.addf %1114, %1113 : vector<2x20xf32>
    %1116 = arith.divf %1114, %1115 : vector<2x20xf32>
    %1117 = math.tanh %1099 : vector<2x20xf32>
    %1118 = arith.negf %1106 : vector<2x20xf32>
    %1119 = math.exp %1118 : vector<2x20xf32>
    %cst_875 = arith.constant 1.000000e+00 : f32
    %1120 = vector.broadcast %cst_875 : f32 to vector<2x20xf32>
    %1121 = arith.addf %1120, %1119 : vector<2x20xf32>
    %1122 = arith.divf %1120, %1121 : vector<2x20xf32>
    %1123 = arith.mulf %1116, %974 : vector<2x20xf32>
    %1124 = arith.mulf %1111, %1117 : vector<2x20xf32>
    %1125 = arith.addf %1123, %1124 : vector<2x20xf32>
    %1126 = math.tanh %1125 : vector<2x20xf32>
    %1127 = arith.mulf %1122, %1126 : vector<2x20xf32>
    %1128 = tpu.concatenate %1127, %1026 in 1 : vector<2x20xf32>, vector<2x20xf32> -> vector<2x40xf32>
    %c1_876 = arith.constant 1 : index
    %c0_877 = arith.constant 0 : index
    %c0_878 = arith.constant 0 : index
    %c0_879 = arith.constant 0 : index
    %1129 = vector.load %arg4[%c1_876, %c0_877, %c0_878, %c0_879] : memref<3x4x40x20xf32, #tpu.memory_space<vmem>>, vector<1x1x40x20xf32>
    %1130 = vector.shape_cast %1129 : vector<1x1x40x20xf32> to vector<40x20xf32>
    %cst_880 = arith.constant dense<0.000000e+00> : vector<2x20xf32>
    %1131 = tpu.matmul %1128, %1130, %cst_880 {dimension_numbers = #tpu.dot_dimension_numbers<[1], [0], [0], [1], [0, 0, 1, 1], [], []>} : vector<2x40xf32>, vector<40x20xf32>, vector<2x20xf32> -> vector<2x20xf32>
    %c1_881 = arith.constant 1 : index
    %c0_882 = arith.constant 0 : index
    %c0_883 = arith.constant 0 : index
    %c0_884 = arith.constant 0 : index
    %1132 = vector.load %arg5[%c1_881, %c0_882, %c0_883, %c0_884] : memref<3x4x1x20xf32, #tpu.memory_space<vmem>>, vector<1x1x1x20xf32>
    %1133 = vector.shape_cast %1132 : vector<1x1x1x20xf32> to vector<1x20xf32>
    %1134 = vector.broadcast %1133 : vector<1x20xf32> to vector<2x20xf32>
    %1135 = arith.addf %1131, %1134 : vector<2x20xf32>
    %c1_885 = arith.constant 1 : index
    %c1_886 = arith.constant 1 : index
    %c0_887 = arith.constant 0 : index
    %c0_888 = arith.constant 0 : index
    %1136 = vector.load %arg4[%c1_885, %c1_886, %c0_887, %c0_888] : memref<3x4x40x20xf32, #tpu.memory_space<vmem>>, vector<1x1x40x20xf32>
    %1137 = vector.shape_cast %1136 : vector<1x1x40x20xf32> to vector<40x20xf32>
    %cst_889 = arith.constant dense<0.000000e+00> : vector<2x20xf32>
    %1138 = tpu.matmul %1128, %1137, %cst_889 {dimension_numbers = #tpu.dot_dimension_numbers<[1], [0], [0], [1], [0, 0, 1, 1], [], []>} : vector<2x40xf32>, vector<40x20xf32>, vector<2x20xf32> -> vector<2x20xf32>
    %c1_890 = arith.constant 1 : index
    %c1_891 = arith.constant 1 : index
    %c0_892 = arith.constant 0 : index
    %c0_893 = arith.constant 0 : index
    %1139 = vector.load %arg5[%c1_890, %c1_891, %c0_892, %c0_893] : memref<3x4x1x20xf32, #tpu.memory_space<vmem>>, vector<1x1x1x20xf32>
    %1140 = vector.shape_cast %1139 : vector<1x1x1x20xf32> to vector<1x20xf32>
    %1141 = vector.broadcast %1140 : vector<1x20xf32> to vector<2x20xf32>
    %1142 = arith.addf %1138, %1141 : vector<2x20xf32>
    %c1_894 = arith.constant 1 : index
    %c2_895 = arith.constant 2 : index
    %c0_896 = arith.constant 0 : index
    %c0_897 = arith.constant 0 : index
    %1143 = vector.load %arg4[%c1_894, %c2_895, %c0_896, %c0_897] : memref<3x4x40x20xf32, #tpu.memory_space<vmem>>, vector<1x1x40x20xf32>
    %1144 = vector.shape_cast %1143 : vector<1x1x40x20xf32> to vector<40x20xf32>
    %cst_898 = arith.constant dense<0.000000e+00> : vector<2x20xf32>
    %1145 = tpu.matmul %1128, %1144, %cst_898 {dimension_numbers = #tpu.dot_dimension_numbers<[1], [0], [0], [1], [0, 0, 1, 1], [], []>} : vector<2x40xf32>, vector<40x20xf32>, vector<2x20xf32> -> vector<2x20xf32>
    %c1_899 = arith.constant 1 : index
    %c2_900 = arith.constant 2 : index
    %c0_901 = arith.constant 0 : index
    %c0_902 = arith.constant 0 : index
    %1146 = vector.load %arg5[%c1_899, %c2_900, %c0_901, %c0_902] : memref<3x4x1x20xf32, #tpu.memory_space<vmem>>, vector<1x1x1x20xf32>
    %1147 = vector.shape_cast %1146 : vector<1x1x1x20xf32> to vector<1x20xf32>
    %1148 = vector.broadcast %1147 : vector<1x20xf32> to vector<2x20xf32>
    %1149 = arith.addf %1145, %1148 : vector<2x20xf32>
    %c1_903 = arith.constant 1 : index
    %c3_904 = arith.constant 3 : index
    %c0_905 = arith.constant 0 : index
    %c0_906 = arith.constant 0 : index
    %1150 = vector.load %arg4[%c1_903, %c3_904, %c0_905, %c0_906] : memref<3x4x40x20xf32, #tpu.memory_space<vmem>>, vector<1x1x40x20xf32>
    %1151 = vector.shape_cast %1150 : vector<1x1x40x20xf32> to vector<40x20xf32>
    %cst_907 = arith.constant dense<0.000000e+00> : vector<2x20xf32>
    %1152 = tpu.matmul %1128, %1151, %cst_907 {dimension_numbers = #tpu.dot_dimension_numbers<[1], [0], [0], [1], [0, 0, 1, 1], [], []>} : vector<2x40xf32>, vector<40x20xf32>, vector<2x20xf32> -> vector<2x20xf32>
    %c1_908 = arith.constant 1 : index
    %c3_909 = arith.constant 3 : index
    %c0_910 = arith.constant 0 : index
    %c0_911 = arith.constant 0 : index
    %1153 = vector.load %arg5[%c1_908, %c3_909, %c0_910, %c0_911] : memref<3x4x1x20xf32, #tpu.memory_space<vmem>>, vector<1x1x1x20xf32>
    %1154 = vector.shape_cast %1153 : vector<1x1x1x20xf32> to vector<1x20xf32>
    %1155 = vector.broadcast %1154 : vector<1x20xf32> to vector<2x20xf32>
    %1156 = arith.addf %1152, %1155 : vector<2x20xf32>
    %1157 = arith.negf %1135 : vector<2x20xf32>
    %1158 = math.exp %1157 : vector<2x20xf32>
    %cst_912 = arith.constant 1.000000e+00 : f32
    %1159 = vector.broadcast %cst_912 : f32 to vector<2x20xf32>
    %1160 = arith.addf %1159, %1158 : vector<2x20xf32>
    %1161 = arith.divf %1159, %1160 : vector<2x20xf32>
    %1162 = arith.negf %1142 : vector<2x20xf32>
    %1163 = math.exp %1162 : vector<2x20xf32>
    %cst_913 = arith.constant 1.000000e+00 : f32
    %1164 = vector.broadcast %cst_913 : f32 to vector<2x20xf32>
    %1165 = arith.addf %1164, %1163 : vector<2x20xf32>
    %1166 = arith.divf %1164, %1165 : vector<2x20xf32>
    %1167 = math.tanh %1149 : vector<2x20xf32>
    %1168 = arith.negf %1156 : vector<2x20xf32>
    %1169 = math.exp %1168 : vector<2x20xf32>
    %cst_914 = arith.constant 1.000000e+00 : f32
    %1170 = vector.broadcast %cst_914 : f32 to vector<2x20xf32>
    %1171 = arith.addf %1170, %1169 : vector<2x20xf32>
    %1172 = arith.divf %1170, %1171 : vector<2x20xf32>
    %1173 = arith.mulf %1166, %1024 : vector<2x20xf32>
    %1174 = arith.mulf %1161, %1167 : vector<2x20xf32>
    %1175 = arith.addf %1173, %1174 : vector<2x20xf32>
    %1176 = math.tanh %1175 : vector<2x20xf32>
    %1177 = arith.mulf %1172, %1176 : vector<2x20xf32>
    %1178 = tpu.concatenate %1177, %1076 in 1 : vector<2x20xf32>, vector<2x20xf32> -> vector<2x40xf32>
    %c2_915 = arith.constant 2 : index
    %c0_916 = arith.constant 0 : index
    %c0_917 = arith.constant 0 : index
    %c0_918 = arith.constant 0 : index
    %1179 = vector.load %arg4[%c2_915, %c0_916, %c0_917, %c0_918] : memref<3x4x40x20xf32, #tpu.memory_space<vmem>>, vector<1x1x40x20xf32>
    %1180 = vector.shape_cast %1179 : vector<1x1x40x20xf32> to vector<40x20xf32>
    %cst_919 = arith.constant dense<0.000000e+00> : vector<2x20xf32>
    %1181 = tpu.matmul %1178, %1180, %cst_919 {dimension_numbers = #tpu.dot_dimension_numbers<[1], [0], [0], [1], [0, 0, 1, 1], [], []>} : vector<2x40xf32>, vector<40x20xf32>, vector<2x20xf32> -> vector<2x20xf32>
    %c2_920 = arith.constant 2 : index
    %c0_921 = arith.constant 0 : index
    %c0_922 = arith.constant 0 : index
    %c0_923 = arith.constant 0 : index
    %1182 = vector.load %arg5[%c2_920, %c0_921, %c0_922, %c0_923] : memref<3x4x1x20xf32, #tpu.memory_space<vmem>>, vector<1x1x1x20xf32>
    %1183 = vector.shape_cast %1182 : vector<1x1x1x20xf32> to vector<1x20xf32>
    %1184 = vector.broadcast %1183 : vector<1x20xf32> to vector<2x20xf32>
    %1185 = arith.addf %1181, %1184 : vector<2x20xf32>
    %c2_924 = arith.constant 2 : index
    %c1_925 = arith.constant 1 : index
    %c0_926 = arith.constant 0 : index
    %c0_927 = arith.constant 0 : index
    %1186 = vector.load %arg4[%c2_924, %c1_925, %c0_926, %c0_927] : memref<3x4x40x20xf32, #tpu.memory_space<vmem>>, vector<1x1x40x20xf32>
    %1187 = vector.shape_cast %1186 : vector<1x1x40x20xf32> to vector<40x20xf32>
    %cst_928 = arith.constant dense<0.000000e+00> : vector<2x20xf32>
    %1188 = tpu.matmul %1178, %1187, %cst_928 {dimension_numbers = #tpu.dot_dimension_numbers<[1], [0], [0], [1], [0, 0, 1, 1], [], []>} : vector<2x40xf32>, vector<40x20xf32>, vector<2x20xf32> -> vector<2x20xf32>
    %c2_929 = arith.constant 2 : index
    %c1_930 = arith.constant 1 : index
    %c0_931 = arith.constant 0 : index
    %c0_932 = arith.constant 0 : index
    %1189 = vector.load %arg5[%c2_929, %c1_930, %c0_931, %c0_932] : memref<3x4x1x20xf32, #tpu.memory_space<vmem>>, vector<1x1x1x20xf32>
    %1190 = vector.shape_cast %1189 : vector<1x1x1x20xf32> to vector<1x20xf32>
    %1191 = vector.broadcast %1190 : vector<1x20xf32> to vector<2x20xf32>
    %1192 = arith.addf %1188, %1191 : vector<2x20xf32>
    %c2_933 = arith.constant 2 : index
    %c2_934 = arith.constant 2 : index
    %c0_935 = arith.constant 0 : index
    %c0_936 = arith.constant 0 : index
    %1193 = vector.load %arg4[%c2_933, %c2_934, %c0_935, %c0_936] : memref<3x4x40x20xf32, #tpu.memory_space<vmem>>, vector<1x1x40x20xf32>
    %1194 = vector.shape_cast %1193 : vector<1x1x40x20xf32> to vector<40x20xf32>
    %cst_937 = arith.constant dense<0.000000e+00> : vector<2x20xf32>
    %1195 = tpu.matmul %1178, %1194, %cst_937 {dimension_numbers = #tpu.dot_dimension_numbers<[1], [0], [0], [1], [0, 0, 1, 1], [], []>} : vector<2x40xf32>, vector<40x20xf32>, vector<2x20xf32> -> vector<2x20xf32>
    %c2_938 = arith.constant 2 : index
    %c2_939 = arith.constant 2 : index
    %c0_940 = arith.constant 0 : index
    %c0_941 = arith.constant 0 : index
    %1196 = vector.load %arg5[%c2_938, %c2_939, %c0_940, %c0_941] : memref<3x4x1x20xf32, #tpu.memory_space<vmem>>, vector<1x1x1x20xf32>
    %1197 = vector.shape_cast %1196 : vector<1x1x1x20xf32> to vector<1x20xf32>
    %1198 = vector.broadcast %1197 : vector<1x20xf32> to vector<2x20xf32>
    %1199 = arith.addf %1195, %1198 : vector<2x20xf32>
    %c2_942 = arith.constant 2 : index
    %c3_943 = arith.constant 3 : index
    %c0_944 = arith.constant 0 : index
    %c0_945 = arith.constant 0 : index
    %1200 = vector.load %arg4[%c2_942, %c3_943, %c0_944, %c0_945] : memref<3x4x40x20xf32, #tpu.memory_space<vmem>>, vector<1x1x40x20xf32>
    %1201 = vector.shape_cast %1200 : vector<1x1x40x20xf32> to vector<40x20xf32>
    %cst_946 = arith.constant dense<0.000000e+00> : vector<2x20xf32>
    %1202 = tpu.matmul %1178, %1201, %cst_946 {dimension_numbers = #tpu.dot_dimension_numbers<[1], [0], [0], [1], [0, 0, 1, 1], [], []>} : vector<2x40xf32>, vector<40x20xf32>, vector<2x20xf32> -> vector<2x20xf32>
    %c2_947 = arith.constant 2 : index
    %c3_948 = arith.constant 3 : index
    %c0_949 = arith.constant 0 : index
    %c0_950 = arith.constant 0 : index
    %1203 = vector.load %arg5[%c2_947, %c3_948, %c0_949, %c0_950] : memref<3x4x1x20xf32, #tpu.memory_space<vmem>>, vector<1x1x1x20xf32>
    %1204 = vector.shape_cast %1203 : vector<1x1x1x20xf32> to vector<1x20xf32>
    %1205 = vector.broadcast %1204 : vector<1x20xf32> to vector<2x20xf32>
    %1206 = arith.addf %1202, %1205 : vector<2x20xf32>
    %1207 = arith.negf %1185 : vector<2x20xf32>
    %1208 = math.exp %1207 : vector<2x20xf32>
    %cst_951 = arith.constant 1.000000e+00 : f32
    %1209 = vector.broadcast %cst_951 : f32 to vector<2x20xf32>
    %1210 = arith.addf %1209, %1208 : vector<2x20xf32>
    %1211 = arith.divf %1209, %1210 : vector<2x20xf32>
    %1212 = arith.negf %1192 : vector<2x20xf32>
    %1213 = math.exp %1212 : vector<2x20xf32>
    %cst_952 = arith.constant 1.000000e+00 : f32
    %1214 = vector.broadcast %cst_952 : f32 to vector<2x20xf32>
    %1215 = arith.addf %1214, %1213 : vector<2x20xf32>
    %1216 = arith.divf %1214, %1215 : vector<2x20xf32>
    %1217 = math.tanh %1199 : vector<2x20xf32>
    %1218 = arith.negf %1206 : vector<2x20xf32>
    %1219 = math.exp %1218 : vector<2x20xf32>
    %cst_953 = arith.constant 1.000000e+00 : f32
    %1220 = vector.broadcast %cst_953 : f32 to vector<2x20xf32>
    %1221 = arith.addf %1220, %1219 : vector<2x20xf32>
    %1222 = arith.divf %1220, %1221 : vector<2x20xf32>
    %1223 = arith.mulf %1216, %1074 : vector<2x20xf32>
    %1224 = arith.mulf %1211, %1217 : vector<2x20xf32>
    %1225 = arith.addf %1223, %1224 : vector<2x20xf32>
    %1226 = math.tanh %1225 : vector<2x20xf32>
    %1227 = arith.mulf %1222, %1226 : vector<2x20xf32>
    %1228 = tpu.concatenate %170, %321, %472, %623, %774, %925, %1076, %1227 in 0 : vector<2x20xf32>, vector<2x20xf32>, vector<2x20xf32>, vector<2x20xf32>, vector<2x20xf32>, vector<2x20xf32>, vector<2x20xf32>, vector<2x20xf32> -> vector<16x20xf32>
    %c0_954 = arith.constant 0 : index
    %c0_955 = arith.constant 0 : index
    %1229 = vector.load %arg6[%c0_954, %c0_955] : memref<20x128xf32, #tpu.memory_space<vmem>>, vector<20x128xf32>
    %cst_956 = arith.constant dense<0.000000e+00> : vector<16x128xf32>
    %1230 = tpu.matmul %1228, %1229, %cst_956 {dimension_numbers = #tpu.dot_dimension_numbers<[1], [0], [0], [1], [0, 0, 1, 1], [], []>} : vector<16x20xf32>, vector<20x128xf32>, vector<16x128xf32> -> vector<16x128xf32>
    %c0_957 = arith.constant 0 : index
    %c0_958 = arith.constant 0 : index
    %1231 = vector.load %arg7[%c0_957, %c0_958] : memref<1x128xf32, #tpu.memory_space<vmem>>, vector<1x128xf32>
    %1232 = vector.broadcast %1231 : vector<1x128xf32> to vector<16x128xf32>
    %1233 = arith.addf %1230, %1232 : vector<16x128xf32>
    %c0_959 = arith.constant 0 : index
    %c0_960 = arith.constant 0 : index
    %1234 = vector.load %arg8[%c0_959, %c0_960] : memref<16x128xf32, #tpu.memory_space<vmem>>, vector<16x128xf32>
    tpu.vector_store %arg8[%c0_959, %c0_960], %1233 {strides = array<i32>} : memref<16x128xf32, #tpu.memory_space<vmem>>, vector<16x128xf32>,
    %c0_961 = arith.constant 0 : index
    %c0_962 = arith.constant 0 : index
    %c0_963 = arith.constant 0 : index
    %1235 = vector.load %arg9[%c0_961, %c0_962, %c0_963] : memref<3x2x20xf32, #tpu.memory_space<vmem>>, vector<1x2x20xf32>
    %1236 = vector.shape_cast %1235 : vector<1x2x20xf32> to vector<2x20xf32>
    %1237 = vector.shape_cast %1127 : vector<2x20xf32> to vector<1x2x20xf32>
    tpu.vector_store %arg9[%c0_961, %c0_962, %c0_963], %1237 {strides = array<i32>} : memref<3x2x20xf32, #tpu.memory_space<vmem>>, vector<1x2x20xf32>,
    %c0_964 = arith.constant 0 : index
    %c0_965 = arith.constant 0 : index
    %c0_966 = arith.constant 0 : index
    %1238 = vector.load %arg10[%c0_964, %c0_965, %c0_966] : memref<3x2x20xf32, #tpu.memory_space<vmem>>, vector<1x2x20xf32>
    %1239 = vector.shape_cast %1238 : vector<1x2x20xf32> to vector<2x20xf32>
    %1240 = vector.shape_cast %1125 : vector<2x20xf32> to vector<1x2x20xf32>
    tpu.vector_store %arg10[%c0_964, %c0_965, %c0_966], %1240 {strides = array<i32>} : memref<3x2x20xf32, #tpu.memory_space<vmem>>, vector<1x2x20xf32>,
    %c1_967 = arith.constant 1 : index
    %c0_968 = arith.constant 0 : index
    %c0_969 = arith.constant 0 : index
    %1241 = vector.load %arg9[%c1_967, %c0_968, %c0_969] : memref<3x2x20xf32, #tpu.memory_space<vmem>>, vector<1x2x20xf32>
    %1242 = vector.shape_cast %1241 : vector<1x2x20xf32> to vector<2x20xf32>
    %1243 = vector.shape_cast %1177 : vector<2x20xf32> to vector<1x2x20xf32>
    tpu.vector_store %arg9[%c1_967, %c0_968, %c0_969], %1243 {strides = array<i32>} : memref<3x2x20xf32, #tpu.memory_space<vmem>>, vector<1x2x20xf32>,
    %c1_970 = arith.constant 1 : index
    %c0_971 = arith.constant 0 : index
    %c0_972 = arith.constant 0 : index
    %1244 = vector.load %arg10[%c1_970, %c0_971, %c0_972] : memref<3x2x20xf32, #tpu.memory_space<vmem>>, vector<1x2x20xf32>
    %1245 = vector.shape_cast %1244 : vector<1x2x20xf32> to vector<2x20xf32>
    %1246 = vector.shape_cast %1175 : vector<2x20xf32> to vector<1x2x20xf32>
    tpu.vector_store %arg10[%c1_970, %c0_971, %c0_972], %1246 {strides = array<i32>} : memref<3x2x20xf32, #tpu.memory_space<vmem>>, vector<1x2x20xf32>,
    %c2_973 = arith.constant 2 : index
    %c0_974 = arith.constant 0 : index
    %c0_975 = arith.constant 0 : index
    %1247 = vector.load %arg9[%c2_973, %c0_974, %c0_975] : memref<3x2x20xf32, #tpu.memory_space<vmem>>, vector<1x2x20xf32>
    %1248 = vector.shape_cast %1247 : vector<1x2x20xf32> to vector<2x20xf32>
    %1249 = vector.shape_cast %1227 : vector<2x20xf32> to vector<1x2x20xf32>
    tpu.vector_store %arg9[%c2_973, %c0_974, %c0_975], %1249 {strides = array<i32>} : memref<3x2x20xf32, #tpu.memory_space<vmem>>, vector<1x2x20xf32>,
    %c2_976 = arith.constant 2 : index
    %c0_977 = arith.constant 0 : index
    %c0_978 = arith.constant 0 : index
    %1250 = vector.load %arg10[%c2_976, %c0_977, %c0_978] : memref<3x2x20xf32, #tpu.memory_space<vmem>>, vector<1x2x20xf32>
    %1251 = vector.shape_cast %1250 : vector<1x2x20xf32> to vector<2x20xf32>
    %1252 = vector.shape_cast %1225 : vector<2x20xf32> to vector<1x2x20xf32>
    tpu.vector_store %arg10[%c2_976, %c0_977, %c0_978], %1252 {strides = array<i32>} : memref<3x2x20xf32, #tpu.memory_space<vmem>>, vector<1x2x20xf32>,
    return
  }
}

</mosaic_0001>

<bundles_post_ra>
// kernel: tpu_custom_call.1
= control target key start
LH: loop header
LB: loop body
LE: loop exit
PB: predicated region body
PF: predicated region fallthrough
CT: control target
= control target key end

     0   :  { %16 = vsyncpa [#allocation3], 0  ;;  %s14024_s0 = inlined_call_operand.vmem [shape: s32[16,1], index: 0, kind: input, shape index: {}]   ;;  %s14025_s1 = inlined_call_operand.vmem [shape: f32[128,20], index: 1, kind: input, shape index: {}]   ;;  %s14026_s2 = inlined_call_operand.hbm [shape: f32[3,2,20], index: 2, kind: input, shape index: {}, may-alias: {2,9}]   ;;  %s14027_s3 = inlined_call_operand.hbm [shape: f32[3,2,20], index: 3, kind: input, shape index: {}, may-alias: {3,10}]   ;;  %s14028_s4 = inlined_call_operand.vmem [shape: f32[3,4,40,20], index: 4, kind: input, shape index: {}]   ;;  %s14029_s5 = inlined_call_operand.vmem [shape: f32[3,4,1,20], index: 5, kind: input, shape index: {}]   ;;  %s14030_s6 = inlined_call_operand.vmem [shape: f32[20,128], index: 6, kind: input, shape index: {}]   ;;  %s14031_s7 = inlined_call_operand.vmem [shape: f32[1,128], index: 7, kind: input, shape index: {}]   ;;  %s14032_s8 = inlined_call_operand.hbm [shape: f32[16,128], index: 8, kind: output, shape index: {0}]   ;;  %s14033_s9 = inlined_call_operand.hbm [shape: f32[3,2,20], index: 9, kind: output, shape index: {1}, may-alias: {2,9}]   ;;  %s14034_s10 = inlined_call_operand.hbm [shape: f32[3,2,20], index: 10, kind: output, shape index: {2}, may-alias: {3,10}]  }
   0x1   :  { %17 = vsyncpa [#allocation6], 0 }
   0x2   :  { %18 = vsyncpa [#allocation4], 0 }
   0x3   :  { %19 = vsyncpa [#allocation9], 0  ;;  %s10893_s13 = smov [#allocation2]  }
   0x4   :  { %s29_s14 = sshll.u32 %s10893_s13, 4  ;;  %s30_s14 = int_to_ptr.vmem [resolvable:$true] %s29_s14 }
   0x5   :  { %s10793_s15 = scalar_lea.vmem %s30_s14, 96  ;;  %p10798_p1 = scmp.lt.s32.totalorder %s30_s14, %s30_s14 }
   0x6   :  { %p10794_p0 = scmp.ne.s32.totalorder %s30_s14, %s10793_s15  ;;  %p10799_p2 = scmp.lt.s32.totalorder %s10793_s15, %s10793_s15 }
   0x8   :  { %p10800_p3 = por %p10799_p2, %p10798_p1 }
   0xa   :  { %p10801_p4 = pnand %p10800_p3, %p10794_p0 }
   0xc   :  { %10804 = shalt.err (!%p10801_p4)
}
   0xd   :  { %s10894_s16 = smov 32   ;;  %s10895_s17 = smov 2  }
   0xe   :  { %35 = dma.hbm_to_vmem [thread:$0]  %s14026_s2, 96, %s30_s14, [#allocation3], %s10894_s16, %s10894_s16, %s10895_s17  }
   0xf   :  { %s10896_s20 = smov [#allocation5]  }
  0x10   :  { %s41_s21 = sshll.u32 %s10896_s20, 4  ;;  %s42_s21 = int_to_ptr.vmem [resolvable:$true] %s41_s21 }
  0x11   :  { %s10813_s22 = scalar_lea.vmem %s42_s21, 96  ;;  %p10818_p6 = scmp.lt.s32.totalorder %s42_s21, %s42_s21 }
  0x12   :  { %p10814_p5 = scmp.ne.s32.totalorder %s42_s21, %s10813_s22  ;;  %p10819_p7 = scmp.lt.s32.totalorder %s10813_s22, %s10813_s22 }
  0x14   :  { %p10820_p8 = por %p10819_p7, %p10818_p6 }
  0x16   :  { %p10821_p9 = pnand %p10820_p8, %p10814_p5 }
  0x18   :  { %10824 = shalt.err (!%p10821_p9)
}
  0x19   :  { %47 = dma.hbm_to_vmem [thread:$0]  %s14027_s3, 96, %s42_s21, [#allocation6], %s10894_s16, %s10894_s16, %s10895_s17  }
  0x1a   :  { %10885 = dma.done.wait [#allocation3], 96  }
  0x1b   :  { %10886 = vsyncadd [#allocation3], 4294967200 }
  0x1c   :  { %10887 = dma.done.wait [#allocation6], 96  }
  0x1d   :  { %10888 = vsyncadd [#allocation6], 4294967200  ;;  %v10897_v0 = vmov 0   ;;  %v62_v1 = vld [vmem:[%s14024_s0] sm:$0xff]  ;;  %v93_v2 = vld [vmem:[%s14025_s1 + $0x78] sm:$0xff]  ;;  %v14038_v6 = vmov 0.0   ;;  %v64_v24 = vlaneseq }
  0x1e   :  { %10184 = vset.pattern.permute.xlu0 %v10897_v0  ;;  %8878 = vmatprep.subr.mxu0 %v93_v2  ;;  %v92_v3 = vld [vmem:[%s14025_s1 + $0x70] sm:$0xff]  ;;  %v63_v4 = vld [vmem:[%s14024_s0 + $0x8] sm:$0xff]  ;;  %v90_v7 = vld [vmem:[%s14025_s1 + $0x60] sm:$0xff]  ;;  %s10899_s20 = smov 20   ;;  %v10900_v27 = vmov 1.0   ;;  %vm10901_vm2 = vmmov 0  }
  0x1f   :  { %67 = vperm.xlu0 %10184, %v62_v1   ;;  %8879 = vmatpush3.msra.mxu0 %v93_v2  ;;  %v91_v5 = vld [vmem:[%s14025_s1 + $0x68] sm:$0xff]  ;;  %v89_v8 = vld [vmem:[%s14025_s1 + $0x58] sm:$0xff]  ;;  %v169_v9 = vld [vmem:[#allocation2] sm:$0x3]  ;;  %v65_v25 = vand.u32 127, %v64_v24  ;;  %vm183_vm3 = vcmask 162816  }
  0x20   :  { %8880 = vmatprep.subr.mxu0 %v92_v3  ;;  %8913 = vmatprep.subr.mxu1 %v14038_v6  ;;  %v10999_v10 = vld [vmem:[%s14028_s4 + $0x20] sm:$0xff]  ;;  %v11005_v11 = vld [vmem:[%s14028_s4 + $0x18] sm:$0xff]  ;;  %v88_v12 = vld [vmem:[%s14025_s1 + $0x50] sm:$0xff]  ;;  %vm197_vm4 = vcmask 326656   ;;  %vm7860_vm5 = vcmask 1041408   ;;  %vm7862_vm6 = vcmask 1043456  }
  0x21   :  { %8881 = vmatpush3.msra.mxu0 %v92_v3  ;;  %180 = vrot.lane.b32.xlu1 %v169_v9, %s10899_s20  ;;  %v11015_v13 = vld [vmem:[%s14028_s4 + $0x10] sm:$0xff]  ;;  %v87_v14 = vld [vmem:[%s14025_s1 + $0x48] sm:$0xff]  ;;  %v86_v15 = vld [vmem:[%s14025_s1 + $0x40] sm:$0xff]  ;;  %vm7864_vm7 = vcmask 1045504   ;;  %vm7965_vm8 = vcmask 156672  }
  0x22   :  { %8882 = vmatprep.subr.mxu0 %v91_v5  ;;  %8914 = vmatpush3.msra.mxu1 %v10999_v10  ;;  %v85_v16 = vld [vmem:[%s14025_s1 + $0x38] sm:$0xff]  ;;  %v84_v17 = vld [vmem:[%s14025_s1 + $0x30] sm:$0xff]  ;;  %v83_v18 = vld [vmem:[%s14025_s1 + $0x28] sm:$0xff] }
  0x23   :  { %70 = vperm.xlu0 %10184, %v63_v4   ;;  %8883 = vmatpush3.msra.mxu0 %v91_v5  ;;  %v82_v19 = vld [vmem:[%s14025_s1 + $0x20] sm:$0xff]  ;;  %v81_v20 = vld [vmem:[%s14025_s1 + $0x18] sm:$0xff]  ;;  %v80_v21 = vld [vmem:[%s14025_s1 + $0x10] sm:$0xff] }
  0x24   :  { %8884 = vmatprep.subr.mxu0 %v90_v7  ;;  %8915 = vmatprep.subr.mxu1 %v14038_v6  ;;  %v79_v22 = vld [vmem:[%s14025_s1 + $0x8] sm:$0xff]  ;;  %v78_v23 = vld [vmem:[%s14025_s1] sm:$0xff]  ;;  %v11095_v38 = vld [vmem:[%s14028_s4 + $0x38] sm:$0xff] }
  0x25   :  { %8885 = vmatpush3.msra.mxu0 %v90_v7  ;;  %8916 = vmatpush3.msra.mxu1 %v11005_v11  ;;  %v11055_v29 = vld [vmem:[%s14028_s4 + $0x8] sm:$0xff]  ;;  %v11061_v30 = vld [vmem:[%s14028_s4] sm:$0xff]  ;;  %v11102_v39 = vld [vmem:[%s14028_s4 + $0x30] sm:$0xff] }
  0x26   :  { %8886 = vmatprep.subr.mxu0 %v89_v8  ;;  %8917 = vmatprep.subr.mxu1 %v14038_v6  ;;  %v171_v31 = vld [vmem:[#allocation2 + $0x2] sm:$0x3]  ;;  %v11078_v35 = vld [vmem:[%s14028_s4 + $0x48] sm:$0xff]  ;;  %v11116_v41 = vld [vmem:[%s14028_s4 + $0x70] sm:$0xff] }
  0x27   :  { %8887 = vmatpush3.msra.mxu0 %v89_v8  ;;  %8918 = vmatpush3.msra.mxu1 %v11015_v13  ;;  %v11086_v37 = vld [vmem:[%s14028_s4 + $0x40] sm:$0xff]  ;;  %v11109_v40 = vld [vmem:[%s14028_s4 + $0x28] sm:$0xff]  ;;  %v11140_v44 = vld [vmem:[%s14028_s4 + $0x58] sm:$0xff] }
  0x28   :  { %8888 = vmatprep.subr.mxu0 %v88_v12  ;;  %8919 = vmatprep.subr.mxu1 %v14038_v6  ;;  %v11124_v42 = vld [vmem:[%s14028_s4 + $0x68] sm:$0xff]  ;;  %v11133_v43 = vld [vmem:[%s14028_s4 + $0x60] sm:$0xff]  ;;  %v11147_v45 = vld [vmem:[%s14028_s4 + $0x50] sm:$0xff] }
  0x29   :  { %8889 = vmatpush3.msra.mxu0 %v88_v12  ;;  %8920 = vmatpush3.msra.mxu1 %v11055_v29  ;;  %v11154_v46 = vld [vmem:[%s14028_s4 + $0x98] sm:$0xff]  ;;  %v11162_v47 = vld [vmem:[%s14028_s4 + $0x90] sm:$0xff]  ;;  %v11171_v48 = vld [vmem:[%s14028_s4 + $0x88] sm:$0xff] }
  0x2a   :  { %8890 = vmatprep.subr.mxu0 %v87_v14  ;;  %8921 = vmatprep.subr.mxu1 %v14038_v6  ;;  %v11178_v49 = vld [vmem:[%s14028_s4 + $0x80] sm:$0xff]  ;;  %v11185_v50 = vld [vmem:[%s14028_s4 + $0x78] sm:$0xff]  ;;  %v11202_v52 = vld [vmem:[%s14028_s4 + $0xe8] sm:$0xff] }
  0x2b   :  { %8891 = vmatpush3.msra.mxu0 %v87_v14  ;;  %8922 = vmatpush3.msra.mxu1 %v11061_v30  ;;  %v11197_v51 = vld [vmem:[%s14028_s4 + $0xc0] sm:$0xff]  ;;  %v11207_v53 = vld [vmem:[%s14028_s4 + $0xb8] sm:$0xff]  ;;  %v11221_v55 = vld [vmem:[%s14028_s4 + $0xb0] sm:$0xff] }
  0x2c   :  { %8892 = vmatprep.subr.mxu0 %v86_v15  ;;  %8923 = vmatprep.mubr.msk.f32.mxu1 %vm10901_vm2, %v14038_v6  ;;  %v11214_v54 = vld [vmem:[%s14028_s4 + $0xe0] sm:$0xff]  ;;  %v11226_v56 = vld [vmem:[%s14028_s4 + $0xd8] sm:$0xff]  ;;  %v11235_v57 = vld [vmem:[%s14028_s4 + $0xa8] sm:$0xff] }
  0x2d   :  { %8893 = vmatpush3.msra.mxu0 %v86_v15  ;;  %8926 = vmatprep.subr.mxu1 %v14038_v6  ;;  %v11240_v58 = vld [vmem:[%s14028_s4 + $0xd0] sm:$0xff]  ;;  %v11253_v59 = vld [vmem:[%s14028_s4 + $0xa0] sm:$0xff]  ;;  %v11258_v60 = vld [vmem:[%s14028_s4 + $0xc8] sm:$0xff] }
  0x2e   :  { %8894 = vmatprep.subr.mxu0 %v85_v16  ;;  %548 = vrot.lane.b32.xlu1 %v171_v31, %s10899_s20  ;;  %v11267_v61 = vld [vmem:[%s14029_s5] ss:$0 sm:$0xff]  ;;  %v11273_v2 = vld [vmem:[%s14029_s5 + $0x1] ss:$0 sm:$0xff]  ;;  %v11279_v12 = vld [vmem:[%s14029_s5 + $0x2] ss:$0 sm:$0xff] }
  0x2f   :  { %8895 = vmatpush3.msra.mxu0 %v85_v16 }
  0x30   :  { %8896 = vmatprep.subr.mxu0 %v84_v17 }
  0x31   :  { %8897 = vmatpush3.msra.mxu0 %v84_v17 }
  0x32   :  { %8898 = vmatprep.subr.mxu0 %v83_v18 }
  0x33   :  { %8899 = vmatpush3.msra.mxu0 %v83_v18  ;;  %v11285_v18 = vld [vmem:[%s14029_s5 + $0x3] ss:$0 sm:$0xff] }
  0x34   :  { %8900 = vmatprep.subr.mxu0 %v82_v19 }
  0x35   :  { %8901 = vmatpush3.msra.mxu0 %v82_v19 }
  0x36   :  { %8902 = vmatprep.subr.mxu0 %v81_v20 }
  0x37   :  { %8903 = vmatpush3.msra.mxu0 %v81_v20 }
  0x38   :  { %8904 = vmatprep.subr.mxu0 %v80_v21 }
  0x39   :  { %8905 = vmatpush3.msra.mxu0 %v80_v21 }
  0x3a   :  { %8906 = vmatprep.subr.mxu0 %v79_v22 }
  0x3b   :  { %8907 = vmatpush3.msra.mxu0 %v79_v22 }
  0x3c   :  { %8908 = vmatprep.subr.mxu0 %v78_v23 }
  0x3d   :  { %8909 = vmatpush3.msra.mxu0 %v78_v23 }
  0x3e   :  { %8965 = vmatprep.subr.mxu0 %v14038_v6 }
  0x93   :  { %v181_v33 = vpop.permute.xlu1 %180 }
  0x9a   :  { %v68_v26 = vpop.permute.xlu0 %67 }
  0x9b   :  { %vm72_vm0 = vcmp.eq.s32.totalorder %v65_v25, %v68_v26  ;;  %v174_v26 = vld [vmem:[#allocation5] sm:$0x3] }
  0x9c   :  { %8910 = vmatprep.mubr.msk.f32.mxu0 %vm72_vm0, %v10900_v27 }
  0x9e   :  { %v71_v28 = vpop.permute.xlu0 %70 }
  0x9f   :  { %vm73_vm1 = vcmp.eq.s32.totalorder %v65_v25, %v71_v28 }
  0xa0   :  { %8911 = vmatmul.mubr.msk.f32.vlgmr.msra.gmra.mxu0 %vm73_vm1, %v10900_v27 }
  0xa1   :  { %8975 = vmatprep.mubr.msk.f32.mxu0 %vm10901_vm2, %v14038_v6  ;;  %8966 = vmatpush3.msra.mxu0 %v11197_v51 }
  0xa2   :  { %8967 = vmatprep.subr.mxu0 %v14038_v6 }
  0xa3   :  { %8968 = vmatpush3.msra.mxu0 %v11207_v53 }
  0xa4   :  { %8969 = vmatprep.subr.mxu0 %v14038_v6 }
  0xa5   :  { %8970 = vmatpush3.msra.mxu0 %v11221_v55 }
  0xa6   :  { %8971 = vmatprep.subr.mxu0 %v14038_v6 }
  0xa7   :  { %8972 = vmatpush3.msra.mxu0 %v11235_v57 }
  0xa8   :  { %8973 = vmatprep.subr.mxu0 %v14038_v6 }
  0xa9   :  { %8974 = vmatpush3.msra.mxu0 %v11253_v59 }
  0xaa   :  { %8991 = vmatprep.subr.mxu0 %v14038_v6 }
 0x160   :  { %v11071_v32 = vpop.f32.mrf.mxu0 }
 0x161   :  { %14097 = vst [vmem:[#allocation15_spill] sm:$0xff] %v11071_v32 }
 0x162   :  { %v11073_v34 = vpop.f32.mrf.mxu0 }
 0x163   :  { %v184_v36 = vsel %vm183_vm3, %v11073_v34, %v181_v33 }
 0x164   :  { %8924 = vmatmul.mubr.msk.f32.vlgmr.msra.gmra.mxu1 %vm197_vm4, %v184_v36 }
 0x165   :  { %8927 = vmatpush3.msra.mxu1 %v11078_v35  ;;  %8936 = vmatprep.mubr.msk.f32.mxu1 %vm10901_vm2, %v14038_v6 }
 0x166   :  { %8928 = vmatprep.subr.mxu1 %v14038_v6 }
 0x167   :  { %8929 = vmatpush3.msra.mxu1 %v11086_v37 }
 0x168   :  { %8930 = vmatprep.subr.mxu1 %v14038_v6 }
 0x169   :  { %8931 = vmatpush3.msra.mxu1 %v11095_v38 }
 0x16a   :  { %8932 = vmatprep.subr.mxu1 %v14038_v6 }
 0x16b   :  { %8933 = vmatpush3.msra.mxu1 %v11102_v39 }
 0x16c   :  { %8934 = vmatprep.subr.mxu1 %v14038_v6 }
 0x16d   :  { %8935 = vmatpush3.msra.mxu1 %v11109_v40 }
 0x16e   :  { %8937 = vmatmul.mubr.msk.f32.vlgmr.msra.gmra.mxu1 %vm197_vm4, %v184_v36  ;;  %8939 = vmatprep.subr.mxu1 %v14038_v6 }
 0x16f   :  { %8940 = vmatpush3.msra.mxu1 %v11116_v41  ;;  %8949 = vmatprep.mubr.msk.f32.mxu1 %vm10901_vm2, %v14038_v6 }
 0x170   :  { %8941 = vmatprep.subr.mxu1 %v14038_v6 }
 0x171   :  { %8942 = vmatpush3.msra.mxu1 %v11124_v42 }
 0x172   :  { %8943 = vmatprep.subr.mxu1 %v14038_v6 }
 0x173   :  { %8944 = vmatpush3.msra.mxu1 %v11133_v43 }
 0x174   :  { %8945 = vmatprep.subr.mxu1 %v14038_v6 }
 0x175   :  { %8946 = vmatpush3.msra.mxu1 %v11140_v44 }
 0x176   :  { %8947 = vmatprep.subr.mxu1 %v14038_v6 }
 0x177   :  { %8948 = vmatpush3.msra.mxu1 %v11147_v45 }
 0x178   :  { %8950 = vmatmul.mubr.msk.f32.vlgmr.msra.gmra.mxu1 %vm197_vm4, %v184_v36  ;;  %8952 = vmatprep.subr.mxu1 %v14038_v6 }
 0x179   :  { %8953 = vmatpush3.msra.mxu1 %v11154_v46  ;;  %8962 = vmatprep.mubr.msk.f32.mxu1 %vm10901_vm2, %v14038_v6 }
 0x17a   :  { %8954 = vmatprep.subr.mxu1 %v14038_v6 }
 0x17b   :  { %8955 = vmatpush3.msra.mxu1 %v11162_v47 }
 0x17c   :  { %8956 = vmatprep.subr.mxu1 %v14038_v6 }
 0x17d   :  { %8957 = vmatpush3.msra.mxu1 %v11171_v48 }
 0x17e   :  { %8958 = vmatprep.subr.mxu1 %v14038_v6 }
 0x17f   :  { %8959 = vmatpush3.msra.mxu1 %v11178_v49 }
 0x180   :  { %8960 = vmatprep.subr.mxu1 %v14038_v6 }
 0x181   :  { %8961 = vmatpush3.msra.mxu1 %v11185_v50 }
 0x182   :  { %8963 = vmatmul.mubr.msk.f32.vlgmr.msra.gmra.mxu1 %vm197_vm4, %v184_v36  ;;  %8978 = vmatprep.subr.mxu1 %v14038_v6 }
 0x183   :  { %8988 = vmatprep.mubr.msk.f32.mxu1 %vm10901_vm2, %v14038_v6  ;;  %8979 = vmatpush3.msra.mxu1 %v11202_v52 }
 0x184   :  { %8980 = vmatprep.subr.mxu1 %v14038_v6 }
 0x185   :  { %8981 = vmatpush3.msra.mxu1 %v11214_v54 }
 0x186   :  { %8982 = vmatprep.subr.mxu1 %v14038_v6 }
 0x187   :  { %8983 = vmatpush3.msra.mxu1 %v11226_v56 }
 0x188   :  { %8984 = vmatprep.subr.mxu1 %v14038_v6 }
 0x189   :  { %8985 = vmatpush3.msra.mxu1 %v11240_v58 }
 0x18a   :  { %8986 = vmatprep.subr.mxu1 %v14038_v6 }
 0x18b   :  { %8987 = vmatpush3.msra.mxu1 %v11258_v60 }
 0x18c   :  { %9004 = vmatprep.subr.mxu1 %v14038_v6 }
 0x224   :  { %v267_v62 = vpop.f32.mrf.mxu1 }
 0x225   :  { %v268_v63 = vadd.f32 %v11267_v61, %v267_v62 }
 0x226   :  { %v8925_v0 = vpop.f32.mrf.mxu1 }
 0x227   :  { %v8055_v1 = vmul.f32 -1.442695, %v268_v63  ;;  %v173_v63 = vld [vmem:[#allocation2 + $0x4] sm:$0x3] }
 0x228   :  { %916 = vrot.lane.b32.xlu0 %v173_v63, %s10899_s20  ;;  %v11436_v63 = vld [vmem:[%s14028_s4 + $0x168] sm:$0xff] }
 0x229   :  { %10185 = vpow2.f32 %v8055_v1  ;;  %14108 = vst [vmem:[#allocation26_spill] sm:$0xff] %v11436_v63 }
 0x22e   :  { %v351_v3 = vpop.f32.mrf.mxu1 }
 0x22f   :  { %v352_v4 = vadd.f32 %v11273_v2, %v351_v3  ;;  %v549_v3 = vpop.permute.xlu1 %548 }
 0x230   :  { %v8938_v5 = vpop.f32.mrf.mxu1 }
 0x231   :  { %v8056_v7 = vmul.f32 -1.442695, %v352_v4  ;;  %v11295_v5 = vld [vmem:[%s14028_s4 + $0x110] sm:$0xff] }
 0x233   :  { %10187 = vpow2.f32 %v8056_v7  ;;  %v11300_v7 = vld [vmem:[%s14028_s4 + $0x138] sm:$0xff] }
 0x236   :  { %v10186_v9 = vpop.eup %10185 }
 0x237   :  { %v526_v15 = vadd.f32 1.0, %v10186_v9 }
 0x238   :  { %v435_v8 = vpop.f32.mrf.mxu1 }
 0x239   :  { %v436_v16 = vadd.f32 %v11279_v12, %v435_v8  ;;  %10189 = vrcp.f32 %v526_v15  ;;  %v11315_v15 = vld [vmem:[%s14028_s4 + $0x130] sm:$0xff] }
 0x23a   :  { %v8951_v14 = vpop.f32.mrf.mxu1 }
 0x23b   :  { %10191 = vtanh.f32 %v436_v16  ;;  %v11308_v14 = vld [vmem:[%s14028_s4 + $0x108] sm:$0xff]  ;;  %v11322_v16 = vld [vmem:[%s14028_s4 + $0x100] sm:$0xff] }
 0x240   :  { %v10188_v17 = vpop.eup %10187 }
 0x241   :  { %v532_v19 = vadd.f32 1.0, %v10188_v17  ;;  %v11329_v17 = vld [vmem:[%s14028_s4 + $0x128] sm:$0xff] }
 0x242   :  { %v519_v20 = vpop.f32.mrf.mxu1 }
 0x243   :  { %10193 = vrcp.f32 %v532_v19  ;;  %v520_v21 = vadd.f32 %v11285_v18, %v519_v20  ;;  %v11336_v19 = vld [vmem:[%s14028_s4 + $0xf8] sm:$0xff]  ;;  %v11343_v20 = vld [vmem:[%s14028_s4 + $0x120] sm:$0xff] }
 0x244   :  { %v8964_v22 = vpop.f32.mrf.mxu1 }
 0x245   :  { %v8057_v23 = vmul.f32 -1.442695, %v520_v21  ;;  %v11350_v21 = vld [vmem:[%s14028_s4 + $0xf0] sm:$0xff]  ;;  %v11357_v22 = vld [vmem:[%s14028_s4 + $0x118] sm:$0xff] }
 0x246   :  { %v10190_v24 = vpop.eup %10189  ;;  %14098 = vst [vmem:[#allocation16_spill] sm:$0xff] %v11357_v22 }
 0x247   :  { %10195 = vpow2.f32 %v8057_v23  ;;  %v11379_v23 = vld [vmem:[%s14028_s4 + $0x160] sm:$0xff] }
 0x248   :  { %v10192_v25 = vpop.eup %10191  ;;  %14099 = vst [vmem:[#allocation17_spill] sm:$0xff] %v11379_v23 }
 0x249   :  { %v543_v31 = vmul.f32 %v10192_v25, %v10190_v24  ;;  %v11384_v24 = vld [vmem:[%s14028_s4 + $0x188] sm:$0xff]  ;;  %v11389_v25 = vld [vmem:[%s14028_s4 + $0x158] sm:$0xff] }
 0x24a   :  { %14100 = vst [vmem:[#allocation18_spill] sm:$0xff] %v11384_v24  ;;  %14101 = vst [vmem:[#allocation19_spill] sm:$0xff] %v11389_v25 }
 0x250   :  { %v10194_v27 = vpop.eup %10193 }
 0x251   :  { %v542_v28 = vmul.f32 %v10194_v27, %v174_v26  ;;  %v11396_v26 = vld [vmem:[%s14028_s4 + $0x180] sm:$0xff]  ;;  %v11403_v27 = vld [vmem:[%s14028_s4 + $0x150] sm:$0xff] }
 0x252   :  { %14102 = vst [vmem:[#allocation20_spill] sm:$0xff] %v11396_v26  ;;  %14103 = vst [vmem:[#allocation21_spill] sm:$0xff] %v11403_v27 }
 0x253   :  { %v11288_v33 = vadd.f32 %v543_v31, %v542_v28  ;;  %v11408_v28 = vld [vmem:[%s14028_s4 + $0x178] sm:$0xff]  ;;  %v11417_v31 = vld [vmem:[%s14028_s4 + $0x148] sm:$0xff] }
 0x254   :  { %v10196_v36 = vpop.eup %10195  ;;  %14104 = vst [vmem:[#allocation22_spill] sm:$0xff] %v11408_v28  ;;  %14105 = vst [vmem:[#allocation23_spill] sm:$0xff] %v11417_v31 }
 0x255   :  { %v539_v62 = vadd.f32 1.0, %v10196_v36  ;;  %10197 = vtanh.f32 %v11288_v33  ;;  %v11422_v36 = vld [vmem:[%s14028_s4 + $0x170] sm:$0xff] }
 0x256   :  { %14106 = vst [vmem:[#allocation24_spill] sm:$0xff] %v11422_v36 }
 0x257   :  { %10199 = vrcp.f32 %v539_v62  ;;  %v11431_v62 = vld [vmem:[%s14028_s4 + $0x140] sm:$0xff] }
 0x258   :  { %14107 = vst [vmem:[#allocation25_spill] sm:$0xff] %v11431_v62 }
 0x262   :  { %v10198_v0 = vpop.eup %10197 }
 0x264   :  { %v10200_v1 = vpop.eup %10199 }
 0x265   :  { %v546_v4 = vmul.f32 %v10200_v1, %v10198_v0  ;;  %v11449_v0 = vld [vmem:[%s14029_s5 + $0x4] ss:$0 sm:$0xff]  ;;  %v11454_v1 = vld [vmem:[%s14029_s5 + $0x5] ss:$0 sm:$0xff] }
 0x266   :  { %14109 = vst [vmem:[#allocation27_spill] sm:$0xff] %v11449_v0  ;;  %14110 = vst [vmem:[#allocation28_spill] sm:$0xff] %v11454_v1 }
 0x267   :  { %v551_v8 = vsel %vm183_vm3, %v546_v4, %v549_v3  ;;  %v1284_v9 = vrot.slane %v546_v4, 6 }
 0x268   :  { %8976 = vmatmul.mubr.msk.f32.vlgmr.msra.gmra.mxu0 %vm197_vm4, %v551_v8  ;;  %8989 = vmatmul.mubr.msk.f32.vlgmr.msra.gmra.mxu1 %vm197_vm4, %v551_v8 }
 0x269   :  { %8992 = vmatpush3.msra.mxu0 %v11295_v5  ;;  %9005 = vmatpush3.msra.mxu1 %v11300_v7 }
 0x26a   :  { %1285 = vrot.lane.b32.xlu1 %v1284_v9, %s10899_s20  ;;  %8993 = vmatprep.subr.mxu0 %v14038_v6 }
 0x26b   :  { %9006 = vmatprep.subr.mxu1 %v14038_v6  ;;  %8994 = vmatpush3.msra.mxu0 %v11308_v14 }
 0x26c   :  { %9007 = vmatpush3.msra.mxu1 %v11315_v15  ;;  %8995 = vmatprep.subr.mxu0 %v14038_v6 }
 0x26d   :  { %9008 = vmatprep.subr.mxu1 %v14038_v6  ;;  %8996 = vmatpush3.msra.mxu0 %v11322_v16 }
 0x26e   :  { %9009 = vmatpush3.msra.mxu1 %v11329_v17  ;;  %8997 = vmatprep.subr.mxu0 %v14038_v6 }
 0x26f   :  { %9010 = vmatprep.subr.mxu1 %v14038_v6  ;;  %8998 = vmatpush3.msra.mxu0 %v11336_v19 }
 0x270   :  { %9011 = vmatpush3.msra.mxu1 %v11343_v20  ;;  %8999 = vmatprep.subr.mxu0 %v14038_v6 }
 0x271   :  { %9012 = vmatprep.subr.mxu1 %v14038_v6  ;;  %9000 = vmatpush3.msra.mxu0 %v11350_v21 }
 0x272   :  { %9001 = vmatprep.mubr.msk.f32.mxu0 %vm10901_vm2, %v14038_v6  ;;  %9013 = vmatpush3.msra.mxu1 %v11357_v22 }
 0x273   :  { %9014 = vmatprep.mubr.msk.f32.mxu1 %vm10901_vm2, %v14038_v6  ;;  %9002 = vmatmul.mubr.msk.f32.vlgmr.msra.gmra.mxu0 %vm197_vm4, %v551_v8 }
 0x274   :  { %9015 = vmatmul.mubr.msk.f32.vlgmr.msra.gmra.mxu1 %vm197_vm4, %v551_v8  ;;  %9017 = vmatprep.subr.mxu0 %v14038_v6 }
 0x275   :  { %9030 = vmatprep.subr.mxu1 %v14038_v6  ;;  %9027 = vmatprep.mubr.msk.f32.mxu0 %vm10901_vm2, %v14038_v6 }
 0x276   :  { %9040 = vmatprep.mubr.msk.f32.mxu1 %vm10901_vm2, %v14038_v6  ;;  %9018 = vmatpush3.msra.mxu0 %v11379_v23 }
 0x277   :  { %9031 = vmatpush3.msra.mxu1 %v11384_v24  ;;  %9019 = vmatprep.subr.mxu0 %v14038_v6 }
 0x278   :  { %9032 = vmatprep.subr.mxu1 %v14038_v6  ;;  %9020 = vmatpush3.msra.mxu0 %v11389_v25  ;;  %v176_v25 = vld [vmem:[#allocation5 + $0x2] sm:$0x3] }
 0x279   :  { %9033 = vmatpush3.msra.mxu1 %v11396_v26  ;;  %9021 = vmatprep.subr.mxu0 %v14038_v6 }
 0x27a   :  { %9034 = vmatprep.subr.mxu1 %v14038_v6  ;;  %9022 = vmatpush3.msra.mxu0 %v11403_v27  ;;  %v11466_v27 = vld [vmem:[%s14029_s5 + $0x6] ss:$0 sm:$0xff] }
 0x27b   :  { %9035 = vmatpush3.msra.mxu1 %v11408_v28  ;;  %9023 = vmatprep.subr.mxu0 %v14038_v6 }
 0x27c   :  { %9036 = vmatprep.subr.mxu1 %v14038_v6  ;;  %9024 = vmatpush3.msra.mxu0 %v11417_v31 }
 0x27d   :  { %9037 = vmatpush3.msra.mxu1 %v11422_v36  ;;  %9025 = vmatprep.subr.mxu0 %v14038_v6  ;;  %v11461_v36 = vld [vmem:[%s14029_s5 + $0x7] ss:$0 sm:$0xff] }
 0x27e   :  { %9038 = vmatprep.subr.mxu1 %v14038_v6  ;;  %9026 = vmatpush3.msra.mxu0 %v11431_v62 }
 0x27f   :  { %9039 = vmatpush3.msra.mxu1 %v11436_v63  ;;  %9043 = vmatprep.subr.mxu0 %v14038_v6 }
 0x280   :  { %9056 = vmatprep.subr.mxu1 %v14038_v6 }
 0x328   :  { %v635_v3 = vpop.f32.mrf.mxu0  ;;  %v719_v4 = vpop.f32.mrf.mxu1 }
 0x329   :  { %v636_v8 = vadd.f32 %v11449_v0, %v635_v3  ;;  %v720_v9 = vadd.f32 %v11454_v1, %v719_v4 }
 0x32a   :  { %v8977_v32 = vpop.f32.mrf.mxu0  ;;  %v8990_v63 = vpop.f32.mrf.mxu1 }
 0x32b   :  { %v8090_v62 = vmul.f32 -1.442695, %v636_v8  ;;  %v8091_v6 = vmul.f32 -1.442695, %v720_v9 }
 0x32d   :  { %10201 = vpow2.f32 %v8090_v62 }
 0x32e   :  { %10203 = vpow2.f32 %v8091_v6 }
 0x333   :  { %v803_v31 = vpop.f32.mrf.mxu0 }
 0x334   :  { %v887_v28 = vpop.f32.mrf.mxu1  ;;  %v804_v62 = vadd.f32 %v11466_v27, %v803_v31 }
 0x335   :  { %v888_v3 = vadd.f32 %v11461_v36, %v887_v28  ;;  %v9003_v32 = vpop.f32.mrf.mxu0 }
 0x336   :  { %v9016_v63 = vpop.f32.mrf.mxu1 }
 0x337   :  { %v8092_v4 = vmul.f32 -1.442695, %v888_v3 }
 0x339   :  { %10205 = vpow2.f32 %v8092_v4  ;;  %v917_v4 = vpop.permute.xlu0 %916 }
 0x33a   :  { %v10202_v6 = vpop.eup %10201  ;;  %10207 = vtanh.f32 %v804_v62  ;;  %v11509_v62 = vld [vmem:[%s14028_s4 + $0x1c8] sm:$0xff] }
 0x33b   :  { %v10204_v8 = vpop.eup %10203  ;;  %v894_v9 = vadd.f32 1.0, %v10202_v6 }
 0x33c   :  { %v900_v1 = vadd.f32 1.0, %v10204_v8  ;;  %v11518_v8 = vld [vmem:[%s14028_s4 + $0x198] sm:$0xff] }
 0x33d   :  { %10209 = vrcp.f32 %v894_v9  ;;  %v11523_v9 = vld [vmem:[%s14028_s4 + $0x1c0] sm:$0xff] }
 0x33e   :  { %10211 = vrcp.f32 %v900_v1  ;;  %v11476_v1 = vld [vmem:[%s14028_s4 + $0x1b0] sm:$0xff] }
 0x346   :  { %v10206_v0 = vpop.eup %10205 }
 0x347   :  { %v10208_v26 = vpop.eup %10207  ;;  %v907_v28 = vadd.f32 1.0, %v10206_v0  ;;  %v11504_v0 = vld [vmem:[%s14028_s4 + $0x1a0] sm:$0xff] }
 0x349   :  { %10213 = vrcp.f32 %v907_v28  ;;  %v11532_v28 = vld [vmem:[%s14028_s4 + $0x190] sm:$0xff] }
 0x34a   :  { %v10210_v24 = vpop.eup %10209 }
 0x34b   :  { %v10212_v23 = vpop.eup %10211  ;;  %v911_v22 = vmul.f32 %v10210_v24, %v10208_v26  ;;  %v11481_v24 = vld [vmem:[%s14028_s4 + $0x1d8] sm:$0xff]  ;;  %v14111_v26 = vmov 0.0  }
 0x34c   :  { %v910_v32 = vmul.f32 %v10212_v23, %v176_v25  ;;  %v11490_v23 = vld [vmem:[%s14028_s4 + $0x1a8] sm:$0xff]  ;;  %v11495_v25 = vld [vmem:[%s14028_s4 + $0x1d0] sm:$0xff] }
 0x34e   :  { %v11470_v63 = vadd.f32 %v911_v22, %v910_v32  ;;  %v11539_v32 = vld [vmem:[%s14028_s4 + $0x1b8] sm:$0xff] }
 0x350   :  { %10215 = vtanh.f32 %v11470_v63 }
 0x356   :  { %v10214_v31 = vpop.eup %10213 }
 0x35d   :  { %v10216_v3 = vpop.eup %10215 }
 0x35e   :  { %v914_v6 = vmul.f32 %v10216_v3, %v10214_v31  ;;  %v1286_v31 = vpop.permute.xlu1 %1285 }
 0x360   :  { %v919_v22 = vsel %vm183_vm3, %v914_v6, %v917_v4  ;;  %1598 = vrot.lane.b32.xlu0 %v914_v6, %s10899_s20 }
 0x361   :  { %9028 = vmatmul.mubr.msk.f32.vlgmr.msra.gmra.mxu0 %vm197_vm4, %v919_v22  ;;  %9041 = vmatmul.mubr.msk.f32.vlgmr.msra.gmra.mxu1 %vm197_vm4, %v919_v22 }
 0x362   :  { %9044 = vmatpush3.msra.mxu0 %v11476_v1  ;;  %9057 = vmatpush3.msra.mxu1 %v11481_v24 }
 0x363   :  { %9045 = vmatprep.subr.mxu0 %v14111_v26  ;;  %9058 = vmatprep.subr.mxu1 %v14111_v26 }
 0x364   :  { %9046 = vmatpush3.msra.mxu0 %v11490_v23  ;;  %9059 = vmatpush3.msra.mxu1 %v11495_v25 }
 0x365   :  { %9047 = vmatprep.subr.mxu0 %v14111_v26  ;;  %9060 = vmatprep.subr.mxu1 %v14111_v26 }
 0x366   :  { %9048 = vmatpush3.msra.mxu0 %v11504_v0  ;;  %9061 = vmatpush3.msra.mxu1 %v11509_v62 }
 0x367   :  { %9049 = vmatprep.subr.mxu0 %v14111_v26  ;;  %9062 = vmatprep.subr.mxu1 %v14111_v26 }
 0x368   :  { %9050 = vmatpush3.msra.mxu0 %v11518_v8  ;;  %9063 = vmatpush3.msra.mxu1 %v11523_v9 }
 0x369   :  { %9051 = vmatprep.subr.mxu0 %v14111_v26  ;;  %9064 = vmatprep.subr.mxu1 %v14111_v26 }
 0x36a   :  { %9052 = vmatpush3.msra.mxu0 %v11532_v28  ;;  %9053 = vmatprep.mubr.msk.f32.mxu0 %vm10901_vm2, %v14111_v26 }
 0x36b   :  { %9065 = vmatpush3.msra.mxu1 %v11539_v32  ;;  %9066 = vmatprep.mubr.msk.f32.mxu1 %vm10901_vm2, %v14111_v26 }
 0x36c   :  { %9054 = vmatmul.mubr.msk.f32.vlgmr.msra.gmra.mxu0 %vm197_vm4, %v919_v22  ;;  %9067 = vmatmul.mubr.msk.f32.vlgmr.msra.gmra.mxu1 %vm197_vm4, %v919_v22 }
 0x36d   :  { %9069 = vmatprep.subr.mxu0 %v14111_v26  ;;  %9082 = vmatprep.subr.mxu1 %v14111_v26 }
 0x36e   :  { %9070 = vmatpush3.msra.mxu0 %v10999_v10  ;;  %9083 = vmatpush3.msra.mxu1 %v11078_v35  ;;  %v1288_v10 = vsel %vm183_vm3, %v11073_v34, %v1286_v31 }
 0x36f   :  { %9071 = vmatprep.subr.mxu0 %v14111_v26  ;;  %9084 = vmatprep.subr.mxu1 %v14111_v26 }
 0x370   :  { %9072 = vmatpush3.msra.mxu0 %v11005_v11  ;;  %9085 = vmatpush3.msra.mxu1 %v11086_v37  ;;  %v1290_v11 = vrot.slane %v1288_v10, 2  ;;  %v178_v10 = vld [vmem:[#allocation5 + $0x4] sm:$0x3] }
 0x371   :  { %9073 = vmatprep.subr.mxu0 %v14111_v26  ;;  %9086 = vmatprep.subr.mxu1 %v14111_v26 }
 0x372   :  { %9074 = vmatpush3.msra.mxu0 %v11015_v13  ;;  %9087 = vmatpush3.msra.mxu1 %v11095_v38  ;;  %v11634_v13 = vld [vmem:[%s14029_s5 + $0x8] ss:$0 sm:$0xff] }
 0x373   :  { %9075 = vmatprep.subr.mxu0 %v14111_v26  ;;  %9088 = vmatprep.subr.mxu1 %v14111_v26 }
 0x374   :  { %9076 = vmatpush3.msra.mxu0 %v11055_v29  ;;  %9089 = vmatpush3.msra.mxu1 %v11102_v39  ;;  %v11639_v29 = vld [vmem:[%s14029_s5 + $0x9] ss:$0 sm:$0xff] }
 0x375   :  { %9077 = vmatprep.subr.mxu0 %v14111_v26  ;;  %9090 = vmatprep.subr.mxu1 %v14111_v26 }
 0x376   :  { %9078 = vmatpush3.msra.mxu0 %v11061_v30  ;;  %9079 = vmatprep.mubr.msk.f32.mxu0 %vm10901_vm2, %v14111_v26 }
 0x377   :  { %9091 = vmatpush3.msra.mxu1 %v11109_v40  ;;  %9092 = vmatprep.mubr.msk.f32.mxu1 %vm10901_vm2, %v14111_v26 }
 0x378   :  { %9080 = vmatmul.mubr.msk.f32.vlgmr.msra.gmra.mxu0 %vm197_vm4, %v1290_v11  ;;  %9093 = vmatmul.mubr.msk.f32.vlgmr.msra.gmra.mxu1 %vm197_vm4, %v1290_v11 }
 0x379   :  { %9095 = vmatprep.subr.mxu0 %v14111_v26  ;;  %9108 = vmatprep.subr.mxu1 %v14111_v26 }
 0x37a   :  { %9096 = vmatpush3.msra.mxu0 %v11116_v41  ;;  %9109 = vmatpush3.msra.mxu1 %v11154_v46  ;;  %v11651_v46 = vld [vmem:[%s14029_s5 + $0xa] ss:$0 sm:$0xff] }
 0x37b   :  { %9097 = vmatprep.subr.mxu0 %v14111_v26  ;;  %9110 = vmatprep.subr.mxu1 %v14111_v26 }
 0x37c   :  { %9098 = vmatpush3.msra.mxu0 %v11124_v42  ;;  %9111 = vmatpush3.msra.mxu1 %v11162_v47 }
 0x37d   :  { %9099 = vmatprep.subr.mxu0 %v14111_v26  ;;  %9112 = vmatprep.subr.mxu1 %v14111_v26 }
 0x37e   :  { %9100 = vmatpush3.msra.mxu0 %v11133_v43  ;;  %9113 = vmatpush3.msra.mxu1 %v11171_v48  ;;  %v11646_v43 = vld [vmem:[%s14029_s5 + $0xb] ss:$0 sm:$0xff] }
 0x37f   :  { %9101 = vmatprep.subr.mxu0 %v14111_v26  ;;  %9114 = vmatprep.subr.mxu1 %v14111_v26 }
 0x380   :  { %9102 = vmatpush3.msra.mxu0 %v11140_v44  ;;  %9115 = vmatpush3.msra.mxu1 %v11178_v49 }
 0x381   :  { %9103 = vmatprep.subr.mxu0 %v14111_v26  ;;  %9116 = vmatprep.subr.mxu1 %v14111_v26 }
 0x382   :  { %9104 = vmatpush3.msra.mxu0 %v11147_v45  ;;  %9105 = vmatprep.mubr.msk.f32.mxu0 %vm10901_vm2, %v14111_v26 }
 0x383   :  { %9117 = vmatpush3.msra.mxu1 %v11185_v50  ;;  %9118 = vmatprep.mubr.msk.f32.mxu1 %vm10901_vm2, %v14111_v26 }
 0x384   :  { %9106 = vmatmul.mubr.msk.f32.vlgmr.msra.gmra.mxu0 %vm197_vm4, %v1290_v11  ;;  %9119 = vmatmul.mubr.msk.f32.vlgmr.msra.gmra.mxu1 %vm197_vm4, %v1290_v11 }
 0x385   :  { %9121 = vmatprep.subr.mxu0 %v14111_v26  ;;  %9134 = vmatprep.subr.mxu1 %v14111_v26 }
 0x386   :  { %9122 = vmatpush3.msra.mxu0 %v11197_v51  ;;  %9135 = vmatpush3.msra.mxu1 %v11202_v52 }
 0x387   :  { %9123 = vmatprep.subr.mxu0 %v14111_v26  ;;  %9136 = vmatprep.subr.mxu1 %v14111_v26 }
 0x388   :  { %9124 = vmatpush3.msra.mxu0 %v11207_v53  ;;  %9137 = vmatpush3.msra.mxu1 %v11214_v54 }
 0x389   :  { %9125 = vmatprep.subr.mxu0 %v14111_v26  ;;  %9138 = vmatprep.subr.mxu1 %v14111_v26 }
 0x38a   :  { %9126 = vmatpush3.msra.mxu0 %v11221_v55  ;;  %9139 = vmatpush3.msra.mxu1 %v11226_v56 }
 0x38b   :  { %9127 = vmatprep.subr.mxu0 %v14111_v26  ;;  %9140 = vmatprep.subr.mxu1 %v14111_v26 }
 0x38c   :  { %9128 = vmatpush3.msra.mxu0 %v11235_v57  ;;  %9141 = vmatpush3.msra.mxu1 %v11240_v58 }
 0x38d   :  { %9129 = vmatprep.subr.mxu0 %v14111_v26  ;;  %9142 = vmatprep.subr.mxu1 %v14111_v26 }
 0x38e   :  { %9130 = vmatpush3.msra.mxu0 %v11253_v59  ;;  %9143 = vmatpush3.msra.mxu1 %v11258_v60 }
 0x38f   :  { %9131 = vmatprep.mubr.msk.f32.mxu0 %vm10901_vm2, %v14111_v26  ;;  %9144 = vmatprep.mubr.msk.f32.mxu1 %vm10901_vm2, %v14111_v26 }
 0x390   :  { %9147 = vmatprep.subr.mxu0 %v14111_v26  ;;  %9160 = vmatprep.subr.mxu1 %v14111_v26 }
 0x421   :  { %v1003_v30 = vpop.f32.mrf.mxu0  ;;  %v1087_v35 = vpop.f32.mrf.mxu1 }
 0x422   :  { %v1004_v37 = vadd.f32 %v11634_v13, %v1003_v30  ;;  %v1088_v38 = vadd.f32 %v11639_v29, %v1087_v35 }
 0x423   :  { %v9029_v39 = vpop.f32.mrf.mxu0  ;;  %v9042_v40 = vpop.f32.mrf.mxu1 }
 0x424   :  { %v8125_v41 = vmul.f32 -1.442695, %v1004_v37  ;;  %v8126_v42 = vmul.f32 -1.442695, %v1088_v38 }
 0x426   :  { %10217 = vpow2.f32 %v8125_v41 }
 0x427   :  { %10219 = vpow2.f32 %v8126_v42 }
 0x42c   :  { %v1171_v44 = vpop.f32.mrf.mxu0  ;;  %v1255_v45 = vpop.f32.mrf.mxu1 }
 0x42d   :  { %v1256_v47 = vadd.f32 %v11646_v43, %v1255_v45  ;;  %v1172_v50 = vadd.f32 %v11651_v46, %v1171_v44 }
 0x42e   :  { %v9055_v48 = vpop.f32.mrf.mxu0  ;;  %v9068_v49 = vpop.f32.mrf.mxu1 }
 0x42f   :  { %v8127_v51 = vmul.f32 -1.442695, %v1256_v47  ;;  %10221 = vtanh.f32 %v1172_v50 }
 0x431   :  { %10223 = vpow2.f32 %v8127_v51 }
 0x433   :  { %v10218_v52 = vpop.eup %10217 }
 0x434   :  { %v10220_v53 = vpop.eup %10219  ;;  %v1262_v54 = vadd.f32 1.0, %v10218_v52 }
 0x435   :  { %v1268_v55 = vadd.f32 1.0, %v10220_v53 }
 0x436   :  { %10225 = vrcp.f32 %v1262_v54 }
 0x437   :  { %10227 = vrcp.f32 %v1268_v55 }
 0x438   :  { %v1359_v56 = vpop.f32.mrf.mxu0  ;;  %v1429_v57 = vpop.f32.mrf.mxu1 }
 0x439   :  { %v1360_v58 = vadd.f32 %v11267_v61, %v1359_v56  ;;  %v1430_v59 = vadd.f32 %v11273_v2, %v1429_v57 }
 0x43a   :  { %v9081_v60 = vpop.f32.mrf.mxu0  ;;  %v9094_v3 = vpop.f32.mrf.mxu1 }
 0x43b   :  { %v8132_v4 = vmul.f32 -1.442695, %v1360_v58  ;;  %v8133_v6 = vmul.f32 -1.442695, %v1430_v59 }
 0x43c   :  { %v10222_v22 = vpop.eup %10221 }
 0x43d   :  { %10229 = vpow2.f32 %v8132_v4 }
 0x43e   :  { %10231 = vpow2.f32 %v8133_v6  ;;  %v10224_v31 = vpop.eup %10223  ;;  %v1599_v6 = vpop.permute.xlu0 %1598 }
 0x43f   :  { %v1275_v40 = vadd.f32 1.0, %v10224_v31 }
 0x441   :  { %10233 = vrcp.f32 %v1275_v40 }
 0x443   :  { %v10226_v11 = vpop.eup %10225 }
 0x444   :  { %v10228_v30 = vpop.eup %10227  ;;  %v1279_v35 = vmul.f32 %v10226_v11, %v10222_v22  ;;  %v1499_v37 = vpop.f32.mrf.mxu0 }
 0x445   :  { %v1569_v38 = vpop.f32.mrf.mxu1  ;;  %v1278_v39 = vmul.f32 %v10228_v30, %v178_v10  ;;  %v1500_v45 = vadd.f32 %v11279_v12, %v1499_v37  ;;  %v14122_v10 = vld [vmem:[#allocation26_spill] sm:$0xff] }
 0x446   :  { %v1570_v61 = vadd.f32 %v11285_v18, %v1569_v38  ;;  %v9107_v41 = vpop.f32.mrf.mxu0  ;;  %v14124_v38 = vld [vmem:[#allocation28_spill] sm:$0xff] }
 0x447   :  { %v9120_v2 = vpop.f32.mrf.mxu1  ;;  %v11658_v42 = vadd.f32 %v1279_v35, %v1278_v39  ;;  %v14123_v35 = vld [vmem:[#allocation27_spill] sm:$0xff] }
 0x448   :  { %v8134_v44 = vmul.f32 -1.442695, %v1570_v61 }
 0x449   :  { %10235 = vtanh.f32 %v11658_v42 }
 0x44a   :  { %v10230_v47 = vpop.eup %10229  ;;  %10237 = vpow2.f32 %v8134_v44 }
 0x44b   :  { %v10232_v48 = vpop.eup %10231  ;;  %v1576_v49 = vadd.f32 1.0, %v10230_v47  ;;  %10239 = vtanh.f32 %v1500_v45 }
 0x44c   :  { %v1582_v50 = vadd.f32 1.0, %v10232_v48 }
 0x44d   :  { %10241 = vrcp.f32 %v1576_v49 }
 0x44e   :  { %10243 = vrcp.f32 %v1582_v50  ;;  %v10234_v51 = vpop.eup %10233 }
 0x456   :  { %v10236_v18 = vpop.eup %10235 }
 0x457   :  { %v10238_v52 = vpop.eup %10237  ;;  %v11662_v53 = vmul.f32 %v10236_v18, %v10234_v51 }
 0x458   :  { %v10240_v54 = vpop.eup %10239  ;;  %v1589_v57 = vadd.f32 1.0, %v10238_v52 }
 0x459   :  { %1910 = vrot.lane.b32.xlu1 %v11662_v53, %s10899_s20 }
 0x45a   :  { %v10242_v55 = vpop.eup %10241  ;;  %10245 = vrcp.f32 %v1589_v57 }
 0x45b   :  { %v10244_v12 = vpop.eup %10243  ;;  %v1593_v56 = vmul.f32 %v10242_v55, %v10240_v54 }
 0x45c   :  { %v1592_v58 = vmul.f32 %v10244_v12, %v11288_v33  ;;  %v14112_v33 = vld [vmem:[#allocation16_spill] sm:$0xff] }
 0x45e   :  { %v11667_v59 = vadd.f32 %v1593_v56, %v1592_v58 }
 0x460   :  { %10247 = vtanh.f32 %v11667_v59 }
 0x467   :  { %v10246_v60 = vpop.eup %10245 }
 0x46d   :  { %v10248_v3 = vpop.eup %10247 }
 0x46e   :  { %v1596_v4 = vmul.f32 %v10248_v3, %v10246_v60 }
 0x470   :  { %v1601_v22 = vsel %vm183_vm3, %v1596_v4, %v1599_v6  ;;  %v2222_v31 = vrot.slane %v1596_v4, 4 }
 0x471   :  { %9132 = vmatmul.mubr.msk.f32.vlgmr.msra.gmra.mxu0 %vm197_vm4, %v1601_v22  ;;  %9145 = vmatmul.mubr.msk.f32.vlgmr.msra.gmra.mxu1 %vm197_vm4, %v1601_v22 }
 0x472   :  { %9148 = vmatpush3.msra.mxu0 %v11295_v5  ;;  %9161 = vmatpush3.msra.mxu1 %v11300_v7  ;;  %v14113_v5 = vld [vmem:[#allocation17_spill] sm:$0xff]  ;;  %v14114_v7 = vld [vmem:[#allocation18_spill] sm:$0xff] }
 0x473   :  { %2223 = vrot.lane.b32.xlu0 %v2222_v31, %s10899_s20  ;;  %9149 = vmatprep.subr.mxu0 %v14111_v26 }
 0x474   :  { %9162 = vmatprep.subr.mxu1 %v14111_v26  ;;  %9150 = vmatpush3.msra.mxu0 %v11308_v14  ;;  %v14115_v14 = vld [vmem:[#allocation19_spill] sm:$0xff] }
 0x475   :  { %9163 = vmatpush3.msra.mxu1 %v11315_v15  ;;  %9151 = vmatprep.subr.mxu0 %v14111_v26  ;;  %v14116_v15 = vld [vmem:[#allocation20_spill] sm:$0xff] }
 0x476   :  { %9164 = vmatprep.subr.mxu1 %v14111_v26  ;;  %9152 = vmatpush3.msra.mxu0 %v11322_v16  ;;  %v14117_v16 = vld [vmem:[#allocation21_spill] sm:$0xff] }
 0x477   :  { %9165 = vmatpush3.msra.mxu1 %v11329_v17  ;;  %9153 = vmatprep.subr.mxu0 %v14111_v26  ;;  %v14118_v17 = vld [vmem:[#allocation22_spill] sm:$0xff] }
 0x478   :  { %9166 = vmatprep.subr.mxu1 %v14111_v26  ;;  %9154 = vmatpush3.msra.mxu0 %v11336_v19  ;;  %v14119_v19 = vld [vmem:[#allocation23_spill] sm:$0xff] }
 0x479   :  { %9167 = vmatpush3.msra.mxu1 %v11343_v20  ;;  %9155 = vmatprep.subr.mxu0 %v14111_v26  ;;  %v14120_v20 = vld [vmem:[#allocation24_spill] sm:$0xff] }
 0x47a   :  { %9168 = vmatprep.subr.mxu1 %v14111_v26  ;;  %9156 = vmatpush3.msra.mxu0 %v11350_v21  ;;  %v14121_v21 = vld [vmem:[#allocation25_spill] sm:$0xff] }
 0x47b   :  { %9157 = vmatprep.mubr.msk.f32.mxu0 %vm10901_vm2, %v14111_v26  ;;  %9169 = vmatpush3.msra.mxu1 %v14112_v33 }
 0x47c   :  { %9170 = vmatprep.mubr.msk.f32.mxu1 %vm10901_vm2, %v14111_v26  ;;  %9158 = vmatmul.mubr.msk.f32.vlgmr.msra.gmra.mxu0 %vm197_vm4, %v1601_v22 }
 0x47d   :  { %9171 = vmatmul.mubr.msk.f32.vlgmr.msra.gmra.mxu1 %vm197_vm4, %v1601_v22  ;;  %9173 = vmatprep.subr.mxu0 %v14111_v26 }
 0x47e   :  { %9186 = vmatprep.subr.mxu1 %v14111_v26  ;;  %9174 = vmatpush3.msra.mxu0 %v14113_v5  ;;  %v11823_v5 = vld [vmem:[%s14028_s4] sm:$0xff] }
 0x47f   :  { %9187 = vmatpush3.msra.mxu1 %v14114_v7  ;;  %9175 = vmatprep.subr.mxu0 %v14111_v26  ;;  %v11831_v7 = vld [vmem:[%s14028_s4 + $0x28] sm:$0xff] }
 0x480   :  { %9188 = vmatprep.subr.mxu1 %v14111_v26  ;;  %9176 = vmatpush3.msra.mxu0 %v14115_v14  ;;  %v11843_v14 = vld [vmem:[%s14028_s4 + $0x70] sm:$0xff] }
 0x481   :  { %9189 = vmatpush3.msra.mxu1 %v14116_v15  ;;  %9177 = vmatprep.subr.mxu0 %v14111_v26  ;;  %v11849_v15 = vld [vmem:[%s14028_s4 + $0x98] sm:$0xff] }
 0x482   :  { %9190 = vmatprep.subr.mxu1 %v14111_v26  ;;  %9178 = vmatpush3.msra.mxu0 %v14117_v16  ;;  %v11857_v16 = vld [vmem:[%s14028_s4 + $0x68] sm:$0xff] }
 0x483   :  { %9191 = vmatpush3.msra.mxu1 %v14118_v17  ;;  %9179 = vmatprep.subr.mxu0 %v14111_v26  ;;  %v11863_v17 = vld [vmem:[%s14028_s4 + $0x90] sm:$0xff] }
 0x484   :  { %9192 = vmatprep.subr.mxu1 %v14111_v26  ;;  %9180 = vmatpush3.msra.mxu0 %v14119_v19  ;;  %v11871_v19 = vld [vmem:[%s14028_s4 + $0x60] sm:$0xff] }
 0x485   :  { %9193 = vmatpush3.msra.mxu1 %v14120_v20  ;;  %9181 = vmatprep.subr.mxu0 %v14111_v26  ;;  %v11877_v20 = vld [vmem:[%s14028_s4 + $0x88] sm:$0xff] }
 0x486   :  { %9194 = vmatprep.subr.mxu1 %v14111_v26  ;;  %9182 = vmatpush3.msra.mxu0 %v14121_v21  ;;  %v11885_v21 = vld [vmem:[%s14028_s4 + $0x58] sm:$0xff] }
 0x487   :  { %9195 = vmatpush3.msra.mxu1 %v14122_v10  ;;  %9183 = vmatprep.mubr.msk.f32.mxu0 %vm10901_vm2, %v14111_v26  ;;  %v11891_v10 = vld [vmem:[%s14028_s4 + $0x80] sm:$0xff] }
 0x488   :  { %9196 = vmatprep.mubr.msk.f32.mxu1 %vm10901_vm2, %v14111_v26  ;;  %9199 = vmatprep.subr.mxu0 %v14111_v26 }
 0x489   :  { %9212 = vmatprep.subr.mxu1 %v14111_v26 }
 0x4cb   :  { %v1911_v31 = vpop.permute.xlu1 %1910 }
 0x531   :  { %v1671_v11 = vpop.f32.mrf.mxu0  ;;  %v1741_v30 = vpop.f32.mrf.mxu1 }
 0x532   :  { %v1672_v37 = vadd.f32 %v14123_v35, %v1671_v11  ;;  %v1742_v39 = vadd.f32 %v14124_v38, %v1741_v30  ;;  %v11899_v11 = vld [vmem:[%s14028_s4 + $0x50] sm:$0xff]  ;;  %v11907_v30 = vld [vmem:[%s14028_s4 + $0x78] sm:$0xff]  ;;  %v11919_v35 = vld [vmem:[%s14028_s4 + $0xc0] sm:$0xff] }
 0x533   :  { %v9133_v40 = vpop.f32.mrf.mxu0  ;;  %v9146_v61 = vpop.f32.mrf.mxu1  ;;  %v11933_v38 = vld [vmem:[%s14028_s4 + $0xb8] sm:$0xff] }
 0x534   :  { %v8139_v41 = vmul.f32 -1.442695, %v1672_v37  ;;  %v8140_v2 = vmul.f32 -1.442695, %v1742_v39  ;;  %v11925_v37 = vld [vmem:[%s14028_s4 + $0xe8] sm:$0xff]  ;;  %v11939_v39 = vld [vmem:[%s14028_s4 + $0xe0] sm:$0xff] }
 0x535   :  { %v11947_v40 = vld [vmem:[%s14028_s4 + $0xb0] sm:$0xff]  ;;  %v11953_v61 = vld [vmem:[%s14028_s4 + $0xd8] sm:$0xff] }
 0x536   :  { %10249 = vpow2.f32 %v8139_v41  ;;  %v11961_v41 = vld [vmem:[%s14028_s4 + $0xa8] sm:$0xff] }
 0x537   :  { %10251 = vpow2.f32 %v8140_v2  ;;  %v11967_v2 = vld [vmem:[%s14028_s4 + $0xd0] sm:$0xff] }
 0x53c   :  { %v1811_v44 = vpop.f32.mrf.mxu0 }
 0x53d   :  { %v1881_v45 = vpop.f32.mrf.mxu1  ;;  %v1812_v51 = vadd.f32 %v11466_v27, %v1811_v44  ;;  %v11975_v44 = vld [vmem:[%s14028_s4 + $0xa0] sm:$0xff] }
 0x53e   :  { %v1882_v47 = vadd.f32 %v11461_v36, %v1881_v45  ;;  %v9159_v48 = vpop.f32.mrf.mxu0  ;;  %v11981_v45 = vld [vmem:[%s14028_s4 + $0xc8] sm:$0xff] }
 0x53f   :  { %v9172_v49 = vpop.f32.mrf.mxu1 }
 0x540   :  { %v8141_v50 = vmul.f32 -1.442695, %v1882_v47 }
 0x542   :  { %10253 = vpow2.f32 %v8141_v50 }
 0x543   :  { %v10250_v18 = vpop.eup %10249  ;;  %10255 = vtanh.f32 %v1812_v51 }
 0x544   :  { %v10252_v52 = vpop.eup %10251  ;;  %v1888_v54 = vadd.f32 1.0, %v10250_v18 }
 0x545   :  { %v1894_v55 = vadd.f32 1.0, %v10252_v52 }
 0x546   :  { %10257 = vrcp.f32 %v1888_v54 }
 0x547   :  { %10259 = vrcp.f32 %v1894_v55 }
 0x54f   :  { %v10254_v12 = vpop.eup %10253 }
 0x550   :  { %v10256_v56 = vpop.eup %10255  ;;  %v1901_v3 = vadd.f32 1.0, %v10254_v12 }
 0x552   :  { %10261 = vrcp.f32 %v1901_v3 }
 0x553   :  { %v10258_v57 = vpop.eup %10257 }
 0x554   :  { %v10260_v58 = vpop.eup %10259  ;;  %v1905_v60 = vmul.f32 %v10258_v57, %v10256_v56 }
 0x555   :  { %v1904_v36 = vmul.f32 %v10260_v58, %v11470_v63  ;;  %v11765_v63 = vld [vmem:[%s14028_s4 + $0x20] sm:$0xff] }
 0x557   :  { %v11729_v4 = vadd.f32 %v1905_v60, %v1904_v36 }
 0x559   :  { %10263 = vtanh.f32 %v11729_v4 }
 0x55f   :  { %v10262_v27 = vpop.eup %10261 }
 0x566   :  { %v10264_v6 = vpop.eup %10263 }
 0x567   :  { %v1908_v22 = vmul.f32 %v10264_v6, %v10262_v27 }
 0x569   :  { %2536 = vrot.lane.b32.xlu1 %v1908_v22, %s10899_s20  ;;  %v1913_v33 = vsel %vm183_vm3, %v1908_v22, %v1911_v31  ;;  %v11997_v31 = vld [vmem:[%s14029_s5] ss:$0 sm:$0xff] }
 0x56a   :  { %9184 = vmatmul.mubr.msk.f32.vlgmr.msra.gmra.mxu0 %vm197_vm4, %v1913_v33  ;;  %9197 = vmatmul.mubr.msk.f32.vlgmr.msra.gmra.mxu1 %vm197_vm4, %v1913_v33 }
 0x56b   :  { %9200 = vmatpush3.msra.mxu0 %v11476_v1  ;;  %9213 = vmatpush3.msra.mxu1 %v11481_v24  ;;  %v11771_v1 = vld [vmem:[%s14028_s4 + $0x48] sm:$0xff]  ;;  %v2224_v24 = vpop.permute.xlu0 %2223 }
 0x56c   :  { %9201 = vmatprep.subr.mxu0 %v14111_v26  ;;  %9214 = vmatprep.subr.mxu1 %v14111_v26 }
 0x56d   :  { %9202 = vmatpush3.msra.mxu0 %v11490_v23  ;;  %9215 = vmatpush3.msra.mxu1 %v11495_v25  ;;  %v11779_v23 = vld [vmem:[%s14028_s4 + $0x18] sm:$0xff]  ;;  %v11785_v25 = vld [vmem:[%s14028_s4 + $0x40] sm:$0xff] }
 0x56e   :  { %9203 = vmatprep.subr.mxu0 %v14111_v26  ;;  %9216 = vmatprep.subr.mxu1 %v14111_v26 }
 0x56f   :  { %9204 = vmatpush3.msra.mxu0 %v11504_v0  ;;  %9217 = vmatpush3.msra.mxu1 %v11509_v62  ;;  %v11793_v0 = vld [vmem:[%s14028_s4 + $0x10] sm:$0xff]  ;;  %v11799_v62 = vld [vmem:[%s14028_s4 + $0x38] sm:$0xff] }
 0x570   :  { %9205 = vmatprep.subr.mxu0 %v14111_v26  ;;  %9218 = vmatprep.subr.mxu1 %v14111_v26 }
 0x571   :  { %9206 = vmatpush3.msra.mxu0 %v11518_v8  ;;  %9219 = vmatpush3.msra.mxu1 %v11523_v9  ;;  %v2226_v8 = vsel %vm183_vm3, %v11073_v34, %v2224_v24  ;;  %v11809_v9 = vld [vmem:[%s14028_s4 + $0x8] sm:$0xff] }
 0x572   :  { %9207 = vmatprep.subr.mxu0 %v14111_v26  ;;  %9220 = vmatprep.subr.mxu1 %v14111_v26 }
 0x573   :  { %9208 = vmatpush3.msra.mxu0 %v11532_v28  ;;  %9209 = vmatprep.mubr.msk.f32.mxu0 %vm10901_vm2, %v14111_v26  ;;  %v11815_v28 = vld [vmem:[%s14028_s4 + $0x30] sm:$0xff] }
 0x574   :  { %9221 = vmatpush3.msra.mxu1 %v11539_v32  ;;  %9222 = vmatprep.mubr.msk.f32.mxu1 %vm10901_vm2, %v14111_v26  ;;  %v2228_v32 = vrot.slane %v2226_v8, 4 }
 0x575   :  { %9210 = vmatmul.mubr.msk.f32.vlgmr.msra.gmra.mxu0 %vm197_vm4, %v1913_v33  ;;  %9223 = vmatmul.mubr.msk.f32.vlgmr.msra.gmra.mxu1 %vm197_vm4, %v1913_v33 }
 0x576   :  { %9225 = vmatprep.subr.mxu0 %v14111_v26  ;;  %9238 = vmatprep.subr.mxu1 %v14111_v26 }
 0x577   :  { %9226 = vmatpush3.msra.mxu0 %v11765_v63  ;;  %9239 = vmatpush3.msra.mxu1 %v11771_v1 }
 0x578   :  { %9227 = vmatprep.subr.mxu0 %v14111_v26  ;;  %9240 = vmatprep.subr.mxu1 %v14111_v26 }
 0x579   :  { %9228 = vmatpush3.msra.mxu0 %v11779_v23  ;;  %9241 = vmatpush3.msra.mxu1 %v11785_v25 }
 0x57a   :  { %9229 = vmatprep.subr.mxu0 %v14111_v26  ;;  %9242 = vmatprep.subr.mxu1 %v14111_v26 }
 0x57b   :  { %9230 = vmatpush3.msra.mxu0 %v11793_v0  ;;  %9243 = vmatpush3.msra.mxu1 %v11799_v62 }
 0x57c   :  { %9231 = vmatprep.subr.mxu0 %v14111_v26  ;;  %9244 = vmatprep.subr.mxu1 %v14111_v26 }
 0x57d   :  { %9232 = vmatpush3.msra.mxu0 %v11809_v9  ;;  %9245 = vmatpush3.msra.mxu1 %v11815_v28 }
 0x57e   :  { %9233 = vmatprep.subr.mxu0 %v14111_v26  ;;  %9246 = vmatprep.subr.mxu1 %v14111_v26 }
 0x57f   :  { %9234 = vmatpush3.msra.mxu0 %v11823_v5  ;;  %9235 = vmatprep.mubr.msk.f32.mxu0 %vm10901_vm2, %v14111_v26 }
 0x580   :  { %9247 = vmatpush3.msra.mxu1 %v11831_v7  ;;  %9248 = vmatprep.mubr.msk.f32.mxu1 %vm10901_vm2, %v14111_v26 }
 0x581   :  { %9236 = vmatmul.mubr.msk.f32.vlgmr.msra.gmra.mxu0 %vm197_vm4, %v2228_v32  ;;  %9249 = vmatmul.mubr.msk.f32.vlgmr.msra.gmra.mxu1 %vm197_vm4, %v2228_v32 }
 0x582   :  { %9251 = vmatprep.subr.mxu0 %v14111_v26  ;;  %9264 = vmatprep.subr.mxu1 %v14111_v26 }
 0x583   :  { %9252 = vmatpush3.msra.mxu0 %v11843_v14  ;;  %9265 = vmatpush3.msra.mxu1 %v11849_v15 }
 0x584   :  { %9253 = vmatprep.subr.mxu0 %v14111_v26  ;;  %9266 = vmatprep.subr.mxu1 %v14111_v26 }
 0x585   :  { %9254 = vmatpush3.msra.mxu0 %v11857_v16  ;;  %9267 = vmatpush3.msra.mxu1 %v11863_v17 }
 0x586   :  { %9255 = vmatprep.subr.mxu0 %v14111_v26  ;;  %9268 = vmatprep.subr.mxu1 %v14111_v26 }
 0x587   :  { %9256 = vmatpush3.msra.mxu0 %v11871_v19  ;;  %9269 = vmatpush3.msra.mxu1 %v11877_v20 }
 0x588   :  { %9257 = vmatprep.subr.mxu0 %v14111_v26  ;;  %9270 = vmatprep.subr.mxu1 %v14111_v26 }
 0x589   :  { %9258 = vmatpush3.msra.mxu0 %v11885_v21  ;;  %9271 = vmatpush3.msra.mxu1 %v11891_v10 }
 0x58a   :  { %9259 = vmatprep.subr.mxu0 %v14111_v26  ;;  %9272 = vmatprep.subr.mxu1 %v14111_v26 }
 0x58b   :  { %9260 = vmatpush3.msra.mxu0 %v11899_v11  ;;  %9261 = vmatprep.mubr.msk.f32.mxu0 %vm10901_vm2, %v14111_v26 }
 0x58c   :  { %9273 = vmatpush3.msra.mxu1 %v11907_v30  ;;  %9274 = vmatprep.mubr.msk.f32.mxu1 %vm10901_vm2, %v14111_v26 }
 0x58d   :  { %9262 = vmatmul.mubr.msk.f32.vlgmr.msra.gmra.mxu0 %vm197_vm4, %v2228_v32  ;;  %9275 = vmatmul.mubr.msk.f32.vlgmr.msra.gmra.mxu1 %vm197_vm4, %v2228_v32 }
 0x58e   :  { %9277 = vmatprep.subr.mxu0 %v14111_v26  ;;  %9290 = vmatprep.subr.mxu1 %v14111_v26 }
 0x58f   :  { %9278 = vmatpush3.msra.mxu0 %v11919_v35  ;;  %9291 = vmatpush3.msra.mxu1 %v11925_v37 }
 0x590   :  { %9279 = vmatprep.subr.mxu0 %v14111_v26  ;;  %9292 = vmatprep.subr.mxu1 %v14111_v26 }
 0x591   :  { %9280 = vmatpush3.msra.mxu0 %v11933_v38  ;;  %9293 = vmatpush3.msra.mxu1 %v11939_v39 }
 0x592   :  { %9281 = vmatprep.subr.mxu0 %v14111_v26  ;;  %9294 = vmatprep.subr.mxu1 %v14111_v26 }
 0x593   :  { %9282 = vmatpush3.msra.mxu0 %v11947_v40  ;;  %9295 = vmatpush3.msra.mxu1 %v11953_v61 }
 0x594   :  { %9283 = vmatprep.subr.mxu0 %v14111_v26  ;;  %9296 = vmatprep.subr.mxu1 %v14111_v26 }
 0x595   :  { %9284 = vmatpush3.msra.mxu0 %v11961_v41  ;;  %9297 = vmatpush3.msra.mxu1 %v11967_v2 }
 0x596   :  { %9285 = vmatprep.subr.mxu0 %v14111_v26  ;;  %9298 = vmatprep.subr.mxu1 %v14111_v26 }
 0x597   :  { %9286 = vmatpush3.msra.mxu0 %v11975_v44  ;;  %9299 = vmatpush3.msra.mxu1 %v11981_v45 }
 0x598   :  { %9287 = vmatprep.mubr.msk.f32.mxu0 %vm10901_vm2, %v14111_v26  ;;  %9300 = vmatprep.mubr.msk.f32.mxu1 %vm10901_vm2, %v14111_v26 }
 0x599   :  { %9303 = vmatprep.subr.mxu0 %v14111_v26  ;;  %9316 = vmatprep.subr.mxu1 %v14111_v26 }
 0x62a   :  { %v1983_v47 = vpop.f32.mrf.mxu0  ;;  %v2053_v48 = vpop.f32.mrf.mxu1 }
 0x62b   :  { %v1984_v49 = vadd.f32 %v11634_v13, %v1983_v47  ;;  %v2054_v50 = vadd.f32 %v11639_v29, %v2053_v48 }
 0x62c   :  { %v9185_v51 = vpop.f32.mrf.mxu0  ;;  %v9198_v18 = vpop.f32.mrf.mxu1 }
 0x62d   :  { %v8146_v52 = vmul.f32 -1.442695, %v1984_v49  ;;  %v8147_v54 = vmul.f32 -1.442695, %v2054_v50 }
 0x62f   :  { %10265 = vpow2.f32 %v8146_v52 }
 0x630   :  { %10267 = vpow2.f32 %v8147_v54 }
 0x635   :  { %v2123_v55 = vpop.f32.mrf.mxu0  ;;  %v2193_v12 = vpop.f32.mrf.mxu1 }
 0x636   :  { %v2194_v56 = vadd.f32 %v11646_v43, %v2193_v12  ;;  %v2124_v60 = vadd.f32 %v11651_v46, %v2123_v55  ;;  %v12003_v46 = vld [vmem:[%s14029_s5 + $0x1] ss:$0 sm:$0xff] }
 0x637   :  { %v9211_v57 = vpop.f32.mrf.mxu0  ;;  %v9224_v58 = vpop.f32.mrf.mxu1 }
 0x638   :  { %v8148_v3 = vmul.f32 -1.442695, %v2194_v56  ;;  %10269 = vtanh.f32 %v2124_v60  ;;  %v12010_v56 = vld [vmem:[%s14029_s5 + $0x3] ss:$0 sm:$0xff] }
 0x63a   :  { %10271 = vpow2.f32 %v8148_v3 }
 0x63c   :  { %v10266_v36 = vpop.eup %10265 }
 0x63d   :  { %v10268_v27 = vpop.eup %10267  ;;  %v2200_v13 = vadd.f32 1.0, %v10266_v36 }
 0x63e   :  { %v2206_v29 = vadd.f32 1.0, %v10268_v27  ;;  %v12018_v27 = vld [vmem:[%s14029_s5 + $0x2] ss:$0 sm:$0xff] }
 0x63f   :  { %10273 = vrcp.f32 %v2200_v13 }
 0x640   :  { %10275 = vrcp.f32 %v2206_v29 }
 0x641   :  { %v2297_v6 = vpop.f32.mrf.mxu0  ;;  %v2367_v22 = vpop.f32.mrf.mxu1 }
 0x642   :  { %v2298_v43 = vadd.f32 %v11997_v31, %v2297_v6  ;;  %v2368_v33 = vadd.f32 %v12003_v46, %v2367_v22 }
 0x643   :  { %v9237_v24 = vpop.f32.mrf.mxu0  ;;  %v9250_v8 = vpop.f32.mrf.mxu1 }
 0x644   :  { %v8153_v32 = vmul.f32 -1.442695, %v2298_v43  ;;  %v8154_v47 = vmul.f32 -1.442695, %v2368_v33 }
 0x645   :  { %v10270_v48 = vpop.eup %10269 }
 0x646   :  { %10277 = vpow2.f32 %v8153_v32 }
 0x647   :  { %10279 = vpow2.f32 %v8154_v47  ;;  %v10272_v49 = vpop.eup %10271 }
 0x648   :  { %v2213_v12 = vadd.f32 1.0, %v10272_v49 }
 0x64a   :  { %10281 = vrcp.f32 %v2213_v12  ;;  %v2537_v12 = vpop.permute.xlu1 %2536 }
 0x64c   :  { %v10274_v50 = vpop.eup %10273 }
 0x64d   :  { %v10276_v51 = vpop.eup %10275  ;;  %v2217_v18 = vmul.f32 %v10274_v50, %v10270_v48  ;;  %v2437_v52 = vpop.f32.mrf.mxu0 }
 0x64e   :  { %v2507_v54 = vpop.f32.mrf.mxu1  ;;  %v2216_v55 = vmul.f32 %v10276_v51, %v11658_v42  ;;  %v2438_v42 = vadd.f32 %v12018_v27, %v2437_v52 }
 0x64f   :  { %v2508_v57 = vadd.f32 %v12010_v56, %v2507_v54  ;;  %v9263_v58 = vpop.f32.mrf.mxu0 }
 0x650   :  { %v9276_v60 = vpop.f32.mrf.mxu1  ;;  %v12013_v3 = vadd.f32 %v2217_v18, %v2216_v55 }
 0x651   :  { %v8155_v36 = vmul.f32 -1.442695, %v2508_v57  ;;  %v12042_v60 = vld [vmem:[%s14028_s4 + $0x138] sm:$0xff] }
 0x652   :  { %10283 = vtanh.f32 %v12013_v3 }
 0x653   :  { %v10278_v13 = vpop.eup %10277  ;;  %10285 = vpow2.f32 %v8155_v36  ;;  %v12051_v36 = vld [vmem:[%s14028_s4 + $0x108] sm:$0xff] }
 0x654   :  { %v10280_v29 = vpop.eup %10279  ;;  %v2514_v6 = vadd.f32 1.0, %v10278_v13  ;;  %10287 = vtanh.f32 %v2438_v42  ;;  %v12057_v42 = vld [vmem:[%s14028_s4 + $0x130] sm:$0xff]  ;;  %v12065_v13 = vld [vmem:[%s14028_s4 + $0x100] sm:$0xff] }
 0x655   :  { %v2520_v22 = vadd.f32 1.0, %v10280_v29  ;;  %v12071_v29 = vld [vmem:[%s14028_s4 + $0x128] sm:$0xff] }
 0x656   :  { %10289 = vrcp.f32 %v2514_v6  ;;  %v12079_v6 = vld [vmem:[%s14028_s4 + $0xf8] sm:$0xff] }
 0x657   :  { %10291 = vrcp.f32 %v2520_v22  ;;  %v10282_v43 = vpop.eup %10281  ;;  %v12085_v22 = vld [vmem:[%s14028_s4 + $0x120] sm:$0xff] }
 0x658   :  { %14125 = vst [vmem:[#allocation16_spill] sm:$0xff] %v12085_v22 }
 0x65f   :  { %v10284_v33 = vpop.eup %10283 }
 0x660   :  { %v10286_v24 = vpop.eup %10285  ;;  %v12022_v8 = vmul.f32 %v10284_v33, %v10282_v43  ;;  %v12093_v43 = vld [vmem:[%s14028_s4 + $0xf0] sm:$0xff]  ;;  %v12101_v33 = vld [vmem:[%s14028_s4 + $0x118] sm:$0xff] }
 0x661   :  { %v10288_v32 = vpop.eup %10287  ;;  %v2527_v50 = vadd.f32 1.0, %v10286_v24  ;;  %14126 = vst [vmem:[#allocation17_spill] sm:$0xff] %v12093_v43  ;;  %14127 = vst [vmem:[#allocation18_spill] sm:$0xff] %v12101_v33  ;;  %v12113_v24 = vld [vmem:[%s14028_s4 + $0x160] sm:$0xff] }
 0x662   :  { %2848 = vrot.lane.b32.xlu0 %v12022_v8, %s10899_s20  ;;  %14128 = vst [vmem:[#allocation19_spill] sm:$0xff] %v12113_v24 }
 0x663   :  { %v10290_v47 = vpop.eup %10289  ;;  %10293 = vrcp.f32 %v2527_v50  ;;  %v12147_v50 = vld [vmem:[%s14028_s4 + $0x178] sm:$0xff] }
 0x664   :  { %v10292_v48 = vpop.eup %10291  ;;  %v2531_v49 = vmul.f32 %v10290_v47, %v10288_v32  ;;  %v12119_v32 = vld [vmem:[%s14028_s4 + $0x188] sm:$0xff]  ;;  %v12127_v47 = vld [vmem:[%s14028_s4 + $0x158] sm:$0xff]  ;;  %14133 = vst [vmem:[#allocation24_spill] sm:$0xff] %v12147_v50 }
 0x665   :  { %v2530_v51 = vmul.f32 %v10292_v48, %v11667_v59  ;;  %v12036_v59 = vld [vmem:[%s14028_s4 + $0x110] sm:$0xff]  ;;  %14129 = vst [vmem:[#allocation20_spill] sm:$0xff] %v12119_v32  ;;  %14130 = vst [vmem:[#allocation21_spill] sm:$0xff] %v12127_v47  ;;  %v12133_v48 = vld [vmem:[%s14028_s4 + $0x180] sm:$0xff] }
 0x666   :  { %14131 = vst [vmem:[#allocation22_spill] sm:$0xff] %v12133_v48 }
 0x667   :  { %v12027_v18 = vadd.f32 %v2531_v49, %v2530_v51  ;;  %v12141_v49 = vld [vmem:[%s14028_s4 + $0x150] sm:$0xff]  ;;  %v12155_v51 = vld [vmem:[%s14028_s4 + $0x148] sm:$0xff] }
 0x668   :  { %14132 = vst [vmem:[#allocation23_spill] sm:$0xff] %v12141_v49  ;;  %14134 = vst [vmem:[#allocation25_spill] sm:$0xff] %v12155_v51 }
 0x669   :  { %10295 = vtanh.f32 %v12027_v18 }
 0x670   :  { %v10294_v52 = vpop.eup %10293 }
 0x676   :  { %v10296_v54 = vpop.eup %10295 }
 0x677   :  { %v2534_v55 = vmul.f32 %v10296_v54, %v10294_v52  ;;  %v12161_v52 = vld [vmem:[%s14028_s4 + $0x170] sm:$0xff]  ;;  %v12169_v54 = vld [vmem:[%s14028_s4 + $0x140] sm:$0xff] }
 0x678   :  { %14135 = vst [vmem:[#allocation26_spill] sm:$0xff] %v12161_v52  ;;  %14136 = vst [vmem:[#allocation27_spill] sm:$0xff] %v12169_v54 }
 0x679   :  { %v2539_v57 = vsel %vm183_vm3, %v2534_v55, %v2537_v12  ;;  %v3160_v58 = vrot.slane %v2534_v55, 2  ;;  %v12175_v55 = vld [vmem:[%s14028_s4 + $0x168] sm:$0xff] }
 0x67a   :  { %9288 = vmatmul.mubr.msk.f32.vlgmr.msra.gmra.mxu0 %vm197_vm4, %v2539_v57  ;;  %9301 = vmatmul.mubr.msk.f32.vlgmr.msra.gmra.mxu1 %vm197_vm4, %v2539_v57  ;;  %14137 = vst [vmem:[#allocation28_spill] sm:$0xff] %v12175_v55 }
 0x67b   :  { %9304 = vmatpush3.msra.mxu0 %v12036_v59  ;;  %9317 = vmatpush3.msra.mxu1 %v12042_v60 }
 0x67c   :  { %3161 = vrot.lane.b32.xlu1 %v3160_v58, %s10899_s20  ;;  %9305 = vmatprep.subr.mxu0 %v14111_v26  ;;  %v12187_v58 = vld [vmem:[%s14029_s5 + $0x4] ss:$0 sm:$0xff] }
 0x67d   :  { %9318 = vmatprep.subr.mxu1 %v14111_v26  ;;  %9306 = vmatpush3.msra.mxu0 %v12051_v36  ;;  %14138 = vst [vmem:[#allocation29_spill] sm:$0xff] %v12187_v58 }
 0x67e   :  { %9319 = vmatpush3.msra.mxu1 %v12057_v42  ;;  %9307 = vmatprep.subr.mxu0 %v14111_v26 }
 0x67f   :  { %9320 = vmatprep.subr.mxu1 %v14111_v26  ;;  %9308 = vmatpush3.msra.mxu0 %v12065_v13 }
 0x680   :  { %9321 = vmatpush3.msra.mxu1 %v12071_v29  ;;  %9309 = vmatprep.subr.mxu0 %v14111_v26 }
 0x681   :  { %9322 = vmatprep.subr.mxu1 %v14111_v26  ;;  %9310 = vmatpush3.msra.mxu0 %v12079_v6 }
 0x682   :  { %9323 = vmatpush3.msra.mxu1 %v12085_v22  ;;  %9311 = vmatprep.subr.mxu0 %v14111_v26 }
 0x683   :  { %9324 = vmatprep.subr.mxu1 %v14111_v26  ;;  %9312 = vmatpush3.msra.mxu0 %v12093_v43 }
 0x684   :  { %9313 = vmatprep.mubr.msk.f32.mxu0 %vm10901_vm2, %v14111_v26  ;;  %9325 = vmatpush3.msra.mxu1 %v12101_v33 }
 0x685   :  { %9326 = vmatprep.mubr.msk.f32.mxu1 %vm10901_vm2, %v14111_v26  ;;  %9314 = vmatmul.mubr.msk.f32.vlgmr.msra.gmra.mxu0 %vm197_vm4, %v2539_v57 }
 0x686   :  { %9327 = vmatmul.mubr.msk.f32.vlgmr.msra.gmra.mxu1 %vm197_vm4, %v2539_v57  ;;  %9329 = vmatprep.subr.mxu0 %v14111_v26 }
 0x687   :  { %9342 = vmatprep.subr.mxu1 %v14111_v26  ;;  %9330 = vmatpush3.msra.mxu0 %v12113_v24  ;;  %v12199_v24 = vld [vmem:[%s14029_s5 + $0x7] ss:$0 sm:$0xff] }
 0x688   :  { %9343 = vmatpush3.msra.mxu1 %v12119_v32  ;;  %9331 = vmatprep.subr.mxu0 %v14111_v26  ;;  %14140 = vst [vmem:[#allocation31_spill] sm:$0xff] %v12199_v24 }
 0x689   :  { %9344 = vmatprep.subr.mxu1 %v14111_v26  ;;  %9332 = vmatpush3.msra.mxu0 %v12127_v47 }
 0x68a   :  { %9345 = vmatpush3.msra.mxu1 %v12133_v48  ;;  %9333 = vmatprep.subr.mxu0 %v14111_v26 }
 0x68b   :  { %9346 = vmatprep.subr.mxu1 %v14111_v26  ;;  %9334 = vmatpush3.msra.mxu0 %v12141_v49 }
 0x68c   :  { %9347 = vmatpush3.msra.mxu1 %v12147_v50  ;;  %9335 = vmatprep.subr.mxu0 %v14111_v26 }
 0x68d   :  { %9348 = vmatprep.subr.mxu1 %v14111_v26  ;;  %9336 = vmatpush3.msra.mxu0 %v12155_v51 }
 0x68e   :  { %9349 = vmatpush3.msra.mxu1 %v12161_v52  ;;  %9337 = vmatprep.subr.mxu0 %v14111_v26 }
 0x68f   :  { %9350 = vmatprep.subr.mxu1 %v14111_v26  ;;  %9338 = vmatpush3.msra.mxu0 %v12169_v54 }
 0x690   :  { %9351 = vmatpush3.msra.mxu1 %v12175_v55  ;;  %9339 = vmatprep.mubr.msk.f32.mxu0 %vm10901_vm2, %v14111_v26  ;;  %v12193_v55 = vld [vmem:[%s14029_s5 + $0x5] ss:$0 sm:$0xff] }
 0x691   :  { %9352 = vmatprep.mubr.msk.f32.mxu1 %vm10901_vm2, %v14111_v26  ;;  %9355 = vmatprep.subr.mxu0 %v14111_v26  ;;  %14139 = vst [vmem:[#allocation30_spill] sm:$0xff] %v12193_v55 }
 0x692   :  { %9368 = vmatprep.subr.mxu1 %v14111_v26 }
 0x73a   :  { %v2609_v12 = vpop.f32.mrf.mxu0  ;;  %v2679_v57 = vpop.f32.mrf.mxu1 }
 0x73b   :  { %v2610_v54 = vadd.f32 %v12187_v58, %v2609_v12  ;;  %v2680_v52 = vadd.f32 %v12193_v55, %v2679_v57 }
 0x73c   :  { %v9289_v51 = vpop.f32.mrf.mxu0  ;;  %v9302_v50 = vpop.f32.mrf.mxu1 }
 0x73d   :  { %v8160_v49 = vmul.f32 -1.442695, %v2610_v54  ;;  %v8161_v48 = vmul.f32 -1.442695, %v2680_v52  ;;  %v12205_v50 = vld [vmem:[%s14029_s5 + $0x6] ss:$0 sm:$0xff] }
 0x73f   :  { %10297 = vpow2.f32 %v8160_v49 }
 0x740   :  { %10299 = vpow2.f32 %v8161_v48 }
 0x745   :  { %v2749_v47 = vpop.f32.mrf.mxu0 }
 0x746   :  { %v2819_v32 = vpop.f32.mrf.mxu1  ;;  %v2750_v49 = vadd.f32 %v12205_v50, %v2749_v47 }
 0x747   :  { %v2820_v12 = vadd.f32 %v12199_v24, %v2819_v32  ;;  %v9315_v58 = vpop.f32.mrf.mxu0 }
 0x748   :  { %v9328_v33 = vpop.f32.mrf.mxu1 }
 0x749   :  { %v8162_v43 = vmul.f32 -1.442695, %v2820_v12 }
 0x74b   :  { %10301 = vpow2.f32 %v8162_v43 }
 0x74c   :  { %v10298_v48 = vpop.eup %10297  ;;  %10303 = vtanh.f32 %v2750_v49 }
 0x74d   :  { %v10300_v51 = vpop.eup %10299  ;;  %v2826_v52 = vadd.f32 1.0, %v10298_v48 }
 0x74e   :  { %v2832_v54 = vadd.f32 1.0, %v10300_v51  ;;  %v2849_v51 = vpop.permute.xlu0 %2848 }
 0x74f   :  { %10305 = vrcp.f32 %v2826_v52  ;;  %v12239_v52 = vld [vmem:[%s14028_s4 + $0x1d0] sm:$0xff] }
 0x750   :  { %10307 = vrcp.f32 %v2832_v54  ;;  %v12247_v54 = vld [vmem:[%s14028_s4 + $0x1a0] sm:$0xff] }
 0x758   :  { %v10302_v57 = vpop.eup %10301 }
 0x759   :  { %v10304_v32 = vpop.eup %10303  ;;  %v2839_v24 = vadd.f32 1.0, %v10302_v57  ;;  %v12253_v57 = vld [vmem:[%s14028_s4 + $0x1c8] sm:$0xff] }
 0x75b   :  { %10309 = vrcp.f32 %v2839_v24  ;;  %v12225_v24 = vld [vmem:[%s14028_s4 + $0x1d8] sm:$0xff] }
 0x75c   :  { %v10306_v58 = vpop.eup %10305 }
 0x75d   :  { %v10308_v33 = vpop.eup %10307  ;;  %v2843_v12 = vmul.f32 %v10306_v58, %v10304_v32  ;;  %v12261_v32 = vld [vmem:[%s14028_s4 + $0x198] sm:$0xff]  ;;  %v12267_v58 = vld [vmem:[%s14028_s4 + $0x1c0] sm:$0xff] }
 0x75e   :  { %v2842_v55 = vmul.f32 %v10308_v33, %v11729_v4  ;;  %v12219_v4 = vld [vmem:[%s14028_s4 + $0x1b0] sm:$0xff] }
 0x75f   :  { %v12275_v33 = vld [vmem:[%s14028_s4 + $0x190] sm:$0xff] }
 0x760   :  { %v12209_v22 = vadd.f32 %v2843_v12, %v2842_v55  ;;  %v12233_v55 = vld [vmem:[%s14028_s4 + $0x1a8] sm:$0xff]  ;;  %v12283_v12 = vld [vmem:[%s14028_s4 + $0x1b8] sm:$0xff] }
 0x762   :  { %10311 = vtanh.f32 %v12209_v22 }
 0x768   :  { %v10310_v47 = vpop.eup %10309 }
 0x76f   :  { %v10312_v48 = vpop.eup %10311 }
 0x770   :  { %v2846_v43 = vmul.f32 %v10312_v48, %v10310_v47  ;;  %v3162_v47 = vpop.permute.xlu1 %3161 }
 0x772   :  { %3474 = vrot.lane.b32.xlu0 %v2846_v43, %s10899_s20  ;;  %v2851_v49 = vsel %vm183_vm3, %v2846_v43, %v2849_v51 }
 0x773   :  { %9340 = vmatmul.mubr.msk.f32.vlgmr.msra.gmra.mxu0 %vm197_vm4, %v2851_v49  ;;  %9353 = vmatmul.mubr.msk.f32.vlgmr.msra.gmra.mxu1 %vm197_vm4, %v2851_v49 }
 0x774   :  { %9356 = vmatpush3.msra.mxu0 %v12219_v4  ;;  %9369 = vmatpush3.msra.mxu1 %v12225_v24 }
 0x775   :  { %9357 = vmatprep.subr.mxu0 %v14111_v26  ;;  %9370 = vmatprep.subr.mxu1 %v14111_v26 }
 0x776   :  { %9358 = vmatpush3.msra.mxu0 %v12233_v55  ;;  %9371 = vmatpush3.msra.mxu1 %v12239_v52 }
 0x777   :  { %9359 = vmatprep.subr.mxu0 %v14111_v26  ;;  %9372 = vmatprep.subr.mxu1 %v14111_v26 }
 0x778   :  { %9360 = vmatpush3.msra.mxu0 %v12247_v54  ;;  %9373 = vmatpush3.msra.mxu1 %v12253_v57 }
 0x779   :  { %9361 = vmatprep.subr.mxu0 %v14111_v26  ;;  %9374 = vmatprep.subr.mxu1 %v14111_v26 }
 0x77a   :  { %9362 = vmatpush3.msra.mxu0 %v12261_v32  ;;  %9375 = vmatpush3.msra.mxu1 %v12267_v58 }
 0x77b   :  { %9363 = vmatprep.subr.mxu0 %v14111_v26  ;;  %9376 = vmatprep.subr.mxu1 %v14111_v26 }
 0x77c   :  { %9364 = vmatpush3.msra.mxu0 %v12275_v33  ;;  %9365 = vmatprep.mubr.msk.f32.mxu0 %vm10901_vm2, %v14111_v26 }
 0x77d   :  { %9377 = vmatpush3.msra.mxu1 %v12283_v12  ;;  %9378 = vmatprep.mubr.msk.f32.mxu1 %vm10901_vm2, %v14111_v26 }
 0x77e   :  { %9366 = vmatmul.mubr.msk.f32.vlgmr.msra.gmra.mxu0 %vm197_vm4, %v2851_v49  ;;  %9379 = vmatmul.mubr.msk.f32.vlgmr.msra.gmra.mxu1 %vm197_vm4, %v2851_v49 }
 0x77f   :  { %9381 = vmatprep.subr.mxu0 %v14111_v26  ;;  %9394 = vmatprep.subr.mxu1 %v14111_v26 }
 0x780   :  { %9382 = vmatpush3.msra.mxu0 %v11765_v63  ;;  %9395 = vmatpush3.msra.mxu1 %v11771_v1  ;;  %v3164_v63 = vsel %vm183_vm3, %v11073_v34, %v3162_v47 }
 0x781   :  { %9383 = vmatprep.subr.mxu0 %v14111_v26  ;;  %9396 = vmatprep.subr.mxu1 %v14111_v26  ;;  %v3166_v1 = vrot.slane %v3164_v63, 6 }
 0x782   :  { %9384 = vmatpush3.msra.mxu0 %v11779_v23  ;;  %9397 = vmatpush3.msra.mxu1 %v11785_v25  ;;  %v12373_v25 = vld [vmem:[%s14029_s5 + $0x8] ss:$0 sm:$0xff] }
 0x783   :  { %9385 = vmatprep.subr.mxu0 %v14111_v26  ;;  %9398 = vmatprep.subr.mxu1 %v14111_v26 }
 0x784   :  { %9386 = vmatpush3.msra.mxu0 %v11793_v0  ;;  %9399 = vmatpush3.msra.mxu1 %v11799_v62  ;;  %v12379_v62 = vld [vmem:[%s14029_s5 + $0x9] ss:$0 sm:$0xff] }
 0x785   :  { %9387 = vmatprep.subr.mxu0 %v14111_v26  ;;  %9400 = vmatprep.subr.mxu1 %v14111_v26 }
 0x786   :  { %9388 = vmatpush3.msra.mxu0 %v11809_v9  ;;  %9401 = vmatpush3.msra.mxu1 %v11815_v28 }
 0x787   :  { %9389 = vmatprep.subr.mxu0 %v14111_v26  ;;  %9402 = vmatprep.subr.mxu1 %v14111_v26 }
 0x788   :  { %9390 = vmatpush3.msra.mxu0 %v11823_v5  ;;  %9391 = vmatprep.mubr.msk.f32.mxu0 %vm10901_vm2, %v14111_v26 }
 0x789   :  { %9403 = vmatpush3.msra.mxu1 %v11831_v7  ;;  %9404 = vmatprep.mubr.msk.f32.mxu1 %vm10901_vm2, %v14111_v26 }
 0x78a   :  { %9392 = vmatmul.mubr.msk.f32.vlgmr.msra.gmra.mxu0 %vm197_vm4, %v3166_v1  ;;  %9405 = vmatmul.mubr.msk.f32.vlgmr.msra.gmra.mxu1 %vm197_vm4, %v3166_v1 }
 0x78b   :  { %9407 = vmatprep.subr.mxu0 %v14111_v26  ;;  %9420 = vmatprep.subr.mxu1 %v14111_v26 }
 0x78c   :  { %9408 = vmatpush3.msra.mxu0 %v11843_v14  ;;  %9421 = vmatpush3.msra.mxu1 %v11849_v15 }
 0x78d   :  { %9409 = vmatprep.subr.mxu0 %v14111_v26  ;;  %9422 = vmatprep.subr.mxu1 %v14111_v26 }
 0x78e   :  { %9410 = vmatpush3.msra.mxu0 %v11857_v16  ;;  %9423 = vmatpush3.msra.mxu1 %v11863_v17  ;;  %v12385_v17 = vld [vmem:[%s14029_s5 + $0xb] ss:$0 sm:$0xff] }
 0x78f   :  { %9411 = vmatprep.subr.mxu0 %v14111_v26  ;;  %9424 = vmatprep.subr.mxu1 %v14111_v26 }
 0x790   :  { %9412 = vmatpush3.msra.mxu0 %v11871_v19  ;;  %9425 = vmatpush3.msra.mxu1 %v11877_v20 }
 0x791   :  { %9413 = vmatprep.subr.mxu0 %v14111_v26  ;;  %9426 = vmatprep.subr.mxu1 %v14111_v26 }
 0x792   :  { %9414 = vmatpush3.msra.mxu0 %v11885_v21  ;;  %9427 = vmatpush3.msra.mxu1 %v11891_v10  ;;  %v12391_v10 = vld [vmem:[%s14029_s5 + $0xa] ss:$0 sm:$0xff] }
 0x793   :  { %9415 = vmatprep.subr.mxu0 %v14111_v26  ;;  %9428 = vmatprep.subr.mxu1 %v14111_v26 }
 0x794   :  { %9416 = vmatpush3.msra.mxu0 %v11899_v11  ;;  %9417 = vmatprep.mubr.msk.f32.mxu0 %vm10901_vm2, %v14111_v26 }
 0x795   :  { %9429 = vmatpush3.msra.mxu1 %v11907_v30  ;;  %9430 = vmatprep.mubr.msk.f32.mxu1 %vm10901_vm2, %v14111_v26 }
 0x796   :  { %9418 = vmatmul.mubr.msk.f32.vlgmr.msra.gmra.mxu0 %vm197_vm4, %v3166_v1  ;;  %9431 = vmatmul.mubr.msk.f32.vlgmr.msra.gmra.mxu1 %vm197_vm4, %v3166_v1 }
 0x797   :  { %9433 = vmatprep.subr.mxu0 %v14111_v26  ;;  %9446 = vmatprep.subr.mxu1 %v14111_v26 }
 0x798   :  { %9434 = vmatpush3.msra.mxu0 %v11919_v35  ;;  %9447 = vmatpush3.msra.mxu1 %v11925_v37 }
 0x799   :  { %9435 = vmatprep.subr.mxu0 %v14111_v26  ;;  %9448 = vmatprep.subr.mxu1 %v14111_v26 }
 0x79a   :  { %9436 = vmatpush3.msra.mxu0 %v11933_v38  ;;  %9449 = vmatpush3.msra.mxu1 %v11939_v39 }
 0x79b   :  { %9437 = vmatprep.subr.mxu0 %v14111_v26  ;;  %9450 = vmatprep.subr.mxu1 %v14111_v26 }
 0x79c   :  { %9438 = vmatpush3.msra.mxu0 %v11947_v40  ;;  %9451 = vmatpush3.msra.mxu1 %v11953_v61 }
 0x79d   :  { %9439 = vmatprep.subr.mxu0 %v14111_v26  ;;  %9452 = vmatprep.subr.mxu1 %v14111_v26 }
 0x79e   :  { %9440 = vmatpush3.msra.mxu0 %v11961_v41  ;;  %9453 = vmatpush3.msra.mxu1 %v11967_v2 }
 0x79f   :  { %9441 = vmatprep.subr.mxu0 %v14111_v26  ;;  %9454 = vmatprep.subr.mxu1 %v14111_v26 }
 0x7a0   :  { %9442 = vmatpush3.msra.mxu0 %v11975_v44  ;;  %9455 = vmatpush3.msra.mxu1 %v11981_v45 }
 0x7a1   :  { %9443 = vmatprep.mubr.msk.f32.mxu0 %vm10901_vm2, %v14111_v26  ;;  %9456 = vmatprep.mubr.msk.f32.mxu1 %vm10901_vm2, %v14111_v26 }
 0x7a2   :  { %9459 = vmatprep.subr.mxu0 %v14111_v26  ;;  %9472 = vmatprep.subr.mxu1 %v14111_v26 }
 0x833   :  { %v2921_v34 = vpop.f32.mrf.mxu0  ;;  %v2991_v23 = vpop.f32.mrf.mxu1 }
 0x834   :  { %v2922_v0 = vadd.f32 %v12373_v25, %v2921_v34  ;;  %v2992_v9 = vadd.f32 %v12379_v62, %v2991_v23 }
 0x835   :  { %v9341_v28 = vpop.f32.mrf.mxu0  ;;  %v9354_v5 = vpop.f32.mrf.mxu1 }
 0x836   :  { %v8167_v7 = vmul.f32 -1.442695, %v2922_v0  ;;  %v8168_v14 = vmul.f32 -1.442695, %v2992_v9 }
 0x838   :  { %10313 = vpow2.f32 %v8167_v7 }
 0x839   :  { %10315 = vpow2.f32 %v8168_v14 }
 0x83e   :  { %v3061_v15 = vpop.f32.mrf.mxu0  ;;  %v3131_v16 = vpop.f32.mrf.mxu1 }
 0x83f   :  { %v3132_v19 = vadd.f32 %v12385_v17, %v3131_v16  ;;  %v3062_v11 = vadd.f32 %v12391_v10, %v3061_v15 }
 0x840   :  { %v9367_v20 = vpop.f32.mrf.mxu0  ;;  %v9380_v21 = vpop.f32.mrf.mxu1 }
 0x841   :  { %v8169_v30 = vmul.f32 -1.442695, %v3132_v19  ;;  %10317 = vtanh.f32 %v3062_v11  ;;  %v7847_v21 = vrot.slane %v12022_v8, 6 }
 0x843   :  { %10319 = vpow2.f32 %v8169_v30 }
 0x845   :  { %v10314_v35 = vpop.eup %10313 }
 0x846   :  { %v10316_v37 = vpop.eup %10315  ;;  %v3138_v38 = vadd.f32 1.0, %v10314_v35 }
 0x847   :  { %v3144_v39 = vadd.f32 1.0, %v10316_v37 }
 0x848   :  { %10321 = vrcp.f32 %v3138_v38 }
 0x849   :  { %10323 = vrcp.f32 %v3144_v39 }
 0x84a   :  { %v3235_v40 = vpop.f32.mrf.mxu0  ;;  %v3305_v61 = vpop.f32.mrf.mxu1 }
 0x84b   :  { %v3236_v41 = vadd.f32 %v11997_v31, %v3235_v40  ;;  %v3306_v2 = vadd.f32 %v12003_v46, %v3305_v61  ;;  %v7861_v61 = vsel %vm7860_vm5, %v11662_v53, %v7847_v21  ;;  %v14141_v53 = vld [vmem:[#allocation16_spill] sm:$0xff] }
 0x84c   :  { %v9393_v44 = vpop.f32.mrf.mxu0  ;;  %v9406_v45 = vpop.f32.mrf.mxu1 }
 0x84d   :  { %v8174_v48 = vmul.f32 -1.442695, %v3236_v41  ;;  %v8175_v43 = vmul.f32 -1.442695, %v3306_v2 }
 0x84e   :  { %v10318_v51 = vpop.eup %10317 }
 0x84f   :  { %10325 = vpow2.f32 %v8174_v48 }
 0x850   :  { %10327 = vpow2.f32 %v8175_v43  ;;  %v10320_v49 = vpop.eup %10319  ;;  %v3475_v43 = vpop.permute.xlu0 %3474 }
 0x851   :  { %v3151_v9 = vadd.f32 1.0, %v10320_v49  ;;  %v14150_v49 = vld [vmem:[#allocation25_spill] sm:$0xff] }
 0x853   :  { %10329 = vrcp.f32 %v3151_v9 }
 0x855   :  { %v10322_v47 = vpop.eup %10321 }
 0x856   :  { %v10324_v63 = vpop.eup %10323  ;;  %v3155_v1 = vmul.f32 %v10322_v47, %v10318_v51  ;;  %v3375_v34 = vpop.f32.mrf.mxu0  ;;  %v14151_v47 = vld [vmem:[#allocation26_spill] sm:$0xff] }
 0x857   :  { %v3445_v23 = vpop.f32.mrf.mxu1  ;;  %v3154_v0 = vmul.f32 %v10324_v63, %v12013_v3  ;;  %v3376_v14 = vadd.f32 %v12018_v27, %v3375_v34  ;;  %v14152_v63 = vld [vmem:[#allocation27_spill] sm:$0xff] }
 0x858   :  { %v3446_v31 = vadd.f32 %v12010_v56, %v3445_v23  ;;  %v9419_v28 = vpop.f32.mrf.mxu0 }
 0x859   :  { %v9432_v46 = vpop.f32.mrf.mxu1  ;;  %v12398_v5 = vadd.f32 %v3155_v1, %v3154_v0  ;;  %v14153_v1 = vld [vmem:[#allocation28_spill] sm:$0xff]  ;;  %v14154_v0 = vld [vmem:[#allocation29_spill] sm:$0xff] }
 0x85a   :  { %v8176_v7 = vmul.f32 -1.442695, %v3446_v31  ;;  %v14155_v31 = vld [vmem:[#allocation30_spill] sm:$0xff] }
 0x85b   :  { %10331 = vtanh.f32 %v12398_v5 }
 0x85c   :  { %v10326_v15 = vpop.eup %10325  ;;  %10333 = vpow2.f32 %v8176_v7 }
 0x85d   :  { %v10328_v16 = vpop.eup %10327  ;;  %v3452_v19 = vadd.f32 1.0, %v10326_v15  ;;  %10335 = vtanh.f32 %v3376_v14 }
 0x85e   :  { %v3458_v20 = vadd.f32 1.0, %v10328_v16 }
 0x85f   :  { %10337 = vrcp.f32 %v3452_v19 }
 0x860   :  { %10339 = vrcp.f32 %v3458_v20  ;;  %v10330_v3 = vpop.eup %10329  ;;  %v14156_v20 = vld [vmem:[#allocation31_spill] sm:$0xff] }
 0x868   :  { %v10332_v56 = vpop.eup %10331 }
 0x869   :  { %v10334_v11 = vpop.eup %10333  ;;  %v3158_v30 = vmul.f32 %v10332_v56, %v10330_v3 }
 0x86a   :  { %v10336_v35 = vpop.eup %10335  ;;  %v3465_v40 = vadd.f32 1.0, %v10334_v11 }
 0x86b   :  { %3786 = vrot.lane.b32.xlu1 %v3158_v30, %s10899_s20  ;;  %v7849_v37 = vrot.slane %v3158_v30, 4 }
 0x86c   :  { %v10338_v27 = vpop.eup %10337  ;;  %10341 = vrcp.f32 %v3465_v40 }
 0x86d   :  { %v10340_v38 = vpop.eup %10339  ;;  %v3469_v39 = vmul.f32 %v10338_v27, %v10336_v35  ;;  %v12408_v2 = vsel %vm7862_vm6, %v7861_v61, %v7849_v37 }
 0x86e   :  { %v3468_v41 = vmul.f32 %v10340_v38, %v12027_v18  ;;  %v14142_v18 = vld [vmem:[#allocation17_spill] sm:$0xff] }
 0x870   :  { %v12410_v8 = vadd.f32 %v3469_v39, %v3468_v41 }
 0x872   :  { %10343 = vtanh.f32 %v12410_v8 }
 0x879   :  { %v10342_v44 = vpop.eup %10341 }
 0x87f   :  { %v10344_v45 = vpop.eup %10343 }
 0x880   :  { %v3472_v48 = vmul.f32 %v10344_v45, %v10342_v44 }
 0x882   :  { %4098 = vrot.lane.b32.xlu0 %v3472_v48, %s10899_s20  ;;  %v3477_v51 = vsel %vm183_vm3, %v3472_v48, %v3475_v43 }
 0x883   :  { %9444 = vmatmul.mubr.msk.f32.vlgmr.msra.gmra.mxu0 %vm197_vm4, %v3477_v51  ;;  %9457 = vmatmul.mubr.msk.f32.vlgmr.msra.gmra.mxu1 %vm197_vm4, %v3477_v51 }
 0x884   :  { %9460 = vmatpush3.msra.mxu0 %v12036_v59  ;;  %9473 = vmatpush3.msra.mxu1 %v12042_v60  ;;  %v14143_v59 = vld [vmem:[#allocation18_spill] sm:$0xff]  ;;  %v14144_v60 = vld [vmem:[#allocation19_spill] sm:$0xff] }
 0x885   :  { %9461 = vmatprep.subr.mxu0 %v14111_v26  ;;  %9474 = vmatprep.subr.mxu1 %v14111_v26 }
 0x886   :  { %9462 = vmatpush3.msra.mxu0 %v12051_v36  ;;  %9475 = vmatpush3.msra.mxu1 %v12057_v42  ;;  %v14145_v36 = vld [vmem:[#allocation20_spill] sm:$0xff]  ;;  %v14146_v42 = vld [vmem:[#allocation21_spill] sm:$0xff] }
 0x887   :  { %9463 = vmatprep.subr.mxu0 %v14111_v26  ;;  %9476 = vmatprep.subr.mxu1 %v14111_v26 }
 0x888   :  { %9464 = vmatpush3.msra.mxu0 %v12065_v13  ;;  %9477 = vmatpush3.msra.mxu1 %v12071_v29  ;;  %v14147_v13 = vld [vmem:[#allocation22_spill] sm:$0xff]  ;;  %v14148_v29 = vld [vmem:[#allocation23_spill] sm:$0xff] }
 0x889   :  { %9465 = vmatprep.subr.mxu0 %v14111_v26  ;;  %9478 = vmatprep.subr.mxu1 %v14111_v26 }
 0x88a   :  { %9466 = vmatpush3.msra.mxu0 %v12079_v6  ;;  %9479 = vmatpush3.msra.mxu1 %v14141_v53  ;;  %v14149_v6 = vld [vmem:[#allocation24_spill] sm:$0xff] }
 0x88b   :  { %9467 = vmatprep.subr.mxu0 %v14111_v26  ;;  %9480 = vmatprep.subr.mxu1 %v14111_v26 }
 0x88c   :  { %9468 = vmatpush3.msra.mxu0 %v14142_v18  ;;  %9469 = vmatprep.mubr.msk.f32.mxu0 %vm10901_vm2, %v14111_v26 }
 0x88d   :  { %9481 = vmatpush3.msra.mxu1 %v14143_v59  ;;  %9482 = vmatprep.mubr.msk.f32.mxu1 %vm10901_vm2, %v14111_v26 }
 0x88e   :  { %9470 = vmatmul.mubr.msk.f32.vlgmr.msra.gmra.mxu0 %vm197_vm4, %v3477_v51  ;;  %9483 = vmatmul.mubr.msk.f32.vlgmr.msra.gmra.mxu1 %vm197_vm4, %v3477_v51 }
 0x88f   :  { %9485 = vmatprep.subr.mxu0 %v14111_v26  ;;  %9498 = vmatprep.subr.mxu1 %v14111_v26 }
 0x890   :  { %9486 = vmatpush3.msra.mxu0 %v14144_v60  ;;  %9499 = vmatpush3.msra.mxu1 %v14145_v36  ;;  %v12574_v36 = vld [vmem:[%s14028_s4 + $0x28] sm:$0xff] }
 0x891   :  { %9487 = vmatprep.subr.mxu0 %v14111_v26  ;;  %9500 = vmatprep.subr.mxu1 %v14111_v26 }
 0x892   :  { %9488 = vmatpush3.msra.mxu0 %v14146_v42  ;;  %9501 = vmatpush3.msra.mxu1 %v14147_v13  ;;  %v12586_v42 = vld [vmem:[%s14028_s4 + $0x70] sm:$0xff]  ;;  %v12592_v13 = vld [vmem:[%s14028_s4 + $0x98] sm:$0xff] }
 0x893   :  { %9489 = vmatprep.subr.mxu0 %v14111_v26  ;;  %9502 = vmatprep.subr.mxu1 %v14111_v26 }
 0x894   :  { %9490 = vmatpush3.msra.mxu0 %v14148_v29  ;;  %9503 = vmatpush3.msra.mxu1 %v14149_v6  ;;  %v12600_v29 = vld [vmem:[%s14028_s4 + $0x68] sm:$0xff]  ;;  %v12606_v6 = vld [vmem:[%s14028_s4 + $0x90] sm:$0xff] }
 0x895   :  { %9491 = vmatprep.subr.mxu0 %v14111_v26  ;;  %9504 = vmatprep.subr.mxu1 %v14111_v26 }
 0x896   :  { %9492 = vmatpush3.msra.mxu0 %v14150_v49  ;;  %9505 = vmatpush3.msra.mxu1 %v14151_v47  ;;  %v12614_v49 = vld [vmem:[%s14028_s4 + $0x60] sm:$0xff]  ;;  %v12620_v47 = vld [vmem:[%s14028_s4 + $0x88] sm:$0xff] }
 0x897   :  { %9493 = vmatprep.subr.mxu0 %v14111_v26  ;;  %9506 = vmatprep.subr.mxu1 %v14111_v26 }
 0x898   :  { %9494 = vmatpush3.msra.mxu0 %v14152_v63  ;;  %9507 = vmatpush3.msra.mxu1 %v14153_v1  ;;  %v12628_v63 = vld [vmem:[%s14028_s4 + $0x58] sm:$0xff]  ;;  %v12634_v1 = vld [vmem:[%s14028_s4 + $0x80] sm:$0xff] }
 0x899   :  { %9495 = vmatprep.mubr.msk.f32.mxu0 %vm10901_vm2, %v14111_v26  ;;  %9508 = vmatprep.mubr.msk.f32.mxu1 %vm10901_vm2, %v14111_v26 }
 0x89a   :  { %9511 = vmatprep.subr.mxu0 %v14111_v26  ;;  %9524 = vmatprep.subr.mxu1 %v14111_v26 }
 0x8dd   :  { %v3787_v18 = vpop.permute.xlu1 %3786 }
 0x943   :  { %v3547_v34 = vpop.f32.mrf.mxu0  ;;  %v3617_v23 = vpop.f32.mrf.mxu1 }
 0x944   :  { %v3548_v9 = vadd.f32 %v14154_v0, %v3547_v34  ;;  %v3618_v28 = vadd.f32 %v14155_v31, %v3617_v23  ;;  %v12642_v34 = vld [vmem:[%s14028_s4 + $0x50] sm:$0xff]  ;;  %v12650_v23 = vld [vmem:[%s14028_s4 + $0x78] sm:$0xff]  ;;  %v12662_v0 = vld [vmem:[%s14028_s4 + $0xc0] sm:$0xff] }
 0x945   :  { %v9445_v46 = vpop.f32.mrf.mxu0  ;;  %v9458_v7 = vpop.f32.mrf.mxu1  ;;  %v12676_v31 = vld [vmem:[%s14028_s4 + $0xb8] sm:$0xff] }
 0x946   :  { %v8181_v14 = vmul.f32 -1.442695, %v3548_v9  ;;  %v8182_v15 = vmul.f32 -1.442695, %v3618_v28  ;;  %v12668_v9 = vld [vmem:[%s14028_s4 + $0xe8] sm:$0xff]  ;;  %v12682_v28 = vld [vmem:[%s14028_s4 + $0xe0] sm:$0xff] }
 0x947   :  { %v12690_v46 = vld [vmem:[%s14028_s4 + $0xb0] sm:$0xff]  ;;  %v12696_v7 = vld [vmem:[%s14028_s4 + $0xd8] sm:$0xff] }
 0x948   :  { %10345 = vpow2.f32 %v8181_v14  ;;  %v12704_v14 = vld [vmem:[%s14028_s4 + $0xa8] sm:$0xff] }
 0x949   :  { %10347 = vpow2.f32 %v8182_v15  ;;  %v12710_v15 = vld [vmem:[%s14028_s4 + $0xd0] sm:$0xff] }
 0x94e   :  { %v3687_v16 = vpop.f32.mrf.mxu0  ;;  %v3757_v19 = vpop.f32.mrf.mxu1 }
 0x94f   :  { %v3758_v3 = vadd.f32 %v14156_v20, %v3757_v19  ;;  %v3688_v30 = vadd.f32 %v12205_v50, %v3687_v16  ;;  %v12718_v16 = vld [vmem:[%s14028_s4 + $0xa0] sm:$0xff]  ;;  %v12724_v19 = vld [vmem:[%s14028_s4 + $0xc8] sm:$0xff] }
 0x950   :  { %v9471_v56 = vpop.f32.mrf.mxu0  ;;  %v9484_v21 = vpop.f32.mrf.mxu1 }
 0x951   :  { %v8183_v11 = vmul.f32 -1.442695, %v3758_v3 }
 0x953   :  { %10349 = vpow2.f32 %v8183_v11 }
 0x954   :  { %10351 = vtanh.f32 %v3688_v30 }
 0x955   :  { %v10346_v35 = vpop.eup %10345 }
 0x956   :  { %v10348_v27 = vpop.eup %10347  ;;  %v3764_v37 = vadd.f32 1.0, %v10346_v35 }
 0x957   :  { %v3770_v38 = vadd.f32 1.0, %v10348_v27 }
 0x958   :  { %10353 = vrcp.f32 %v3764_v37 }
 0x959   :  { %10355 = vrcp.f32 %v3770_v38 }
 0x960   :  { %v10350_v39 = vpop.eup %10349 }
 0x961   :  { %v10352_v40 = vpop.eup %10351  ;;  %v3777_v45 = vadd.f32 1.0, %v10350_v39 }
 0x963   :  { %10357 = vrcp.f32 %v3777_v45 }
 0x965   :  { %v10354_v61 = vpop.eup %10353 }
 0x966   :  { %v10356_v41 = vpop.eup %10355  ;;  %v3781_v44 = vmul.f32 %v10354_v61, %v10352_v40 }
 0x967   :  { %v3780_v48 = vmul.f32 %v10356_v41, %v12209_v22  ;;  %v12508_v22 = vld [vmem:[%s14028_s4 + $0x20] sm:$0xff] }
 0x969   :  { %v12472_v43 = vadd.f32 %v3781_v44, %v3780_v48 }
 0x96b   :  { %10359 = vtanh.f32 %v12472_v43 }
 0x970   :  { %v10358_v50 = vpop.eup %10357 }
 0x978   :  { %v10360_v51 = vpop.eup %10359 }
 0x979   :  { %v3784_v53 = vmul.f32 %v10360_v51, %v10358_v50 }
 0x97b   :  { %4410 = vrot.lane.b32.xlu1 %v3784_v53, %s10899_s20  ;;  %v3789_v59 = vsel %vm183_vm3, %v3784_v53, %v3787_v18  ;;  %v12740_v53 = vld [vmem:[%s14029_s5] ss:$0 sm:$0xff] }
 0x97c   :  { %9496 = vmatmul.mubr.msk.f32.vlgmr.msra.gmra.mxu0 %vm197_vm4, %v3789_v59  ;;  %9509 = vmatmul.mubr.msk.f32.vlgmr.msra.gmra.mxu1 %vm197_vm4, %v3789_v59 }
 0x97d   :  { %9512 = vmatpush3.msra.mxu0 %v12219_v4  ;;  %9525 = vmatpush3.msra.mxu1 %v12225_v24  ;;  %v12514_v4 = vld [vmem:[%s14028_s4 + $0x48] sm:$0xff]  ;;  %v12522_v24 = vld [vmem:[%s14028_s4 + $0x18] sm:$0xff] }
 0x97e   :  { %9513 = vmatprep.subr.mxu0 %v14111_v26  ;;  %9526 = vmatprep.subr.mxu1 %v14111_v26 }
 0x97f   :  { %9514 = vmatpush3.msra.mxu0 %v12233_v55  ;;  %9527 = vmatpush3.msra.mxu1 %v12239_v52  ;;  %v12528_v55 = vld [vmem:[%s14028_s4 + $0x40] sm:$0xff]  ;;  %v12536_v52 = vld [vmem:[%s14028_s4 + $0x10] sm:$0xff] }
 0x980   :  { %9515 = vmatprep.subr.mxu0 %v14111_v26  ;;  %9528 = vmatprep.subr.mxu1 %v14111_v26 }
 0x981   :  { %9516 = vmatpush3.msra.mxu0 %v12247_v54  ;;  %9529 = vmatpush3.msra.mxu1 %v12253_v57  ;;  %v12542_v54 = vld [vmem:[%s14028_s4 + $0x38] sm:$0xff]  ;;  %v4099_v57 = vpop.permute.xlu0 %4098 }
 0x982   :  { %9517 = vmatprep.subr.mxu0 %v14111_v26  ;;  %9530 = vmatprep.subr.mxu1 %v14111_v26 }
 0x983   :  { %9518 = vmatpush3.msra.mxu0 %v12261_v32  ;;  %9531 = vmatpush3.msra.mxu1 %v12267_v58  ;;  %v12550_v32 = vld [vmem:[%s14028_s4 + $0x8] sm:$0xff]  ;;  %v12556_v58 = vld [vmem:[%s14028_s4 + $0x30] sm:$0xff] }
 0x984   :  { %9519 = vmatprep.subr.mxu0 %v14111_v26  ;;  %9532 = vmatprep.subr.mxu1 %v14111_v26 }
 0x985   :  { %9520 = vmatpush3.msra.mxu0 %v12275_v33  ;;  %9521 = vmatprep.mubr.msk.f32.mxu0 %vm10901_vm2, %v14111_v26  ;;  %v12564_v33 = vld [vmem:[%s14028_s4] sm:$0xff] }
 0x986   :  { %9533 = vmatpush3.msra.mxu1 %v12283_v12  ;;  %9534 = vmatprep.mubr.msk.f32.mxu1 %vm10901_vm2, %v14111_v26  ;;  %v14157_v12 = vld [vmem:[#allocation15_spill] sm:$0xff] }
 0x987   :  { %9522 = vmatmul.mubr.msk.f32.vlgmr.msra.gmra.mxu0 %vm197_vm4, %v3789_v59  ;;  %9535 = vmatmul.mubr.msk.f32.vlgmr.msra.gmra.mxu1 %vm197_vm4, %v3789_v59  ;;  %v4101_v60 = vsel %vm183_vm3, %v14157_v12, %v4099_v57 }
 0x988   :  { %9537 = vmatprep.subr.mxu0 %v14111_v26  ;;  %9550 = vmatprep.subr.mxu1 %v14111_v26 }
 0x989   :  { %9538 = vmatpush3.msra.mxu0 %v12508_v22  ;;  %9551 = vmatpush3.msra.mxu1 %v12514_v4 }
 0x98a   :  { %9539 = vmatprep.subr.mxu0 %v14111_v26  ;;  %9552 = vmatprep.subr.mxu1 %v14111_v26 }
 0x98b   :  { %9540 = vmatpush3.msra.mxu0 %v12522_v24  ;;  %9553 = vmatpush3.msra.mxu1 %v12528_v55 }
 0x98c   :  { %9541 = vmatprep.subr.mxu0 %v14111_v26  ;;  %9554 = vmatprep.subr.mxu1 %v14111_v26 }
 0x98d   :  { %9542 = vmatpush3.msra.mxu0 %v12536_v52  ;;  %9555 = vmatpush3.msra.mxu1 %v12542_v54 }
 0x98e   :  { %9543 = vmatprep.subr.mxu0 %v14111_v26  ;;  %9556 = vmatprep.subr.mxu1 %v14111_v26 }
 0x98f   :  { %9544 = vmatpush3.msra.mxu0 %v12550_v32  ;;  %9557 = vmatpush3.msra.mxu1 %v12556_v58 }
 0x990   :  { %9545 = vmatprep.subr.mxu0 %v14111_v26  ;;  %9558 = vmatprep.subr.mxu1 %v14111_v26 }
 0x991   :  { %9546 = vmatpush3.msra.mxu0 %v12564_v33  ;;  %9547 = vmatprep.mubr.msk.f32.mxu0 %vm10901_vm2, %v14111_v26 }
 0x992   :  { %9559 = vmatpush3.msra.mxu1 %v12574_v36  ;;  %9560 = vmatprep.mubr.msk.f32.mxu1 %vm10901_vm2, %v14111_v26 }
 0x993   :  { %9548 = vmatmul.mubr.msk.f32.vlgmr.msra.gmra.mxu0 %vm197_vm4, %v4101_v60  ;;  %9561 = vmatmul.mubr.msk.f32.vlgmr.msra.gmra.mxu1 %vm197_vm4, %v4101_v60 }
 0x994   :  { %9563 = vmatprep.subr.mxu0 %v14111_v26  ;;  %9576 = vmatprep.subr.mxu1 %v14111_v26 }
 0x995   :  { %9564 = vmatpush3.msra.mxu0 %v12586_v42  ;;  %9577 = vmatpush3.msra.mxu1 %v12592_v13 }
 0x996   :  { %9565 = vmatprep.subr.mxu0 %v14111_v26  ;;  %9578 = vmatprep.subr.mxu1 %v14111_v26 }
 0x997   :  { %9566 = vmatpush3.msra.mxu0 %v12600_v29  ;;  %9579 = vmatpush3.msra.mxu1 %v12606_v6 }
 0x998   :  { %9567 = vmatprep.subr.mxu0 %v14111_v26  ;;  %9580 = vmatprep.subr.mxu1 %v14111_v26 }
 0x999   :  { %9568 = vmatpush3.msra.mxu0 %v12614_v49  ;;  %9581 = vmatpush3.msra.mxu1 %v12620_v47 }
 0x99a   :  { %9569 = vmatprep.subr.mxu0 %v14111_v26  ;;  %9582 = vmatprep.subr.mxu1 %v14111_v26 }
 0x99b   :  { %9570 = vmatpush3.msra.mxu0 %v12628_v63  ;;  %9583 = vmatpush3.msra.mxu1 %v12634_v1 }
 0x99c   :  { %9571 = vmatprep.subr.mxu0 %v14111_v26  ;;  %9584 = vmatprep.subr.mxu1 %v14111_v26 }
 0x99d   :  { %9572 = vmatpush3.msra.mxu0 %v12642_v34  ;;  %9573 = vmatprep.mubr.msk.f32.mxu0 %vm10901_vm2, %v14111_v26 }
 0x99e   :  { %9585 = vmatpush3.msra.mxu1 %v12650_v23  ;;  %9586 = vmatprep.mubr.msk.f32.mxu1 %vm10901_vm2, %v14111_v26 }
 0x99f   :  { %9574 = vmatmul.mubr.msk.f32.vlgmr.msra.gmra.mxu0 %vm197_vm4, %v4101_v60  ;;  %9587 = vmatmul.mubr.msk.f32.vlgmr.msra.gmra.mxu1 %vm197_vm4, %v4101_v60 }
 0x9a0   :  { %9589 = vmatprep.subr.mxu0 %v14111_v26  ;;  %9602 = vmatprep.subr.mxu1 %v14111_v26 }
 0x9a1   :  { %9590 = vmatpush3.msra.mxu0 %v12662_v0  ;;  %9603 = vmatpush3.msra.mxu1 %v12668_v9 }
 0x9a2   :  { %9591 = vmatprep.subr.mxu0 %v14111_v26  ;;  %9604 = vmatprep.subr.mxu1 %v14111_v26 }
 0x9a3   :  { %9592 = vmatpush3.msra.mxu0 %v12676_v31  ;;  %9605 = vmatpush3.msra.mxu1 %v12682_v28 }
 0x9a4   :  { %9593 = vmatprep.subr.mxu0 %v14111_v26  ;;  %9606 = vmatprep.subr.mxu1 %v14111_v26 }
 0x9a5   :  { %9594 = vmatpush3.msra.mxu0 %v12690_v46  ;;  %9607 = vmatpush3.msra.mxu1 %v12696_v7 }
 0x9a6   :  { %9595 = vmatprep.subr.mxu0 %v14111_v26  ;;  %9608 = vmatprep.subr.mxu1 %v14111_v26 }
 0x9a7   :  { %9596 = vmatpush3.msra.mxu0 %v12704_v14  ;;  %9609 = vmatpush3.msra.mxu1 %v12710_v15 }
 0x9a8   :  { %9597 = vmatprep.subr.mxu0 %v14111_v26  ;;  %9610 = vmatprep.subr.mxu1 %v14111_v26 }
 0x9a9   :  { %9598 = vmatpush3.msra.mxu0 %v12718_v16  ;;  %9611 = vmatpush3.msra.mxu1 %v12724_v19 }
 0x9aa   :  { %9599 = vmatprep.mubr.msk.f32.mxu0 %vm10901_vm2, %v14111_v26  ;;  %9612 = vmatprep.mubr.msk.f32.mxu1 %vm10901_vm2, %v14111_v26 }
 0x9ab   :  { %9615 = vmatprep.subr.mxu0 %v14111_v26  ;;  %9628 = vmatprep.subr.mxu1 %v14111_v26 }
 0xa3c   :  { %v3859_v20 = vpop.f32.mrf.mxu0  ;;  %v3929_v3 = vpop.f32.mrf.mxu1 }
 0xa3d   :  { %v3860_v56 = vadd.f32 %v12373_v25, %v3859_v20  ;;  %v3930_v21 = vadd.f32 %v12379_v62, %v3929_v3 }
 0xa3e   :  { %v9497_v11 = vpop.f32.mrf.mxu0  ;;  %v9510_v30 = vpop.f32.mrf.mxu1 }
 0xa3f   :  { %v8188_v35 = vmul.f32 -1.442695, %v3860_v56  ;;  %v8189_v27 = vmul.f32 -1.442695, %v3930_v21 }
 0xa41   :  { %10361 = vpow2.f32 %v8188_v35 }
 0xa42   :  { %10363 = vpow2.f32 %v8189_v27 }
 0xa47   :  { %v3999_v37 = vpop.f32.mrf.mxu0  ;;  %v4069_v38 = vpop.f32.mrf.mxu1 }
 0xa48   :  { %v4070_v39 = vadd.f32 %v12385_v17, %v4069_v38  ;;  %v4000_v41 = vadd.f32 %v12391_v10, %v3999_v37  ;;  %v12746_v10 = vld [vmem:[%s14029_s5 + $0x1] ss:$0 sm:$0xff] }
 0xa49   :  { %v9523_v40 = vpop.f32.mrf.mxu0  ;;  %v9536_v61 = vpop.f32.mrf.mxu1 }
 0xa4a   :  { %v8190_v44 = vmul.f32 -1.442695, %v4070_v39  ;;  %10365 = vtanh.f32 %v4000_v41  ;;  %v12753_v39 = vld [vmem:[%s14029_s5 + $0x3] ss:$0 sm:$0xff] }
 0xa4c   :  { %10367 = vpow2.f32 %v8190_v44 }
 0xa4e   :  { %v10362_v45 = vpop.eup %10361 }
 0xa4f   :  { %v10364_v48 = vpop.eup %10363  ;;  %v4076_v25 = vadd.f32 1.0, %v10362_v45 }
 0xa50   :  { %v4082_v62 = vadd.f32 1.0, %v10364_v48  ;;  %v12761_v48 = vld [vmem:[%s14029_s5 + $0x2] ss:$0 sm:$0xff] }
 0xa51   :  { %10369 = vrcp.f32 %v4076_v25 }
 0xa52   :  { %10371 = vrcp.f32 %v4082_v62 }
 0xa53   :  { %v4171_v50 = vpop.f32.mrf.mxu0  ;;  %v4241_v51 = vpop.f32.mrf.mxu1 }
 0xa54   :  { %v4172_v17 = vadd.f32 %v12740_v53, %v4171_v50  ;;  %v4242_v18 = vadd.f32 %v12746_v10, %v4241_v51 }
 0xa55   :  { %v9549_v59 = vpop.f32.mrf.mxu0  ;;  %v9562_v57 = vpop.f32.mrf.mxu1 }
 0xa56   :  { %v8195_v60 = vmul.f32 -1.442695, %v4172_v17  ;;  %v8196_v20 = vmul.f32 -1.442695, %v4242_v18 }
 0xa57   :  { %v10366_v3 = vpop.eup %10365 }
 0xa58   :  { %10373 = vpow2.f32 %v8195_v60 }
 0xa59   :  { %10375 = vpow2.f32 %v8196_v20  ;;  %v10368_v56 = vpop.eup %10367 }
 0xa5a   :  { %v4089_v38 = vadd.f32 1.0, %v10368_v56 }
 0xa5c   :  { %10377 = vrcp.f32 %v4089_v38 }
 0xa5e   :  { %v10370_v21 = vpop.eup %10369 }
 0xa5f   :  { %v10372_v11 = vpop.eup %10371  ;;  %v4093_v30 = vmul.f32 %v10370_v21, %v10366_v3  ;;  %v4311_v35 = vpop.f32.mrf.mxu0 }
 0xa60   :  { %v4381_v27 = vpop.f32.mrf.mxu1  ;;  %v4092_v37 = vmul.f32 %v10372_v11, %v12398_v5  ;;  %v4312_v5 = vadd.f32 %v12761_v48, %v4311_v35 }
 0xa61   :  { %v4382_v40 = vadd.f32 %v12753_v39, %v4381_v27  ;;  %v9575_v61 = vpop.f32.mrf.mxu0 }
 0xa62   :  { %v9588_v41 = vpop.f32.mrf.mxu1  ;;  %v12756_v44 = vadd.f32 %v4093_v30, %v4092_v37  ;;  %v4411_v61 = vpop.permute.xlu1 %4410 }
 0xa63   :  { %v8197_v45 = vmul.f32 -1.442695, %v4382_v40 }
 0xa64   :  { %10379 = vtanh.f32 %v12756_v44 }
 0xa65   :  { %v10374_v25 = vpop.eup %10373  ;;  %10381 = vpow2.f32 %v8197_v45 }
 0xa66   :  { %v10376_v62 = vpop.eup %10375  ;;  %v4388_v50 = vadd.f32 1.0, %v10374_v25  ;;  %10383 = vtanh.f32 %v4312_v5  ;;  %v12795_v5 = vld [vmem:[%s14028_s4 + $0x108] sm:$0xff]  ;;  %v12801_v25 = vld [vmem:[%s14028_s4 + $0x130] sm:$0xff] }
 0xa67   :  { %v4394_v51 = vadd.f32 1.0, %v10376_v62  ;;  %v12809_v62 = vld [vmem:[%s14028_s4 + $0x100] sm:$0xff] }
 0xa68   :  { %10385 = vrcp.f32 %v4388_v50  ;;  %v12815_v50 = vld [vmem:[%s14028_s4 + $0x128] sm:$0xff] }
 0xa69   :  { %10387 = vrcp.f32 %v4394_v51  ;;  %v10378_v17 = vpop.eup %10377  ;;  %v12823_v51 = vld [vmem:[%s14028_s4 + $0xf8] sm:$0xff] }
 0xa71   :  { %v10380_v18 = vpop.eup %10379 }
 0xa72   :  { %v10382_v59 = vpop.eup %10381  ;;  %v4096_v57 = vmul.f32 %v10380_v18, %v10378_v17  ;;  %v12829_v17 = vld [vmem:[%s14028_s4 + $0x120] sm:$0xff]  ;;  %v12837_v18 = vld [vmem:[%s14028_s4 + $0xf0] sm:$0xff] }
 0xa73   :  { %v10384_v60 = vpop.eup %10383  ;;  %v4401_v11 = vadd.f32 1.0, %v10382_v59  ;;  %v12845_v59 = vld [vmem:[%s14028_s4 + $0x118] sm:$0xff] }
 0xa74   :  { %4722 = vrot.lane.b32.xlu0 %v4096_v57, %s10899_s20  ;;  %v7851_v3 = vrot.slane %v4096_v57, 2  ;;  %14159 = vst [vmem:[#allocation17_spill] sm:$0xff] %v12845_v59  ;;  %v12857_v57 = vld [vmem:[%s14028_s4 + $0x160] sm:$0xff] }
 0xa75   :  { %v10386_v20 = vpop.eup %10385  ;;  %10389 = vrcp.f32 %v4401_v11  ;;  %14160 = vst [vmem:[#allocation18_spill] sm:$0xff] %v12857_v57  ;;  %v12899_v11 = vld [vmem:[%s14028_s4 + $0x148] sm:$0xff] }
 0xa76   :  { %v10388_v56 = vpop.eup %10387  ;;  %v4405_v21 = vmul.f32 %v10386_v20, %v10384_v60  ;;  %v12769_v35 = vsel %vm7864_vm7, %v12408_v2, %v7851_v3  ;;  %v12780_v2 = vld [vmem:[%s14028_s4 + $0x110] sm:$0xff]  ;;  %v12863_v60 = vld [vmem:[%s14028_s4 + $0x188] sm:$0xff]  ;;  %v12871_v20 = vld [vmem:[%s14028_s4 + $0x158] sm:$0xff]  ;;  %14166 = vst [vmem:[#allocation24_spill] sm:$0xff] %v12899_v11 }
 0xa77   :  { %v4404_v30 = vmul.f32 %v10388_v56, %v12410_v8  ;;  %14158 = vst [vmem:[#allocation16_spill] sm:$0xff] %v12769_v35  ;;  %v12786_v8 = vld [vmem:[%s14028_s4 + $0x138] sm:$0xff]  ;;  %14161 = vst [vmem:[#allocation19_spill] sm:$0xff] %v12863_v60  ;;  %v12877_v3 = vld [vmem:[%s14028_s4 + $0x180] sm:$0xff] }
 0xa78   :  { %14162 = vst [vmem:[#allocation20_spill] sm:$0xff] %v12871_v20  ;;  %14163 = vst [vmem:[#allocation21_spill] sm:$0xff] %v12877_v3  ;;  %v12885_v56 = vld [vmem:[%s14028_s4 + $0x150] sm:$0xff]  ;;  %v12937_v35 = vld [vmem:[%s14029_s5 + $0x5] ss:$0 sm:$0xff] }
 0xa79   :  { %v12771_v27 = vadd.f32 %v4405_v21, %v4404_v30  ;;  %14164 = vst [vmem:[#allocation22_spill] sm:$0xff] %v12885_v56  ;;  %v12891_v21 = vld [vmem:[%s14028_s4 + $0x178] sm:$0xff]  ;;  %v12905_v30 = vld [vmem:[%s14028_s4 + $0x170] sm:$0xff]  ;;  %14171 = vst [vmem:[#allocation29_spill] sm:$0xff] %v12937_v35 }
 0xa7a   :  { %14165 = vst [vmem:[#allocation23_spill] sm:$0xff] %v12891_v21  ;;  %14167 = vst [vmem:[#allocation25_spill] sm:$0xff] %v12905_v30 }
 0xa7b   :  { %10391 = vtanh.f32 %v12771_v27 }
 0xa82   :  { %v10390_v37 = vpop.eup %10389 }
 0xa88   :  { %v10392_v38 = vpop.eup %10391 }
 0xa89   :  { %v4408_v40 = vmul.f32 %v10392_v38, %v10390_v37  ;;  %v12913_v37 = vld [vmem:[%s14028_s4 + $0x140] sm:$0xff]  ;;  %v12919_v38 = vld [vmem:[%s14028_s4 + $0x168] sm:$0xff] }
 0xa8a   :  { %14168 = vst [vmem:[#allocation26_spill] sm:$0xff] %v12913_v37  ;;  %14169 = vst [vmem:[#allocation27_spill] sm:$0xff] %v12919_v38 }
 0xa8b   :  { %v4413_v41 = vsel %vm183_vm3, %v4408_v40, %v4411_v61  ;;  %v5034_v45 = vrot.slane %v4408_v40, 6 }
 0xa8c   :  { %9600 = vmatmul.mubr.msk.f32.vlgmr.msra.gmra.mxu0 %vm197_vm4, %v4413_v41  ;;  %9613 = vmatmul.mubr.msk.f32.vlgmr.msra.gmra.mxu1 %vm197_vm4, %v4413_v41 }
 0xa8d   :  { %9616 = vmatpush3.msra.mxu0 %v12780_v2  ;;  %9629 = vmatpush3.msra.mxu1 %v12786_v8 }
 0xa8e   :  { %5035 = vrot.lane.b32.xlu1 %v5034_v45, %s10899_s20  ;;  %9617 = vmatprep.subr.mxu0 %v14111_v26 }
 0xa8f   :  { %9630 = vmatprep.subr.mxu1 %v14111_v26  ;;  %9618 = vmatpush3.msra.mxu0 %v12795_v5 }
 0xa90   :  { %9631 = vmatpush3.msra.mxu1 %v12801_v25  ;;  %9619 = vmatprep.subr.mxu0 %v14111_v26 }
 0xa91   :  { %9632 = vmatprep.subr.mxu1 %v14111_v26  ;;  %9620 = vmatpush3.msra.mxu0 %v12809_v62 }
 0xa92   :  { %9633 = vmatpush3.msra.mxu1 %v12815_v50  ;;  %9621 = vmatprep.subr.mxu0 %v14111_v26 }
 0xa93   :  { %9634 = vmatprep.subr.mxu1 %v14111_v26  ;;  %9622 = vmatpush3.msra.mxu0 %v12823_v51 }
 0xa94   :  { %9635 = vmatpush3.msra.mxu1 %v12829_v17  ;;  %9623 = vmatprep.subr.mxu0 %v14111_v26 }
 0xa95   :  { %9636 = vmatprep.subr.mxu1 %v14111_v26  ;;  %9624 = vmatpush3.msra.mxu0 %v12837_v18 }
 0xa96   :  { %9625 = vmatprep.mubr.msk.f32.mxu0 %vm10901_vm2, %v14111_v26  ;;  %9637 = vmatpush3.msra.mxu1 %v12845_v59 }
 0xa97   :  { %9638 = vmatprep.mubr.msk.f32.mxu1 %vm10901_vm2, %v14111_v26  ;;  %9626 = vmatmul.mubr.msk.f32.vlgmr.msra.gmra.mxu0 %vm197_vm4, %v4413_v41 }
 0xa98   :  { %9639 = vmatmul.mubr.msk.f32.vlgmr.msra.gmra.mxu1 %vm197_vm4, %v4413_v41  ;;  %9641 = vmatprep.subr.mxu0 %v14111_v26  ;;  %v12931_v41 = vld [vmem:[%s14029_s5 + $0x4] ss:$0 sm:$0xff] }
 0xa99   :  { %9654 = vmatprep.subr.mxu1 %v14111_v26  ;;  %9642 = vmatpush3.msra.mxu0 %v12857_v57  ;;  %14170 = vst [vmem:[#allocation28_spill] sm:$0xff] %v12931_v41 }
 0xa9a   :  { %9655 = vmatpush3.msra.mxu1 %v12863_v60  ;;  %9643 = vmatprep.subr.mxu0 %v14111_v26 }
 0xa9b   :  { %9656 = vmatprep.subr.mxu1 %v14111_v26  ;;  %9644 = vmatpush3.msra.mxu0 %v12871_v20  ;;  %v12943_v20 = vld [vmem:[%s14029_s5 + $0x7] ss:$0 sm:$0xff] }
 0xa9c   :  { %9657 = vmatpush3.msra.mxu1 %v12877_v3  ;;  %9645 = vmatprep.subr.mxu0 %v14111_v26  ;;  %14172 = vst [vmem:[#allocation30_spill] sm:$0xff] %v12943_v20 }
 0xa9d   :  { %9658 = vmatprep.subr.mxu1 %v14111_v26  ;;  %9646 = vmatpush3.msra.mxu0 %v12885_v56 }
 0xa9e   :  { %9659 = vmatpush3.msra.mxu1 %v12891_v21  ;;  %9647 = vmatprep.subr.mxu0 %v14111_v26 }
 0xa9f   :  { %9660 = vmatprep.subr.mxu1 %v14111_v26  ;;  %9648 = vmatpush3.msra.mxu0 %v12899_v11 }
 0xaa0   :  { %9661 = vmatpush3.msra.mxu1 %v12905_v30  ;;  %9649 = vmatprep.subr.mxu0 %v14111_v26 }
 0xaa1   :  { %9662 = vmatprep.subr.mxu1 %v14111_v26  ;;  %9650 = vmatpush3.msra.mxu0 %v12913_v37 }
 0xaa2   :  { %9663 = vmatpush3.msra.mxu1 %v12919_v38  ;;  %9651 = vmatprep.mubr.msk.f32.mxu0 %vm10901_vm2, %v14111_v26 }
 0xaa3   :  { %9664 = vmatprep.mubr.msk.f32.mxu1 %vm10901_vm2, %v14111_v26  ;;  %9667 = vmatprep.subr.mxu0 %v14111_v26 }
 0xaa4   :  { %9680 = vmatprep.subr.mxu1 %v14111_v26 }
 0xb4c   :  { %v4483_v40 = vpop.f32.mrf.mxu0  ;;  %v4553_v61 = vpop.f32.mrf.mxu1 }
 0xb4d   :  { %v4484_v45 = vadd.f32 %v12931_v41, %v4483_v40  ;;  %v4554_v38 = vadd.f32 %v12937_v35, %v4553_v61 }
 0xb4e   :  { %v9601_v37 = vpop.f32.mrf.mxu0  ;;  %v9614_v30 = vpop.f32.mrf.mxu1 }
 0xb4f   :  { %v8202_v11 = vmul.f32 -1.442695, %v4484_v45  ;;  %v8203_v21 = vmul.f32 -1.442695, %v4554_v38  ;;  %v12949_v30 = vld [vmem:[%s14029_s5 + $0x6] ss:$0 sm:$0xff] }
 0xb51   :  { %10393 = vpow2.f32 %v8202_v11 }
 0xb52   :  { %10395 = vpow2.f32 %v8203_v21 }
 0xb57   :  { %v4623_v56 = vpop.f32.mrf.mxu0 }
 0xb58   :  { %v4693_v3 = vpop.f32.mrf.mxu1  ;;  %v4624_v11 = vadd.f32 %v12949_v30, %v4623_v56 }
 0xb59   :  { %v4694_v40 = vadd.f32 %v12943_v20, %v4693_v3  ;;  %v9627_v41 = vpop.f32.mrf.mxu0 }
 0xb5a   :  { %v9640_v60 = vpop.f32.mrf.mxu1 }
 0xb5b   :  { %v8204_v57 = vmul.f32 -1.442695, %v4694_v40 }
 0xb5d   :  { %10397 = vpow2.f32 %v8204_v57 }
 0xb5e   :  { %v10394_v21 = vpop.eup %10393  ;;  %10399 = vtanh.f32 %v4624_v11 }
 0xb5f   :  { %v10396_v37 = vpop.eup %10395  ;;  %v4700_v38 = vadd.f32 1.0, %v10394_v21 }
 0xb60   :  { %v4706_v61 = vadd.f32 1.0, %v10396_v37  ;;  %v4723_v37 = vpop.permute.xlu0 %4722 }
 0xb61   :  { %10401 = vrcp.f32 %v4700_v38  ;;  %v12983_v38 = vld [vmem:[%s14028_s4 + $0x1d0] sm:$0xff] }
 0xb62   :  { %10403 = vrcp.f32 %v4706_v61  ;;  %v12991_v61 = vld [vmem:[%s14028_s4 + $0x1a0] sm:$0xff] }
 0xb6a   :  { %v10398_v45 = vpop.eup %10397 }
 0xb6b   :  { %v10400_v3 = vpop.eup %10399  ;;  %v4713_v20 = vadd.f32 1.0, %v10398_v45  ;;  %v12997_v45 = vld [vmem:[%s14028_s4 + $0x1c8] sm:$0xff] }
 0xb6d   :  { %10405 = vrcp.f32 %v4713_v20  ;;  %v12977_v20 = vld [vmem:[%s14028_s4 + $0x1a8] sm:$0xff] }
 0xb6e   :  { %v10402_v41 = vpop.eup %10401 }
 0xb6f   :  { %v10404_v60 = vpop.eup %10403  ;;  %v4717_v40 = vmul.f32 %v10402_v41, %v10400_v3  ;;  %v13005_v3 = vld [vmem:[%s14028_s4 + $0x198] sm:$0xff]  ;;  %v13011_v41 = vld [vmem:[%s14028_s4 + $0x1c0] sm:$0xff] }
 0xb70   :  { %v4716_v35 = vmul.f32 %v10404_v60, %v12472_v43  ;;  %v12963_v43 = vld [vmem:[%s14028_s4 + $0x1b0] sm:$0xff] }
 0xb71   :  { %v13019_v60 = vld [vmem:[%s14028_s4 + $0x190] sm:$0xff] }
 0xb72   :  { %v12953_v59 = vadd.f32 %v4717_v40, %v4716_v35  ;;  %v12969_v35 = vld [vmem:[%s14028_s4 + $0x1d8] sm:$0xff] }
 0xb73   :  { %v13027_v40 = vld [vmem:[%s14028_s4 + $0x1b8] sm:$0xff] }
 0xb74   :  { %10407 = vtanh.f32 %v12953_v59 }
 0xb7a   :  { %v10406_v56 = vpop.eup %10405 }
 0xb81   :  { %v10408_v21 = vpop.eup %10407 }
 0xb82   :  { %v4720_v57 = vmul.f32 %v10408_v21, %v10406_v56  ;;  %v5036_v56 = vpop.permute.xlu1 %5035 }
 0xb84   :  { %5348 = vrot.lane.b32.xlu0 %v4720_v57, %s10899_s20  ;;  %v4725_v11 = vsel %vm183_vm3, %v4720_v57, %v4723_v37 }
 0xb85   :  { %9652 = vmatmul.mubr.msk.f32.vlgmr.msra.gmra.mxu0 %vm197_vm4, %v4725_v11  ;;  %9665 = vmatmul.mubr.msk.f32.vlgmr.msra.gmra.mxu1 %vm197_vm4, %v4725_v11 }
 0xb86   :  { %9668 = vmatpush3.msra.mxu0 %v12963_v43  ;;  %9681 = vmatpush3.msra.mxu1 %v12969_v35 }
 0xb87   :  { %9669 = vmatprep.subr.mxu0 %v14111_v26  ;;  %9682 = vmatprep.subr.mxu1 %v14111_v26 }
 0xb88   :  { %9670 = vmatpush3.msra.mxu0 %v12977_v20  ;;  %9683 = vmatpush3.msra.mxu1 %v12983_v38 }
 0xb89   :  { %9671 = vmatprep.subr.mxu0 %v14111_v26  ;;  %9684 = vmatprep.subr.mxu1 %v14111_v26 }
 0xb8a   :  { %9672 = vmatpush3.msra.mxu0 %v12991_v61  ;;  %9685 = vmatpush3.msra.mxu1 %v12997_v45 }
 0xb8b   :  { %9673 = vmatprep.subr.mxu0 %v14111_v26  ;;  %9686 = vmatprep.subr.mxu1 %v14111_v26 }
 0xb8c   :  { %9674 = vmatpush3.msra.mxu0 %v13005_v3  ;;  %9687 = vmatpush3.msra.mxu1 %v13011_v41 }
 0xb8d   :  { %9675 = vmatprep.subr.mxu0 %v14111_v26  ;;  %9688 = vmatprep.subr.mxu1 %v14111_v26 }
 0xb8e   :  { %9676 = vmatpush3.msra.mxu0 %v13019_v60  ;;  %9677 = vmatprep.mubr.msk.f32.mxu0 %vm10901_vm2, %v14111_v26 }
 0xb8f   :  { %9689 = vmatpush3.msra.mxu1 %v13027_v40  ;;  %9690 = vmatprep.mubr.msk.f32.mxu1 %vm10901_vm2, %v14111_v26 }
 0xb90   :  { %9678 = vmatmul.mubr.msk.f32.vlgmr.msra.gmra.mxu0 %vm197_vm4, %v4725_v11  ;;  %9691 = vmatmul.mubr.msk.f32.vlgmr.msra.gmra.mxu1 %vm197_vm4, %v4725_v11 }
 0xb91   :  { %9693 = vmatprep.subr.mxu0 %v14111_v26  ;;  %9706 = vmatprep.subr.mxu1 %v14111_v26 }
 0xb92   :  { %9694 = vmatpush3.msra.mxu0 %v12508_v22  ;;  %9707 = vmatpush3.msra.mxu1 %v12514_v4  ;;  %v5038_v22 = vsel %vm183_vm3, %v14157_v12, %v5036_v56 }
 0xb93   :  { %9695 = vmatprep.subr.mxu0 %v14111_v26  ;;  %9708 = vmatprep.subr.mxu1 %v14111_v26  ;;  %v5040_v4 = vrot.slane %v5038_v22, 2 }
 0xb94   :  { %9696 = vmatpush3.msra.mxu0 %v12522_v24  ;;  %9709 = vmatpush3.msra.mxu1 %v12528_v55 }
 0xb95   :  { %9697 = vmatprep.subr.mxu0 %v14111_v26  ;;  %9710 = vmatprep.subr.mxu1 %v14111_v26 }
 0xb96   :  { %9698 = vmatpush3.msra.mxu0 %v12536_v52  ;;  %9711 = vmatpush3.msra.mxu1 %v12542_v54  ;;  %v13117_v52 = vld [vmem:[%s14029_s5 + $0x8] ss:$0 sm:$0xff] }
 0xb97   :  { %9699 = vmatprep.subr.mxu0 %v14111_v26  ;;  %9712 = vmatprep.subr.mxu1 %v14111_v26 }
 0xb98   :  { %9700 = vmatpush3.msra.mxu0 %v12550_v32  ;;  %9713 = vmatpush3.msra.mxu1 %v12556_v58  ;;  %v13123_v32 = vld [vmem:[%s14029_s5 + $0x9] ss:$0 sm:$0xff] }
 0xb99   :  { %9701 = vmatprep.subr.mxu0 %v14111_v26  ;;  %9714 = vmatprep.subr.mxu1 %v14111_v26 }
 0xb9a   :  { %9702 = vmatpush3.msra.mxu0 %v12564_v33  ;;  %9703 = vmatprep.mubr.msk.f32.mxu0 %vm10901_vm2, %v14111_v26 }
 0xb9b   :  { %9715 = vmatpush3.msra.mxu1 %v12574_v36  ;;  %9716 = vmatprep.mubr.msk.f32.mxu1 %vm10901_vm2, %v14111_v26 }
 0xb9c   :  { %9704 = vmatmul.mubr.msk.f32.vlgmr.msra.gmra.mxu0 %vm197_vm4, %v5040_v4  ;;  %9717 = vmatmul.mubr.msk.f32.vlgmr.msra.gmra.mxu1 %vm197_vm4, %v5040_v4 }
 0xb9d   :  { %9719 = vmatprep.subr.mxu0 %v14111_v26  ;;  %9732 = vmatprep.subr.mxu1 %v14111_v26 }
 0xb9e   :  { %9720 = vmatpush3.msra.mxu0 %v12586_v42  ;;  %9733 = vmatpush3.msra.mxu1 %v12592_v13 }
 0xb9f   :  { %9721 = vmatprep.subr.mxu0 %v14111_v26  ;;  %9734 = vmatprep.subr.mxu1 %v14111_v26 }
 0xba0   :  { %9722 = vmatpush3.msra.mxu0 %v12600_v29  ;;  %9735 = vmatpush3.msra.mxu1 %v12606_v6 }
 0xba1   :  { %9723 = vmatprep.subr.mxu0 %v14111_v26  ;;  %9736 = vmatprep.subr.mxu1 %v14111_v26 }
 0xba2   :  { %9724 = vmatpush3.msra.mxu0 %v12614_v49  ;;  %9737 = vmatpush3.msra.mxu1 %v12620_v47  ;;  %v13129_v49 = vld [vmem:[%s14029_s5 + $0xb] ss:$0 sm:$0xff] }
 0xba3   :  { %9725 = vmatprep.subr.mxu0 %v14111_v26  ;;  %9738 = vmatprep.subr.mxu1 %v14111_v26 }
 0xba4   :  { %9726 = vmatpush3.msra.mxu0 %v12628_v63  ;;  %9739 = vmatpush3.msra.mxu1 %v12634_v1 }
 0xba5   :  { %9727 = vmatprep.subr.mxu0 %v14111_v26  ;;  %9740 = vmatprep.subr.mxu1 %v14111_v26 }
 0xba6   :  { %9728 = vmatpush3.msra.mxu0 %v12642_v34  ;;  %9729 = vmatprep.mubr.msk.f32.mxu0 %vm10901_vm2, %v14111_v26  ;;  %v13135_v34 = vld [vmem:[%s14029_s5 + $0xa] ss:$0 sm:$0xff] }
 0xba7   :  { %9741 = vmatpush3.msra.mxu1 %v12650_v23  ;;  %9742 = vmatprep.mubr.msk.f32.mxu1 %vm10901_vm2, %v14111_v26 }
 0xba8   :  { %9730 = vmatmul.mubr.msk.f32.vlgmr.msra.gmra.mxu0 %vm197_vm4, %v5040_v4  ;;  %9743 = vmatmul.mubr.msk.f32.vlgmr.msra.gmra.mxu1 %vm197_vm4, %v5040_v4 }
 0xba9   :  { %9745 = vmatprep.subr.mxu0 %v14111_v26  ;;  %9758 = vmatprep.subr.mxu1 %v14111_v26 }
 0xbaa   :  { %9746 = vmatpush3.msra.mxu0 %v12662_v0  ;;  %9759 = vmatpush3.msra.mxu1 %v12668_v9 }
 0xbab   :  { %9747 = vmatprep.subr.mxu0 %v14111_v26  ;;  %9760 = vmatprep.subr.mxu1 %v14111_v26 }
 0xbac   :  { %9748 = vmatpush3.msra.mxu0 %v12676_v31  ;;  %9761 = vmatpush3.msra.mxu1 %v12682_v28 }
 0xbad   :  { %9749 = vmatprep.subr.mxu0 %v14111_v26  ;;  %9762 = vmatprep.subr.mxu1 %v14111_v26 }
 0xbae   :  { %9750 = vmatpush3.msra.mxu0 %v12690_v46  ;;  %9763 = vmatpush3.msra.mxu1 %v12696_v7 }
 0xbaf   :  { %9751 = vmatprep.subr.mxu0 %v14111_v26  ;;  %9764 = vmatprep.subr.mxu1 %v14111_v26 }
 0xbb0   :  { %9752 = vmatpush3.msra.mxu0 %v12704_v14  ;;  %9765 = vmatpush3.msra.mxu1 %v12710_v15 }
 0xbb1   :  { %9753 = vmatprep.subr.mxu0 %v14111_v26  ;;  %9766 = vmatprep.subr.mxu1 %v14111_v26 }
 0xbb2   :  { %9754 = vmatpush3.msra.mxu0 %v12718_v16  ;;  %9767 = vmatpush3.msra.mxu1 %v12724_v19 }
 0xbb3   :  { %9755 = vmatprep.mubr.msk.f32.mxu0 %vm10901_vm2, %v14111_v26  ;;  %9768 = vmatprep.mubr.msk.f32.mxu1 %vm10901_vm2, %v14111_v26 }
 0xbb4   :  { %9771 = vmatprep.subr.mxu0 %v14111_v26  ;;  %9784 = vmatprep.subr.mxu1 %v14111_v26 }
 0xc45   :  { %v4795_v24 = vpop.f32.mrf.mxu0  ;;  %v4865_v55 = vpop.f32.mrf.mxu1 }
 0xc46   :  { %v4796_v54 = vadd.f32 %v13117_v52, %v4795_v24  ;;  %v4866_v58 = vadd.f32 %v13123_v32, %v4865_v55 }
 0xc47   :  { %v9653_v33 = vpop.f32.mrf.mxu0  ;;  %v9666_v36 = vpop.f32.mrf.mxu1 }
 0xc48   :  { %v8209_v42 = vmul.f32 -1.442695, %v4796_v54  ;;  %v8210_v13 = vmul.f32 -1.442695, %v4866_v58 }
 0xc4a   :  { %10409 = vpow2.f32 %v8209_v42 }
 0xc4b   :  { %10411 = vpow2.f32 %v8210_v13 }
 0xc50   :  { %v4935_v29 = vpop.f32.mrf.mxu0  ;;  %v5005_v6 = vpop.f32.mrf.mxu1 }
 0xc51   :  { %v5006_v47 = vadd.f32 %v13129_v49, %v5005_v6  ;;  %v4936_v23 = vadd.f32 %v13135_v34, %v4935_v29 }
 0xc52   :  { %v9679_v63 = vpop.f32.mrf.mxu0  ;;  %v9692_v1 = vpop.f32.mrf.mxu1 }
 0xc53   :  { %v8211_v0 = vmul.f32 -1.442695, %v5006_v47  ;;  %10413 = vtanh.f32 %v4936_v23 }
 0xc55   :  { %10415 = vpow2.f32 %v8211_v0 }
 0xc57   :  { %v10410_v9 = vpop.eup %10409 }
 0xc58   :  { %v10412_v31 = vpop.eup %10411  ;;  %v5012_v28 = vadd.f32 1.0, %v10410_v9 }
 0xc59   :  { %v5018_v46 = vadd.f32 1.0, %v10412_v31 }
 0xc5a   :  { %10417 = vrcp.f32 %v5012_v28 }
 0xc5b   :  { %10419 = vrcp.f32 %v5018_v46 }
 0xc5c   :  { %v5109_v7 = vpop.f32.mrf.mxu0  ;;  %v5179_v14 = vpop.f32.mrf.mxu1 }
 0xc5d   :  { %v5110_v15 = vadd.f32 %v12740_v53, %v5109_v7  ;;  %v5180_v16 = vadd.f32 %v12746_v10, %v5179_v14 }
 0xc5e   :  { %v9705_v19 = vpop.f32.mrf.mxu0  ;;  %v9718_v21 = vpop.f32.mrf.mxu1 }
 0xc5f   :  { %v8216_v57 = vmul.f32 -1.442695, %v5110_v15  ;;  %v8217_v37 = vmul.f32 -1.442695, %v5180_v16  ;;  %v5349_v21 = vpop.permute.xlu0 %5348 }
 0xc60   :  { %v10414_v11 = vpop.eup %10413 }
 0xc61   :  { %10421 = vpow2.f32 %v8216_v57 }
 0xc62   :  { %10423 = vpow2.f32 %v8217_v37  ;;  %v10416_v56 = vpop.eup %10415 }
 0xc63   :  { %v5025_v33 = vadd.f32 1.0, %v10416_v56 }
 0xc65   :  { %10425 = vrcp.f32 %v5025_v33 }
 0xc67   :  { %v10418_v22 = vpop.eup %10417 }
 0xc68   :  { %v10420_v4 = vpop.eup %10419  ;;  %v5029_v24 = vmul.f32 %v10418_v22, %v10414_v11  ;;  %v5249_v55 = vpop.f32.mrf.mxu0  ;;  %v14183_v11 = vld [vmem:[#allocation27_spill] sm:$0xff] }
 0xc69   :  { %v5319_v54 = vpop.f32.mrf.mxu1  ;;  %v5028_v58 = vmul.f32 %v10420_v4, %v12756_v44  ;;  %v5250_v29 = vadd.f32 %v12761_v48, %v5249_v55  ;;  %v14184_v4 = vld [vmem:[#allocation28_spill] sm:$0xff]  ;;  %v14185_v55 = vld [vmem:[#allocation29_spill] sm:$0xff] }
 0xc6a   :  { %v5320_v53 = vadd.f32 %v12753_v39, %v5319_v54  ;;  %v9731_v36 = vpop.f32.mrf.mxu0 }
 0xc6b   :  { %v9744_v10 = vpop.f32.mrf.mxu1  ;;  %v13142_v42 = vadd.f32 %v5029_v24, %v5028_v58 }
 0xc6c   :  { %v8218_v13 = vmul.f32 -1.442695, %v5320_v53 }
 0xc6d   :  { %10427 = vtanh.f32 %v13142_v42 }
 0xc6e   :  { %v10422_v6 = vpop.eup %10421  ;;  %10429 = vpow2.f32 %v8218_v13 }
 0xc6f   :  { %v10424_v47 = vpop.eup %10423  ;;  %v5326_v63 = vadd.f32 1.0, %v10422_v6  ;;  %10431 = vtanh.f32 %v5250_v29  ;;  %v14186_v29 = vld [vmem:[#allocation30_spill] sm:$0xff] }
 0xc70   :  { %v5332_v1 = vadd.f32 1.0, %v10424_v47 }
 0xc71   :  { %10433 = vrcp.f32 %v5326_v63 }
 0xc72   :  { %10435 = vrcp.f32 %v5332_v1  ;;  %v10426_v44 = vpop.eup %10425 }
 0xc7a   :  { %v10428_v39 = vpop.eup %10427 }
 0xc7b   :  { %v10430_v23 = vpop.eup %10429  ;;  %v13146_v0 = vmul.f32 %v10428_v39, %v10426_v44 }
 0xc7c   :  { %v10432_v9 = vpop.eup %10431  ;;  %v5339_v46 = vadd.f32 1.0, %v10430_v23 }
 0xc7d   :  { %5660 = vrot.lane.b32.xlu1 %v13146_v0, %s10899_s20 }
 0xc7e   :  { %v10434_v31 = vpop.eup %10433  ;;  %10437 = vrcp.f32 %v5339_v46 }
 0xc7f   :  { %v10436_v48 = vpop.eup %10435  ;;  %v5343_v28 = vmul.f32 %v10434_v31, %v10432_v9 }
 0xc80   :  { %v5342_v7 = vmul.f32 %v10436_v48, %v12771_v27  ;;  %v14173_v27 = vld [vmem:[#allocation17_spill] sm:$0xff] }
 0xc82   :  { %v13151_v14 = vadd.f32 %v5343_v28, %v5342_v7 }
 0xc84   :  { %10439 = vtanh.f32 %v13151_v14 }
 0xc8b   :  { %v10438_v15 = vpop.eup %10437 }
 0xc91   :  { %v10440_v16 = vpop.eup %10439 }
 0xc92   :  { %v5346_v19 = vmul.f32 %v10440_v16, %v10438_v15 }
 0xc94   :  { %v5351_v57 = vsel %vm183_vm3, %v5346_v19, %v5349_v21  ;;  %v5972_v37 = vrot.slane %v5346_v19, 4 }
 0xc95   :  { %9756 = vmatmul.mubr.msk.f32.vlgmr.msra.gmra.mxu0 %vm197_vm4, %v5351_v57  ;;  %9769 = vmatmul.mubr.msk.f32.vlgmr.msra.gmra.mxu1 %vm197_vm4, %v5351_v57 }
 0xc96   :  { %9772 = vmatpush3.msra.mxu0 %v12780_v2  ;;  %9785 = vmatpush3.msra.mxu1 %v12786_v8  ;;  %v14174_v2 = vld [vmem:[#allocation18_spill] sm:$0xff]  ;;  %v14175_v8 = vld [vmem:[#allocation19_spill] sm:$0xff] }
 0xc97   :  { %5973 = vrot.lane.b32.xlu0 %v5972_v37, %s10899_s20  ;;  %9773 = vmatprep.subr.mxu0 %v14111_v26 }
 0xc98   :  { %9786 = vmatprep.subr.mxu1 %v14111_v26  ;;  %9774 = vmatpush3.msra.mxu0 %v12795_v5  ;;  %v14176_v5 = vld [vmem:[#allocation20_spill] sm:$0xff] }
 0xc99   :  { %9787 = vmatpush3.msra.mxu1 %v12801_v25  ;;  %9775 = vmatprep.subr.mxu0 %v14111_v26  ;;  %v14177_v25 = vld [vmem:[#allocation21_spill] sm:$0xff] }
 0xc9a   :  { %9788 = vmatprep.subr.mxu1 %v14111_v26  ;;  %9776 = vmatpush3.msra.mxu0 %v12809_v62  ;;  %v14178_v62 = vld [vmem:[#allocation22_spill] sm:$0xff] }
 0xc9b   :  { %9789 = vmatpush3.msra.mxu1 %v12815_v50  ;;  %9777 = vmatprep.subr.mxu0 %v14111_v26  ;;  %v14179_v50 = vld [vmem:[#allocation23_spill] sm:$0xff] }
 0xc9c   :  { %9790 = vmatprep.subr.mxu1 %v14111_v26  ;;  %9778 = vmatpush3.msra.mxu0 %v12823_v51  ;;  %v14180_v51 = vld [vmem:[#allocation24_spill] sm:$0xff] }
 0xc9d   :  { %9791 = vmatpush3.msra.mxu1 %v12829_v17  ;;  %9779 = vmatprep.subr.mxu0 %v14111_v26  ;;  %v14181_v17 = vld [vmem:[#allocation25_spill] sm:$0xff] }
 0xc9e   :  { %9792 = vmatprep.subr.mxu1 %v14111_v26  ;;  %9780 = vmatpush3.msra.mxu0 %v12837_v18  ;;  %v14182_v18 = vld [vmem:[#allocation26_spill] sm:$0xff] }
 0xc9f   :  { %9781 = vmatprep.mubr.msk.f32.mxu0 %vm10901_vm2, %v14111_v26  ;;  %9793 = vmatpush3.msra.mxu1 %v14173_v27 }
 0xca0   :  { %9794 = vmatprep.mubr.msk.f32.mxu1 %vm10901_vm2, %v14111_v26  ;;  %9782 = vmatmul.mubr.msk.f32.vlgmr.msra.gmra.mxu0 %vm197_vm4, %v5351_v57 }
 0xca1   :  { %9795 = vmatmul.mubr.msk.f32.vlgmr.msra.gmra.mxu1 %vm197_vm4, %v5351_v57  ;;  %9797 = vmatprep.subr.mxu0 %v14111_v26 }
 0xca2   :  { %9810 = vmatprep.subr.mxu1 %v14111_v26  ;;  %9798 = vmatpush3.msra.mxu0 %v14174_v2 }
 0xca3   :  { %9811 = vmatpush3.msra.mxu1 %v14175_v8  ;;  %9799 = vmatprep.subr.mxu0 %v14111_v26  ;;  %v13307_v8 = vld [vmem:[%s14028_s4] sm:$0xff] }
 0xca4   :  { %9812 = vmatprep.subr.mxu1 %v14111_v26  ;;  %9800 = vmatpush3.msra.mxu0 %v14176_v5  ;;  %v13315_v5 = vld [vmem:[%s14028_s4 + $0x28] sm:$0xff] }
 0xca5   :  { %9813 = vmatpush3.msra.mxu1 %v14177_v25  ;;  %9801 = vmatprep.subr.mxu0 %v14111_v26  ;;  %v13327_v25 = vld [vmem:[%s14028_s4 + $0x70] sm:$0xff] }
 0xca6   :  { %9814 = vmatprep.subr.mxu1 %v14111_v26  ;;  %9802 = vmatpush3.msra.mxu0 %v14178_v62  ;;  %v13333_v62 = vld [vmem:[%s14028_s4 + $0x98] sm:$0xff] }
 0xca7   :  { %9815 = vmatpush3.msra.mxu1 %v14179_v50  ;;  %9803 = vmatprep.subr.mxu0 %v14111_v26  ;;  %v13341_v50 = vld [vmem:[%s14028_s4 + $0x68] sm:$0xff] }
 0xca8   :  { %9816 = vmatprep.subr.mxu1 %v14111_v26  ;;  %9804 = vmatpush3.msra.mxu0 %v14180_v51  ;;  %v13347_v51 = vld [vmem:[%s14028_s4 + $0x90] sm:$0xff] }
 0xca9   :  { %9817 = vmatpush3.msra.mxu1 %v14181_v17  ;;  %9805 = vmatprep.subr.mxu0 %v14111_v26  ;;  %v13355_v17 = vld [vmem:[%s14028_s4 + $0x60] sm:$0xff] }
 0xcaa   :  { %9818 = vmatprep.subr.mxu1 %v14111_v26  ;;  %9806 = vmatpush3.msra.mxu0 %v14182_v18  ;;  %v13361_v18 = vld [vmem:[%s14028_s4 + $0x88] sm:$0xff] }
 0xcab   :  { %9819 = vmatpush3.msra.mxu1 %v14183_v11  ;;  %9807 = vmatprep.mubr.msk.f32.mxu0 %vm10901_vm2, %v14111_v26  ;;  %v13369_v11 = vld [vmem:[%s14028_s4 + $0x58] sm:$0xff] }
 0xcac   :  { %9820 = vmatprep.mubr.msk.f32.mxu1 %vm10901_vm2, %v14111_v26  ;;  %9823 = vmatprep.subr.mxu0 %v14111_v26 }
 0xcad   :  { %9836 = vmatprep.subr.mxu1 %v14111_v26 }
 0xcef   :  { %v5661_v27 = vpop.permute.xlu1 %5660 }
 0xd55   :  { %v5421_v56 = vpop.f32.mrf.mxu0  ;;  %v5491_v22 = vpop.f32.mrf.mxu1 }
 0xd56   :  { %v5422_v24 = vadd.f32 %v14184_v4, %v5421_v56  ;;  %v5492_v54 = vadd.f32 %v14185_v55, %v5491_v22  ;;  %v13375_v56 = vld [vmem:[%s14028_s4 + $0x80] sm:$0xff]  ;;  %v13383_v22 = vld [vmem:[%s14028_s4 + $0x50] sm:$0xff]  ;;  %v13391_v4 = vld [vmem:[%s14028_s4 + $0x78] sm:$0xff] }
 0xd57   :  { %v9757_v58 = vpop.f32.mrf.mxu0  ;;  %v9770_v33 = vpop.f32.mrf.mxu1  ;;  %v13409_v55 = vld [vmem:[%s14028_s4 + $0xe8] sm:$0xff] }
 0xd58   :  { %v8223_v53 = vmul.f32 -1.442695, %v5422_v24  ;;  %v8224_v36 = vmul.f32 -1.442695, %v5492_v54  ;;  %v13403_v24 = vld [vmem:[%s14028_s4 + $0xc0] sm:$0xff]  ;;  %v13417_v54 = vld [vmem:[%s14028_s4 + $0xb8] sm:$0xff] }
 0xd59   :  { %v13423_v58 = vld [vmem:[%s14028_s4 + $0xe0] sm:$0xff]  ;;  %v13431_v33 = vld [vmem:[%s14028_s4 + $0xb0] sm:$0xff] }
 0xd5a   :  { %10441 = vpow2.f32 %v8223_v53  ;;  %v13437_v53 = vld [vmem:[%s14028_s4 + $0xd8] sm:$0xff] }
 0xd5b   :  { %10443 = vpow2.f32 %v8224_v36  ;;  %v13445_v36 = vld [vmem:[%s14028_s4 + $0xa8] sm:$0xff] }
 0xd60   :  { %v5561_v10 = vpop.f32.mrf.mxu0 }
 0xd61   :  { %v5631_v13 = vpop.f32.mrf.mxu1  ;;  %v5562_v44 = vadd.f32 %v12949_v30, %v5561_v10  ;;  %v13451_v10 = vld [vmem:[%s14028_s4 + $0xd0] sm:$0xff] }
 0xd62   :  { %v5632_v6 = vadd.f32 %v14186_v29, %v5631_v13  ;;  %v9783_v47 = vpop.f32.mrf.mxu0  ;;  %v13459_v13 = vld [vmem:[%s14028_s4 + $0xa0] sm:$0xff]  ;;  %v13465_v29 = vld [vmem:[%s14028_s4 + $0xc8] sm:$0xff] }
 0xd63   :  { %v9796_v63 = vpop.f32.mrf.mxu1 }
 0xd64   :  { %v8225_v1 = vmul.f32 -1.442695, %v5632_v6 }
 0xd66   :  { %10445 = vpow2.f32 %v8225_v1 }
 0xd67   :  { %v10442_v39 = vpop.eup %10441  ;;  %10447 = vtanh.f32 %v5562_v44 }
 0xd68   :  { %v10444_v23 = vpop.eup %10443  ;;  %v5638_v9 = vadd.f32 1.0, %v10442_v39 }
 0xd69   :  { %v5644_v31 = vadd.f32 1.0, %v10444_v23 }
 0xd6a   :  { %10449 = vrcp.f32 %v5638_v9 }
 0xd6b   :  { %10451 = vrcp.f32 %v5644_v31 }
 0xd73   :  { %v10446_v48 = vpop.eup %10445 }
 0xd74   :  { %v10448_v28 = vpop.eup %10447  ;;  %v5651_v16 = vadd.f32 1.0, %v10446_v48 }
 0xd76   :  { %10453 = vrcp.f32 %v5651_v16 }
 0xd77   :  { %v10450_v46 = vpop.eup %10449 }
 0xd78   :  { %v10452_v7 = vpop.eup %10451  ;;  %v5655_v15 = vmul.f32 %v10450_v46, %v10448_v28 }
 0xd79   :  { %v5654_v19 = vmul.f32 %v10452_v7, %v12953_v59  ;;  %v13249_v59 = vld [vmem:[%s14028_s4 + $0x20] sm:$0xff] }
 0xd7b   :  { %v13213_v21 = vadd.f32 %v5655_v15, %v5654_v19 }
 0xd7d   :  { %10455 = vtanh.f32 %v13213_v21 }
 0xd83   :  { %v10454_v30 = vpop.eup %10453 }
 0xd8a   :  { %v10456_v57 = vpop.eup %10455 }
 0xd8b   :  { %v5658_v37 = vmul.f32 %v10456_v57, %v10454_v30 }
 0xd8d   :  { %6286 = vrot.lane.b32.xlu1 %v5658_v37, %s10899_s20  ;;  %v5663_v2 = vsel %vm183_vm3, %v5658_v37, %v5661_v27  ;;  %v13481_v27 = vld [vmem:[%s14029_s5] ss:$0 sm:$0xff] }
 0xd8e   :  { %9808 = vmatmul.mubr.msk.f32.vlgmr.msra.gmra.mxu0 %vm197_vm4, %v5663_v2  ;;  %9821 = vmatmul.mubr.msk.f32.vlgmr.msra.gmra.mxu1 %vm197_vm4, %v5663_v2 }
 0xd8f   :  { %9824 = vmatpush3.msra.mxu0 %v12963_v43  ;;  %9837 = vmatpush3.msra.mxu1 %v12969_v35  ;;  %v13255_v43 = vld [vmem:[%s14028_s4 + $0x48] sm:$0xff]  ;;  %v5974_v35 = vpop.permute.xlu0 %5973 }
 0xd90   :  { %9825 = vmatprep.subr.mxu0 %v14111_v26  ;;  %9838 = vmatprep.subr.mxu1 %v14111_v26 }
 0xd91   :  { %9826 = vmatpush3.msra.mxu0 %v12977_v20  ;;  %9839 = vmatpush3.msra.mxu1 %v12983_v38  ;;  %v13263_v20 = vld [vmem:[%s14028_s4 + $0x18] sm:$0xff]  ;;  %v13269_v38 = vld [vmem:[%s14028_s4 + $0x40] sm:$0xff] }
 0xd92   :  { %9827 = vmatprep.subr.mxu0 %v14111_v26  ;;  %9840 = vmatprep.subr.mxu1 %v14111_v26 }
 0xd93   :  { %9828 = vmatpush3.msra.mxu0 %v12991_v61  ;;  %9841 = vmatpush3.msra.mxu1 %v12997_v45  ;;  %v13277_v61 = vld [vmem:[%s14028_s4 + $0x10] sm:$0xff]  ;;  %v13283_v45 = vld [vmem:[%s14028_s4 + $0x38] sm:$0xff] }
 0xd94   :  { %9829 = vmatprep.subr.mxu0 %v14111_v26  ;;  %9842 = vmatprep.subr.mxu1 %v14111_v26 }
 0xd95   :  { %9830 = vmatpush3.msra.mxu0 %v13005_v3  ;;  %9843 = vmatpush3.msra.mxu1 %v13011_v41  ;;  %v5976_v3 = vsel %vm183_vm3, %v14157_v12, %v5974_v35  ;;  %v13293_v41 = vld [vmem:[%s14028_s4 + $0x8] sm:$0xff] }
 0xd96   :  { %9831 = vmatprep.subr.mxu0 %v14111_v26  ;;  %9844 = vmatprep.subr.mxu1 %v14111_v26 }
 0xd97   :  { %9832 = vmatpush3.msra.mxu0 %v13019_v60  ;;  %9833 = vmatprep.mubr.msk.f32.mxu0 %vm10901_vm2, %v14111_v26  ;;  %v13299_v60 = vld [vmem:[%s14028_s4 + $0x30] sm:$0xff] }
 0xd98   :  { %9845 = vmatpush3.msra.mxu1 %v13027_v40  ;;  %9846 = vmatprep.mubr.msk.f32.mxu1 %vm10901_vm2, %v14111_v26  ;;  %v5978_v40 = vrot.slane %v5976_v3, 4 }
 0xd99   :  { %9834 = vmatmul.mubr.msk.f32.vlgmr.msra.gmra.mxu0 %vm197_vm4, %v5663_v2  ;;  %9847 = vmatmul.mubr.msk.f32.vlgmr.msra.gmra.mxu1 %vm197_vm4, %v5663_v2 }
 0xd9a   :  { %9849 = vmatprep.subr.mxu0 %v14111_v26  ;;  %9862 = vmatprep.subr.mxu1 %v14111_v26 }
 0xd9b   :  { %9850 = vmatpush3.msra.mxu0 %v13249_v59  ;;  %9863 = vmatpush3.msra.mxu1 %v13255_v43 }
 0xd9c   :  { %9851 = vmatprep.subr.mxu0 %v14111_v26  ;;  %9864 = vmatprep.subr.mxu1 %v14111_v26 }
 0xd9d   :  { %9852 = vmatpush3.msra.mxu0 %v13263_v20  ;;  %9865 = vmatpush3.msra.mxu1 %v13269_v38 }
 0xd9e   :  { %9853 = vmatprep.subr.mxu0 %v14111_v26  ;;  %9866 = vmatprep.subr.mxu1 %v14111_v26 }
 0xd9f   :  { %9854 = vmatpush3.msra.mxu0 %v13277_v61  ;;  %9867 = vmatpush3.msra.mxu1 %v13283_v45 }
 0xda0   :  { %9855 = vmatprep.subr.mxu0 %v14111_v26  ;;  %9868 = vmatprep.subr.mxu1 %v14111_v26 }
 0xda1   :  { %9856 = vmatpush3.msra.mxu0 %v13293_v41  ;;  %9869 = vmatpush3.msra.mxu1 %v13299_v60 }
 0xda2   :  { %9857 = vmatprep.subr.mxu0 %v14111_v26  ;;  %9870 = vmatprep.subr.mxu1 %v14111_v26 }
 0xda3   :  { %9858 = vmatpush3.msra.mxu0 %v13307_v8  ;;  %9859 = vmatprep.mubr.msk.f32.mxu0 %vm10901_vm2, %v14111_v26 }
 0xda4   :  { %9871 = vmatpush3.msra.mxu1 %v13315_v5  ;;  %9872 = vmatprep.mubr.msk.f32.mxu1 %vm10901_vm2, %v14111_v26 }
 0xda5   :  { %9860 = vmatmul.mubr.msk.f32.vlgmr.msra.gmra.mxu0 %vm197_vm4, %v5978_v40  ;;  %9873 = vmatmul.mubr.msk.f32.vlgmr.msra.gmra.mxu1 %vm197_vm4, %v5978_v40 }
 0xda6   :  { %9875 = vmatprep.subr.mxu0 %v14111_v26  ;;  %9888 = vmatprep.subr.mxu1 %v14111_v26 }
 0xda7   :  { %9876 = vmatpush3.msra.mxu0 %v13327_v25  ;;  %9889 = vmatpush3.msra.mxu1 %v13333_v62 }
 0xda8   :  { %9877 = vmatprep.subr.mxu0 %v14111_v26  ;;  %9890 = vmatprep.subr.mxu1 %v14111_v26 }
 0xda9   :  { %9878 = vmatpush3.msra.mxu0 %v13341_v50  ;;  %9891 = vmatpush3.msra.mxu1 %v13347_v51 }
 0xdaa   :  { %9879 = vmatprep.subr.mxu0 %v14111_v26  ;;  %9892 = vmatprep.subr.mxu1 %v14111_v26 }
 0xdab   :  { %9880 = vmatpush3.msra.mxu0 %v13355_v17  ;;  %9893 = vmatpush3.msra.mxu1 %v13361_v18 }
 0xdac   :  { %9881 = vmatprep.subr.mxu0 %v14111_v26  ;;  %9894 = vmatprep.subr.mxu1 %v14111_v26 }
 0xdad   :  { %9882 = vmatpush3.msra.mxu0 %v13369_v11  ;;  %9895 = vmatpush3.msra.mxu1 %v13375_v56 }
 0xdae   :  { %9883 = vmatprep.subr.mxu0 %v14111_v26  ;;  %9896 = vmatprep.subr.mxu1 %v14111_v26 }
 0xdaf   :  { %9884 = vmatpush3.msra.mxu0 %v13383_v22  ;;  %9885 = vmatprep.mubr.msk.f32.mxu0 %vm10901_vm2, %v14111_v26 }
 0xdb0   :  { %9897 = vmatpush3.msra.mxu1 %v13391_v4  ;;  %9898 = vmatprep.mubr.msk.f32.mxu1 %vm10901_vm2, %v14111_v26 }
 0xdb1   :  { %9886 = vmatmul.mubr.msk.f32.vlgmr.msra.gmra.mxu0 %vm197_vm4, %v5978_v40  ;;  %9899 = vmatmul.mubr.msk.f32.vlgmr.msra.gmra.mxu1 %vm197_vm4, %v5978_v40 }
 0xdb2   :  { %9901 = vmatprep.subr.mxu0 %v14111_v26  ;;  %9914 = vmatprep.subr.mxu1 %v14111_v26 }
 0xdb3   :  { %9902 = vmatpush3.msra.mxu0 %v13403_v24  ;;  %9915 = vmatpush3.msra.mxu1 %v13409_v55 }
 0xdb4   :  { %9903 = vmatprep.subr.mxu0 %v14111_v26  ;;  %9916 = vmatprep.subr.mxu1 %v14111_v26 }
 0xdb5   :  { %9904 = vmatpush3.msra.mxu0 %v13417_v54  ;;  %9917 = vmatpush3.msra.mxu1 %v13423_v58 }
 0xdb6   :  { %9905 = vmatprep.subr.mxu0 %v14111_v26  ;;  %9918 = vmatprep.subr.mxu1 %v14111_v26 }
 0xdb7   :  { %9906 = vmatpush3.msra.mxu0 %v13431_v33  ;;  %9919 = vmatpush3.msra.mxu1 %v13437_v53 }
 0xdb8   :  { %9907 = vmatprep.subr.mxu0 %v14111_v26  ;;  %9920 = vmatprep.subr.mxu1 %v14111_v26 }
 0xdb9   :  { %9908 = vmatpush3.msra.mxu0 %v13445_v36  ;;  %9921 = vmatpush3.msra.mxu1 %v13451_v10 }
 0xdba   :  { %9909 = vmatprep.subr.mxu0 %v14111_v26  ;;  %9922 = vmatprep.subr.mxu1 %v14111_v26 }
 0xdbb   :  { %9910 = vmatpush3.msra.mxu0 %v13459_v13  ;;  %9923 = vmatpush3.msra.mxu1 %v13465_v29 }
 0xdbc   :  { %9911 = vmatprep.mubr.msk.f32.mxu0 %vm10901_vm2, %v14111_v26  ;;  %9924 = vmatprep.mubr.msk.f32.mxu1 %vm10901_vm2, %v14111_v26 }
 0xdbd   :  { %9927 = vmatprep.subr.mxu0 %v14111_v26  ;;  %9940 = vmatprep.subr.mxu1 %v14111_v26 }
 0xe4e   :  { %v5733_v6 = vpop.f32.mrf.mxu0  ;;  %v5803_v47 = vpop.f32.mrf.mxu1 }
 0xe4f   :  { %v5734_v63 = vadd.f32 %v13117_v52, %v5733_v6  ;;  %v5804_v1 = vadd.f32 %v13123_v32, %v5803_v47 }
 0xe50   :  { %v9809_v44 = vpop.f32.mrf.mxu0  ;;  %v9822_v39 = vpop.f32.mrf.mxu1 }
 0xe51   :  { %v8230_v23 = vmul.f32 -1.442695, %v5734_v63  ;;  %v8231_v9 = vmul.f32 -1.442695, %v5804_v1 }
 0xe53   :  { %10457 = vpow2.f32 %v8230_v23 }
 0xe54   :  { %10459 = vpow2.f32 %v8231_v9 }
 0xe59   :  { %v5873_v31 = vpop.f32.mrf.mxu0  ;;  %v5943_v48 = vpop.f32.mrf.mxu1 }
 0xe5a   :  { %v5944_v28 = vadd.f32 %v13129_v49, %v5943_v48  ;;  %v5874_v15 = vadd.f32 %v13135_v34, %v5873_v31  ;;  %v13487_v34 = vld [vmem:[%s14029_s5 + $0x1] ss:$0 sm:$0xff] }
 0xe5b   :  { %v9835_v46 = vpop.f32.mrf.mxu0  ;;  %v9848_v7 = vpop.f32.mrf.mxu1 }
 0xe5c   :  { %v8232_v16 = vmul.f32 -1.442695, %v5944_v28  ;;  %10461 = vtanh.f32 %v5874_v15  ;;  %v13494_v28 = vld [vmem:[%s14029_s5 + $0x3] ss:$0 sm:$0xff] }
 0xe5e   :  { %10463 = vpow2.f32 %v8232_v16 }
 0xe60   :  { %v10458_v19 = vpop.eup %10457 }
 0xe61   :  { %v10460_v30 = vpop.eup %10459  ;;  %v5950_v52 = vadd.f32 1.0, %v10458_v19 }
 0xe62   :  { %v5956_v32 = vadd.f32 1.0, %v10460_v30  ;;  %v13502_v30 = vld [vmem:[%s14029_s5 + $0x2] ss:$0 sm:$0xff] }
 0xe63   :  { %10465 = vrcp.f32 %v5950_v52 }
 0xe64   :  { %10467 = vrcp.f32 %v5956_v32 }
 0xe65   :  { %v6047_v57 = vpop.f32.mrf.mxu0  ;;  %v6117_v37 = vpop.f32.mrf.mxu1 }
 0xe66   :  { %v6048_v49 = vadd.f32 %v13481_v27, %v6047_v57  ;;  %v6118_v2 = vadd.f32 %v13487_v34, %v6117_v37 }
 0xe67   :  { %v9861_v35 = vpop.f32.mrf.mxu0  ;;  %v9874_v3 = vpop.f32.mrf.mxu1 }
 0xe68   :  { %v8237_v40 = vmul.f32 -1.442695, %v6048_v49  ;;  %v8238_v6 = vmul.f32 -1.442695, %v6118_v2 }
 0xe69   :  { %v10462_v47 = vpop.eup %10461 }
 0xe6a   :  { %10469 = vpow2.f32 %v8237_v40 }
 0xe6b   :  { %10471 = vpow2.f32 %v8238_v6  ;;  %v10464_v63 = vpop.eup %10463 }
 0xe6c   :  { %v5963_v48 = vadd.f32 1.0, %v10464_v63 }
 0xe6e   :  { %10473 = vrcp.f32 %v5963_v48  ;;  %v6287_v48 = vpop.permute.xlu1 %6286 }
 0xe70   :  { %v10466_v1 = vpop.eup %10465 }
 0xe71   :  { %v10468_v44 = vpop.eup %10467  ;;  %v5967_v39 = vmul.f32 %v10466_v1, %v10462_v47  ;;  %v6187_v23 = vpop.f32.mrf.mxu0 }
 0xe72   :  { %v6257_v9 = vpop.f32.mrf.mxu1  ;;  %v5966_v31 = vmul.f32 %v10468_v44, %v13142_v42  ;;  %v6188_v42 = vadd.f32 %v13502_v30, %v6187_v23 }
 0xe73   :  { %v6258_v46 = vadd.f32 %v13494_v28, %v6257_v9  ;;  %v9887_v7 = vpop.f32.mrf.mxu0 }
 0xe74   :  { %v9900_v15 = vpop.f32.mrf.mxu1  ;;  %v13497_v16 = vadd.f32 %v5967_v39, %v5966_v31 }
 0xe75   :  { %v8239_v19 = vmul.f32 -1.442695, %v6258_v46  ;;  %v13526_v15 = vld [vmem:[%s14028_s4 + $0x138] sm:$0xff] }
 0xe76   :  { %10475 = vtanh.f32 %v13497_v16 }
 0xe77   :  { %v10470_v52 = vpop.eup %10469  ;;  %10477 = vpow2.f32 %v8239_v19  ;;  %v13535_v19 = vld [vmem:[%s14028_s4 + $0x108] sm:$0xff] }
 0xe78   :  { %v10472_v32 = vpop.eup %10471  ;;  %v6264_v57 = vadd.f32 1.0, %v10470_v52  ;;  %10479 = vtanh.f32 %v6188_v42  ;;  %v13541_v42 = vld [vmem:[%s14028_s4 + $0x130] sm:$0xff]  ;;  %v13549_v52 = vld [vmem:[%s14028_s4 + $0x100] sm:$0xff] }
 0xe79   :  { %v6270_v37 = vadd.f32 1.0, %v10472_v32  ;;  %v13555_v32 = vld [vmem:[%s14028_s4 + $0x128] sm:$0xff] }
 0xe7a   :  { %10481 = vrcp.f32 %v6264_v57  ;;  %v13563_v57 = vld [vmem:[%s14028_s4 + $0xf8] sm:$0xff] }
 0xe7b   :  { %10483 = vrcp.f32 %v6270_v37  ;;  %v10474_v49 = vpop.eup %10473  ;;  %v13569_v37 = vld [vmem:[%s14028_s4 + $0x120] sm:$0xff] }
 0xe7c   :  { %14187 = vst [vmem:[#allocation31_spill] sm:$0xff] %v13569_v37 }
 0xe83   :  { %v10476_v2 = vpop.eup %10475 }
 0xe84   :  { %v10478_v35 = vpop.eup %10477  ;;  %v13506_v3 = vmul.f32 %v10476_v2, %v10474_v49  ;;  %v13577_v49 = vld [vmem:[%s14028_s4 + $0xf0] sm:$0xff]  ;;  %v13585_v2 = vld [vmem:[%s14028_s4 + $0x118] sm:$0xff] }
 0xe85   :  { %v10480_v40 = vpop.eup %10479  ;;  %v6277_v1 = vadd.f32 1.0, %v10478_v35  ;;  %14188 = vst [vmem:[#allocation15_spill] sm:$0xff] %v13577_v49  ;;  %14189 = vst [vmem:[#allocation17_spill] sm:$0xff] %v13585_v2  ;;  %v13597_v35 = vld [vmem:[%s14028_s4 + $0x160] sm:$0xff] }
 0xe86   :  { %6598 = vrot.lane.b32.xlu0 %v13506_v3, %s10899_s20  ;;  %14190 = vst [vmem:[#allocation18_spill] sm:$0xff] %v13597_v35 }
 0xe87   :  { %v10482_v6 = vpop.eup %10481  ;;  %10485 = vrcp.f32 %v6277_v1  ;;  %v13631_v1 = vld [vmem:[%s14028_s4 + $0x178] sm:$0xff] }
 0xe88   :  { %v10484_v47 = vpop.eup %10483  ;;  %v6281_v63 = vmul.f32 %v10482_v6, %v10480_v40  ;;  %v13603_v40 = vld [vmem:[%s14028_s4 + $0x188] sm:$0xff]  ;;  %v13611_v6 = vld [vmem:[%s14028_s4 + $0x158] sm:$0xff]  ;;  %14195 = vst [vmem:[#allocation23_spill] sm:$0xff] %v13631_v1 }
 0xe89   :  { %v6280_v44 = vmul.f32 %v10484_v47, %v13151_v14  ;;  %v13520_v14 = vld [vmem:[%s14028_s4 + $0x110] sm:$0xff]  ;;  %14191 = vst [vmem:[#allocation19_spill] sm:$0xff] %v13603_v40  ;;  %14192 = vst [vmem:[#allocation20_spill] sm:$0xff] %v13611_v6  ;;  %v13617_v47 = vld [vmem:[%s14028_s4 + $0x180] sm:$0xff] }
 0xe8a   :  { %14193 = vst [vmem:[#allocation21_spill] sm:$0xff] %v13617_v47 }
 0xe8b   :  { %v13511_v39 = vadd.f32 %v6281_v63, %v6280_v44  ;;  %v13625_v63 = vld [vmem:[%s14028_s4 + $0x150] sm:$0xff]  ;;  %v13639_v44 = vld [vmem:[%s14028_s4 + $0x148] sm:$0xff] }
 0xe8c   :  { %14194 = vst [vmem:[#allocation22_spill] sm:$0xff] %v13625_v63  ;;  %14196 = vst [vmem:[#allocation24_spill] sm:$0xff] %v13639_v44 }
 0xe8d   :  { %10487 = vtanh.f32 %v13511_v39 }
 0xe94   :  { %v10486_v23 = vpop.eup %10485 }
 0xe9a   :  { %v10488_v9 = vpop.eup %10487 }
 0xe9b   :  { %v6284_v31 = vmul.f32 %v10488_v9, %v10486_v23  ;;  %v13645_v23 = vld [vmem:[%s14028_s4 + $0x170] sm:$0xff]  ;;  %v13653_v9 = vld [vmem:[%s14028_s4 + $0x140] sm:$0xff] }
 0xe9c   :  { %14197 = vst [vmem:[#allocation25_spill] sm:$0xff] %v13645_v23  ;;  %14198 = vst [vmem:[#allocation26_spill] sm:$0xff] %v13653_v9 }
 0xe9d   :  { %v6289_v46 = vsel %vm183_vm3, %v6284_v31, %v6287_v48  ;;  %v6910_v7 = vrot.slane %v6284_v31, 2  ;;  %v13659_v31 = vld [vmem:[%s14028_s4 + $0x168] sm:$0xff] }
 0xe9e   :  { %9912 = vmatmul.mubr.msk.f32.vlgmr.msra.gmra.mxu0 %vm197_vm4, %v6289_v46  ;;  %9925 = vmatmul.mubr.msk.f32.vlgmr.msra.gmra.mxu1 %vm197_vm4, %v6289_v46  ;;  %14199 = vst [vmem:[#allocation27_spill] sm:$0xff] %v13659_v31 }
 0xe9f   :  { %9928 = vmatpush3.msra.mxu0 %v13520_v14  ;;  %9941 = vmatpush3.msra.mxu1 %v13526_v15 }
 0xea0   :  { %6911 = vrot.lane.b32.xlu1 %v6910_v7, %s10899_s20  ;;  %9929 = vmatprep.subr.mxu0 %v14111_v26  ;;  %v13671_v7 = vld [vmem:[%s14029_s5 + $0x4] ss:$0 sm:$0xff] }
 0xea1   :  { %9942 = vmatprep.subr.mxu1 %v14111_v26  ;;  %9930 = vmatpush3.msra.mxu0 %v13535_v19  ;;  %14200 = vst [vmem:[#allocation28_spill] sm:$0xff] %v13671_v7 }
 0xea2   :  { %9943 = vmatpush3.msra.mxu1 %v13541_v42  ;;  %9931 = vmatprep.subr.mxu0 %v14111_v26 }
 0xea3   :  { %9944 = vmatprep.subr.mxu1 %v14111_v26  ;;  %9932 = vmatpush3.msra.mxu0 %v13549_v52 }
 0xea4   :  { %9945 = vmatpush3.msra.mxu1 %v13555_v32  ;;  %9933 = vmatprep.subr.mxu0 %v14111_v26 }
 0xea5   :  { %9946 = vmatprep.subr.mxu1 %v14111_v26  ;;  %9934 = vmatpush3.msra.mxu0 %v13563_v57 }
 0xea6   :  { %9947 = vmatpush3.msra.mxu1 %v13569_v37  ;;  %9935 = vmatprep.subr.mxu0 %v14111_v26 }
 0xea7   :  { %9948 = vmatprep.subr.mxu1 %v14111_v26  ;;  %9936 = vmatpush3.msra.mxu0 %v13577_v49 }
 0xea8   :  { %9937 = vmatprep.mubr.msk.f32.mxu0 %vm10901_vm2, %v14111_v26  ;;  %9949 = vmatpush3.msra.mxu1 %v13585_v2 }
 0xea9   :  { %9950 = vmatprep.mubr.msk.f32.mxu1 %vm10901_vm2, %v14111_v26  ;;  %9938 = vmatmul.mubr.msk.f32.vlgmr.msra.gmra.mxu0 %vm197_vm4, %v6289_v46 }
 0xeaa   :  { %9951 = vmatmul.mubr.msk.f32.vlgmr.msra.gmra.mxu1 %vm197_vm4, %v6289_v46  ;;  %9953 = vmatprep.subr.mxu0 %v14111_v26 }
 0xeab   :  { %9966 = vmatprep.subr.mxu1 %v14111_v26  ;;  %9954 = vmatpush3.msra.mxu0 %v13597_v35  ;;  %v13683_v35 = vld [vmem:[%s14029_s5 + $0x7] ss:$0 sm:$0xff] }
 0xeac   :  { %9967 = vmatpush3.msra.mxu1 %v13603_v40  ;;  %9955 = vmatprep.subr.mxu0 %v14111_v26  ;;  %14202 = vst [vmem:[#allocation30_spill] sm:$0xff] %v13683_v35 }
 0xead   :  { %9968 = vmatprep.subr.mxu1 %v14111_v26  ;;  %9956 = vmatpush3.msra.mxu0 %v13611_v6 }
 0xeae   :  { %9969 = vmatpush3.msra.mxu1 %v13617_v47  ;;  %9957 = vmatprep.subr.mxu0 %v14111_v26 }
 0xeaf   :  { %9970 = vmatprep.subr.mxu1 %v14111_v26  ;;  %9958 = vmatpush3.msra.mxu0 %v13625_v63 }
 0xeb0   :  { %9971 = vmatpush3.msra.mxu1 %v13631_v1  ;;  %9959 = vmatprep.subr.mxu0 %v14111_v26 }
 0xeb1   :  { %9972 = vmatprep.subr.mxu1 %v14111_v26  ;;  %9960 = vmatpush3.msra.mxu0 %v13639_v44 }
 0xeb2   :  { %9973 = vmatpush3.msra.mxu1 %v13645_v23  ;;  %9961 = vmatprep.subr.mxu0 %v14111_v26 }
 0xeb3   :  { %9974 = vmatprep.subr.mxu1 %v14111_v26  ;;  %9962 = vmatpush3.msra.mxu0 %v13653_v9 }
 0xeb4   :  { %9975 = vmatpush3.msra.mxu1 %v13659_v31  ;;  %9963 = vmatprep.mubr.msk.f32.mxu0 %vm10901_vm2, %v14111_v26  ;;  %v13677_v31 = vld [vmem:[%s14029_s5 + $0x5] ss:$0 sm:$0xff] }
 0xeb5   :  { %9976 = vmatprep.mubr.msk.f32.mxu1 %vm10901_vm2, %v14111_v26  ;;  %9979 = vmatprep.subr.mxu0 %v14111_v26  ;;  %14201 = vst [vmem:[#allocation29_spill] sm:$0xff] %v13677_v31 }
 0xeb6   :  { %9992 = vmatprep.subr.mxu1 %v14111_v26 }
 0xf5e   :  { %v6359_v48 = vpop.f32.mrf.mxu0  ;;  %v6429_v46 = vpop.f32.mrf.mxu1 }
 0xf5f   :  { %v6360_v9 = vadd.f32 %v13671_v7, %v6359_v48  ;;  %v6430_v23 = vadd.f32 %v13677_v31, %v6429_v46 }
 0xf60   :  { %v9913_v44 = vpop.f32.mrf.mxu0  ;;  %v9926_v1 = vpop.f32.mrf.mxu1 }
 0xf61   :  { %v8244_v63 = vmul.f32 -1.442695, %v6360_v9  ;;  %v8245_v47 = vmul.f32 -1.442695, %v6430_v23  ;;  %v13689_v1 = vld [vmem:[%s14029_s5 + $0x6] ss:$0 sm:$0xff] }
 0xf63   :  { %10489 = vpow2.f32 %v8244_v63 }
 0xf64   :  { %10491 = vpow2.f32 %v8245_v47 }
 0xf69   :  { %v6499_v6 = vpop.f32.mrf.mxu0 }
 0xf6a   :  { %v6569_v40 = vpop.f32.mrf.mxu1  ;;  %v6500_v63 = vadd.f32 %v13689_v1, %v6499_v6 }
 0xf6b   :  { %v6570_v48 = vadd.f32 %v13683_v35, %v6569_v40  ;;  %v9939_v7 = vpop.f32.mrf.mxu0 }
 0xf6c   :  { %v9952_v2 = vpop.f32.mrf.mxu1 }
 0xf6d   :  { %v8246_v49 = vmul.f32 -1.442695, %v6570_v48 }
 0xf6f   :  { %10493 = vpow2.f32 %v8246_v49 }
 0xf70   :  { %v10490_v47 = vpop.eup %10489  ;;  %10495 = vtanh.f32 %v6500_v63 }
 0xf71   :  { %v10492_v44 = vpop.eup %10491  ;;  %v6576_v23 = vadd.f32 1.0, %v10490_v47 }
 0xf72   :  { %v6582_v9 = vadd.f32 1.0, %v10492_v44  ;;  %v6599_v44 = vpop.permute.xlu0 %6598 }
 0xf73   :  { %10497 = vrcp.f32 %v6576_v23  ;;  %v13723_v23 = vld [vmem:[%s14028_s4 + $0x1d0] sm:$0xff] }
 0xf74   :  { %10499 = vrcp.f32 %v6582_v9  ;;  %v13731_v9 = vld [vmem:[%s14028_s4 + $0x1a0] sm:$0xff] }
 0xf7c   :  { %v10494_v46 = vpop.eup %10493 }
 0xf7d   :  { %v10496_v40 = vpop.eup %10495  ;;  %v6589_v35 = vadd.f32 1.0, %v10494_v46  ;;  %v13737_v46 = vld [vmem:[%s14028_s4 + $0x1c8] sm:$0xff] }
 0xf7f   :  { %10501 = vrcp.f32 %v6589_v35  ;;  %v13709_v35 = vld [vmem:[%s14028_s4 + $0x1d8] sm:$0xff] }
 0xf80   :  { %v10498_v7 = vpop.eup %10497 }
 0xf81   :  { %v10500_v2 = vpop.eup %10499  ;;  %v6593_v48 = vmul.f32 %v10498_v7, %v10496_v40  ;;  %v13745_v40 = vld [vmem:[%s14028_s4 + $0x198] sm:$0xff]  ;;  %v13751_v7 = vld [vmem:[%s14028_s4 + $0x1c0] sm:$0xff] }
 0xf82   :  { %v6592_v31 = vmul.f32 %v10500_v2, %v13213_v21  ;;  %v13703_v21 = vld [vmem:[%s14028_s4 + $0x1b0] sm:$0xff] }
 0xf83   :  { %v13759_v2 = vld [vmem:[%s14028_s4 + $0x190] sm:$0xff] }
 0xf84   :  { %v13693_v37 = vadd.f32 %v6593_v48, %v6592_v31  ;;  %v13717_v31 = vld [vmem:[%s14028_s4 + $0x1a8] sm:$0xff]  ;;  %v13767_v48 = vld [vmem:[%s14028_s4 + $0x1b8] sm:$0xff] }
 0xf86   :  { %10503 = vtanh.f32 %v13693_v37 }
 0xf8c   :  { %v10502_v6 = vpop.eup %10501 }
 0xf93   :  { %v10504_v47 = vpop.eup %10503 }
 0xf94   :  { %v6596_v49 = vmul.f32 %v10504_v47, %v10502_v6  ;;  %v6912_v6 = vpop.permute.xlu1 %6911 }
 0xf96   :  { %7224 = vrot.lane.b32.xlu0 %v6596_v49, %s10899_s20  ;;  %v6601_v63 = vsel %vm183_vm3, %v6596_v49, %v6599_v44 }
 0xf97   :  { %9964 = vmatmul.mubr.msk.f32.vlgmr.msra.gmra.mxu0 %vm197_vm4, %v6601_v63  ;;  %9977 = vmatmul.mubr.msk.f32.vlgmr.msra.gmra.mxu1 %vm197_vm4, %v6601_v63 }
 0xf98   :  { %9980 = vmatpush3.msra.mxu0 %v13703_v21  ;;  %9993 = vmatpush3.msra.mxu1 %v13709_v35 }
 0xf99   :  { %9981 = vmatprep.subr.mxu0 %v14111_v26  ;;  %9994 = vmatprep.subr.mxu1 %v14111_v26 }
 0xf9a   :  { %9982 = vmatpush3.msra.mxu0 %v13717_v31  ;;  %9995 = vmatpush3.msra.mxu1 %v13723_v23 }
 0xf9b   :  { %9983 = vmatprep.subr.mxu0 %v14111_v26  ;;  %9996 = vmatprep.subr.mxu1 %v14111_v26 }
 0xf9c   :  { %9984 = vmatpush3.msra.mxu0 %v13731_v9  ;;  %9997 = vmatpush3.msra.mxu1 %v13737_v46 }
 0xf9d   :  { %9985 = vmatprep.subr.mxu0 %v14111_v26  ;;  %9998 = vmatprep.subr.mxu1 %v14111_v26 }
 0xf9e   :  { %9986 = vmatpush3.msra.mxu0 %v13745_v40  ;;  %9999 = vmatpush3.msra.mxu1 %v13751_v7 }
 0xf9f   :  { %9987 = vmatprep.subr.mxu0 %v14111_v26  ;;  %10000 = vmatprep.subr.mxu1 %v14111_v26 }
 0xfa0   :  { %9988 = vmatpush3.msra.mxu0 %v13759_v2  ;;  %9989 = vmatprep.mubr.msk.f32.mxu0 %vm10901_vm2, %v14111_v26 }
 0xfa1   :  { %10001 = vmatpush3.msra.mxu1 %v13767_v48  ;;  %10002 = vmatprep.mubr.msk.f32.mxu1 %vm10901_vm2, %v14111_v26 }
 0xfa2   :  { %9990 = vmatmul.mubr.msk.f32.vlgmr.msra.gmra.mxu0 %vm197_vm4, %v6601_v63  ;;  %10003 = vmatmul.mubr.msk.f32.vlgmr.msra.gmra.mxu1 %vm197_vm4, %v6601_v63 }
 0xfa3   :  { %10005 = vmatprep.subr.mxu0 %v14111_v26  ;;  %10018 = vmatprep.subr.mxu1 %v14111_v26 }
 0xfa4   :  { %10006 = vmatpush3.msra.mxu0 %v13249_v59  ;;  %10019 = vmatpush3.msra.mxu1 %v13255_v43  ;;  %v6914_v59 = vsel %vm183_vm3, %v14157_v12, %v6912_v6 }
 0xfa5   :  { %10007 = vmatprep.subr.mxu0 %v14111_v26  ;;  %10020 = vmatprep.subr.mxu1 %v14111_v26  ;;  %v6916_v43 = vrot.slane %v6914_v59, 6 }
 0xfa6   :  { %10008 = vmatpush3.msra.mxu0 %v13263_v20  ;;  %10021 = vmatpush3.msra.mxu1 %v13269_v38  ;;  %v13857_v38 = vld [vmem:[%s14029_s5 + $0x8] ss:$0 sm:$0xff] }
 0xfa7   :  { %10009 = vmatprep.subr.mxu0 %v14111_v26  ;;  %10022 = vmatprep.subr.mxu1 %v14111_v26 }
 0xfa8   :  { %10010 = vmatpush3.msra.mxu0 %v13277_v61  ;;  %10023 = vmatpush3.msra.mxu1 %v13283_v45  ;;  %v13863_v45 = vld [vmem:[%s14029_s5 + $0x9] ss:$0 sm:$0xff] }
 0xfa9   :  { %10011 = vmatprep.subr.mxu0 %v14111_v26  ;;  %10024 = vmatprep.subr.mxu1 %v14111_v26 }
 0xfaa   :  { %10012 = vmatpush3.msra.mxu0 %v13293_v41  ;;  %10025 = vmatpush3.msra.mxu1 %v13299_v60 }
 0xfab   :  { %10013 = vmatprep.subr.mxu0 %v14111_v26  ;;  %10026 = vmatprep.subr.mxu1 %v14111_v26 }
 0xfac   :  { %10014 = vmatpush3.msra.mxu0 %v13307_v8  ;;  %10015 = vmatprep.mubr.msk.f32.mxu0 %vm10901_vm2, %v14111_v26 }
 0xfad   :  { %10027 = vmatpush3.msra.mxu1 %v13315_v5  ;;  %10028 = vmatprep.mubr.msk.f32.mxu1 %vm10901_vm2, %v14111_v26 }
 0xfae   :  { %10016 = vmatmul.mubr.msk.f32.vlgmr.msra.gmra.mxu0 %vm197_vm4, %v6916_v43  ;;  %10029 = vmatmul.mubr.msk.f32.vlgmr.msra.gmra.mxu1 %vm197_vm4, %v6916_v43 }
 0xfaf   :  { %10031 = vmatprep.subr.mxu0 %v14111_v26  ;;  %10044 = vmatprep.subr.mxu1 %v14111_v26 }
 0xfb0   :  { %10032 = vmatpush3.msra.mxu0 %v13327_v25  ;;  %10045 = vmatpush3.msra.mxu1 %v13333_v62 }
 0xfb1   :  { %10033 = vmatprep.subr.mxu0 %v14111_v26  ;;  %10046 = vmatprep.subr.mxu1 %v14111_v26 }
 0xfb2   :  { %10034 = vmatpush3.msra.mxu0 %v13341_v50  ;;  %10047 = vmatpush3.msra.mxu1 %v13347_v51  ;;  %v13869_v51 = vld [vmem:[%s14029_s5 + $0xb] ss:$0 sm:$0xff] }
 0xfb3   :  { %10035 = vmatprep.subr.mxu0 %v14111_v26  ;;  %10048 = vmatprep.subr.mxu1 %v14111_v26 }
 0xfb4   :  { %10036 = vmatpush3.msra.mxu0 %v13355_v17  ;;  %10049 = vmatpush3.msra.mxu1 %v13361_v18 }
 0xfb5   :  { %10037 = vmatprep.subr.mxu0 %v14111_v26  ;;  %10050 = vmatprep.subr.mxu1 %v14111_v26 }
 0xfb6   :  { %10038 = vmatpush3.msra.mxu0 %v13369_v11  ;;  %10051 = vmatpush3.msra.mxu1 %v13375_v56  ;;  %v13875_v56 = vld [vmem:[%s14029_s5 + $0xa] ss:$0 sm:$0xff] }
 0xfb7   :  { %10039 = vmatprep.subr.mxu0 %v14111_v26  ;;  %10052 = vmatprep.subr.mxu1 %v14111_v26 }
 0xfb8   :  { %10040 = vmatpush3.msra.mxu0 %v13383_v22  ;;  %10041 = vmatprep.mubr.msk.f32.mxu0 %vm10901_vm2, %v14111_v26 }
 0xfb9   :  { %10053 = vmatpush3.msra.mxu1 %v13391_v4  ;;  %10054 = vmatprep.mubr.msk.f32.mxu1 %vm10901_vm2, %v14111_v26 }
 0xfba   :  { %10042 = vmatmul.mubr.msk.f32.vlgmr.msra.gmra.mxu0 %vm197_vm4, %v6916_v43  ;;  %10055 = vmatmul.mubr.msk.f32.vlgmr.msra.gmra.mxu1 %vm197_vm4, %v6916_v43 }
 0xfbb   :  { %10057 = vmatprep.subr.mxu0 %v14111_v26  ;;  %10070 = vmatprep.subr.mxu1 %v14111_v26 }
 0xfbc   :  { %10058 = vmatpush3.msra.mxu0 %v13403_v24  ;;  %10071 = vmatpush3.msra.mxu1 %v13409_v55 }
 0xfbd   :  { %10059 = vmatprep.subr.mxu0 %v14111_v26  ;;  %10072 = vmatprep.subr.mxu1 %v14111_v26 }
 0xfbe   :  { %10060 = vmatpush3.msra.mxu0 %v13417_v54  ;;  %10073 = vmatpush3.msra.mxu1 %v13423_v58 }
 0xfbf   :  { %10061 = vmatprep.subr.mxu0 %v14111_v26  ;;  %10074 = vmatprep.subr.mxu1 %v14111_v26 }
 0xfc0   :  { %10062 = vmatpush3.msra.mxu0 %v13431_v33  ;;  %10075 = vmatpush3.msra.mxu1 %v13437_v53 }
 0xfc1   :  { %10063 = vmatprep.subr.mxu0 %v14111_v26  ;;  %10076 = vmatprep.subr.mxu1 %v14111_v26 }
 0xfc2   :  { %10064 = vmatpush3.msra.mxu0 %v13445_v36  ;;  %10077 = vmatpush3.msra.mxu1 %v13451_v10 }
 0xfc3   :  { %10065 = vmatprep.subr.mxu0 %v14111_v26  ;;  %10078 = vmatprep.subr.mxu1 %v14111_v26 }
 0xfc4   :  { %10066 = vmatpush3.msra.mxu0 %v13459_v13  ;;  %10079 = vmatpush3.msra.mxu1 %v13465_v29 }
 0xfc5   :  { %10067 = vmatprep.mubr.msk.f32.mxu0 %vm10901_vm2, %v14111_v26  ;;  %10080 = vmatprep.mubr.msk.f32.mxu1 %vm10901_vm2, %v14111_v26 }
 0xfc6   :  { %10083 = vmatprep.subr.mxu0 %v14111_v26  ;;  %10096 = vmatprep.subr.mxu1 %v14111_v26 }
0x1057   :  { %v6671_v12 = vpop.f32.mrf.mxu0  ;;  %v6741_v20 = vpop.f32.mrf.mxu1 }
0x1058   :  { %v6672_v61 = vadd.f32 %v13857_v38, %v6671_v12  ;;  %v6742_v41 = vadd.f32 %v13863_v45, %v6741_v20 }
0x1059   :  { %v9965_v60 = vpop.f32.mrf.mxu0  ;;  %v9978_v8 = vpop.f32.mrf.mxu1 }
0x105a   :  { %v8251_v5 = vmul.f32 -1.442695, %v6672_v61  ;;  %v8252_v25 = vmul.f32 -1.442695, %v6742_v41 }
0x105c   :  { %10505 = vpow2.f32 %v8251_v5 }
0x105d   :  { %10507 = vpow2.f32 %v8252_v25 }
0x1062   :  { %v6811_v62 = vpop.f32.mrf.mxu0  ;;  %v6881_v50 = vpop.f32.mrf.mxu1 }
0x1063   :  { %v6882_v17 = vadd.f32 %v13869_v51, %v6881_v50  ;;  %v6812_v22 = vadd.f32 %v13875_v56, %v6811_v62 }
0x1064   :  { %v9991_v18 = vpop.f32.mrf.mxu0  ;;  %v10004_v11 = vpop.f32.mrf.mxu1 }
0x1065   :  { %v8253_v4 = vmul.f32 -1.442695, %v6882_v17  ;;  %10509 = vtanh.f32 %v6812_v22  ;;  %v7853_v11 = vrot.slane %v13506_v3, 6 }
0x1067   :  { %10511 = vpow2.f32 %v8253_v4 }
0x1069   :  { %v10506_v24 = vpop.eup %10505 }
0x106a   :  { %v10508_v55 = vpop.eup %10507  ;;  %v6888_v54 = vadd.f32 1.0, %v10506_v24 }
0x106b   :  { %v6894_v58 = vadd.f32 1.0, %v10508_v55 }
0x106c   :  { %10513 = vrcp.f32 %v6888_v54 }
0x106d   :  { %10515 = vrcp.f32 %v6894_v58 }
0x106e   :  { %v6985_v33 = vpop.f32.mrf.mxu0  ;;  %v7055_v53 = vpop.f32.mrf.mxu1 }
0x106f   :  { %v6986_v36 = vadd.f32 %v13481_v27, %v6985_v33  ;;  %v7056_v10 = vadd.f32 %v13487_v34, %v7055_v53  ;;  %v7866_v53 = vsel %vm7860_vm5, %v13146_v0, %v7853_v11  ;;  %v14203_v0 = vld [vmem:[#allocation31_spill] sm:$0xff] }
0x1070   :  { %v10017_v13 = vpop.f32.mrf.mxu0  ;;  %v10030_v29 = vpop.f32.mrf.mxu1 }
0x1071   :  { %v8258_v47 = vmul.f32 -1.442695, %v6986_v36  ;;  %v8259_v49 = vmul.f32 -1.442695, %v7056_v10 }
0x1072   :  { %v10510_v44 = vpop.eup %10509 }
0x1073   :  { %10517 = vpow2.f32 %v8258_v47 }
0x1074   :  { %10519 = vpow2.f32 %v8259_v49  ;;  %v10512_v63 = vpop.eup %10511  ;;  %v7225_v49 = vpop.permute.xlu0 %7224 }
0x1075   :  { %v6901_v41 = vadd.f32 1.0, %v10512_v63  ;;  %v14212_v63 = vld [vmem:[#allocation24_spill] sm:$0xff] }
0x1077   :  { %10521 = vrcp.f32 %v6901_v41 }
0x1079   :  { %v10514_v6 = vpop.eup %10513 }
0x107a   :  { %v10516_v59 = vpop.eup %10515  ;;  %v6905_v43 = vmul.f32 %v10514_v6, %v10510_v44  ;;  %v7125_v12 = vpop.f32.mrf.mxu0  ;;  %v14213_v6 = vld [vmem:[#allocation25_spill] sm:$0xff] }
0x107b   :  { %v7195_v20 = vpop.f32.mrf.mxu1  ;;  %v6904_v61 = vmul.f32 %v10516_v59, %v13497_v16  ;;  %v7126_v25 = vadd.f32 %v13502_v30, %v7125_v12  ;;  %v14214_v59 = vld [vmem:[#allocation26_spill] sm:$0xff] }
0x107c   :  { %v7196_v27 = vadd.f32 %v13494_v28, %v7195_v20  ;;  %v10043_v60 = vpop.f32.mrf.mxu0 }
0x107d   :  { %v10056_v34 = vpop.f32.mrf.mxu1  ;;  %v13882_v8 = vadd.f32 %v6905_v43, %v6904_v61  ;;  %v14215_v43 = vld [vmem:[#allocation27_spill] sm:$0xff]  ;;  %v14216_v61 = vld [vmem:[#allocation28_spill] sm:$0xff] }
0x107e   :  { %v8260_v5 = vmul.f32 -1.442695, %v7196_v27  ;;  %v14217_v27 = vld [vmem:[#allocation29_spill] sm:$0xff] }
0x107f   :  { %10523 = vtanh.f32 %v13882_v8 }
0x1080   :  { %v10518_v62 = vpop.eup %10517  ;;  %10525 = vpow2.f32 %v8260_v5 }
0x1081   :  { %v10520_v50 = vpop.eup %10519  ;;  %v7202_v17 = vadd.f32 1.0, %v10518_v62  ;;  %10527 = vtanh.f32 %v7126_v25 }
0x1082   :  { %v7208_v18 = vadd.f32 1.0, %v10520_v50 }
0x1083   :  { %10529 = vrcp.f32 %v7202_v17 }
0x1084   :  { %10531 = vrcp.f32 %v7208_v18  ;;  %v10522_v16 = vpop.eup %10521  ;;  %v14218_v18 = vld [vmem:[#allocation30_spill] sm:$0xff] }
0x108c   :  { %v10524_v28 = vpop.eup %10523 }
0x108d   :  { %v10526_v22 = vpop.eup %10525  ;;  %v6908_v4 = vmul.f32 %v10524_v28, %v10522_v16 }
0x108e   :  { %v10528_v24 = vpop.eup %10527  ;;  %v7215_v33 = vadd.f32 1.0, %v10526_v22 }
0x108f   :  { %7536 = vrot.lane.b32.xlu1 %v6908_v4, %s10899_s20  ;;  %v7855_v30 = vrot.slane %v6908_v4, 4 }
0x1090   :  { %v10530_v55 = vpop.eup %10529  ;;  %10533 = vrcp.f32 %v7215_v33 }
0x1091   :  { %v10532_v54 = vpop.eup %10531  ;;  %v7219_v58 = vmul.f32 %v10530_v55, %v10528_v24  ;;  %v13892_v10 = vsel %vm7862_vm6, %v7866_v53, %v7855_v30 }
0x1092   :  { %v7218_v36 = vmul.f32 %v10532_v54, %v13511_v39  ;;  %v14204_v39 = vld [vmem:[#allocation15_spill] sm:$0xff] }
0x1094   :  { %v7220_v3 = vadd.f32 %v7219_v58, %v7218_v36 }
0x1096   :  { %10535 = vtanh.f32 %v7220_v3  ;;  %7967 = vst.msk [vmem:[#allocation10] sm:$0x3] %vm7965_vm8, %v7220_v3 }
0x109d   :  { %v10534_v13 = vpop.eup %10533 }
0x10a3   :  { %v10536_v29 = vpop.eup %10535 }
0x10a4   :  { %v7222_v47 = vmul.f32 %v10536_v29, %v10534_v13 }
0x10a6   :  { %v7227_v44 = vsel %vm183_vm3, %v7222_v47, %v7225_v49  ;;  %7966 = vst.msk [vmem:[#allocation8] sm:$0x3] %vm7965_vm8, %v7222_v47 }
0x10a7   :  { %10068 = vmatmul.mubr.msk.f32.vlgmr.msra.gmra.mxu0 %vm197_vm4, %v7227_v44  ;;  %10081 = vmatmul.mubr.msk.f32.vlgmr.msra.gmra.mxu1 %vm197_vm4, %v7227_v44 }
0x10a8   :  { %10084 = vmatpush3.msra.mxu0 %v13520_v14  ;;  %10097 = vmatpush3.msra.mxu1 %v13526_v15  ;;  %v14205_v14 = vld [vmem:[#allocation17_spill] sm:$0xff]  ;;  %v14206_v15 = vld [vmem:[#allocation18_spill] sm:$0xff] }
0x10a9   :  { %10085 = vmatprep.subr.mxu0 %v14111_v26  ;;  %10098 = vmatprep.subr.mxu1 %v14111_v26 }
0x10aa   :  { %10086 = vmatpush3.msra.mxu0 %v13535_v19  ;;  %10099 = vmatpush3.msra.mxu1 %v13541_v42  ;;  %v14207_v19 = vld [vmem:[#allocation19_spill] sm:$0xff]  ;;  %v14208_v42 = vld [vmem:[#allocation20_spill] sm:$0xff] }
0x10ab   :  { %10087 = vmatprep.subr.mxu0 %v14111_v26  ;;  %10100 = vmatprep.subr.mxu1 %v14111_v26 }
0x10ac   :  { %10088 = vmatpush3.msra.mxu0 %v13549_v52  ;;  %10101 = vmatpush3.msra.mxu1 %v13555_v32  ;;  %v14209_v52 = vld [vmem:[#allocation21_spill] sm:$0xff]  ;;  %v14210_v32 = vld [vmem:[#allocation22_spill] sm:$0xff] }
0x10ad   :  { %10089 = vmatprep.subr.mxu0 %v14111_v26  ;;  %10102 = vmatprep.subr.mxu1 %v14111_v26 }
0x10ae   :  { %10090 = vmatpush3.msra.mxu0 %v13563_v57  ;;  %10103 = vmatpush3.msra.mxu1 %v14203_v0  ;;  %v14211_v57 = vld [vmem:[#allocation23_spill] sm:$0xff] }
0x10af   :  { %10091 = vmatprep.subr.mxu0 %v14111_v26  ;;  %10104 = vmatprep.subr.mxu1 %v14111_v26 }
0x10b0   :  { %10092 = vmatpush3.msra.mxu0 %v14204_v39  ;;  %10093 = vmatprep.mubr.msk.f32.mxu0 %vm10901_vm2, %v14111_v26 }
0x10b1   :  { %10105 = vmatpush3.msra.mxu1 %v14205_v14  ;;  %10106 = vmatprep.mubr.msk.f32.mxu1 %vm10901_vm2, %v14111_v26 }
0x10b2   :  { %10094 = vmatmul.mubr.msk.f32.vlgmr.msra.gmra.mxu0 %vm197_vm4, %v7227_v44  ;;  %10107 = vmatmul.mubr.msk.f32.vlgmr.msra.gmra.mxu1 %vm197_vm4, %v7227_v44 }
0x10b3   :  { %10109 = vmatprep.subr.mxu0 %v14111_v26  ;;  %10122 = vmatprep.subr.mxu1 %v14111_v26 }
0x10b4   :  { %10110 = vmatpush3.msra.mxu0 %v14206_v15  ;;  %10123 = vmatpush3.msra.mxu1 %v14207_v19 }
0x10b5   :  { %10111 = vmatprep.subr.mxu0 %v14111_v26  ;;  %10124 = vmatprep.subr.mxu1 %v14111_v26 }
0x10b6   :  { %10112 = vmatpush3.msra.mxu0 %v14208_v42  ;;  %10125 = vmatpush3.msra.mxu1 %v14209_v52 }
0x10b7   :  { %10113 = vmatprep.subr.mxu0 %v14111_v26  ;;  %10126 = vmatprep.subr.mxu1 %v14111_v26 }
0x10b8   :  { %10114 = vmatpush3.msra.mxu0 %v14210_v32  ;;  %10127 = vmatpush3.msra.mxu1 %v14211_v57 }
0x10b9   :  { %10115 = vmatprep.subr.mxu0 %v14111_v26  ;;  %10128 = vmatprep.subr.mxu1 %v14111_v26 }
0x10ba   :  { %10116 = vmatpush3.msra.mxu0 %v14212_v63  ;;  %10129 = vmatpush3.msra.mxu1 %v14213_v6 }
0x10bb   :  { %10117 = vmatprep.subr.mxu0 %v14111_v26  ;;  %10130 = vmatprep.subr.mxu1 %v14111_v26 }
0x10bc   :  { %10118 = vmatpush3.msra.mxu0 %v14214_v59  ;;  %10131 = vmatpush3.msra.mxu1 %v14215_v43 }
0x10bd   :  { %10119 = vmatprep.mubr.msk.f32.mxu0 %vm10901_vm2, %v14111_v26  ;;  %10132 = vmatprep.mubr.msk.f32.mxu1 %vm10901_vm2, %v14111_v26 }
0x10be   :  { %10135 = vmatprep.subr.mxu0 %v14111_v26  ;;  %10148 = vmatprep.subr.mxu1 %v14111_v26 }
0x1101   :  { %v7537_v0 = vpop.permute.xlu1 %7536 }
0x1167   :  { %v7297_v12 = vpop.f32.mrf.mxu0  ;;  %v7367_v20 = vpop.f32.mrf.mxu1 }
0x1168   :  { %v7298_v41 = vadd.f32 %v14216_v61, %v7297_v12  ;;  %v7368_v60 = vadd.f32 %v14217_v27, %v7367_v20 }
0x1169   :  { %v10069_v34 = vpop.f32.mrf.mxu0  ;;  %v10082_v5 = vpop.f32.mrf.mxu1 }
0x116a   :  { %v8265_v25 = vmul.f32 -1.442695, %v7298_v41  ;;  %v8266_v62 = vmul.f32 -1.442695, %v7368_v60 }
0x116c   :  { %10537 = vpow2.f32 %v8265_v25 }
0x116d   :  { %10539 = vpow2.f32 %v8266_v62 }
0x1172   :  { %v7437_v50 = vpop.f32.mrf.mxu0  ;;  %v7507_v17 = vpop.f32.mrf.mxu1 }
0x1173   :  { %v7508_v16 = vadd.f32 %v14218_v18, %v7507_v17  ;;  %v7438_v4 = vadd.f32 %v13689_v1, %v7437_v50 }
0x1174   :  { %v10095_v28 = vpop.f32.mrf.mxu0  ;;  %v10108_v11 = vpop.f32.mrf.mxu1 }
0x1175   :  { %v8267_v22 = vmul.f32 -1.442695, %v7508_v16 }
0x1177   :  { %10541 = vpow2.f32 %v8267_v22 }
0x1178   :  { %10543 = vtanh.f32 %v7438_v4 }
0x1179   :  { %v10538_v24 = vpop.eup %10537 }
0x117a   :  { %v10540_v55 = vpop.eup %10539  ;;  %v7514_v30 = vadd.f32 1.0, %v10538_v24 }
0x117b   :  { %v7520_v54 = vadd.f32 1.0, %v10540_v55 }
0x117c   :  { %10545 = vrcp.f32 %v7514_v30 }
0x117d   :  { %10547 = vrcp.f32 %v7520_v54 }
0x1184   :  { %v10542_v58 = vpop.eup %10541 }
0x1185   :  { %v10544_v33 = vpop.eup %10543  ;;  %v7527_v13 = vadd.f32 1.0, %v10542_v58 }
0x1187   :  { %10549 = vrcp.f32 %v7527_v13 }
0x1189   :  { %v10546_v53 = vpop.eup %10545 }
0x118a   :  { %v10548_v36 = vpop.eup %10547  ;;  %v7531_v3 = vmul.f32 %v10546_v53, %v10544_v33 }
0x118b   :  { %v7530_v29 = vmul.f32 %v10548_v36, %v13693_v37  ;;  %v14219_v37 = vld [vmem:[#allocation16_spill] sm:$0xff] }
0x118d   :  { %v7532_v47 = vadd.f32 %v7531_v3, %v7530_v29 }
0x118f   :  { %10551 = vtanh.f32 %v7532_v47  ;;  %7971 = vst.msk [vmem:[#allocation10 + $0x2] sm:$0x3] %vm7965_vm8, %v7532_v47 }
0x1194   :  { %v10550_v1 = vpop.eup %10549 }
0x119c   :  { %v10552_v49 = vpop.eup %10551 }
0x119d   :  { %v7534_v44 = vmul.f32 %v10552_v49, %v10550_v1 }
0x119f   :  { %v7539_v39 = vsel %vm183_vm3, %v7534_v44, %v7537_v0  ;;  %7969 = vst.msk [vmem:[#allocation8 + $0x2] sm:$0x3] %vm7965_vm8, %v7534_v44 }
0x11a0   :  { %10120 = vmatmul.mubr.msk.f32.vlgmr.msra.gmra.mxu0 %vm197_vm4, %v7539_v39  ;;  %10133 = vmatmul.mubr.msk.f32.vlgmr.msra.gmra.mxu1 %vm197_vm4, %v7539_v39 }
0x11a1   :  { %10136 = vmatpush3.msra.mxu0 %v13703_v21  ;;  %10149 = vmatpush3.msra.mxu1 %v13709_v35  ;;  %v7871_v21 = vld [vmem:[%s14030_s6 + $0x10] sm:$0xf]  ;;  %v7870_v35 = vld [vmem:[%s14030_s6 + $0x8] sm:$0xff] }
0x11a2   :  { %10137 = vmatprep.subr.mxu0 %v14111_v26  ;;  %10150 = vmatprep.subr.mxu1 %v14111_v26 }
0x11a3   :  { %10138 = vmatpush3.msra.mxu0 %v13717_v31  ;;  %10151 = vmatpush3.msra.mxu1 %v13723_v23 }
0x11a4   :  { %10139 = vmatprep.subr.mxu0 %v14111_v26  ;;  %10152 = vmatprep.subr.mxu1 %v14111_v26 }
0x11a5   :  { %10140 = vmatpush3.msra.mxu0 %v13731_v9  ;;  %10153 = vmatpush3.msra.mxu1 %v13737_v46 }
0x11a6   :  { %10141 = vmatprep.subr.mxu0 %v14111_v26  ;;  %10154 = vmatprep.subr.mxu1 %v14111_v26 }
0x11a7   :  { %10142 = vmatpush3.msra.mxu0 %v13745_v40  ;;  %10155 = vmatpush3.msra.mxu1 %v13751_v7 }
0x11a8   :  { %10143 = vmatprep.subr.mxu0 %v14111_v26  ;;  %10156 = vmatprep.subr.mxu1 %v14111_v26 }
0x11a9   :  { %10144 = vmatpush3.msra.mxu0 %v13759_v2  ;;  %10145 = vmatprep.mubr.msk.f32.mxu0 %vm10901_vm2, %v14111_v26 }
0x11aa   :  { %10157 = vmatpush3.msra.mxu1 %v13767_v48  ;;  %10158 = vmatprep.mubr.msk.f32.mxu1 %vm10901_vm2, %v14111_v26  ;;  %v7869_v26 = vld [vmem:[%s14030_s6] sm:$0xff]  ;;  %s10902_s6 = smov [#allocation8]  }
0x11ab   :  { %10146 = vmatmul.mubr.msk.f32.vlgmr.msra.gmra.mxu0 %vm197_vm4, %v7539_v39  ;;  %10159 = vmatmul.mubr.msk.f32.vlgmr.msra.gmra.mxu1 %vm197_vm4, %v7539_v39  ;;  %s7993_s30 = sshll.u32 %s10902_s6, 4  ;;  %s7994_s30 = int_to_ptr.vmem [resolvable:$true] %s7993_s30 }
0x11ac   :  { %10167 = vmatprep.mubr.msk.f32.mxu0 %vm183_vm3, %v14219_v37  ;;  %10161 = vmatprep.subr.msk.mxu0 %vm7862_vm6, %v7871_v21  ;;  %s10825_s11 = scalar_lea.vmem %s7994_s30, 96  ;;  %p10830_p11 = scmp.lt.s32.totalorder %s7994_s30, %s7994_s30 }
0x11ad   :  { %10162 = vmatpush3.msk.msra.mxu0 %vm7862_vm6, %v7871_v21  ;;  %p10826_p10 = scmp.ne.s32.totalorder %s7994_s30, %s10825_s11  ;;  %p10831_p12 = scmp.lt.s32.totalorder %s10825_s11, %s10825_s11 }
0x11ae   :  { %10163 = vmatprep.subr.mxu0 %v7870_v35 }
0x11af   :  { %10164 = vmatpush3.msra.mxu0 %v7870_v35  ;;  %p10832_p13 = por %p10831_p12, %p10830_p11 }
0x11b0   :  { %10165 = vmatprep.subr.mxu0 %v7869_v26 }
0x11b1   :  { %10166 = vmatpush3.msra.mxu0 %v7869_v26  ;;  %p10833_p0 = pnand %p10832_p13, %p10826_p10 }
0x1260   :  { %v7609_v31 = vpop.f32.mrf.mxu0  ;;  %v7679_v23 = vpop.f32.mrf.mxu1 }
0x1261   :  { %v7610_v9 = vadd.f32 %v13857_v38, %v7609_v31  ;;  %v7680_v46 = vadd.f32 %v13863_v45, %v7679_v23 }
0x1262   :  { %v10121_v40 = vpop.f32.mrf.mxu0  ;;  %v10134_v7 = vpop.f32.mrf.mxu1 }
0x1263   :  { %v8272_v2 = vmul.f32 -1.442695, %v7610_v9  ;;  %v8273_v48 = vmul.f32 -1.442695, %v7680_v46 }
0x1265   :  { %10553 = vpow2.f32 %v8272_v2 }
0x1266   :  { %10555 = vpow2.f32 %v8273_v48 }
0x126b   :  { %v7749_v14 = vpop.f32.mrf.mxu0  ;;  %v7819_v15 = vpop.f32.mrf.mxu1 }
0x126c   :  { %v7820_v19 = vadd.f32 %v13869_v51, %v7819_v15  ;;  %v7750_v57 = vadd.f32 %v13875_v56, %v7749_v14 }
0x126d   :  { %v10147_v42 = vpop.f32.mrf.mxu0  ;;  %v10160_v52 = vpop.f32.mrf.mxu1 }
0x126e   :  { %v8274_v32 = vmul.f32 -1.442695, %v7820_v19 }
0x1270   :  { %10557 = vpow2.f32 %v8274_v32 }
0x1271   :  { %10559 = vtanh.f32 %v7750_v57 }
0x1272   :  { %v10554_v63 = vpop.eup %10553 }
0x1273   :  { %v10556_v6 = vpop.eup %10555  ;;  %v7826_v38 = vadd.f32 1.0, %v10554_v63 }
0x1274   :  { %v7832_v45 = vadd.f32 1.0, %v10556_v6 }
0x1275   :  { %10561 = vrcp.f32 %v7826_v38 }
0x1276   :  { %10563 = vrcp.f32 %v7832_v45 }
0x127d   :  { %v10558_v59 = vpop.eup %10557 }
0x127e   :  { %v10560_v43 = vpop.eup %10559  ;;  %v7839_v41 = vadd.f32 1.0, %v10558_v59 }
0x1280   :  { %10565 = vrcp.f32 %v7839_v41 }
0x1282   :  { %v10562_v12 = vpop.eup %10561 }
0x1283   :  { %v10564_v20 = vpop.eup %10563  ;;  %v7843_v61 = vmul.f32 %v10562_v12, %v10560_v43 }
0x1284   :  { %v7842_v51 = vmul.f32 %v10564_v20, %v13882_v8 }
0x1286   :  { %v7844_v27 = vadd.f32 %v7843_v61, %v7842_v51 }
0x1288   :  { %10567 = vtanh.f32 %v7844_v27  ;;  %7975 = vst.msk [vmem:[#allocation10 + $0x4] sm:$0x3] %vm7965_vm8, %v7844_v27 }
0x128d   :  { %v10566_v56 = vpop.eup %10565 }
0x1295   :  { %v10568_v60 = vpop.eup %10567 }
0x1296   :  { %v7846_v34 = vmul.f32 %v10568_v60, %v10566_v56 }
0x1298   :  { %v7858_v5 = vrot.slane %v7846_v34, 2  ;;  %7973 = vst.msk [vmem:[#allocation8 + $0x4] sm:$0x3] %vm7965_vm8, %v7846_v34 }
0x129a   :  { %v7868_v25 = vsel %vm7864_vm7, %v13892_v10, %v7858_v5 }
0x129b   :  { %10168 = vmatmul.mubr.msk.f32.vlgmr.msra.gmra.mxu0 %vm183_vm3, %v7868_v25 }
0x129c   :  { %10836 = shalt.err (!%p10833_p0)
}
0x129d   :  { %7999 = dma.vmem_to_hbm [thread:$0]  %s7994_s30, 96, %s14033_s9, [#allocation9], %s10894_s16, %s10894_s16, %s10895_s17  }
0x129e   :  { %s10903_s14 = smov [#allocation10]  }
0x129f   :  { %s8005_s15 = sshll.u32 %s10903_s14, 4  ;;  %s8006_s15 = int_to_ptr.vmem [resolvable:$true] %s8005_s15 }
0x12a0   :  { %s10845_s18 = scalar_lea.vmem %s8006_s15, 96  ;;  %p10850_p2 = scmp.lt.s32.totalorder %s8006_s15, %s8006_s15 }
0x12a1   :  { %p10846_p1 = scmp.ne.s32.totalorder %s8006_s15, %s10845_s18  ;;  %p10851_p3 = scmp.lt.s32.totalorder %s10845_s18, %s10845_s18 }
0x12a3   :  { %p10852_p4 = por %p10851_p3, %p10850_p2 }
0x12a5   :  { %p10853_p5 = pnand %p10852_p4, %p10846_p1 }
0x12a7   :  { %10856 = shalt.err (!%p10853_p5)
}
0x12a8   :  { %8011 = dma.vmem_to_hbm [thread:$0]  %s8006_s15, 96, %s14034_s10, [#allocation9], %s10894_s16, %s10894_s16, %s10895_s17  }
0x12a9   :  { %v8275_v8 = vld [vmem:[%s14031_s7] ss:$0 sm:$0xff]  ;;  %s10904_s9 = smov [#allocation7]  }
0x12aa   :  { %s7981_s22 = sshll.u32 %s10904_s9, 4  ;;  %s7982_s22 = int_to_ptr.vmem [resolvable:$true] %s7981_s22 }
0x12ab   :  { %s10865_s23 = scalar_lea.vmem %s7982_s22, 256  ;;  %p10870_p7 = scmp.lt.s32.totalorder %s7982_s22, %s7982_s22 }
0x12ac   :  { %p10866_p6 = scmp.ne.s32.totalorder %s7982_s22, %s10865_s23  ;;  %p10871_p8 = scmp.lt.s32.totalorder %s10865_s23, %s10865_s23 }
0x12ae   :  { %p10872_p9 = por %p10871_p8, %p10870_p7 }
0x12b0   :  { %p10873_p10 = pnand %p10872_p9, %p10866_p6 }
0x135b   :  { %v10169_v10 = vpop.f32.mrf.mxu0 }
0x135c   :  { %v7960_v62 = vadd.f32 %v10169_v10, %v8275_v8 }
0x135d   :  { %v7954_v50 = vpop.f32.mrf.mxu0 }
0x135e   :  { %7964 = vst [vmem:[#allocation7 + $0x8] sm:$0xff] %v7960_v62  ;;  %v7955_v17 = vadd.f32 %v8275_v8, %v7954_v50 }
0x1360   :  { %7963 = vst [vmem:[#allocation7] sm:$0xff] %v7955_v17 }
0x1361   :  { %10876 = shalt.err (!%p10873_p10)
}
0x1362   :  { %s10905_s10 = smov 128   ;;  %s10906_s16 = smov 8  }
0x1363   :  { %7987 = dma.vmem_to_hbm [thread:$0]  %s7982_s22, 256, %s14032_s8, [#allocation4], %s10905_s10, %s10905_s10, %s10906_s16  }
0x1364   :  { %10889 = dma.done.wait [#allocation4], 256  }
0x1365   :  { %10890 = vsyncadd [#allocation4], 4294967040 }
0x1366   :  { %10891 = dma.done.wait [#allocation9], 192  }
0x1367   :  { %10892 = vsyncadd [#allocation9], 4294967104 }
0x1368   :  { %8021 = vsyncpa [#allocation3], 1 }
0x1369   :  { %8022 = vsyncpa [#allocation6], 1 }
0x136a   :  { %8023 = vsyncpa [#allocation4], 1 }
0x136b   :  { %8024 = vsyncpa [#allocation9], 1 }

</bundles_post_ra>
